<compile_context>
chip_gen: v7x
topology: tpu7x:2x2x1
jax: 0.10.0
libtpu: 0.0.40
codegen_flags: <defaults>
</compile_context>

<pallas_src>
import functools

import jax
import jax.numpy as jnp
from jax.experimental import pallas as pl
from jax.experimental.pallas import tpu as pltpu


# --------------------------------------------------------------------------
# Helpers
# --------------------------------------------------------------------------
def _round_up(x, m):
    return ((x + m - 1) // m) * m


def _pick_divisor(n, candidates, min_blocks=1):
    """Largest candidate c that divides n with n // c >= min_blocks, else n."""
    for c in candidates:
        if c <= n and n % c == 0 and n // c >= min_blocks:
            return c
    return n


def _padded_tile_bytes(rows, cols, dtype):
    itemsize = jnp.dtype(dtype).itemsize
    sublane = 8 * max(1, 4 // itemsize)          # 8 for f32, 16 for bf16
    return _round_up(rows, sublane) * _round_up(cols, 128) * itemsize


def _vmem_tile_budget():
    """Per-pallas_call budget for (double-buffered) tiles, per generation."""
    try:
        cap = getattr(pltpu.get_tpu_info(), "vmem_capacity_bytes", 64 << 20)
    except Exception:
        cap = 64 << 20                            # conservative (v7x physical)
    # Stay well inside the scoped-VMEM defaults of every generation
    # (16 MiB on v5e, 32 MiB on v6e/v7x).
    return min(cap // 8, 12 << 20)


# --------------------------------------------------------------------------
# Fused GEMM + bias + (optional) ReLU Pallas kernel
# --------------------------------------------------------------------------
def _gemm_bias_act_kernel(a_ref, b_ref, bias_ref, o_ref, *, apply_relu, nk):
    if nk == 1:
        out = jnp.dot(a_ref[...], b_ref[...],
                      preferred_element_type=jnp.float32) + bias_ref[...]
        if apply_relu:
            out = jnp.maximum(out, 0.0)
        o_ref[...] = out.astype(o_ref.dtype)
    else:
        k = pl.program_id(2)

        @pl.when(k == 0)
        def _():
            o_ref[...] = jnp.zeros_like(o_ref)

        o_ref[...] += jnp.dot(a_ref[...], b_ref[...],
                              preferred_element_type=jnp.float32)

        @pl.when(k == nk - 1)
        def _():
            out = o_ref[...] + bias_ref[...]
            if apply_relu:
                out = jnp.maximum(out, 0.0)
            o_ref[...] = out


def gemm_bias_act(a, b, bias, *, apply_relu, bias_axis, out_dtype=jnp.float32):
    """out = act(a @ b + bias);  a:[M,K], b:[K,N], bias along 'row' or 'col'.

    Operands stream as bf16 (f32 accumulation).  Tiling aims for >= 4 parallel
    grid blocks (DMA/compute overlap + megacore work) and is checked against a
    generation-aware VMEM budget with double buffering.
    """
    M, K = a.shape
    K2, N = b.shape
    assert K == K2
    a = a.astype(jnp.bfloat16)
    b = b.astype(jnp.bfloat16)
    if bias_axis == "row":
        bias2d = bias.reshape(M, 1).astype(jnp.float32)
    else:
        bias2d = bias.reshape(1, N).astype(jnp.float32)

    budget = _vmem_tile_budget()

    # ---- K: single reduction sweep when it fits (true for every conv here) --
    tk = K if K <= 4096 else _pick_divisor(
        K, (8192, 4096, 2048, 1024, 512, 256, 128))
    nk = K // tk
    out_store_dtype = jnp.float32 if nk > 1 else out_dtype

    # ---- N (output lane dim): >= 4 lane-dense blocks when N is large --------
    tn = _pick_divisor(N, (2048, 1024, 512, 256, 128), min_blocks=4) \
        if N > 512 else N
    gn = N // tn
    # ---- M: add blocks until the parallel grid has >= 4 blocks if possible --
    need_gm = 1 if gn >= 4 else (2 if gn >= 2 else 4)
    tm = _pick_divisor(M, (512, 256, 128, 64, 32, 16, 8), min_blocks=need_gm) \
        if need_gm > 1 else M

    def fits(tm_, tk_, tn_):
        a_t = _padded_tile_bytes(tm_, tk_, jnp.bfloat16)
        b_t = _padded_tile_bytes(tk_, tn_, jnp.bfloat16)
        o_t = _padded_tile_bytes(tm_, tn_, out_store_dtype)
        bias_t = (_padded_tile_bytes(tm_, 1, jnp.float32)
                  + _padded_tile_bytes(1, tn_, jnp.float32))
        # inputs AND outputs are double buffered by the Pallas pipeline
        return 2 * (a_t + b_t + o_t + bias_t) <= budget

    # Shrink tiles (largest contributor first) until they fit the budget.
    while not fits(tm, tk, tn):
        if tn > 128 and N % (tn // 2) == 0:
            tn //= 2
        elif tm > 8 and M % (tm // 2) == 0:
            tm //= 2
        elif tk > 128 and K % (tk // 2) == 0:
            tk //= 2
            nk = K // tk
            out_store_dtype = jnp.float32
        else:
            break
    assert fits(tm, tk, tn), "no tile configuration fits the VMEM budget"

    if bias_axis == "row":
        bias_spec = pl.BlockSpec((tm, 1), lambda i, j, k: (i, 0))
    else:
        bias_spec = pl.BlockSpec((1, tn), lambda i, j, k: (0, j))

    grid = (M // tm, N // tn, nk)
    out = pl.pallas_call(
        functools.partial(_gemm_bias_act_kernel, apply_relu=apply_relu, nk=nk),
        out_shape=jax.ShapeDtypeStruct((M, N), out_store_dtype),
        grid_spec=pltpu.PrefetchScalarGridSpec(
            num_scalar_prefetch=0,
            grid=grid,
            in_specs=[
                pl.BlockSpec((tm, tk), lambda i, j, k: (i, k)),
                pl.BlockSpec((tk, tn), lambda i, j, k: (k, j)),
                bias_spec,
            ],
            out_specs=pl.BlockSpec((tm, tn), lambda i, j, k: (i, j)),
        ),
        compiler_params=pltpu.CompilerParams(
            dimension_semantics=("parallel", "parallel", "arbitrary")),
    )(a, b, bias2d)
    return out.astype(out_dtype)


# --------------------------------------------------------------------------
# Conv2d(k=3, stride=2, pad=1) + ReLU, channel-first transposed GEMM form
# --------------------------------------------------------------------------
def conv2d_relu_cf(x_cf, w_mk, bias, *, stride=2, pad=1, ksize=3):
    """x_cf: [Cin, B, H, W]  ->  [Cout, B, Ho, Wo] (bf16)."""
    Cin, B, H, W = x_cf.shape
    Cout, KKC = w_mk.shape
    assert KKC == ksize * ksize * Cin

    xp = jnp.pad(x_cf, ((0, 0), (0, 0), (pad, pad), (pad, pad)))
    Ho = (H + 2 * pad - ksize) // stride + 1
    Wo = (W + 2 * pad - ksize) // stride + 1

    # Transposed im2col: K rows ordered (kh, kw, cin); lane dim = B*Ho*Wo.
    # TODO(synk): fuse this gather into the Pallas kernel (halo'd input block
    # + 9 in-kernel sub-GEMMs) to drop the patches HBM round trip per layer.
    taps = []
    for kh in range(ksize):
        for kw in range(ksize):
            t = xp[:, :, kh:kh + stride * Ho:stride,
                   kw:kw + stride * Wo:stride]
            taps.append(t.reshape(Cin, B * Ho * Wo))
    patches_t = jnp.concatenate(taps, axis=0)             # [9*Cin, B*Ho*Wo]

    out_t = gemm_bias_act(w_mk, patches_t, bias, apply_relu=True,
                          bias_axis="row", out_dtype=jnp.bfloat16)
    return out_t.reshape(Cout, B, Ho, Wo)


# --------------------------------------------------------------------------
# Fused mu/logvar FC head: K reduction split across 2 parallel grid blocks
# --------------------------------------------------------------------------
def _fc_partial_kernel(x_ref, w_ref, o_ref):
    @pl.when(pl.program_id(1) == 0)
    def _():
        o_ref[...] = jnp.zeros_like(o_ref)

    o_ref[...] += jnp.dot(x_ref[...], w_ref[...],
                          preferred_element_type=jnp.float32)[None]


def fc_dual_head(x, w, bias, *, ksplit=2):
    """(mu || logvar) = x @ w + bias.  x:[B,K], w:[K,2L].

    The K=65536 reduction is split over a leading *parallel* grid axis of
    size `ksplit` (one half per v7x TensorCore); each half accumulates a
    resident f32 [B,2L] partial over its inner K steps.  Partials + bias are
    combined in a tiny JAX epilogue.
    """
    M, K = x.shape
    K2, N = w.shape
    assert K == K2 and K % ksplit == 0
    x = x.astype(jnp.bfloat16)
    w = w.astype(jnp.bfloat16)

    k_half = K // ksplit
    tk = _pick_divisor(k_half, (8192, 4096, 2048, 1024, 512, 256, 128))
    nk = k_half // tk

    partials = pl.pallas_call(
        _fc_partial_kernel,
        out_shape=jax.ShapeDtypeStruct((ksplit, M, N), jnp.float32),
        grid_spec=pltpu.PrefetchScalarGridSpec(
            num_scalar_prefetch=0,
            grid=(ksplit, nk),
            in_specs=[
                pl.BlockSpec((M, tk), lambda h, k: (0, h * nk + k)),
                pl.BlockSpec((tk, N), lambda h, k: (h * nk + k, 0)),
            ],
            out_specs=pl.BlockSpec((1, M, N), lambda h, k: (h, 0, 0)),
        ),
        compiler_params=pltpu.CompilerParams(
            dimension_semantics=("parallel", "arbitrary")),
    )(x, w)
    return jnp.sum(partials, axis=0) + bias[None, :].astype(jnp.float32)


# --------------------------------------------------------------------------
# Param preparation (one-time layout conversion from torch layout)
# --------------------------------------------------------------------------
def prepare_params(tp):
    """Torch-layout params -> kernel layout (transposed-GEMM form, bf16)."""
    p = {}
    for i in range(1, 6):
        w = tp[f"conv{i}_w"]                               # [Cout, Cin, 3, 3]
        cout, cin, kh, kw = w.shape
        # A-operand of the transposed GEMM: [Cout, (kh, kw, cin)]
        p[f"conv{i}_w"] = (jnp.transpose(w, (0, 2, 3, 1))
                           .reshape(cout, kh * kw * cin).astype(jnp.bfloat16))
        p[f"conv{i}_b"] = tp[f"conv{i}_b"].astype(jnp.float32)
    # Fused mu/logvar head: single weight over K = 1024*8*8, N = 2*latent_dim.
    # (Rows stay in torch NCHW-flatten order; the forward produces exactly
    # that order with one tiny transpose, so no row permutation is needed.)
    fc_w = jnp.concatenate([tp["fc_mu_w"], tp["fc_logvar_w"]], axis=0)
    p["fc_w"] = jnp.transpose(fc_w).astype(jnp.bfloat16)   # [K, 2L]
    p["fc_b"] = jnp.concatenate(
        [tp["fc_mu_b"], tp["fc_logvar_b"]]).astype(jnp.float32)
    return p


# --------------------------------------------------------------------------
# Encoder forward
# --------------------------------------------------------------------------
def encoder_forward(params, x_nchw, *, latent_dim):
    # NCHW -> channel-first-with-batch-inside ([Cin, B, H, W]), bf16.
    x = jnp.transpose(x_nchw, (1, 0, 2, 3)).astype(jnp.bfloat16)
    for i in range(1, 6):
        x = conv2d_relu_cf(x, params[f"conv{i}_w"], params[f"conv{i}_b"])
    # [1024, B, 8, 8] -> torch NCHW flatten order [B, 1024*8*8] (262 KB move).
    C, B, Ho, Wo = x.shape
    x = jnp.transpose(x, (1, 0, 2, 3)).reshape(B, C * Ho * Wo)
    out = fc_dual_head(x, params["fc_w"], params["fc_b"])
    return out[:, :latent_dim], out[:, latent_dim:]


# --------------------------------------------------------------------------
# Deterministic parameter init (torch layout, shapes from Encoder.__init__)
# --------------------------------------------------------------------------
def init_params(key, latent_dim):
    chans = [1, 4, 16, 64, 256, 1024]
    keys = jax.random.split(key, 12)
    params = {}
    for i in range(5):
        cin, cout = chans[i], chans[i + 1]
        scale = 1.0 / jnp.sqrt(cin * 9.0)
        params[f"conv{i + 1}_w"] = scale * jax.random.normal(
            keys[2 * i], (cout, cin, 3, 3), jnp.float32)
        params[f"conv{i + 1}_b"] = 0.01 * jax.random.normal(
            keys[2 * i + 1], (cout,), jnp.float32)
    fc_in = 1024 * 8 * 8
    fscale = 1.0 / jnp.sqrt(float(fc_in))
    params["fc_mu_w"] = fscale * jax.random.normal(
        keys[10], (latent_dim, fc_in), jnp.float32)
    params["fc_mu_b"] = jnp.zeros((latent_dim,), jnp.float32)
    params["fc_logvar_w"] = fscale * jax.random.normal(
        keys[11], (latent_dim, fc_in), jnp.float32)
    params["fc_logvar_b"] = jnp.zeros((latent_dim,), jnp.float32)
    return params


if __name__ == "__main__":
    latent_dim = 32
    key = jax.random.PRNGKey(0)
    pkey, xkey = jax.random.split(key)
    torch_params = init_params(pkey, latent_dim)
    params = prepare_params(torch_params)

    # fc layers expect 1024*8*8 features => input spatial must be 256x256
    # (256 -> 128 -> 64 -> 32 -> 16 -> 8 over the five stride-2 convs).
    x = jax.random.normal(xkey, (2, 1, 256, 256), jnp.float32)

    fwd = jax.jit(functools.partial(encoder_forward, latent_dim=latent_dim))
    mu, logvar = fwd(params, x)
    jax.block_until_ready((mu, logvar))

    assert mu.shape == (2, latent_dim)
    assert logvar.shape == (2, latent_dim)
    assert bool(jnp.all(jnp.isfinite(mu))) and bool(jnp.all(jnp.isfinite(logvar)))
    print("KERNEL_OK")
</pallas_src>

<mosaic_0001>
module attributes {stable_mosaic.version = 11 : i64} {
  func.func @_gemm_bias_act_kernel(%arg0: i32, %arg1: i32, %arg2: i32, %arg3: memref<4x9xbf16, #tpu.memory_space<vmem>>, %arg4: memref<9x2048xbf16, #tpu.memory_space<vmem>>, %arg5: memref<4x1xf32, #tpu.memory_space<vmem>>, %arg6: memref<4x2048xbf16, #tpu.memory_space<vmem>>) attributes {dimension_semantics = [#tpu.dimension_semantics<parallel>, #tpu.dimension_semantics<parallel>, #tpu.dimension_semantics<arbitrary>], iteration_bounds = array<i64: 1, 16, 1>, scalar_prefetch = 0 : i64, scratch_operands = 0 : i64, tpu.core_type = #tpu.core_type<tc>, window_params = [{transform_indices = @transform_0, window_bounds = array<i64: 4, 9>}, {transform_indices = @transform_1, window_bounds = array<i64: 9, 2048>}, {transform_indices = @transform_2, window_bounds = array<i64: 4, 1>}, {transform_indices = @transform_3, window_bounds = array<i64: 4, 2048>}]} {
    %c0 = arith.constant 0 : index
    %c0_0 = arith.constant 0 : index
    %0 = vector.load %arg3[%c0, %c0_0] : memref<4x9xbf16, #tpu.memory_space<vmem>>, vector<4x9xbf16>
    %c0_1 = arith.constant 0 : index
    %c0_2 = arith.constant 0 : index
    %1 = vector.load %arg4[%c0_1, %c0_2] : memref<9x2048xbf16, #tpu.memory_space<vmem>>, vector<9x2048xbf16>
    %cst = arith.constant dense<0.000000e+00> : vector<4x2048xf32>
    %2 = tpu.matmul %0, %1, %cst {dimension_numbers = #tpu.dot_dimension_numbers<[1], [0], [0], [1], [0, 0, 1, 1], [], []>} : vector<4x9xbf16>, vector<9x2048xbf16>, vector<4x2048xf32> -> vector<4x2048xf32>
    %c0_3 = arith.constant 0 : index
    %c0_4 = arith.constant 0 : index
    %3 = vector.load %arg5[%c0_3, %c0_4] : memref<4x1xf32, #tpu.memory_space<vmem>>, vector<4x1xf32>
    %4 = vector.broadcast %3 : vector<4x1xf32> to vector<4x2048xf32>
    %5 = arith.addf %2, %4 : vector<4x2048xf32>
    %cst_5 = arith.constant 0.000000e+00 : f32
    %6 = vector.broadcast %cst_5 : f32 to vector<4x2048xf32>
    %7 = arith.maximumf %5, %6 : vector<4x2048xf32>
    %8 = arith.truncf %7 : vector<4x2048xf32> to vector<4x2048xbf16>
    %c0_6 = arith.constant 0 : index
    %c0_7 = arith.constant 0 : index
    %9 = vector.load %arg6[%c0_6, %c0_7] : memref<4x2048xbf16, #tpu.memory_space<vmem>>, vector<4x2048xbf16>
    tpu.vector_store %arg6[%c0_6, %c0_7], %8 {strides = array<i32>} : memref<4x2048xbf16, #tpu.memory_space<vmem>>, vector<4x2048xbf16>,
    return
  }
  func.func @transform_0(%arg0: i32, %arg1: i32, %arg2: i32) -> (i32, i32) {
    %c0_i32 = arith.constant 0 : i32
    return %arg0, %arg2 : i32, i32
  }
  func.func @transform_1(%arg0: i32, %arg1: i32, %arg2: i32) -> (i32, i32) {
    %c0_i32 = arith.constant 0 : i32
    return %arg2, %arg1 : i32, i32
  }
  func.func @transform_2(%arg0: i32, %arg1: i32, %arg2: i32) -> (i32, i32) {
    %c0_i32 = arith.constant 0 : i32
    %c0_i32_0 = arith.constant 0 : i32
    return %arg0, %c0_i32 : i32, i32
  }
  func.func @transform_3(%arg0: i32, %arg1: i32, %arg2: i32) -> (i32, i32) {
    %c0_i32 = arith.constant 0 : i32
    return %arg0, %arg1 : i32, i32
  }
}

module attributes {stable_mosaic.version = 11 : i64} {
  func.func @_gemm_bias_act_kernel(%arg0: i32, %arg1: i32, %arg2: i32, %arg3: memref<16x36xbf16, #tpu.memory_space<vmem>>, %arg4: memref<36x2048xbf16, #tpu.memory_space<vmem>>, %arg5: memref<16x1xf32, #tpu.memory_space<vmem>>, %arg6: memref<16x2048xbf16, #tpu.memory_space<vmem>>) attributes {dimension_semantics = [#tpu.dimension_semantics<parallel>, #tpu.dimension_semantics<parallel>, #tpu.dimension_semantics<arbitrary>], iteration_bounds = array<i64: 1, 4, 1>, scalar_prefetch = 0 : i64, scratch_operands = 0 : i64, tpu.core_type = #tpu.core_type<tc>, window_params = [{transform_indices = @transform_0, window_bounds = array<i64: 16, 36>}, {transform_indices = @transform_1, window_bounds = array<i64: 36, 2048>}, {transform_indices = @transform_2, window_bounds = array<i64: 16, 1>}, {transform_indices = @transform_3, window_bounds = array<i64: 16, 2048>}]} {
    %c0 = arith.constant 0 : index
    %c0_0 = arith.constant 0 : index
    %0 = vector.load %arg3[%c0, %c0_0] : memref<16x36xbf16, #tpu.memory_space<vmem>>, vector<16x36xbf16>
    %c0_1 = arith.constant 0 : index
    %c0_2 = arith.constant 0 : index
    %1 = vector.load %arg4[%c0_1, %c0_2] : memref<36x2048xbf16, #tpu.memory_space<vmem>>, vector<36x2048xbf16>
    %cst = arith.constant dense<0.000000e+00> : vector<16x2048xf32>
    %2 = tpu.matmul %0, %1, %cst {dimension_numbers = #tpu.dot_dimension_numbers<[1], [0], [0], [1], [0, 0, 1, 1], [], []>} : vector<16x36xbf16>, vector<36x2048xbf16>, vector<16x2048xf32> -> vector<16x2048xf32>
    %c0_3 = arith.constant 0 : index
    %c0_4 = arith.constant 0 : index
    %3 = vector.load %arg5[%c0_3, %c0_4] : memref<16x1xf32, #tpu.memory_space<vmem>>, vector<16x1xf32>
    %4 = vector.broadcast %3 : vector<16x1xf32> to vector<16x2048xf32>
    %5 = arith.addf %2, %4 : vector<16x2048xf32>
    %cst_5 = arith.constant 0.000000e+00 : f32
    %6 = vector.broadcast %cst_5 : f32 to vector<16x2048xf32>
    %7 = arith.maximumf %5, %6 : vector<16x2048xf32>
    %8 = arith.truncf %7 : vector<16x2048xf32> to vector<16x2048xbf16>
    %c0_6 = arith.constant 0 : index
    %c0_7 = arith.constant 0 : index
    %9 = vector.load %arg6[%c0_6, %c0_7] : memref<16x2048xbf16, #tpu.memory_space<vmem>>, vector<16x2048xbf16>
    tpu.vector_store %arg6[%c0_6, %c0_7], %8 {strides = array<i32>} : memref<16x2048xbf16, #tpu.memory_space<vmem>>, vector<16x2048xbf16>,
    return
  }
  func.func @transform_0(%arg0: i32, %arg1: i32, %arg2: i32) -> (i32, i32) {
    %c0_i32 = arith.constant 0 : i32
    return %arg0, %arg2 : i32, i32
  }
  func.func @transform_1(%arg0: i32, %arg1: i32, %arg2: i32) -> (i32, i32) {
    %c0_i32 = arith.constant 0 : i32
    return %arg2, %arg1 : i32, i32
  }
  func.func @transform_2(%arg0: i32, %arg1: i32, %arg2: i32) -> (i32, i32) {
    %c0_i32 = arith.constant 0 : i32
    %c0_i32_0 = arith.constant 0 : i32
    return %arg0, %c0_i32 : i32, i32
  }
  func.func @transform_3(%arg0: i32, %arg1: i32, %arg2: i32) -> (i32, i32) {
    %c0_i32 = arith.constant 0 : i32
    return %arg0, %arg1 : i32, i32
  }
}

module attributes {stable_mosaic.version = 11 : i64} {
  func.func @_gemm_bias_act_kernel(%arg0: i32, %arg1: i32, %arg2: i32, %arg3: memref<64x144xbf16, #tpu.memory_space<vmem>>, %arg4: memref<144x512xbf16, #tpu.memory_space<vmem>>, %arg5: memref<64x1xf32, #tpu.memory_space<vmem>>, %arg6: memref<64x512xbf16, #tpu.memory_space<vmem>>) attributes {dimension_semantics = [#tpu.dimension_semantics<parallel>, #tpu.dimension_semantics<parallel>, #tpu.dimension_semantics<arbitrary>], iteration_bounds = array<i64: 1, 4, 1>, scalar_prefetch = 0 : i64, scratch_operands = 0 : i64, tpu.core_type = #tpu.core_type<tc>, window_params = [{transform_indices = @transform_0, window_bounds = array<i64: 64, 144>}, {transform_indices = @transform_1, window_bounds = array<i64: 144, 512>}, {transform_indices = @transform_2, window_bounds = array<i64: 64, 1>}, {transform_indices = @transform_3, window_bounds = array<i64: 64, 512>}]} {
    %c0 = arith.constant 0 : index
    %c0_0 = arith.constant 0 : index
    %0 = vector.load %arg3[%c0, %c0_0] : memref<64x144xbf16, #tpu.memory_space<vmem>>, vector<64x144xbf16>
    %c0_1 = arith.constant 0 : index
    %c0_2 = arith.constant 0 : index
    %1 = vector.load %arg4[%c0_1, %c0_2] : memref<144x512xbf16, #tpu.memory_space<vmem>>, vector<144x512xbf16>
    %cst = arith.constant dense<0.000000e+00> : vector<64x512xf32>
    %2 = tpu.matmul %0, %1, %cst {dimension_numbers = #tpu.dot_dimension_numbers<[1], [0], [0], [1], [0, 0, 1, 1], [], []>} : vector<64x144xbf16>, vector<144x512xbf16>, vector<64x512xf32> -> vector<64x512xf32>
    %c0_3 = arith.constant 0 : index
    %c0_4 = arith.constant 0 : index
    %3 = vector.load %arg5[%c0_3, %c0_4] : memref<64x1xf32, #tpu.memory_space<vmem>>, vector<64x1xf32>
    %4 = vector.broadcast %3 : vector<64x1xf32> to vector<64x512xf32>
    %5 = arith.addf %2, %4 : vector<64x512xf32>
    %cst_5 = arith.constant 0.000000e+00 : f32
    %6 = vector.broadcast %cst_5 : f32 to vector<64x512xf32>
    %7 = arith.maximumf %5, %6 : vector<64x512xf32>
    %8 = arith.truncf %7 : vector<64x512xf32> to vector<64x512xbf16>
    %c0_6 = arith.constant 0 : index
    %c0_7 = arith.constant 0 : index
    %9 = vector.load %arg6[%c0_6, %c0_7] : memref<64x512xbf16, #tpu.memory_space<vmem>>, vector<64x512xbf16>
    tpu.vector_store %arg6[%c0_6, %c0_7], %8 {strides = array<i32>} : memref<64x512xbf16, #tpu.memory_space<vmem>>, vector<64x512xbf16>,
    return
  }
  func.func @transform_0(%arg0: i32, %arg1: i32, %arg2: i32) -> (i32, i32) {
    %c0_i32 = arith.constant 0 : i32
    return %arg0, %arg2 : i32, i32
  }
  func.func @transform_1(%arg0: i32, %arg1: i32, %arg2: i32) -> (i32, i32) {
    %c0_i32 = arith.constant 0 : i32
    return %arg2, %arg1 : i32, i32
  }
  func.func @transform_2(%arg0: i32, %arg1: i32, %arg2: i32) -> (i32, i32) {
    %c0_i32 = arith.constant 0 : i32
    %c0_i32_0 = arith.constant 0 : i32
    return %arg0, %c0_i32 : i32, i32
  }
  func.func @transform_3(%arg0: i32, %arg1: i32, %arg2: i32) -> (i32, i32) {
    %c0_i32 = arith.constant 0 : i32
    return %arg0, %arg1 : i32, i32
  }
}

module attributes {stable_mosaic.version = 11 : i64} {
  func.func @_gemm_bias_act_kernel(%arg0: i32, %arg1: i32, %arg2: i32, %arg3: memref<64x576xbf16, #tpu.memory_space<vmem>>, %arg4: memref<576x512xbf16, #tpu.memory_space<vmem>>, %arg5: memref<64x1xf32, #tpu.memory_space<vmem>>, %arg6: memref<64x512xbf16, #tpu.memory_space<vmem>>) attributes {dimension_semantics = [#tpu.dimension_semantics<parallel>, #tpu.dimension_semantics<parallel>, #tpu.dimension_semantics<arbitrary>], iteration_bounds = array<i64: 4, 1, 1>, scalar_prefetch = 0 : i64, scratch_operands = 0 : i64, tpu.core_type = #tpu.core_type<tc>, window_params = [{transform_indices = @transform_0, window_bounds = array<i64: 64, 576>}, {transform_indices = @transform_1, window_bounds = array<i64: 576, 512>}, {transform_indices = @transform_2, window_bounds = array<i64: 64, 1>}, {transform_indices = @transform_3, window_bounds = array<i64: 64, 512>}]} {
    %c0 = arith.constant 0 : index
    %c0_0 = arith.constant 0 : index
    %0 = vector.load %arg3[%c0, %c0_0] : memref<64x576xbf16, #tpu.memory_space<vmem>>, vector<64x576xbf16>
    %c0_1 = arith.constant 0 : index
    %c0_2 = arith.constant 0 : index
    %1 = vector.load %arg4[%c0_1, %c0_2] : memref<576x512xbf16, #tpu.memory_space<vmem>>, vector<576x512xbf16>
    %cst = arith.constant dense<0.000000e+00> : vector<64x512xf32>
    %2 = tpu.matmul %0, %1, %cst {dimension_numbers = #tpu.dot_dimension_numbers<[1], [0], [0], [1], [0, 0, 1, 1], [], []>} : vector<64x576xbf16>, vector<576x512xbf16>, vector<64x512xf32> -> vector<64x512xf32>
    %c0_3 = arith.constant 0 : index
    %c0_4 = arith.constant 0 : index
    %3 = vector.load %arg5[%c0_3, %c0_4] : memref<64x1xf32, #tpu.memory_space<vmem>>, vector<64x1xf32>
    %4 = vector.broadcast %3 : vector<64x1xf32> to vector<64x512xf32>
    %5 = arith.addf %2, %4 : vector<64x512xf32>
    %cst_5 = arith.constant 0.000000e+00 : f32
    %6 = vector.broadcast %cst_5 : f32 to vector<64x512xf32>
    %7 = arith.maximumf %5, %6 : vector<64x512xf32>
    %8 = arith.truncf %7 : vector<64x512xf32> to vector<64x512xbf16>
    %c0_6 = arith.constant 0 : index
    %c0_7 = arith.constant 0 : index
    %9 = vector.load %arg6[%c0_6, %c0_7] : memref<64x512xbf16, #tpu.memory_space<vmem>>, vector<64x512xbf16>
    tpu.vector_store %arg6[%c0_6, %c0_7], %8 {strides = array<i32>} : memref<64x512xbf16, #tpu.memory_space<vmem>>, vector<64x512xbf16>,
    return
  }
  func.func @transform_0(%arg0: i32, %arg1: i32, %arg2: i32) -> (i32, i32) {
    %c0_i32 = arith.constant 0 : i32
    return %arg0, %arg2 : i32, i32
  }
  func.func @transform_1(%arg0: i32, %arg1: i32, %arg2: i32) -> (i32, i32) {
    %c0_i32 = arith.constant 0 : i32
    return %arg2, %arg1 : i32, i32
  }
  func.func @transform_2(%arg0: i32, %arg1: i32, %arg2: i32) -> (i32, i32) {
    %c0_i32 = arith.constant 0 : i32
    %c0_i32_0 = arith.constant 0 : i32
    return %arg0, %c0_i32 : i32, i32
  }
  func.func @transform_3(%arg0: i32, %arg1: i32, %arg2: i32) -> (i32, i32) {
    %c0_i32 = arith.constant 0 : i32
    return %arg0, %arg1 : i32, i32
  }
}

module attributes {stable_mosaic.version = 11 : i64} {
  func.func @_gemm_bias_act_kernel(%arg0: i32, %arg1: i32, %arg2: i32, %arg3: memref<256x2304xbf16, #tpu.memory_space<vmem>>, %arg4: memref<2304x128xbf16, #tpu.memory_space<vmem>>, %arg5: memref<256x1xf32, #tpu.memory_space<vmem>>, %arg6: memref<256x128xbf16, #tpu.memory_space<vmem>>) attributes {dimension_semantics = [#tpu.dimension_semantics<parallel>, #tpu.dimension_semantics<parallel>, #tpu.dimension_semantics<arbitrary>], iteration_bounds = array<i64: 4, 1, 1>, scalar_prefetch = 0 : i64, scratch_operands = 0 : i64, tpu.core_type = #tpu.core_type<tc>, window_params = [{transform_indices = @transform_0, window_bounds = array<i64: 256, 2304>}, {transform_indices = @transform_1, window_bounds = array<i64: 2304, 128>}, {transform_indices = @transform_2, window_bounds = array<i64: 256, 1>}, {transform_indices = @transform_3, window_bounds = array<i64: 256, 128>}]} {
    %c0 = arith.constant 0 : index
    %c0_0 = arith.constant 0 : index
    %0 = vector.load %arg3[%c0, %c0_0] : memref<256x2304xbf16, #tpu.memory_space<vmem>>, vector<256x2304xbf16>
    %c0_1 = arith.constant 0 : index
    %c0_2 = arith.constant 0 : index
    %1 = vector.load %arg4[%c0_1, %c0_2] : memref<2304x128xbf16, #tpu.memory_space<vmem>>, vector<2304x128xbf16>
    %cst = arith.constant dense<0.000000e+00> : vector<256x128xf32>
    %2 = tpu.matmul %0, %1, %cst {dimension_numbers = #tpu.dot_dimension_numbers<[1], [0], [0], [1], [0, 0, 1, 1], [], []>} : vector<256x2304xbf16>, vector<2304x128xbf16>, vector<256x128xf32> -> vector<256x128xf32>
    %c0_3 = arith.constant 0 : index
    %c0_4 = arith.constant 0 : index
    %3 = vector.load %arg5[%c0_3, %c0_4] : memref<256x1xf32, #tpu.memory_space<vmem>>, vector<256x1xf32>
    %4 = vector.broadcast %3 : vector<256x1xf32> to vector<256x128xf32>
    %5 = arith.addf %2, %4 : vector<256x128xf32>
    %cst_5 = arith.constant 0.000000e+00 : f32
    %6 = vector.broadcast %cst_5 : f32 to vector<256x128xf32>
    %7 = arith.maximumf %5, %6 : vector<256x128xf32>
    %8 = arith.truncf %7 : vector<256x128xf32> to vector<256x128xbf16>
    %c0_6 = arith.constant 0 : index
    %c0_7 = arith.constant 0 : index
    %9 = vector.load %arg6[%c0_6, %c0_7] : memref<256x128xbf16, #tpu.memory_space<vmem>>, vector<256x128xbf16>
    tpu.vector_store %arg6[%c0_6, %c0_7], %8 {strides = array<i32>} : memref<256x128xbf16, #tpu.memory_space<vmem>>, vector<256x128xbf16>,
    return
  }
  func.func @transform_0(%arg0: i32, %arg1: i32, %arg2: i32) -> (i32, i32) {
    %c0_i32 = arith.constant 0 : i32
    return %arg0, %arg2 : i32, i32
  }
  func.func @transform_1(%arg0: i32, %arg1: i32, %arg2: i32) -> (i32, i32) {
    %c0_i32 = arith.constant 0 : i32
    return %arg2, %arg1 : i32, i32
  }
  func.func @transform_2(%arg0: i32, %arg1: i32, %arg2: i32) -> (i32, i32) {
    %c0_i32 = arith.constant 0 : i32
    %c0_i32_0 = arith.constant 0 : i32
    return %arg0, %c0_i32 : i32, i32
  }
  func.func @transform_3(%arg0: i32, %arg1: i32, %arg2: i32) -> (i32, i32) {
    %c0_i32 = arith.constant 0 : i32
    return %arg0, %arg1 : i32, i32
  }
}

module attributes {stable_mosaic.version = 11 : i64} {
  func.func @_fc_partial_kernel(%arg0: i32, %arg1: i32, %arg2: memref<2x8192xbf16, #tpu.memory_space<vmem>>, %arg3: memref<8192x64xbf16, #tpu.memory_space<vmem>>, %arg4: memref<1x2x64xf32, #tpu.memory_space<vmem>>) attributes {dimension_semantics = [#tpu.dimension_semantics<parallel>, #tpu.dimension_semantics<arbitrary>], iteration_bounds = array<i64: 2, 4>, scalar_prefetch = 0 : i64, scratch_operands = 0 : i64, tpu.core_type = #tpu.core_type<tc>, window_params = [{transform_indices = @transform_0, window_bounds = array<i64: 2, 8192>}, {transform_indices = @transform_1, window_bounds = array<i64: 8192, 64>}, {transform_indices = @transform_2, window_bounds = array<i64: 1, 2, 64>}]} {
    %c0_i32 = arith.constant 0 : i32
    %0 = arith.cmpi eq, %arg1, %c0_i32 : i32
    %1 = arith.extui %0 : i1 to i32
    %c0_i32_0 = arith.constant 0 : i32
    %2 = arith.cmpi ne, %1, %c0_i32_0 : i32
    scf.if %2 {
      %cst_10 = arith.constant 0.000000e+00 : f32
      %10 = vector.broadcast %cst_10 : f32 to vector<1x2x64xf32>
      %c0_11 = arith.constant 0 : index
      %c0_12 = arith.constant 0 : index
      %c0_13 = arith.constant 0 : index
      %11 = vector.load %arg4[%c0_11, %c0_12, %c0_13] : memref<1x2x64xf32, #tpu.memory_space<vmem>>, vector<1x2x64xf32>
      tpu.vector_store %arg4[%c0_11, %c0_12, %c0_13], %10 {strides = array<i32>} : memref<1x2x64xf32, #tpu.memory_space<vmem>>, vector<1x2x64xf32>,
    } else {
    }
    %c0 = arith.constant 0 : index
    %c0_1 = arith.constant 0 : index
    %c0_2 = arith.constant 0 : index
    %3 = vector.load %arg4[%c0, %c0_1, %c0_2] : memref<1x2x64xf32, #tpu.memory_space<vmem>>, vector<1x2x64xf32>
    %c0_3 = arith.constant 0 : index
    %c0_4 = arith.constant 0 : index
    %4 = vector.load %arg2[%c0_3, %c0_4] : memref<2x8192xbf16, #tpu.memory_space<vmem>>, vector<2x8192xbf16>
    %c0_5 = arith.constant 0 : index
    %c0_6 = arith.constant 0 : index
    %5 = vector.load %arg3[%c0_5, %c0_6] : memref<8192x64xbf16, #tpu.memory_space<vmem>>, vector<8192x64xbf16>
    %cst = arith.constant dense<0.000000e+00> : vector<2x64xf32>
    %6 = tpu.matmul %4, %5, %cst {dimension_numbers = #tpu.dot_dimension_numbers<[1], [0], [0], [1], [0, 0, 1, 1], [], []>} : vector<2x8192xbf16>, vector<8192x64xbf16>, vector<2x64xf32> -> vector<2x64xf32>
    %7 = vector.shape_cast %6 : vector<2x64xf32> to vector<1x2x64xf32>
    %8 = arith.addf %3, %7 : vector<1x2x64xf32>
    %c0_7 = arith.constant 0 : index
    %c0_8 = arith.constant 0 : index
    %c0_9 = arith.constant 0 : index
    %9 = vector.load %arg4[%c0_7, %c0_8, %c0_9] : memref<1x2x64xf32, #tpu.memory_space<vmem>>, vector<1x2x64xf32>
    tpu.vector_store %arg4[%c0_7, %c0_8, %c0_9], %8 {strides = array<i32>} : memref<1x2x64xf32, #tpu.memory_space<vmem>>, vector<1x2x64xf32>,
    return
  }
  func.func @transform_0(%arg0: i32, %arg1: i32) -> (i32, i32) {
    %c4_i32 = arith.constant 4 : i32
    %0 = arith.muli %arg0, %c4_i32 : i32
    %1 = arith.addi %0, %arg1 : i32
    %c0_i32 = arith.constant 0 : i32
    %c0_i32_0 = arith.constant 0 : i32
    return %c0_i32, %1 : i32, i32
  }
  func.func @transform_1(%arg0: i32, %arg1: i32) -> (i32, i32) {
    %c4_i32 = arith.constant 4 : i32
    %0 = arith.muli %arg0, %c4_i32 : i32
    %1 = arith.addi %0, %arg1 : i32
    %c0_i32 = arith.constant 0 : i32
    %c0_i32_0 = arith.constant 0 : i32
    return %1, %c0_i32 : i32, i32
  }
  func.func @transform_2(%arg0: i32, %arg1: i32) -> (i32, i32, i32) {
    %c0_i32 = arith.constant 0 : i32
    %c0_i32_0 = arith.constant 0 : i32
    %c0_i32_1 = arith.constant 0 : i32
    return %arg0, %c0_i32, %c0_i32_0 : i32, i32, i32
  }
}

</mosaic_0001>

<bundles_post_ra>
// kernel: encoder_forward.6
= control target key start
LH: loop header
LB: loop body
LE: loop exit
PB: predicated region body
PF: predicated region fallthrough
CT: control target
= control target key end

     0   :  { %8 = vsyncpa [#allocation3], 0  ;;  %s1217_s12 = smov 0   ;;  %s1219_s13 = smov 0   ;;  %s1435_s0 = inlined_call_operand.hbm [shape: bf16[4,9], index: 0, kind: input, shape index: {}]   ;;  %s1436_s1 = inlined_call_operand.vmem [shape: bf16[9,32768], index: 1, kind: input, shape index: {}]   ;;  %s1437_s2 = inlined_call_operand.vmem [shape: f32[4,1], index: 2, kind: input, shape index: {}]   ;;  %s1438_s3 = inlined_call_operand.vmem [shape: bf16[4,32768], index: 3, kind: output, shape index: {}]  }
   0x1   :  { %s1221_s14 = smov 0   ;;  %s1223_s15 = smov 0  }
   0x2   :  { %s1225_s16 = smov 0  }
   0x3 LB: > { %s1017_s17 = sadd.s32 4294967295, %s1191_s16   ;;  %s29_s18 = sadd.s32 1, %s1187_s15  ;;  %s1191_s16 = sphi %s1225_s16, %s14_s16   ;;  %s1187_s15 = sphi %s1223_s15, %s1452_s15   ;;  %s1183_s14 = sphi %s1221_s14, %s1451_s14   ;;  %s1179_s13 = sphi %s1219_s13, %s1450_s13   ;;  %s1175_s12 = sphi %s1217_s12, %s1449_s12  }
   0x4   : > { %p31_p0 = scmp.ge.s32.totalorder %s29_s18, 16  ;;  %s70_s19 = sadd.s32 1, %s1179_s13 }
   0x5   : > { %p77_p1 = scmp.ne.s32.totalorder %s1179_s13, %s1175_s12  ;;  %p78_p2 = scmp.eq.s32.totalorder %s1191_s16, 0 }
   0x6   : > { %s1454_s18 = smov (%p31_p0, %s29_s18), 0  ;;  %p1019_p4 = scmp.ge.s32.totalorder %s1191_s16, 1 }
   0x7   : > { %p1250_p3 = por %p78_p2, %p77_p1  ;;  %s66_s21 = ssub.s32 %s1187_s15, %s1454_s18 }
   0x8   : > { %p148_p5 = scmp.lt.s32.totalorder %s1191_s16, 17  ;;  %p68_p6 = scmp.eq.s32.totalorder %s66_s21, 0 }
   0x9   : > { %s1442_s20 = scalar_select %p1250_p3, 1, 0 }
   0xa   : > { %p1258_p7 = pnand %p1019_p4, %p148_p5  ;;  %p1262_p8 = scmp.eq.s32.totalorder %s1017_s17, 0 }
   0xb   : > { %s1267_s24 = scalar_select %p68_p6, %s1179_s13, %s70_s19  }
   0xc   : > { %s1443_s22 = scalar_select %p1258_p7, 1, 0 }
   0xd   : > { %s1444_s23 = scalar_select %p1262_p8, 1, 0 }
   0xe   : > { %p1070_p9 = pneg %p1258_p7  ;;  %s1193_s25 = smov [#allocation2]  }
   0xf   : > { %s164_s26 = sshll.u32 %s1193_s25, 4  ;;  %s1121_s30 = scalar_lea.hbm %s1435_s0, 32  ;;  %s165_s26 = int_to_ptr.vmem [resolvable:$true] %s164_s26 }
  0x10   : > { %p1273_p10 = pnand %p1262_p8, %p1070_p9  ;;  %p1122_p11 = scmp.ne.s32.totalorder %s1435_s0, %s1121_s30 }
  0x11   : > { %p1128_p1 = scmp.lt.u32.totalorder %s1121_s30, %s1435_s0 }
  0x12   : > { %p1123_p12 = pneg %p1273_p10 }
  0x14   : > { %p1124_p13 = pnand %p1123_p12, %p1122_p11 }
  0x16   : > { %p1125_p0 = pneg %p1124_p13 }
  0x18   : > { %p1130_p2 = pnand %p1128_p1, %p1125_p0 }
  0x1a   : > { %1133 = shalt.err (!%p1130_p2)
}
  0x1b   : > { %s1134_s8 = scalar_lea.vmem %s165_s26, 32  ;;  %p1142_p9 = scmp.lt.s32.totalorder %s165_s26, %s165_s26 }
  0x1c   : > { %p1135_p4 = scmp.ne.s32.totalorder %s165_s26, %s1134_s8  ;;  %p1143_p8 = scmp.lt.s32.totalorder %s1134_s8, %s1134_s8 }
  0x1e   : > { %p1137_p5 = pnand %p1135_p4, %p1123_p12  ;;  %p1144_p7 = por %p1143_p8, %p1142_p9 }
  0x20   : > { %p1138_p6 = pneg %p1137_p5 }
  0x22   : > { %p1145_p3 = pnand %p1144_p7, %p1138_p6 }
  0x24   : > { %1148 = shalt.err (!%p1145_p3)
}
  0x25   : > { %1073 = dma.hbm_to_vmem [thread:$0]  (!%p1273_p10), %s1435_s0, 32, %s165_s26, [#allocation3]  }
  0x26   : > { %p1022_p11 = scmp.ge.s32.totalorder %s1191_s16, 16 }
  0x27   : > { %p1446_p13 = scmp.ne.s32.totalorder (!%p1022_p11), %s1442_s20, 0 }
  0x28   : > { %178 = sbr.rel (%p1022_p11) target bundleno = 59 (0x3b), region = 24 }
  0x2f   : > { %181 = sbr.rel (!%p1446_p13) target bundleno = 59 (0x3b), region = 28  ;;  %s183_s11 = sand.u32 (%p1446_p13), 1, %s1179_s13  }
  0x30   : > { %s1065_s17 = sshll.u32 (%p1446_p13), %s1187_s15, 6  ;;  %s1023_s19 = sshll.u32 (%p1446_p13), %s183_s11, 7 }
  0x31   : > { %s1301_s28 = scalar_lea.vmem (%p1446_p13), %s1436_s1, %s1065_s17  ;;  %s185_s20 = scalar_lea.vmem (%p1446_p13), [#allocation4], %s1023_s19 }
  0x32   : > { %v204_v0 = vld [vmem:[%s1301_s28] sm:$0xff] (%p1446_p13)  ;;  %v206_v1 = vld [vmem:[%s1301_s28 + $0x8] sm:$0xff] (%p1446_p13)  ;;  %v208_v2 = vld [vmem:[%s1301_s28 + $0x10] sm:$0xff] (%p1446_p13) }
  0x33   : > { %205 = vst [vmem:[%s185_s20] sm:$0xff] (%p1446_p13), %v204_v0  ;;  %207 = vst [vmem:[%s185_s20 + $0x8] sm:$0xff] (%p1446_p13), %v206_v1  ;;  %v210_v3 = vld [vmem:[%s1301_s28 + $0x18] sm:$0xff] (%p1446_p13)  ;;  %v212_v4 = vld [vmem:[%s1301_s28 + $0x20] sm:$0xff] (%p1446_p13) }
  0x34   : > { %209 = vst [vmem:[%s185_s20 + $0x10] sm:$0xff] (%p1446_p13), %v208_v2  ;;  %v214_v5 = vld [vmem:[%s1301_s28 + $0x28] sm:$0xff] (%p1446_p13)  ;;  %211 = vst [vmem:[%s185_s20 + $0x18] sm:$0xff] (%p1446_p13), %v210_v3  ;;  %v216_v6 = vld [vmem:[%s1301_s28 + $0x30] sm:$0xff] (%p1446_p13) }
  0x35   : > { %213 = vst [vmem:[%s185_s20 + $0x20] sm:$0xff] (%p1446_p13), %v212_v4  ;;  %215 = vst [vmem:[%s185_s20 + $0x28] sm:$0xff] (%p1446_p13), %v214_v5  ;;  %v218_v7 = vld [vmem:[%s1301_s28 + $0x38] sm:$0xff] (%p1446_p13)  ;;  %v220_v8 = vld [vmem:[%s1301_s28 + $0x400] sm:$0xff] (%p1446_p13) }
  0x36   : > { %217 = vst [vmem:[%s185_s20 + $0x30] sm:$0xff] %v216_v6  ;;  %219 = vst [vmem:[%s185_s20 + $0x38] sm:$0xff] %v218_v7  ;;  %v222_v9 = vld [vmem:[%s1301_s28 + $0x408] sm:$0xff]  ;;  %v224_v10 = vld [vmem:[%s1301_s28 + $0x410] sm:$0xff] }
  0x37   : > { %221 = vst [vmem:[%s185_s20 + $0x40] sm:$0xff] %v220_v8  ;;  %v226_v11 = vld [vmem:[%s1301_s28 + $0x418] sm:$0xff]  ;;  %223 = vst [vmem:[%s185_s20 + $0x48] sm:$0xff] %v222_v9  ;;  %v228_v12 = vld [vmem:[%s1301_s28 + $0x420] sm:$0xff] }
  0x38   : > { %225 = vst [vmem:[%s185_s20 + $0x50] sm:$0xff] %v224_v10  ;;  %227 = vst [vmem:[%s185_s20 + $0x58] sm:$0xff] %v226_v11  ;;  %v230_v13 = vld [vmem:[%s1301_s28 + $0x428] sm:$0xff]  ;;  %v232_v14 = vld [vmem:[%s1301_s28 + $0x430] sm:$0xff] }
  0x39   : > { %229 = vst [vmem:[%s185_s20 + $0x60] sm:$0xff] %v228_v12  ;;  %231 = vst [vmem:[%s185_s20 + $0x68] sm:$0xff] %v230_v13  ;;  %v234_v15 = vld [vmem:[%s1301_s28 + $0x438] sm:$0xff] }
  0x3a   : > { %233 = vst [vmem:[%s185_s20 + $0x70] sm:$0xff] %v232_v14  ;;  %235 = vst [vmem:[%s185_s20 + $0x78] sm:$0xff] %v234_v15 }
  0x3b PF: > { %p1447_p3 = scmp.ne.s32.totalorder %s1443_s22, 0 }
  0x3c   : > { %p1448_p7 = scmp.ne.s32.totalorder (!%p1447_p3), %s1444_s23, 0 }
  0x3d   : > { %244 = sbr.rel (%p1447_p3) target bundleno = 330 (0x14a), region = 51 }
  0x44   : > { %1170 = dma.done.wait (%p1448_p7), [#allocation3], 32  }
  0x45   : > { %1172 = vsyncadd (%p1448_p7), [#allocation3], 4294967264  ;;  %s251_s26 = sand.u32 1, %s1175_s12   ;;  %vm390_vm0 = vcmask 1043456   ;;  %v1194_v16 = vmov 0   ;;  %vm391_vm1 = vcmask 1044480   ;;  %v823_v8 = vlaneseq }
  0x46   : > { %s1028_s27 = sshll.u32 %s251_s26, 7  ;;  %474 = vmatprep.mubr.bf16.mxu0 %v1194_v16  ;;  %515 = vmatprep.mubr.bf16.mxu1 %v1194_v16  ;;  %v1195_v17 = vmov 65535   ;;  %v299_v46 = vld [vmem:[#allocation2] sm:$0x3]  ;;  %vm386_vm2 = vcmask 72704   ;;  %s1029_s29 = sshll.u32 %s1183_s14, 4 }
  0x47   : > { %1120 = vset.pattern.permute.xlu0 %v1194_v16  ;;  %v392_v18 = vsel %vm390_vm0, 4294967295, %v1195_v17  ;;  %s1329_s22 = scalar_lea.vmem [#allocation4], %s1028_s27  ;;  %v316_v49 = vld [vmem:[%s1437_s2] sm:$0xf]  ;;  %v1196_v6 = vmov 1983009808  }
  0x48   : > { %v300_v19 = vld [vmem:[%s1329_s22] sm:$0xff]  ;;  %v1333_v21 = vsel %vm391_vm1, %v392_v18, 0  ;;  %v301_v22 = vld [vmem:[%s1329_s22 + $0x8] sm:$0xff]  ;;  %v302_v26 = vld [vmem:[%s1329_s22 + $0x10] sm:$0xff]  ;;  %319 = vperm.xlu0 %1120, %v316_v49   ;;  %v821_v7 = vunpack.c.l.s4 %v1196_v6  ;;  %p291_p8 = scmp.lt.s32.totalorder %s1029_s29, 255  ;;  %v824_v12 = vshrl.u32 %v823_v8, 7 }
  0x49   : > { %v308_v20 = vld [vmem:[%s1329_s22 + $0x40] sm:$0x11]  ;;  %v309_v24 = vld [vmem:[%s1329_s22 + $0x48] sm:$0x11]  ;;  %v310_v29 = vld [vmem:[%s1329_s22 + $0x50] sm:$0x11] }
  0x4a   : > { %v1032_v23 = vcombine.high %v300_v19, %v308_v20  ;;  %v1031_v25 = vcombine.low %v300_v19, %v308_v20  ;;  %v1034_v27 = vcombine.high %v301_v22, %v309_v24  ;;  %v1033_v28 = vcombine.low %v301_v22, %v309_v24  ;;  %v303_v30 = vld [vmem:[%s1329_s22 + $0x18] sm:$0xff]  ;;  %v304_v36 = vld [vmem:[%s1329_s22 + $0x20] sm:$0xff]  ;;  %v305_v42 = vld [vmem:[%s1329_s22 + $0x28] sm:$0xff]  ;;  %s1456_s29 = smov (!%p291_p8, %s1029_s29), 255 }
  0x4b   : > { %v311_v31 = vld [vmem:[%s1329_s22 + $0x58] sm:$0x11]  ;;  %v1035_v34 = vcombine.low %v302_v26, %v310_v29  ;;  %v1036_v35 = vcombine.high %v302_v26, %v310_v29  ;;  %v312_v37 = vld [vmem:[%s1329_s22 + $0x60] sm:$0x11]  ;;  %v313_v43 = vld [vmem:[%s1329_s22 + $0x68] sm:$0x11]  ;;  %v822_v11 = vunpack.c.0.s8 %v821_v7 }
  0x4c   : > { %v398_v32 = vand.u32 %v1032_v23, %v1333_v21  ;;  %v395_v33 = vand.u32 %v1031_v25, %v1333_v21  ;;  %v404_v38 = vand.u32 %v1034_v27, %v1333_v21  ;;  %v401_v39 = vand.u32 %v1033_v28, %v1333_v21  ;;  %v306_v54 = vld [vmem:[%s1329_s22 + $0x30] sm:$0xff]  ;;  %v307_v57 = vld [vmem:[%s1329_s22 + $0x38] sm:$0xff]  ;;  %s1030_s14 = sshll.u32 %s1456_s29, 1 }
  0x4d   : > { %v1037_v40 = vcombine.low %v303_v30, %v311_v31  ;;  %v1038_v41 = vcombine.high %v303_v30, %v311_v31  ;;  %v410_v44 = vand.u32 %v1036_v35, %v1333_v21  ;;  %v1040_v45 = vcombine.high %v304_v36, %v312_v37  ;;  %v314_v55 = vld [vmem:[%s1329_s22 + $0x70] sm:$0x11]  ;;  %v315_v58 = vld [vmem:[%s1329_s22 + $0x78] sm:$0x11]  ;;  %s1397_s5 = scalar_lea.vmem %s1438_s3, %s1030_s14 }
  0x4e   : > { %442 = vmatprep.subr.bf16.mxu0 %v398_v32  ;;  %483 = vmatprep.subr.bf16.mxu1 %v404_v38  ;;  %v407_v48 = vand.u32 %v1035_v34, %v1333_v21  ;;  %v1042_v51 = vcombine.high %v305_v42, %v313_v43  ;;  %v1039_v56 = vcombine.low %v304_v36, %v312_v37 }
  0x4f   : > { %443 = vmatpush1.bf16.msra.mxu0 %v395_v33  ;;  %v416_v47 = vand.u32 %v1038_v41, %v1333_v21  ;;  %484 = vmatpush1.bf16.msra.mxu1 %v401_v39  ;;  %v413_v50 = vand.u32 %v1037_v40, %v1333_v21  ;;  %v422_v52 = vand.u32 %v1040_v45, %v1333_v21 }
  0x50   : > { %524 = vmatprep.subr.bf16.mxu0 %v410_v44  ;;  %v428_v53 = vand.u32 %v1042_v51, %v1333_v21  ;;  %v1041_v59 = vcombine.low %v305_v42, %v313_v43  ;;  %v1044_v60 = vcombine.high %v306_v54, %v314_v55  ;;  %v1046_v61 = vcombine.high %v307_v57, %v315_v58 }
  0x51   : > { %565 = vmatprep.subr.bf16.mxu1 %v416_v47  ;;  %v419_v62 = vand.u32 %v1039_v56, %v1333_v21  ;;  %v1043_v2 = vcombine.low %v306_v54, %v314_v55  ;;  %v1045_v3 = vcombine.low %v307_v57, %v315_v58  ;;  %v1389_v25 = vsub.s32 %v822_v11, %v824_v12 }
  0x52   : > { %1047 = vmatmul.mubr.msk.bf16.vlgmr.msra.gmra.mrb[0].mxu0 %vm386_vm2, %v299_v46  ;;  %1048 = vmatmul.mubr.msk.bf16.vlgmr.msra.gmra.mrb[0].mxu1 %vm386_vm2, %v299_v46  ;;  %v425_v63 = vand.u32 %v1041_v59, %v1333_v21  ;;  %v434_v0 = vand.u32 %v1044_v60, %v1333_v21  ;;  %v440_v1 = vand.u32 %v1046_v61, %v1333_v21 }
  0x53   : > { %525 = vmatpush1.bf16.msra.mxu0 %v407_v48  ;;  %566 = vmatpush1.bf16.msra.mxu1 %v413_v50  ;;  %v431_v4 = vand.u32 %v1043_v2, %v1333_v21  ;;  %v437_v5 = vand.u32 %v1045_v3, %v1333_v21 }
  0x54   : > { %556 = vmatprep.mubr.bf16.mxu0 %v1194_v16  ;;  %597 = vmatprep.mubr.bf16.mxu1 %v1194_v16 }
  0x55   : > { %606 = vmatprep.subr.bf16.mxu0 %v422_v52  ;;  %647 = vmatprep.subr.bf16.mxu1 %v428_v53 }
  0x5a   : > { %1049 = vmatmul.mubr.msk.bf16.vlgmr.msra.gmra.mrb[4].mxu0 %vm386_vm2, %v299_v46  ;;  %1050 = vmatmul.mubr.msk.bf16.vlgmr.msra.gmra.mrb[4].mxu1 %vm386_vm2, %v299_v46 }
  0x5b   : > { %607 = vmatpush1.bf16.msra.mxu0 %v419_v62  ;;  %648 = vmatpush1.bf16.msra.mxu1 %v425_v63 }
  0x5c   : > { %638 = vmatprep.mubr.bf16.mxu0 %v1194_v16  ;;  %679 = vmatprep.mubr.bf16.mxu1 %v1194_v16 }
  0x5d   : > { %688 = vmatprep.subr.bf16.mxu0 %v434_v0  ;;  %729 = vmatprep.subr.bf16.mxu1 %v440_v1 }
  0x62   : > { %1051 = vmatmul.mubr.msk.bf16.vlgmr.msra.gmra.mrb[8].mxu0 %vm386_vm2, %v299_v46  ;;  %1052 = vmatmul.mubr.msk.bf16.vlgmr.msra.gmra.mrb[8].mxu1 %vm386_vm2, %v299_v46 }
  0x63   : > { %689 = vmatpush1.bf16.msra.mxu0 %v431_v4  ;;  %730 = vmatpush1.bf16.msra.mxu1 %v437_v5 }
  0x64   : > { %720 = vmatprep.mubr.bf16.mxu0 %v1194_v16  ;;  %761 = vmatprep.mubr.bf16.mxu1 %v1194_v16 }
  0x6a   : > { %1053 = vmatmul.mubr.msk.bf16.vlgmr.msra.gmra.mrb[12].mxu0 %vm386_vm2, %v299_v46  ;;  %1054 = vmatmul.mubr.msk.bf16.vlgmr.msra.gmra.mrb[12].mxu1 %vm386_vm2, %v299_v46 }
  0xc7   : > { %v1383_v9 = vpop.permute.xlu0 %319 }
 0x125   : > { %v476_v10 = vpop.f32.mrb[0].mxu0  ;;  %v517_v13 = vpop.f32.mrb[0].mxu1 }
 0x126   : > { %v477_v14 = vadd.f32 %v476_v10, %v1383_v9  ;;  %v478_v15 = vpop.f32.mrb[1].mxu0  ;;  %v518_v17 = vadd.f32 %v517_v13, %v1383_v9  ;;  %v519_v18 = vpop.f32.mrb[1].mxu1 }
 0x127   : > { %v479_v16 = vadd.f32 %v478_v15, %v1383_v9  ;;  %v480_v19 = vpop.f32.mrb[2].mxu0  ;;  %v520_v21 = vadd.f32 %v519_v18, %v1383_v9  ;;  %v521_v22 = vpop.f32.mrb[2].mxu1 }
 0x128   : > { %v770_v20 = vmax.f32 %v477_v14, 0.0  ;;  %v481_v23 = vpop.f32.mrb[3].mxu0  ;;  %v772_v26 = vmax.f32 %v518_v17, 0.0  ;;  %v522_v27 = vpop.f32.mrb[3].mxu1 }
 0x129   : > { %v771_v24 = vmax.f32 %v479_v16, 0.0  ;;  %v773_v28 = vmax.f32 %v520_v21, 0.0 }
 0x12b   : > { %v1055_v29 = vpack.c.bf16 %v771_v24, %v770_v20  ;;  %v1056_v30 = vpack.c.bf16 %v773_v28, %v772_v26 }
 0x12d   : > { %v826_v31 = vrot.slane %v1055_v29, %v1389_v25  ;;  %v558_v32 = vpop.f32.mrb[4].mxu0  ;;  %v833_v33 = vrot.slane %v1056_v30, %v1389_v25  ;;  %v599_v35 = vpop.f32.mrb[4].mxu1 }
 0x12e   : > { %v559_v34 = vadd.f32 %v558_v32, %v1383_v9  ;;  %v560_v36 = vpop.f32.mrb[5].mxu0  ;;  %v600_v37 = vadd.f32 %v599_v35, %v1383_v9  ;;  %v601_v39 = vpop.f32.mrb[5].mxu1 }
 0x12f   : > { %v561_v38 = vadd.f32 %v560_v36, %v1383_v9  ;;  %v562_v40 = vpop.f32.mrb[6].mxu0  ;;  %v834_v41 = vcombine.low %v826_v31, %v833_v33  ;;  %v602_v43 = vadd.f32 %v601_v39, %v1383_v9  ;;  %v603_v44 = vpop.f32.mrb[6].mxu1 }
 0x130   : > { %v774_v42 = vmax.f32 %v559_v34, 0.0  ;;  %v563_v45 = vpop.f32.mrb[7].mxu0  ;;  %v776_v46 = vmax.f32 %v600_v37, 0.0  ;;  %v604_v48 = vpop.f32.mrb[7].mxu1 }
 0x131   : > { %v775_v47 = vmax.f32 %v561_v38, 0.0  ;;  %890 = vst [vmem:[%s1397_s5] sm:$0xff] %v834_v41  ;;  %v777_v49 = vmax.f32 %v602_v43, 0.0 }
 0x133   : > { %v1057_v50 = vpack.c.bf16 %v775_v47, %v774_v42  ;;  %v1058_v51 = vpack.c.bf16 %v777_v49, %v776_v46 }
 0x135   : > { %v843_v52 = vrot.slane %v1057_v50, %v1389_v25  ;;  %v640_v53 = vpop.f32.mrb[8].mxu0  ;;  %v850_v54 = vrot.slane %v1058_v51, %v1389_v25  ;;  %v681_v56 = vpop.f32.mrb[8].mxu1 }
 0x136   : > { %v641_v55 = vadd.f32 %v640_v53, %v1383_v9  ;;  %v642_v57 = vpop.f32.mrb[9].mxu0  ;;  %v682_v58 = vadd.f32 %v681_v56, %v1383_v9  ;;  %v683_v60 = vpop.f32.mrb[9].mxu1 }
 0x137   : > { %v643_v59 = vadd.f32 %v642_v57, %v1383_v9  ;;  %v644_v61 = vpop.f32.mrb[10].mxu0  ;;  %v851_v62 = vcombine.low %v843_v52, %v850_v54  ;;  %v684_v0 = vadd.f32 %v683_v60, %v1383_v9  ;;  %v685_v1 = vpop.f32.mrb[10].mxu1 }
 0x138   : > { %v778_v63 = vmax.f32 %v641_v55, 0.0  ;;  %v645_v2 = vpop.f32.mrb[11].mxu0  ;;  %v780_v3 = vmax.f32 %v682_v58, 0.0  ;;  %v686_v5 = vpop.f32.mrb[11].mxu1 }
 0x139   : > { %v779_v4 = vmax.f32 %v643_v59, 0.0  ;;  %891 = vst [vmem:[%s1397_s5 + $0x8] sm:$0xff] %v851_v62  ;;  %v781_v6 = vmax.f32 %v684_v0, 0.0 }
 0x13b   : > { %v1059_v7 = vpack.c.bf16 %v779_v4, %v778_v63  ;;  %v1060_v8 = vpack.c.bf16 %v781_v6, %v780_v3 }
 0x13d   : > { %v860_v10 = vrot.slane %v1059_v7, %v1389_v25  ;;  %v722_v11 = vpop.f32.mrb[12].mxu0  ;;  %v867_v12 = vrot.slane %v1060_v8, %v1389_v25  ;;  %v763_v14 = vpop.f32.mrb[12].mxu1 }
 0x13e   : > { %v723_v13 = vadd.f32 %v722_v11, %v1383_v9  ;;  %v724_v15 = vpop.f32.mrb[13].mxu0  ;;  %v764_v16 = vadd.f32 %v763_v14, %v1383_v9  ;;  %v765_v18 = vpop.f32.mrb[13].mxu1 }
 0x13f   : > { %v725_v17 = vadd.f32 %v724_v15, %v1383_v9  ;;  %v726_v19 = vpop.f32.mrb[14].mxu0  ;;  %v868_v20 = vcombine.low %v860_v10, %v867_v12  ;;  %v766_v22 = vadd.f32 %v765_v18, %v1383_v9  ;;  %v767_v23 = vpop.f32.mrb[14].mxu1 }
 0x140   : > { %v782_v21 = vmax.f32 %v723_v13, 0.0  ;;  %v727_v24 = vpop.f32.mrb[15].mxu0  ;;  %v784_v26 = vmax.f32 %v764_v16, 0.0  ;;  %v768_v28 = vpop.f32.mrb[15].mxu1 }
 0x141   : > { %v783_v27 = vmax.f32 %v725_v17, 0.0  ;;  %892 = vst [vmem:[%s1397_s5 + $0x10] sm:$0xff] %v868_v20  ;;  %v785_v29 = vmax.f32 %v766_v22, 0.0 }
 0x143   : > { %v1061_v30 = vpack.c.bf16 %v783_v27, %v782_v21  ;;  %v1062_v31 = vpack.c.bf16 %v785_v29, %v784_v26 }
 0x145   : > { %v877_v32 = vrot.slane %v1061_v30, %v1389_v25  ;;  %v884_v33 = vrot.slane %v1062_v31, %v1389_v25 }
 0x147   : > { %v885_v34 = vcombine.low %v877_v32, %v884_v33 }
 0x149   : > { %893 = vst [vmem:[%s1397_s5 + $0x18] sm:$0xff] %v885_v34 }
 0x14a PF: > { %s14_s16 = sadd.s32 1, %s1191_s16   ;;  %s1449_s12 = smov %s1179_s13 }
 0x14b   : > { %p11_p10 = scmp.ge.s32.totalorder %s14_s16, 18   ;;  %s1450_s13 = smov %s1267_s24 }
 0x14c   : > { %s1451_s14 = smov %s1187_s15  ;;  %s1452_s15 = smov %s1454_s18 }
 0x14d   :  { %13 = sbr.rel (!%p11_p10) target bundleno = 3 (0x3), region = 99 }
 0x154   :  { %924 = vsyncpa [#allocation3], 1 }
 0x155   :  { %926 = vsyncpa [#allocation3 + $0x1], 1 }

// kernel: encoder_forward.7
= control target key start
LH: loop header
LB: loop body
LE: loop exit
PB: predicated region body
PF: predicated region fallthrough
CT: control target
= control target key end

     0   :  { %s1552_s12 = smov 0   ;;  %s1554_s13 = smov 0   ;;  %s1876_s0 = inlined_call_operand.vmem [shape: bf16[16,36], index: 0, kind: input, shape index: {}]   ;;  %s1877_s1 = inlined_call_operand.vmem [shape: bf16[36,8192], index: 1, kind: input, shape index: {}]   ;;  %s1878_s2 = inlined_call_operand.vmem [shape: f32[16,1], index: 2, kind: input, shape index: {}]   ;;  %s1879_s3 = inlined_call_operand.vmem [shape: bf16[16,8192], index: 3, kind: output, shape index: {}]  }
   0x1   :  { %s1556_s14 = smov 0   ;;  %s1558_s15 = smov 0  }
   0x2   :  { %s1560_s16 = smov 0  }
   0x3 LB: > { %s28_s17 = sadd.s32 1, %s1525_s15  ;;  %s1316_s18 = sadd.s32 4294967295, %s1529_s16   ;;  %s1529_s16 = sphi %s1560_s16, %s13_s16   ;;  %s1525_s15 = sphi %s1558_s15, %s1884_s15   ;;  %s1521_s14 = sphi %s1556_s14, %s1883_s14   ;;  %s1517_s13 = sphi %s1554_s13, %s1882_s13   ;;  %s1513_s12 = sphi %s1552_s12, %s1881_s12  }
   0x4   : > { %p30_p0 = scmp.ge.s32.totalorder %s28_s17, 4  ;;  %p76_p1 = scmp.ne.s32.totalorder %s1517_s13, %s1513_s12 }
   0x5   : > { %p77_p2 = scmp.eq.s32.totalorder %s1529_s16, 0  ;;  %p134_p4 = scmp.eq.s32.totalorder %s1316_s18, 3 }
   0x6   : > { %s1886_s17 = smov (%p30_p0, %s28_s17), 0  ;;  %s69_s20 = sadd.s32 1, %s1517_s13 }
   0x7   : > { %p78_p3 = por %p77_p2, %p76_p1  ;;  %s65_s19 = ssub.s32 %s1525_s15, %s1886_s17 }
   0x8   : > { %p67_p5 = scmp.eq.s32.totalorder %s65_s19, 0  ;;  %p1587_p6 = por %p134_p4, %p76_p1 }
   0x9   : > { %p1321_p7 = scmp.ge.s32.totalorder %s1529_s16, 4 }
   0xa   : > { %s1592_s22 = scalar_select %p67_p5, %s1517_s13, %s69_s20  }
   0xb   : > { %177 = sbr.rel (%p1321_p7) target bundleno = 43 (0x2b), region = 24 }
  0x12   : > { %180 = sbr.rel (!%p78_p3) target bundleno = 43 (0x2b), region = 28  ;;  %s182_s23 = sand.u32 (%p78_p3), 1, %s1517_s13  }
  0x13   : > { %s1412_s24 = sshll.u32 (%p78_p3), %s1525_s15, 6  ;;  %s1430_s25 = smul.u32 (%p78_p3), 320, %s182_s23 }
  0x14   : > { %s1600_s28 = scalar_lea.vmem (%p78_p3), %s1877_s1, %s1412_s24 }
  0x15   : > { %v203_v0 = vld [vmem:[%s1600_s28] sm:$0xff] (%p78_p3)  ;;  %v205_v1 = vld [vmem:[%s1600_s28 + $0x8] sm:$0xff] (%p78_p3)  ;;  %v207_v2 = vld [vmem:[%s1600_s28 + $0x10] sm:$0xff] (%p78_p3)  ;;  %s1608_s29 = scalar_lea.vmem (%p78_p3), [#allocation2], %s1430_s25 }
  0x16   : > { %v209_v3 = vld [vmem:[%s1600_s28 + $0x18] sm:$0xff] (%p78_p3)  ;;  %v211_v4 = vld [vmem:[%s1600_s28 + $0x20] sm:$0xff] (%p78_p3)  ;;  %v213_v5 = vld [vmem:[%s1600_s28 + $0x28] sm:$0xff] (%p78_p3)  ;;  %204 = vst [vmem:[%s1608_s29] sm:$0xff] (%p78_p3), %v203_v0 }
  0x17   : > { %206 = vst [vmem:[%s1608_s29 + $0x8] sm:$0xff] (%p78_p3), %v205_v1  ;;  %208 = vst [vmem:[%s1608_s29 + $0x10] sm:$0xff] (%p78_p3), %v207_v2  ;;  %v215_v6 = vld [vmem:[%s1600_s28 + $0x30] sm:$0xff] (%p78_p3)  ;;  %v217_v7 = vld [vmem:[%s1600_s28 + $0x38] sm:$0xff] (%p78_p3) }
  0x18   : > { %210 = vst [vmem:[%s1608_s29 + $0x18] sm:$0xff] (%p78_p3), %v209_v3  ;;  %212 = vst [vmem:[%s1608_s29 + $0x20] sm:$0xff] (%p78_p3), %v211_v4  ;;  %v219_v8 = vld [vmem:[%s1600_s28 + $0x100] sm:$0xff] (%p78_p3)  ;;  %v221_v9 = vld [vmem:[%s1600_s28 + $0x108] sm:$0xff] (%p78_p3) }
  0x19   : > { %214 = vst [vmem:[%s1608_s29 + $0x28] sm:$0xff] %v213_v5  ;;  %216 = vst [vmem:[%s1608_s29 + $0x30] sm:$0xff] %v215_v6  ;;  %v223_v10 = vld [vmem:[%s1600_s28 + $0x110] sm:$0xff]  ;;  %v225_v11 = vld [vmem:[%s1600_s28 + $0x118] sm:$0xff] }
  0x1a   : > { %218 = vst [vmem:[%s1608_s29 + $0x38] sm:$0xff] %v217_v7  ;;  %220 = vst [vmem:[%s1608_s29 + $0x40] sm:$0xff] %v219_v8  ;;  %v227_v12 = vld [vmem:[%s1600_s28 + $0x120] sm:$0xff]  ;;  %v229_v13 = vld [vmem:[%s1600_s28 + $0x128] sm:$0xff] }
  0x1b   : > { %222 = vst [vmem:[%s1608_s29 + $0x48] sm:$0xff] %v221_v9  ;;  %224 = vst [vmem:[%s1608_s29 + $0x50] sm:$0xff] %v223_v10  ;;  %v231_v14 = vld [vmem:[%s1600_s28 + $0x130] sm:$0xff]  ;;  %v233_v15 = vld [vmem:[%s1600_s28 + $0x138] sm:$0xff] }
  0x1c   : > { %226 = vst [vmem:[%s1608_s29 + $0x58] sm:$0xff] %v225_v11  ;;  %228 = vst [vmem:[%s1608_s29 + $0x60] sm:$0xff] %v227_v12  ;;  %v235_v16 = vld [vmem:[%s1600_s28 + $0x200] sm:$0xff]  ;;  %v237_v17 = vld [vmem:[%s1600_s28 + $0x208] sm:$0xff] }
  0x1d   : > { %230 = vst [vmem:[%s1608_s29 + $0x68] sm:$0xff] %v229_v13  ;;  %232 = vst [vmem:[%s1608_s29 + $0x70] sm:$0xff] %v231_v14  ;;  %v239_v18 = vld [vmem:[%s1600_s28 + $0x210] sm:$0xff]  ;;  %v241_v19 = vld [vmem:[%s1600_s28 + $0x218] sm:$0xff] }
  0x1e   : > { %234 = vst [vmem:[%s1608_s29 + $0x78] sm:$0xff] %v233_v15  ;;  %236 = vst [vmem:[%s1608_s29 + $0x80] sm:$0xff] %v235_v16  ;;  %v243_v20 = vld [vmem:[%s1600_s28 + $0x220] sm:$0xff]  ;;  %v245_v21 = vld [vmem:[%s1600_s28 + $0x228] sm:$0xff] }
  0x1f   : > { %238 = vst [vmem:[%s1608_s29 + $0x88] sm:$0xff] %v237_v17  ;;  %240 = vst [vmem:[%s1608_s29 + $0x90] sm:$0xff] %v239_v18  ;;  %v247_v22 = vld [vmem:[%s1600_s28 + $0x230] sm:$0xff]  ;;  %v249_v23 = vld [vmem:[%s1600_s28 + $0x238] sm:$0xff] }
  0x20   : > { %242 = vst [vmem:[%s1608_s29 + $0x98] sm:$0xff] %v241_v19  ;;  %244 = vst [vmem:[%s1608_s29 + $0xa0] sm:$0xff] %v243_v20  ;;  %v251_v24 = vld [vmem:[%s1600_s28 + $0x300] sm:$0xff]  ;;  %v253_v25 = vld [vmem:[%s1600_s28 + $0x308] sm:$0xff] }
  0x21   : > { %246 = vst [vmem:[%s1608_s29 + $0xa8] sm:$0xff] %v245_v21  ;;  %248 = vst [vmem:[%s1608_s29 + $0xb0] sm:$0xff] %v247_v22  ;;  %v255_v26 = vld [vmem:[%s1600_s28 + $0x310] sm:$0xff]  ;;  %v257_v27 = vld [vmem:[%s1600_s28 + $0x318] sm:$0xff] }
  0x22   : > { %250 = vst [vmem:[%s1608_s29 + $0xb8] sm:$0xff] %v249_v23  ;;  %252 = vst [vmem:[%s1608_s29 + $0xc0] sm:$0xff] %v251_v24  ;;  %v259_v28 = vld [vmem:[%s1600_s28 + $0x320] sm:$0xff]  ;;  %v261_v29 = vld [vmem:[%s1600_s28 + $0x328] sm:$0xff] }
  0x23   : > { %254 = vst [vmem:[%s1608_s29 + $0xc8] sm:$0xff] %v253_v25  ;;  %256 = vst [vmem:[%s1608_s29 + $0xd0] sm:$0xff] %v255_v26  ;;  %v263_v30 = vld [vmem:[%s1600_s28 + $0x330] sm:$0xff]  ;;  %v265_v31 = vld [vmem:[%s1600_s28 + $0x338] sm:$0xff] }
  0x24   : > { %258 = vst [vmem:[%s1608_s29 + $0xd8] sm:$0xff] %v257_v27  ;;  %260 = vst [vmem:[%s1608_s29 + $0xe0] sm:$0xff] %v259_v28  ;;  %v267_v32 = vld [vmem:[%s1600_s28 + $0x400] sm:$0xff]  ;;  %v269_v33 = vld [vmem:[%s1600_s28 + $0x408] sm:$0xff] }
  0x25   : > { %262 = vst [vmem:[%s1608_s29 + $0xe8] sm:$0xff] %v261_v29  ;;  %264 = vst [vmem:[%s1608_s29 + $0xf0] sm:$0xff] %v263_v30  ;;  %v271_v34 = vld [vmem:[%s1600_s28 + $0x410] sm:$0xff]  ;;  %v273_v35 = vld [vmem:[%s1600_s28 + $0x418] sm:$0xff] }
  0x26   : > { %266 = vst [vmem:[%s1608_s29 + $0xf8] sm:$0xff] %v265_v31  ;;  %268 = vst [vmem:[%s1608_s29 + $0x100] sm:$0xff] %v267_v32  ;;  %v275_v36 = vld [vmem:[%s1600_s28 + $0x420] sm:$0xff]  ;;  %v277_v37 = vld [vmem:[%s1600_s28 + $0x428] sm:$0xff] }
  0x27   : > { %270 = vst [vmem:[%s1608_s29 + $0x108] sm:$0xff] %v269_v33  ;;  %272 = vst [vmem:[%s1608_s29 + $0x110] sm:$0xff] %v271_v34  ;;  %v279_v38 = vld [vmem:[%s1600_s28 + $0x430] sm:$0xff]  ;;  %v281_v39 = vld [vmem:[%s1600_s28 + $0x438] sm:$0xff] }
  0x28   : > { %274 = vst [vmem:[%s1608_s29 + $0x118] sm:$0xff] %v273_v35  ;;  %276 = vst [vmem:[%s1608_s29 + $0x120] sm:$0xff] %v275_v36 }
  0x29   : > { %278 = vst [vmem:[%s1608_s29 + $0x128] sm:$0xff] %v277_v37  ;;  %280 = vst [vmem:[%s1608_s29 + $0x130] sm:$0xff] %v279_v38 }
  0x2a   : > { %282 = vst [vmem:[%s1608_s29 + $0x138] sm:$0xff] %v281_v39 }
  0x2b PF: > { %p1324_p8 = scmp.ge.s32.totalorder %s1529_s16, 1  ;;  %p287_p9 = scmp.lt.s32.totalorder %s1529_s16, 5 }
  0x2d   : > { %p288_p10 = pnand %p1324_p8, %p287_p9 }
  0x2e   : > { %s294_s30 = sand.u32 (!%p288_p10), 1, %s1513_s12   ;;  %v1531_v40 = vmov (!%p288_p10), 0   ;;  %v391_v41 = vld [vmem:[%s1878_s2] sm:$0xff] (!%p288_p10)  ;;  %v392_v58 = vld [vmem:[%s1878_s2 + $0x8] sm:$0xff] (!%p288_p10)  ;;  %vm612_vm0 = vcmask (!%p288_p10), 1041408   ;;  %vm608_vm1 = vcmask (!%p288_p10), 293888  }
  0x2f   : > { %291 = sbr.rel (%p288_p10) target bundleno = 333 (0x14d), region = 51  ;;  %693 = vmatprep.mubr.bf16.mxu0 (!%p288_p10), %v1531_v40  ;;  %736 = vmatprep.mubr.bf16.mxu1 (!%p288_p10), %v1531_v40  ;;  %v1723_v11 = vld [vmem:[%s1876_s0] sm:$0xff] (!%p288_p10)   ;;  %s1325_s18 = sshll.u32 (!%p288_p10), %s294_s30, 7 }
  0x30   : > { %s1431_s4 = smul.u32 (!%p288_p10), 320, %s294_s30  ;;  %1473 = vset.pattern.permute.xlu0 (!%p288_p10), %v1531_v40  ;;  %s1797_s12 = scalar_lea.vmem (!%p288_p10), [#allocation3], %s1325_s18 }
  0x31   : > { %395 = vperm.xlu0 (!%p288_p10), %1473, %v391_v41  }
  0x32   : > { %s1695_s7 = scalar_lea.vmem (!%p288_p10), [#allocation2], %s1431_s4 }
  0x33   : > { %v351_v42 = vld [vmem:[%s1695_s7] sm:$0xff] (!%p288_p10)  ;;  %v352_v44 = vld [vmem:[%s1695_s7 + $0x8] sm:$0xff] (!%p288_p10)  ;;  %v353_v1 = vld [vmem:[%s1695_s7 + $0x10] sm:$0xff] (!%p288_p10) }
  0x34   : > { %v359_v43 = vld [vmem:[%s1695_s7 + $0x40] sm:$0xff] (!%p288_p10)  ;;  %v360_v46 = vld [vmem:[%s1695_s7 + $0x48] sm:$0xff] (!%p288_p10)  ;;  %v361_v2 = vld [vmem:[%s1695_s7 + $0x50] sm:$0xff] (!%p288_p10) }
  0x35   : > { %v1328_v45 = vcombine.high (!%p288_p10), %v351_v42, %v359_v43  ;;  %v1327_v47 = vcombine.low (!%p288_p10), %v351_v42, %v359_v43  ;;  %v367_v48 = vld [vmem:[%s1695_s7 + $0x80] sm:$0xff] (!%p288_p10)  ;;  %v1330_v50 = vcombine.high (!%p288_p10), %v352_v44, %v360_v46  ;;  %v1329_v51 = vcombine.low (!%p288_p10), %v352_v44, %v360_v46  ;;  %v368_v53 = vld [vmem:[%s1695_s7 + $0x88] sm:$0xff] (!%p288_p10)  ;;  %400 = vperm.xlu0 (!%p288_p10), %1473, %v392_v58   ;;  %v354_v3 = vld [vmem:[%s1695_s7 + $0x18] sm:$0xff] (!%p288_p10) }
  0x36   : > { %v375_v49 = vld [vmem:[%s1695_s7 + $0xc0] sm:$0xff]  ;;  %v376_v54 = vld [vmem:[%s1695_s7 + $0xc8] sm:$0xff]  ;;  %v362_v4 = vld [vmem:[%s1695_s7 + $0x58] sm:$0xff]  ;;  %v1332_v6 = vcombine.high %v353_v1, %v361_v2  ;;  %v1331_v14 = vcombine.low %v353_v1, %v361_v2  ;;  %s1429_s19 = sshll.u32 (%p1587_p6), %s1521_s14, 6 }
  0x37   : > { %v1344_v52 = vcombine.high %v367_v48, %v375_v49  ;;  %v383_v55 = vld [vmem:[%s1695_s7 + $0x100] sm:$0x33]  ;;  %661 = vmatprep.subr.bf16.mxu0 %v1328_v45  ;;  %v1346_v56 = vcombine.high %v368_v53, %v376_v54  ;;  %v384_v57 = vld [vmem:[%s1695_s7 + $0x108] sm:$0x33]  ;;  %704 = vmatprep.subr.bf16.mxu1 %v1330_v50  ;;  %v1343_v59 = vcombine.low %v367_v48, %v375_v49  ;;  %v369_v9 = vld [vmem:[%s1695_s7 + $0x90] sm:$0xff]  ;;  %s1161_s24 = scalar_lea.vmem (%p1587_p6), %s1879_s3, %s1429_s19 }
  0x38   : > { %662 = vmatpush1.bf16.msra.mxu0 %v1327_v47  ;;  %705 = vmatpush1.bf16.msra.mxu1 %v1329_v51  ;;  %v1345_v60 = vcombine.low %v368_v53, %v376_v54  ;;  %v1360_v61 = vcombine.high %v383_v55, %v383_v55  ;;  %v1359_v62 = vcombine.low %v383_v55, %v383_v55  ;;  %v377_v10 = vld [vmem:[%s1695_s7 + $0xd0] sm:$0xff]  ;;  %v370_v12 = vld [vmem:[%s1695_s7 + $0x98] sm:$0xff]  ;;  %v355_v26 = vld [vmem:[%s1695_s7 + $0x20] sm:$0xff] }
  0x39   : > { %663 = vmatprep.subr.bf16.mxu0 %v1344_v52  ;;  %706 = vmatprep.subr.bf16.mxu1 %v1346_v56  ;;  %v1362_v63 = vcombine.high %v384_v57, %v384_v57  ;;  %v1361_v0 = vcombine.low %v384_v57, %v384_v57  ;;  %v1334_v8 = vcombine.high %v354_v3, %v362_v4  ;;  %v378_v13 = vld [vmem:[%s1695_s7 + $0xd8] sm:$0xff]  ;;  %v385_v18 = vld [vmem:[%s1695_s7 + $0x110] sm:$0x33]  ;;  %v363_v27 = vld [vmem:[%s1695_s7 + $0x60] sm:$0xff] }
  0x3a   : > { %v614_v5 = vsel %vm612_vm0, %v1359_v62, 0  ;;  %v1333_v15 = vcombine.low %v354_v3, %v362_v4  ;;  %v1348_v16 = vcombine.high %v369_v9, %v377_v10  ;;  %v1350_v17 = vcombine.high %v370_v12, %v378_v13  ;;  %v386_v19 = vld [vmem:[%s1695_s7 + $0x118] sm:$0x33]  ;;  %v356_v28 = vld [vmem:[%s1695_s7 + $0x28] sm:$0xff]  ;;  %v371_v34 = vld [vmem:[%s1695_s7 + $0xa0] sm:$0xff] }
  0x3b   : > { %v620_v7 = vsel %vm612_vm0, %v1361_v0, 0  ;;  %v1347_v20 = vcombine.low %v369_v9, %v377_v10  ;;  %v1349_v21 = vcombine.low %v370_v12, %v378_v13  ;;  %v1364_v22 = vcombine.high %v385_v18, %v385_v18  ;;  %v364_v29 = vld [vmem:[%s1695_s7 + $0x68] sm:$0xff]  ;;  %v379_v35 = vld [vmem:[%s1695_s7 + $0xe0] sm:$0xff]  ;;  %v357_v51 = vld [vmem:[%s1695_s7 + $0x30] sm:$0xff] }
  0x3c   : > { %664 = vmatpush1.bf16.msra.mxu0 %v1343_v59  ;;  %707 = vmatpush1.bf16.msra.mxu1 %v1345_v60  ;;  %v1363_v23 = vcombine.low %v385_v18, %v385_v18  ;;  %v1366_v24 = vcombine.high %v386_v19, %v386_v19  ;;  %v1365_v25 = vcombine.low %v386_v19, %v386_v19  ;;  %v372_v36 = vld [vmem:[%s1695_s7 + $0xa8] sm:$0xff]  ;;  %v387_v43 = vld [vmem:[%s1695_s7 + $0x120] sm:$0x33]  ;;  %v365_v52 = vld [vmem:[%s1695_s7 + $0x70] sm:$0xff] }
  0x3d   : > { %1375 = vmatprep.subr.msk.bf16.mxu0 %vm612_vm0, %v1360_v61  ;;  %1377 = vmatprep.subr.msk.bf16.mxu1 %vm612_vm0, %v1362_v63  ;;  %v1336_v31 = vcombine.high %v355_v26, %v363_v27  ;;  %v1338_v33 = vcombine.high %v356_v28, %v364_v29  ;;  %v380_v37 = vld [vmem:[%s1695_s7 + $0xe8] sm:$0xff]  ;;  %v1335_v38 = vcombine.low %v355_v26, %v363_v27  ;;  %v358_v53 = vld [vmem:[%s1695_s7 + $0x38] sm:$0xff]  ;;  %v373_v59 = vld [vmem:[%s1695_s7 + $0xb0] sm:$0xff] }
  0x3e   : > { %v626_v30 = vsel %vm612_vm0, %v1363_v23, 0  ;;  %v632_v32 = vsel %vm612_vm0, %v1365_v25, 0  ;;  %v1337_v39 = vcombine.low %v356_v28, %v364_v29  ;;  %v1352_v41 = vcombine.high %v371_v34, %v379_v35  ;;  %v388_v44 = vld [vmem:[%s1695_s7 + $0x128] sm:$0x33]  ;;  %v366_v54 = vld [vmem:[%s1695_s7 + $0x78] sm:$0xff]  ;;  %v381_v60 = vld [vmem:[%s1695_s7 + $0xf0] sm:$0xff] }
  0x3f   : > { %v1354_v42 = vcombine.high %v372_v36, %v380_v37  ;;  %v1351_v45 = vcombine.low %v371_v34, %v379_v35  ;;  %v1353_v46 = vcombine.low %v372_v36, %v380_v37  ;;  %v1368_v47 = vcombine.high %v387_v43, %v387_v43  ;;  %v374_v61 = vld [vmem:[%s1695_s7 + $0xb8] sm:$0xff]  ;;  %v389_v3 = vld [vmem:[%s1695_s7 + $0x130] sm:$0x33] }
  0x40   : > { %666 = vmatpush1.bf16.msra.mxu0 %v614_v5  ;;  %709 = vmatpush1.bf16.msra.mxu1 %v620_v7  ;;  %v1367_v48 = vcombine.low %v387_v43, %v387_v43  ;;  %v1370_v49 = vcombine.high %v388_v44, %v388_v44  ;;  %v1369_v50 = vcombine.low %v388_v44, %v388_v44  ;;  %v382_v62 = vld [vmem:[%s1695_s7 + $0xf8] sm:$0xff] }
  0x41   : > { %747 = vmatprep.subr.bf16.mxu0 %v1332_v6  ;;  %790 = vmatprep.subr.bf16.mxu1 %v1334_v8  ;;  %v1340_v56 = vcombine.high %v357_v51, %v365_v52  ;;  %v1342_v58 = vcombine.high %v358_v53, %v366_v54  ;;  %v1339_v63 = vcombine.low %v357_v51, %v365_v52  ;;  %v390_v4 = vld [vmem:[%s1695_s7 + $0x138] sm:$0x33] }
  0x42   : > { %v638_v55 = vsel %vm612_vm0, %v1367_v48, 0  ;;  %v644_v57 = vsel %vm612_vm0, %v1369_v50, 0  ;;  %v1341_v0 = vcombine.low %v358_v53, %v366_v54  ;;  %v1356_v1 = vcombine.high %v373_v59, %v381_v60 }
  0x43   : > { %1376 = vmatmul.mubr.msk.bf16.vlgmr.msra.gmra.mrb[0].mxu0 %vm608_vm1, %v1723_v11  ;;  %1378 = vmatmul.mubr.msk.bf16.vlgmr.msra.gmra.mrb[0].mxu1 %vm608_vm1, %v1723_v11  ;;  %v1358_v2 = vcombine.high %v374_v61, %v382_v62  ;;  %v1355_v5 = vcombine.low %v373_v59, %v381_v60  ;;  %v1357_v6 = vcombine.low %v374_v61, %v382_v62 }
  0x44   : > { %748 = vmatpush1.bf16.msra.mxu0 %v1331_v14  ;;  %791 = vmatpush1.bf16.msra.mxu1 %v1333_v15  ;;  %v1372_v7 = vcombine.high %v389_v3, %v389_v3  ;;  %v1371_v8 = vcombine.low %v389_v3, %v389_v3  ;;  %v1374_v9 = vcombine.high %v390_v4, %v390_v4 }
  0x45   : > { %749 = vmatprep.subr.bf16.mxu0 %v1348_v16  ;;  %792 = vmatprep.subr.bf16.mxu1 %v1350_v17  ;;  %v1373_v10 = vcombine.low %v390_v4, %v390_v4 }
  0x46   : > { %779 = vmatprep.mubr.bf16.mxu0 %v1531_v40  ;;  %822 = vmatprep.mubr.bf16.mxu1 %v1531_v40  ;;  %v650_v12 = vsel %vm612_vm0, %v1371_v8, 0 }
  0x47   : > { %v656_v13 = vsel %vm612_vm0, %v1373_v10, 0 }
  0x48   : > { %750 = vmatpush1.bf16.msra.mxu0 %v1347_v20  ;;  %793 = vmatpush1.bf16.msra.mxu1 %v1349_v21 }
  0x49   : > { %1379 = vmatprep.subr.msk.bf16.mxu0 %vm612_vm0, %v1364_v22  ;;  %1381 = vmatprep.subr.msk.bf16.mxu1 %vm612_vm0, %v1366_v24 }
  0x4c   : > { %752 = vmatpush1.bf16.msra.mxu0 %v626_v30  ;;  %795 = vmatpush1.bf16.msra.mxu1 %v632_v32 }
  0x4d   : > { %833 = vmatprep.subr.bf16.mxu0 %v1336_v31  ;;  %876 = vmatprep.subr.bf16.mxu1 %v1338_v33 }
  0x4f   : > { %1380 = vmatmul.mubr.msk.bf16.vlgmr.msra.gmra.mrb[4].mxu0 %vm608_vm1, %v1723_v11  ;;  %1382 = vmatmul.mubr.msk.bf16.vlgmr.msra.gmra.mrb[4].mxu1 %vm608_vm1, %v1723_v11 }
  0x50   : > { %834 = vmatpush1.bf16.msra.mxu0 %v1335_v38  ;;  %877 = vmatpush1.bf16.msra.mxu1 %v1337_v39 }
  0x51   : > { %835 = vmatprep.subr.bf16.mxu0 %v1352_v41  ;;  %878 = vmatprep.subr.bf16.mxu1 %v1354_v42 }
  0x52   : > { %865 = vmatprep.mubr.bf16.mxu0 %v1531_v40  ;;  %908 = vmatprep.mubr.bf16.mxu1 %v1531_v40 }
  0x54   : > { %836 = vmatpush1.bf16.msra.mxu0 %v1351_v45  ;;  %879 = vmatpush1.bf16.msra.mxu1 %v1353_v46 }
  0x55   : > { %1383 = vmatprep.subr.msk.bf16.mxu0 %vm612_vm0, %v1368_v47  ;;  %1385 = vmatprep.subr.msk.bf16.mxu1 %vm612_vm0, %v1370_v49 }
  0x58   : > { %838 = vmatpush1.bf16.msra.mxu0 %v638_v55  ;;  %881 = vmatpush1.bf16.msra.mxu1 %v644_v57 }
  0x59   : > { %919 = vmatprep.subr.bf16.mxu0 %v1340_v56  ;;  %962 = vmatprep.subr.bf16.mxu1 %v1342_v58 }
  0x5b   : > { %1384 = vmatmul.mubr.msk.bf16.vlgmr.msra.gmra.mrb[8].mxu0 %vm608_vm1, %v1723_v11  ;;  %1386 = vmatmul.mubr.msk.bf16.vlgmr.msra.gmra.mrb[8].mxu1 %vm608_vm1, %v1723_v11 }
  0x5c   : > { %920 = vmatpush1.bf16.msra.mxu0 %v1339_v63  ;;  %963 = vmatpush1.bf16.msra.mxu1 %v1341_v0 }
  0x5d   : > { %921 = vmatprep.subr.bf16.mxu0 %v1356_v1  ;;  %964 = vmatprep.subr.bf16.mxu1 %v1358_v2 }
  0x5e   : > { %951 = vmatprep.mubr.bf16.mxu0 %v1531_v40  ;;  %994 = vmatprep.mubr.bf16.mxu1 %v1531_v40 }
  0x60   : > { %922 = vmatpush1.bf16.msra.mxu0 %v1355_v5  ;;  %965 = vmatpush1.bf16.msra.mxu1 %v1357_v6 }
  0x61   : > { %1387 = vmatprep.subr.msk.bf16.mxu0 %vm612_vm0, %v1372_v7  ;;  %1389 = vmatprep.subr.msk.bf16.mxu1 %vm612_vm0, %v1374_v9 }
  0x64   : > { %924 = vmatpush1.bf16.msra.mxu0 %v650_v12  ;;  %967 = vmatpush1.bf16.msra.mxu1 %v656_v13 }
  0x67   : > { %1388 = vmatmul.mubr.msk.bf16.vlgmr.msra.gmra.mrb[12].mxu0 %vm608_vm1, %v1723_v11  ;;  %1390 = vmatmul.mubr.msk.bf16.vlgmr.msra.gmra.mrb[12].mxu1 %vm608_vm1, %v1723_v11 }
  0xb0   : > { %v1783_v40 = vpop.permute.xlu0 %395 }
  0xb4   : > { %v1785_v15 = vpop.permute.xlu0 %400 }
 0x116   : > { %v695_v14 = vpop.f32.mrb[0].mxu0  ;;  %v738_v17 = vpop.f32.mrb[0].mxu1 }
 0x117   : > { %v696_v16 = vadd.f32 %v695_v14, %v1783_v40  ;;  %v697_v18 = vpop.f32.mrb[1].mxu0  ;;  %v739_v19 = vadd.f32 %v738_v17, %v1783_v40  ;;  %v740_v21 = vpop.f32.mrb[1].mxu1 }
 0x118   : > { %v698_v20 = vadd.f32 %v697_v18, %v1783_v40  ;;  %v699_v22 = vpop.f32.mrb[2].mxu0  ;;  %v741_v11 = vadd.f32 %v740_v21, %v1783_v40  ;;  %v742_v25 = vpop.f32.mrb[2].mxu1 }
 0x119   : > { %v1005_v23 = vmax.f32 %v696_v16, 0.0  ;;  %v700_v24 = vadd.f32 %v699_v22, %v1785_v15  ;;  %v701_v26 = vpop.f32.mrb[3].mxu0  ;;  %v1007_v27 = vmax.f32 %v739_v19, 0.0  ;;  %v743_v29 = vadd.f32 %v742_v25, %v1785_v15  ;;  %v744_v31 = vpop.f32.mrb[3].mxu1 }
 0x11a   : > { %v1006_v28 = vmax.f32 %v698_v20, 0.0  ;;  %v702_v30 = vadd.f32 %v701_v26, %v1785_v15  ;;  %v1008_v32 = vmax.f32 %v741_v11, 0.0  ;;  %v745_v34 = vadd.f32 %v744_v31, %v1785_v15 }
 0x11b   : > { %v1021_v33 = vmax.f32 %v700_v24, 0.0  ;;  %v1023_v36 = vmax.f32 %v743_v29, 0.0 }
 0x11c   : > { %v1413_v35 = vpack.c.bf16 %v1006_v28, %v1005_v23  ;;  %v1022_v37 = vmax.f32 %v702_v30, 0.0  ;;  %v1414_v38 = vpack.c.bf16 %v1008_v32, %v1007_v27  ;;  %v1024_v39 = vmax.f32 %v745_v34, 0.0 }
 0x11e   : > { %1133 = vst [vmem:[%s1797_s12] sm:$0xff] %v1413_v35  ;;  %v1421_v41 = vpack.c.bf16 %v1022_v37, %v1021_v33  ;;  %1134 = vst [vmem:[%s1797_s12 + $0x8] sm:$0xff] %v1414_v38  ;;  %v1422_v42 = vpack.c.bf16 %v1024_v39, %v1023_v36 }
 0x120   : > { %1141 = vst [vmem:[%s1797_s12 + $0x40] sm:$0xff] %v1421_v41  ;;  %1142 = vst [vmem:[%s1797_s12 + $0x48] sm:$0xff] %v1422_v42 }
 0x122   : > { %v781_v43 = vpop.f32.mrb[4].mxu0  ;;  %v824_v45 = vpop.f32.mrb[4].mxu1 }
 0x123   : > { %v782_v44 = vadd.f32 %v781_v43, %v1783_v40  ;;  %v783_v46 = vpop.f32.mrb[5].mxu0  ;;  %v825_v47 = vadd.f32 %v824_v45, %v1783_v40  ;;  %v826_v49 = vpop.f32.mrb[5].mxu1 }
 0x124   : > { %v784_v48 = vadd.f32 %v783_v46, %v1783_v40  ;;  %v785_v50 = vpop.f32.mrb[6].mxu0  ;;  %v827_v52 = vadd.f32 %v826_v49, %v1783_v40  ;;  %v828_v54 = vpop.f32.mrb[6].mxu1 }
 0x125   : > { %v1009_v51 = vmax.f32 %v782_v44, 0.0  ;;  %v786_v53 = vadd.f32 %v785_v50, %v1785_v15  ;;  %v787_v55 = vpop.f32.mrb[7].mxu0  ;;  %v1011_v56 = vmax.f32 %v825_v47, 0.0  ;;  %v829_v58 = vadd.f32 %v828_v54, %v1785_v15  ;;  %v830_v60 = vpop.f32.mrb[7].mxu1 }
 0x126   : > { %v1010_v57 = vmax.f32 %v784_v48, 0.0  ;;  %v788_v59 = vadd.f32 %v787_v55, %v1785_v15  ;;  %v1012_v61 = vmax.f32 %v827_v52, 0.0  ;;  %v831_v63 = vadd.f32 %v830_v60, %v1785_v15 }
 0x127   : > { %v1025_v62 = vmax.f32 %v786_v53, 0.0  ;;  %v1027_v1 = vmax.f32 %v829_v58, 0.0 }
 0x128   : > { %v1415_v0 = vpack.c.bf16 %v1010_v57, %v1009_v51  ;;  %v1026_v2 = vmax.f32 %v788_v59, 0.0  ;;  %v1416_v3 = vpack.c.bf16 %v1012_v61, %v1011_v56  ;;  %v1028_v4 = vmax.f32 %v831_v63, 0.0 }
 0x12a   : > { %1135 = vst [vmem:[%s1797_s12 + $0x10] sm:$0xff] %v1415_v0  ;;  %v1423_v5 = vpack.c.bf16 %v1026_v2, %v1025_v62  ;;  %1136 = vst [vmem:[%s1797_s12 + $0x18] sm:$0xff] %v1416_v3  ;;  %v1424_v6 = vpack.c.bf16 %v1028_v4, %v1027_v1  ;;  %v1176_v0 = vld [vmem:[%s1797_s12 + $0x8] sm:$0xff] (%p1587_p6) }
 0x12b   : > { %1177 = vst [vmem:[%s1161_s24 + $0x8] sm:$0xff] (%p1587_p6), %v1176_v0 }
 0x12c   : > { %1143 = vst [vmem:[%s1797_s12 + $0x50] sm:$0xff] %v1423_v5  ;;  %1144 = vst [vmem:[%s1797_s12 + $0x58] sm:$0xff] %v1424_v6 }
 0x12e   : > { %v867_v7 = vpop.f32.mrb[8].mxu0  ;;  %v910_v9 = vpop.f32.mrb[8].mxu1 }
 0x12f   : > { %v868_v8 = vadd.f32 %v867_v7, %v1783_v40  ;;  %v869_v10 = vpop.f32.mrb[9].mxu0  ;;  %v911_v12 = vadd.f32 %v910_v9, %v1783_v40  ;;  %v912_v14 = vpop.f32.mrb[9].mxu1  ;;  %v1190_v7 = vld [vmem:[%s1797_s12 + $0x40] sm:$0xff] (%p1587_p6) }
 0x130   : > { %v870_v13 = vadd.f32 %v869_v10, %v1783_v40  ;;  %v871_v16 = vpop.f32.mrb[10].mxu0  ;;  %v913_v18 = vadd.f32 %v912_v14, %v1783_v40  ;;  %v914_v20 = vpop.f32.mrb[10].mxu1  ;;  %1191 = vst [vmem:[%s1161_s24 + $0x100] sm:$0xff] (%p1587_p6), %v1190_v7 }
 0x131   : > { %v1013_v17 = vmax.f32 %v868_v8, 0.0  ;;  %v872_v19 = vadd.f32 %v871_v16, %v1785_v15  ;;  %v873_v21 = vpop.f32.mrb[11].mxu0  ;;  %v1015_v22 = vmax.f32 %v911_v12, 0.0  ;;  %v915_v11 = vadd.f32 %v914_v20, %v1785_v15  ;;  %v916_v25 = vpop.f32.mrb[11].mxu1  ;;  %v1178_v1 = vld [vmem:[%s1797_s12 + $0x10] sm:$0xff] (%p1587_p6)  ;;  %v1180_v2 = vld [vmem:[%s1797_s12 + $0x18] sm:$0xff] (%p1587_p6) }
 0x132   : > { %v1014_v23 = vmax.f32 %v870_v13, 0.0  ;;  %v874_v24 = vadd.f32 %v873_v21, %v1785_v15  ;;  %v1016_v26 = vmax.f32 %v913_v18, 0.0  ;;  %v917_v28 = vadd.f32 %v916_v25, %v1785_v15  ;;  %1179 = vst [vmem:[%s1161_s24 + $0x10] sm:$0xff] (%p1587_p6), %v1178_v1  ;;  %1181 = vst [vmem:[%s1161_s24 + $0x18] sm:$0xff] (%p1587_p6), %v1180_v2  ;;  %v1192_v8 = vld [vmem:[%s1797_s12 + $0x48] sm:$0xff] (%p1587_p6) }
 0x133   : > { %v1029_v27 = vmax.f32 %v872_v19, 0.0  ;;  %v1031_v30 = vmax.f32 %v915_v11, 0.0  ;;  %v1194_v9 = vld [vmem:[%s1797_s12 + $0x50] sm:$0xff] (%p1587_p6)  ;;  %v1196_v10 = vld [vmem:[%s1797_s12 + $0x58] sm:$0xff] (%p1587_p6)  ;;  %1193 = vst [vmem:[%s1161_s24 + $0x108] sm:$0xff] (%p1587_p6), %v1192_v8 }
 0x134   : > { %v1417_v29 = vpack.c.bf16 %v1014_v23, %v1013_v17  ;;  %v1030_v31 = vmax.f32 %v874_v24, 0.0  ;;  %v1418_v32 = vpack.c.bf16 %v1016_v26, %v1015_v22  ;;  %v1032_v33 = vmax.f32 %v917_v28, 0.0  ;;  %1195 = vst [vmem:[%s1161_s24 + $0x110] sm:$0xff] (%p1587_p6), %v1194_v9  ;;  %1197 = vst [vmem:[%s1161_s24 + $0x118] sm:$0xff] (%p1587_p6), %v1196_v10 }
 0x136   : > { %1137 = vst [vmem:[%s1797_s12 + $0x20] sm:$0xff] %v1417_v29  ;;  %v1425_v34 = vpack.c.bf16 %v1030_v31, %v1029_v27  ;;  %1138 = vst [vmem:[%s1797_s12 + $0x28] sm:$0xff] %v1418_v32  ;;  %v1426_v35 = vpack.c.bf16 %v1032_v33, %v1031_v30 }
 0x138   : > { %1145 = vst [vmem:[%s1797_s12 + $0x60] sm:$0xff] %v1425_v34  ;;  %1146 = vst [vmem:[%s1797_s12 + $0x68] sm:$0xff] %v1426_v35 }
 0x13a   : > { %v953_v36 = vpop.f32.mrb[12].mxu0  ;;  %v996_v38 = vpop.f32.mrb[12].mxu1 }
 0x13b   : > { %v954_v37 = vadd.f32 %v953_v36, %v1783_v40  ;;  %v955_v39 = vpop.f32.mrb[13].mxu0  ;;  %v997_v41 = vadd.f32 %v996_v38, %v1783_v40  ;;  %v998_v43 = vpop.f32.mrb[13].mxu1 }
 0x13c   : > { %v956_v42 = vadd.f32 %v955_v39, %v1783_v40  ;;  %v957_v44 = vpop.f32.mrb[14].mxu0  ;;  %v999_v46 = vadd.f32 %v998_v43, %v1783_v40  ;;  %v1000_v48 = vpop.f32.mrb[14].mxu1 }
 0x13d   : > { %v1017_v45 = vmax.f32 %v954_v37, 0.0  ;;  %v958_v47 = vadd.f32 %v957_v44, %v1785_v15  ;;  %v959_v49 = vpop.f32.mrb[15].mxu0  ;;  %v1019_v50 = vmax.f32 %v997_v41, 0.0  ;;  %v1001_v52 = vadd.f32 %v1000_v48, %v1785_v15  ;;  %v1002_v54 = vpop.f32.mrb[15].mxu1  ;;  %v1182_v3 = vld [vmem:[%s1797_s12 + $0x20] sm:$0xff] (%p1587_p6)  ;;  %v1184_v4 = vld [vmem:[%s1797_s12 + $0x28] sm:$0xff] (%p1587_p6) }
 0x13e   : > { %v1018_v51 = vmax.f32 %v956_v42, 0.0  ;;  %v960_v53 = vadd.f32 %v959_v49, %v1785_v15  ;;  %v1020_v55 = vmax.f32 %v999_v46, 0.0  ;;  %v1003_v57 = vadd.f32 %v1002_v54, %v1785_v15  ;;  %1155 = sbr.rel (!%p1587_p6) target bundleno = 333 (0x14d), region = 59  ;;  %v1174_v15 = vld [vmem:[%s1797_s12] sm:$0xff] (%p1587_p6)  ;;  %1183 = vst [vmem:[%s1161_s24 + $0x20] sm:$0xff] (%p1587_p6), %v1182_v3  ;;  %1185 = vst [vmem:[%s1161_s24 + $0x28] sm:$0xff] (%p1587_p6), %v1184_v4 }
 0x13f   : > { %v1033_v56 = vmax.f32 %v958_v47, 0.0  ;;  %v1035_v58 = vmax.f32 %v1001_v52, 0.0  ;;  %1175 = vst [vmem:[%s1161_s24] sm:$0xff] (%p1587_p6), %v1174_v15  ;;  %v1198_v12 = vld [vmem:[%s1797_s12 + $0x60] sm:$0xff] (%p1587_p6)  ;;  %v1200_v13 = vld [vmem:[%s1797_s12 + $0x68] sm:$0xff] (%p1587_p6) }
 0x140   : > { %v1419_v40 = vpack.c.bf16 %v1018_v51, %v1017_v45  ;;  %v1034_v59 = vmax.f32 %v960_v53, 0.0  ;;  %v1420_v60 = vpack.c.bf16 %v1020_v55, %v1019_v50  ;;  %v1036_v61 = vmax.f32 %v1003_v57, 0.0  ;;  %1199 = vst [vmem:[%s1161_s24 + $0x120] sm:$0xff] (%p1587_p6), %v1198_v12  ;;  %1201 = vst [vmem:[%s1161_s24 + $0x128] sm:$0xff] (%p1587_p6), %v1200_v13 }
 0x142   : > { %1139 = vst [vmem:[%s1797_s12 + $0x30] sm:$0xff] %v1419_v40  ;;  %v1427_v62 = vpack.c.bf16 %v1034_v59, %v1033_v56  ;;  %1140 = vst [vmem:[%s1797_s12 + $0x38] sm:$0xff] %v1420_v60  ;;  %v1428_v63 = vpack.c.bf16 %v1036_v61, %v1035_v58 }
 0x144   : > { %1147 = vst [vmem:[%s1797_s12 + $0x70] sm:$0xff] %v1427_v62  ;;  %1148 = vst [vmem:[%s1797_s12 + $0x78] sm:$0xff] %v1428_v63 }
 0x149   : > { %v1186_v5 = vld [vmem:[%s1797_s12 + $0x30] sm:$0xff]  ;;  %v1188_v6 = vld [vmem:[%s1797_s12 + $0x38] sm:$0xff] }
 0x14a   : > { %1187 = vst [vmem:[%s1161_s24 + $0x30] sm:$0xff] %v1186_v5  ;;  %1189 = vst [vmem:[%s1161_s24 + $0x38] sm:$0xff] %v1188_v6 }
 0x14b   : > { %v1202_v14 = vld [vmem:[%s1797_s12 + $0x70] sm:$0xff]  ;;  %v1204_v16 = vld [vmem:[%s1797_s12 + $0x78] sm:$0xff] }
 0x14c   : > { %1203 = vst [vmem:[%s1161_s24 + $0x130] sm:$0xff] %v1202_v14  ;;  %1205 = vst [vmem:[%s1161_s24 + $0x138] sm:$0xff] %v1204_v16 }
 0x14d PF: > { %s13_s16 = sadd.s32 1, %s1529_s16   ;;  %s1881_s12 = smov %s1517_s13 }
 0x14e   : > { %p10_p11 = scmp.ge.s32.totalorder %s13_s16, 6   ;;  %s1882_s13 = smov %s1592_s22 }
 0x14f   : > { %s1883_s14 = smov %s1525_s15  ;;  %s1884_s15 = smov %s1886_s17 }
 0x150   :  { %12 = sbr.rel (!%p10_p11) target bundleno = 3 (0x3), region = 119 }

// kernel: encoder_forward.8
= control target key start
LH: loop header
LB: loop body
LE: loop exit
PB: predicated region body
PF: predicated region fallthrough
CT: control target
= control target key end

     0   :  { %s1403_s12 = smov 0   ;;  %s1405_s13 = smov 0   ;;  %s1683_s0 = inlined_call_operand.vmem [shape: bf16[64,144], index: 0, kind: input, shape index: {}]   ;;  %s1684_s1 = inlined_call_operand.vmem [shape: bf16[144,2048], index: 1, kind: input, shape index: {}]   ;;  %s1685_s2 = inlined_call_operand.vmem [shape: f32[64,1], index: 2, kind: input, shape index: {}]   ;;  %s1686_s3 = inlined_call_operand.vmem [shape: bf16[64,2048], index: 3, kind: output, shape index: {}]  }
   0x1   :  { %s1407_s14 = smov 0   ;;  %s1409_s15 = smov 0  }
   0x2   :  { %s1411_s16 = smov 0  }
   0x3 LB: > { %s28_s17 = sadd.s32 1, %s1376_s15  ;;  %s1130_s18 = sadd.s32 4294967295, %s1380_s16   ;;  %s1380_s16 = sphi %s1411_s16, %s13_s16   ;;  %s1376_s15 = sphi %s1409_s15, %s1691_s15   ;;  %s1372_s14 = sphi %s1407_s14, %s1690_s14   ;;  %s1368_s13 = sphi %s1405_s13, %s1689_s13   ;;  %s1364_s12 = sphi %s1403_s12, %s1688_s12  }
   0x4   : > { %p30_p0 = scmp.ge.s32.totalorder %s28_s17, 4  ;;  %p76_p1 = scmp.ne.s32.totalorder %s1368_s13, %s1364_s12 }
   0x5   : > { %p77_p2 = scmp.eq.s32.totalorder %s1380_s16, 0  ;;  %p134_p4 = scmp.eq.s32.totalorder %s1130_s18, 3 }
   0x6   : > { %s1693_s17 = smov (%p30_p0, %s28_s17), 0  ;;  %s69_s20 = sadd.s32 1, %s1368_s13 }
   0x7   : > { %p78_p3 = por %p77_p2, %p76_p1  ;;  %s65_s19 = ssub.s32 %s1376_s15, %s1693_s17 }
   0x8   : > { %p67_p5 = scmp.eq.s32.totalorder %s65_s19, 0  ;;  %p1438_p6 = por %p134_p4, %p76_p1 }
   0x9   : > { %p1135_p7 = scmp.ge.s32.totalorder %s1380_s16, 4 }
   0xa   : > { %s1443_s22 = scalar_select %p67_p5, %s1368_s13, %s69_s20  }
   0xb   : > { %180 = sbr.rel (%p1135_p7) target bundleno = 40 (0x28), region = 24 }
  0x12   : > { %183 = sbr.rel (!%p78_p3) target bundleno = 40 (0x28), region = 28  ;;  %s185_s23 = sand.u32 (%p78_p3), 1, %s1368_s13  }
  0x13   : > { %s1213_s24 = sshll.u32 (%p78_p3), %s1376_s15, 4  ;;  %s1231_s25 = smul.u32 (%p78_p3), 288, %s185_s23 }
  0x14   : > { %s1451_s28 = scalar_lea.vmem (%p78_p3), %s1684_s1, %s1213_s24 }
  0x15   : > { %v206_v0 = vld [vmem:[%s1451_s28] sm:$0xff] (%p78_p3)  ;;  %v208_v1 = vld [vmem:[%s1451_s28 + $0x8] sm:$0xff] (%p78_p3)  ;;  %s1459_s29 = scalar_lea.vmem (%p78_p3), [#allocation2], %s1231_s25 }
  0x16   : > { %v210_v2 = vld [vmem:[%s1451_s28 + $0x40] sm:$0xff] (%p78_p3)  ;;  %v212_v3 = vld [vmem:[%s1451_s28 + $0x48] sm:$0xff] (%p78_p3)  ;;  %207 = vst [vmem:[%s1459_s29] sm:$0xff] (%p78_p3), %v206_v0  ;;  %209 = vst [vmem:[%s1459_s29 + $0x8] sm:$0xff] (%p78_p3), %v208_v1 }
  0x17   : > { %v214_v4 = vld [vmem:[%s1451_s28 + $0x80] sm:$0xff] (%p78_p3)  ;;  %v216_v5 = vld [vmem:[%s1451_s28 + $0x88] sm:$0xff] (%p78_p3)  ;;  %211 = vst [vmem:[%s1459_s29 + $0x10] sm:$0xff] (%p78_p3), %v210_v2  ;;  %213 = vst [vmem:[%s1459_s29 + $0x18] sm:$0xff] (%p78_p3), %v212_v3 }
  0x18   : > { %215 = vst [vmem:[%s1459_s29 + $0x20] sm:$0xff] (%p78_p3), %v214_v4  ;;  %217 = vst [vmem:[%s1459_s29 + $0x28] sm:$0xff] (%p78_p3), %v216_v5  ;;  %v218_v6 = vld [vmem:[%s1451_s28 + $0xc0] sm:$0xff] (%p78_p3)  ;;  %v220_v7 = vld [vmem:[%s1451_s28 + $0xc8] sm:$0xff] (%p78_p3) }
  0x19   : > { %v222_v8 = vld [vmem:[%s1451_s28 + $0x100] sm:$0xff]  ;;  %219 = vst [vmem:[%s1459_s29 + $0x30] sm:$0xff] %v218_v6  ;;  %221 = vst [vmem:[%s1459_s29 + $0x38] sm:$0xff] %v220_v7  ;;  %v224_v9 = vld [vmem:[%s1451_s28 + $0x108] sm:$0xff] }
  0x1a   : > { %223 = vst [vmem:[%s1459_s29 + $0x40] sm:$0xff] %v222_v8  ;;  %v226_v10 = vld [vmem:[%s1451_s28 + $0x140] sm:$0xff]  ;;  %v228_v11 = vld [vmem:[%s1451_s28 + $0x148] sm:$0xff]  ;;  %225 = vst [vmem:[%s1459_s29 + $0x48] sm:$0xff] %v224_v9 }
  0x1b   : > { %227 = vst [vmem:[%s1459_s29 + $0x50] sm:$0xff] %v226_v10  ;;  %229 = vst [vmem:[%s1459_s29 + $0x58] sm:$0xff] %v228_v11  ;;  %v230_v12 = vld [vmem:[%s1451_s28 + $0x180] sm:$0xff]  ;;  %v232_v13 = vld [vmem:[%s1451_s28 + $0x188] sm:$0xff] }
  0x1c   : > { %v234_v14 = vld [vmem:[%s1451_s28 + $0x1c0] sm:$0xff]  ;;  %231 = vst [vmem:[%s1459_s29 + $0x60] sm:$0xff] %v230_v12  ;;  %233 = vst [vmem:[%s1459_s29 + $0x68] sm:$0xff] %v232_v13  ;;  %v236_v15 = vld [vmem:[%s1451_s28 + $0x1c8] sm:$0xff] }
  0x1d   : > { %235 = vst [vmem:[%s1459_s29 + $0x70] sm:$0xff] %v234_v14  ;;  %v238_v16 = vld [vmem:[%s1451_s28 + $0x200] sm:$0xff]  ;;  %v240_v17 = vld [vmem:[%s1451_s28 + $0x208] sm:$0xff]  ;;  %237 = vst [vmem:[%s1459_s29 + $0x78] sm:$0xff] %v236_v15 }
  0x1e   : > { %239 = vst [vmem:[%s1459_s29 + $0x80] sm:$0xff] %v238_v16  ;;  %241 = vst [vmem:[%s1459_s29 + $0x88] sm:$0xff] %v240_v17  ;;  %v242_v18 = vld [vmem:[%s1451_s28 + $0x240] sm:$0xff]  ;;  %v244_v19 = vld [vmem:[%s1451_s28 + $0x248] sm:$0xff] }
  0x1f   : > { %v246_v20 = vld [vmem:[%s1451_s28 + $0x280] sm:$0xff]  ;;  %243 = vst [vmem:[%s1459_s29 + $0x90] sm:$0xff] %v242_v18  ;;  %245 = vst [vmem:[%s1459_s29 + $0x98] sm:$0xff] %v244_v19  ;;  %v248_v21 = vld [vmem:[%s1451_s28 + $0x288] sm:$0xff] }
  0x20   : > { %247 = vst [vmem:[%s1459_s29 + $0xa0] sm:$0xff] %v246_v20  ;;  %v250_v22 = vld [vmem:[%s1451_s28 + $0x2c0] sm:$0xff]  ;;  %v252_v23 = vld [vmem:[%s1451_s28 + $0x2c8] sm:$0xff]  ;;  %249 = vst [vmem:[%s1459_s29 + $0xa8] sm:$0xff] %v248_v21 }
  0x21   : > { %251 = vst [vmem:[%s1459_s29 + $0xb0] sm:$0xff] %v250_v22  ;;  %253 = vst [vmem:[%s1459_s29 + $0xb8] sm:$0xff] %v252_v23  ;;  %v254_v24 = vld [vmem:[%s1451_s28 + $0x300] sm:$0xff]  ;;  %v256_v25 = vld [vmem:[%s1451_s28 + $0x308] sm:$0xff] }
  0x22   : > { %v258_v26 = vld [vmem:[%s1451_s28 + $0x340] sm:$0xff]  ;;  %255 = vst [vmem:[%s1459_s29 + $0xc0] sm:$0xff] %v254_v24  ;;  %257 = vst [vmem:[%s1459_s29 + $0xc8] sm:$0xff] %v256_v25  ;;  %v260_v27 = vld [vmem:[%s1451_s28 + $0x348] sm:$0xff] }
  0x23   : > { %259 = vst [vmem:[%s1459_s29 + $0xd0] sm:$0xff] %v258_v26  ;;  %v262_v28 = vld [vmem:[%s1451_s28 + $0x380] sm:$0xff]  ;;  %v264_v29 = vld [vmem:[%s1451_s28 + $0x388] sm:$0xff]  ;;  %261 = vst [vmem:[%s1459_s29 + $0xd8] sm:$0xff] %v260_v27 }
  0x24   : > { %263 = vst [vmem:[%s1459_s29 + $0xe0] sm:$0xff] %v262_v28  ;;  %265 = vst [vmem:[%s1459_s29 + $0xe8] sm:$0xff] %v264_v29  ;;  %v266_v30 = vld [vmem:[%s1451_s28 + $0x3c0] sm:$0xff]  ;;  %v268_v31 = vld [vmem:[%s1451_s28 + $0x3c8] sm:$0xff] }
  0x25   : > { %v270_v32 = vld [vmem:[%s1451_s28 + $0x400] sm:$0xff]  ;;  %267 = vst [vmem:[%s1459_s29 + $0xf0] sm:$0xff] %v266_v30  ;;  %269 = vst [vmem:[%s1459_s29 + $0xf8] sm:$0xff] %v268_v31  ;;  %v272_v33 = vld [vmem:[%s1451_s28 + $0x408] sm:$0xff] }
  0x26   : > { %271 = vst [vmem:[%s1459_s29 + $0x100] sm:$0xff] %v270_v32  ;;  %v274_v34 = vld [vmem:[%s1451_s28 + $0x440] sm:$0xff]  ;;  %v276_v35 = vld [vmem:[%s1451_s28 + $0x448] sm:$0xff]  ;;  %273 = vst [vmem:[%s1459_s29 + $0x108] sm:$0xff] %v272_v33 }
  0x27   : > { %275 = vst [vmem:[%s1459_s29 + $0x110] sm:$0xff] %v274_v34  ;;  %277 = vst [vmem:[%s1459_s29 + $0x118] sm:$0xff] %v276_v35 }
  0x28 PF: > { %p1138_p8 = scmp.ge.s32.totalorder %s1380_s16, 1  ;;  %p282_p9 = scmp.lt.s32.totalorder %s1380_s16, 5 }
  0x2a   : > { %p283_p10 = pnand %p1138_p8, %p282_p9 }
  0x2b   : > { %s289_s30 = sand.u32 (!%p283_p10), 1, %s1364_s12   ;;  %vm657_vm0 = vcmask (!%p283_p10), 130048   ;;  %v1332_v36 = vld [vmem:[%s1683_s0 + $0x4] ss:$8 sps:$4 sm:$0xff] (!%p283_p10)   ;;  %v1382_v37 = vmov (!%p283_p10), 0   ;;  %v395_v5 = vld [vmem:[%s1685_s2 + $0x10] sm:$0xff] (!%p283_p10) }
  0x2c   : > { %286 = sbr.rel (%p283_p10) target bundleno = 339 (0x153), region = 51  ;;  %1274 = vset.pattern.permute.xlu0 (!%p283_p10), %v1382_v37  ;;  %1275 = vset.pattern.permute.xlu1 (!%p283_p10), %v1382_v37  ;;  %v393_v4 = vld [vmem:[%s1685_s2] sm:$0xff] (!%p283_p10)  ;;  %v394_v6 = vld [vmem:[%s1685_s2 + $0x8] sm:$0xff] (!%p283_p10)  ;;  %v396_v9 = vld [vmem:[%s1685_s2 + $0x18] sm:$0xff] (!%p283_p10)  ;;  %s1139_s28 = sshll.u32 (!%p283_p10), %s289_s30, 7 }
  0x2d   : > { %s1232_s4 = smul.u32 (!%p283_p10), 288, %s289_s30  ;;  %1184 = vmatprep.mubr.msk.bf16.mxu0 (!%p283_p10), %vm657_vm0, %v1332_v36  ;;  %1188 = vmatprep.mubr.msk.bf16.mxu1 (!%p283_p10), %vm657_vm0, %v1332_v36  ;;  %v397_v12 = vld [vmem:[%s1685_s2 + $0x20] sm:$0xff] (!%p283_p10)  ;;  %v398_v15 = vld [vmem:[%s1685_s2 + $0x28] sm:$0xff] (!%p283_p10)  ;;  %v399_v17 = vld [vmem:[%s1685_s2 + $0x30] sm:$0xff] (!%p283_p10)  ;;  %s1628_s12 = scalar_lea.vmem (!%p283_p10), [#allocation3], %s1139_s28 }
  0x2e   : > { %403 = vperm.xlu0 (!%p283_p10), %1274, %v393_v4   ;;  %413 = vperm.xlu1 (!%p283_p10), %1275, %v395_v5   ;;  %v1330_v16 = vld [vmem:[%s1683_s0] ss:$8 sps:$4 sm:$0xff] (!%p283_p10)   ;;  %v1333_v18 = vld [vmem:[%s1683_s0 + $0x14] ss:$8 sps:$4 sm:$0xff] (!%p283_p10)   ;;  %v1335_v20 = vld [vmem:[%s1683_s0 + $0x10] ss:$8 sps:$4 sm:$0xff] (!%p283_p10)  }
  0x2f   : > { %s1537_s7 = scalar_lea.vmem (!%p283_p10), [#allocation2], %s1232_s4  ;;  %v400_v19 = vld [vmem:[%s1685_s2 + $0x38] sm:$0xff] (!%p283_p10)  ;;  %v1336_v21 = vld [vmem:[%s1683_s0 + $0x24] ss:$8 sps:$4 sm:$0xff] (!%p283_p10)   ;;  %v1338_v22 = vld [vmem:[%s1683_s0 + $0x20] ss:$8 sps:$4 sm:$0xff] (!%p283_p10)  }
  0x30   : > { %v1276_v38 = vld [vmem:[%s1537_s7 + $0x4] ss:$16 sps:$4 sm:$0xff] (!%p283_p10)   ;;  %v1278_v39 = vld [vmem:[%s1537_s7 + $0xc] ss:$16 sps:$4 sm:$0xff] (!%p283_p10)   ;;  %v1280_v40 = vld [vmem:[%s1537_s7] ss:$16 sps:$4 sm:$0xff] (!%p283_p10)  }
  0x31   : > { %670 = vmatprep.subr.bf16.mxu0 (!%p283_p10), %v1276_v38  ;;  %v1281_v41 = vld [vmem:[%s1537_s7 + $0x8] ss:$16 sps:$4 sm:$0xff] (!%p283_p10)   ;;  %743 = vmatprep.subr.bf16.mxu1 (!%p283_p10), %v1278_v39  ;;  %v1282_v42 = vld [vmem:[%s1537_s7 + $0x24] ss:$16 sps:$4 sm:$0xff] (!%p283_p10)   ;;  %v1284_v43 = vld [vmem:[%s1537_s7 + $0x2c] ss:$16 sps:$4 sm:$0xff] (!%p283_p10)  }
  0x32   : > { %671 = vmatpush1.bf16.msra.mxu0 (!%p283_p10), %v1280_v40  ;;  %744 = vmatpush1.bf16.msra.mxu1 (!%p283_p10), %v1281_v41  ;;  %v1286_v44 = vld [vmem:[%s1537_s7 + $0x20] ss:$16 sps:$4 sm:$0xff] (!%p283_p10)   ;;  %v1287_v45 = vld [vmem:[%s1537_s7 + $0x28] ss:$16 sps:$4 sm:$0xff] (!%p283_p10)   ;;  %v1288_v46 = vld [vmem:[%s1537_s7 + $0x44] ss:$16 sps:$4 sm:$0xff] (!%p283_p10)  }
  0x33   : > { %672 = vmatprep.subr.bf16.mxu0 %v1282_v42  ;;  %745 = vmatprep.subr.bf16.mxu1 %v1284_v43  ;;  %v1290_v47 = vld [vmem:[%s1537_s7 + $0x4c] ss:$16 sps:$4 sm:$0xff]   ;;  %v1292_v48 = vld [vmem:[%s1537_s7 + $0x40] ss:$16 sps:$4 sm:$0xff]   ;;  %v1293_v49 = vld [vmem:[%s1537_s7 + $0x48] ss:$16 sps:$4 sm:$0xff]  }
  0x34   : > { %v1294_v50 = vld [vmem:[%s1537_s7 + $0x64] ss:$16 sps:$4 sm:$0xff]   ;;  %v1296_v51 = vld [vmem:[%s1537_s7 + $0x6c] ss:$16 sps:$4 sm:$0xff]   ;;  %v1298_v52 = vld [vmem:[%s1537_s7 + $0x60] ss:$16 sps:$4 sm:$0xff]   ;;  %408 = vperm.xlu0 %1274, %v394_v6   ;;  %418 = vperm.xlu1 %1275, %v396_v9  }
  0x35   : > { %v1299_v53 = vld [vmem:[%s1537_s7 + $0x68] ss:$16 sps:$4 sm:$0xff]   ;;  %v1300_v54 = vld [vmem:[%s1537_s7 + $0x84] ss:$16 sps:$4 sm:$0xff]   ;;  %v1302_v55 = vld [vmem:[%s1537_s7 + $0x8c] ss:$16 sps:$4 sm:$0xff]  }
  0x36   : > { %673 = vmatpush1.bf16.msra.mxu0 %v1286_v44  ;;  %746 = vmatpush1.bf16.msra.mxu1 %v1287_v45  ;;  %v1304_v56 = vld [vmem:[%s1537_s7 + $0x80] ss:$16 sps:$4 sm:$0xff]   ;;  %v1305_v57 = vld [vmem:[%s1537_s7 + $0x88] ss:$16 sps:$4 sm:$0xff]   ;;  %v1306_v58 = vld [vmem:[%s1537_s7 + $0xa4] ss:$16 sps:$4 sm:$0xff]  }
  0x37   : > { %674 = vmatprep.subr.bf16.mxu0 %v1288_v46  ;;  %747 = vmatprep.subr.bf16.mxu1 %v1290_v47  ;;  %v1308_v59 = vld [vmem:[%s1537_s7 + $0xac] ss:$16 sps:$4 sm:$0xff]   ;;  %v1310_v60 = vld [vmem:[%s1537_s7 + $0xa0] ss:$16 sps:$4 sm:$0xff]   ;;  %v1311_v61 = vld [vmem:[%s1537_s7 + $0xa8] ss:$16 sps:$4 sm:$0xff]  }
  0x38   : > { %v1312_v62 = vld [vmem:[%s1537_s7 + $0xc4] ss:$16 sps:$4 sm:$0xff]   ;;  %v1314_v63 = vld [vmem:[%s1537_s7 + $0xcc] ss:$16 sps:$4 sm:$0xff]   ;;  %v1316_v0 = vld [vmem:[%s1537_s7 + $0xc0] ss:$16 sps:$4 sm:$0xff]   ;;  %423 = vperm.xlu0 %1274, %v397_v12   ;;  %428 = vperm.xlu1 %1275, %v398_v15  }
  0x39   : > { %v1317_v1 = vld [vmem:[%s1537_s7 + $0xc8] ss:$16 sps:$4 sm:$0xff]   ;;  %v1318_v2 = vld [vmem:[%s1537_s7 + $0xe4] ss:$16 sps:$4 sm:$0xff]   ;;  %v1320_v3 = vld [vmem:[%s1537_s7 + $0xec] ss:$16 sps:$4 sm:$0xff]  }
  0x3a   : > { %675 = vmatpush1.bf16.msra.mxu0 %v1292_v48  ;;  %748 = vmatpush1.bf16.msra.mxu1 %v1293_v49  ;;  %v1322_v7 = vld [vmem:[%s1537_s7 + $0xe0] ss:$16 sps:$4 sm:$0xff]   ;;  %v1323_v8 = vld [vmem:[%s1537_s7 + $0xe8] ss:$16 sps:$4 sm:$0xff]   ;;  %v1324_v10 = vld [vmem:[%s1537_s7 + $0x104] ss:$16 sps:$4 sm:$0xff]  }
  0x3b   : > { %676 = vmatprep.subr.bf16.mxu0 %v1294_v50  ;;  %749 = vmatprep.subr.bf16.mxu1 %v1296_v51  ;;  %v1326_v11 = vld [vmem:[%s1537_s7 + $0x10c] ss:$16 sps:$4 sm:$0xff]   ;;  %v1328_v13 = vld [vmem:[%s1537_s7 + $0x100] ss:$16 sps:$4 sm:$0xff]   ;;  %v1329_v14 = vld [vmem:[%s1537_s7 + $0x108] ss:$16 sps:$4 sm:$0xff]  }
  0x3c   : > { %433 = vperm.xlu0 %1274, %v399_v17   ;;  %438 = vperm.xlu1 %1275, %v400_v19   ;;  %v1339_v23 = vld [vmem:[%s1683_s0 + $0x34] ss:$8 sps:$4 sm:$0xff]   ;;  %v1341_v24 = vld [vmem:[%s1683_s0 + $0x30] ss:$8 sps:$4 sm:$0xff]   ;;  %s1230_s30 = sshll.u32 (%p1438_p6), %s1372_s14, 4 }
  0x3d   : > { %s972_s5 = scalar_lea.vmem (%p1438_p6), %s1686_s3, %s1230_s30 }
  0x3e   : > { %677 = vmatpush1.bf16.msra.mxu0 %v1298_v52  ;;  %750 = vmatpush1.bf16.msra.mxu1 %v1299_v53 }
  0x3f   : > { %678 = vmatprep.subr.bf16.mxu0 %v1300_v54  ;;  %751 = vmatprep.subr.bf16.mxu1 %v1302_v55 }
  0x42   : > { %679 = vmatpush1.bf16.msra.mxu0 %v1304_v56  ;;  %752 = vmatpush1.bf16.msra.mxu1 %v1305_v57 }
  0x43   : > { %680 = vmatprep.subr.bf16.mxu0 %v1306_v58  ;;  %753 = vmatprep.subr.bf16.mxu1 %v1308_v59 }
  0x46   : > { %681 = vmatpush1.bf16.msra.mxu0 %v1310_v60  ;;  %754 = vmatpush1.bf16.msra.mxu1 %v1311_v61 }
  0x47   : > { %682 = vmatprep.subr.bf16.mxu0 %v1312_v62  ;;  %755 = vmatprep.subr.bf16.mxu1 %v1314_v63 }
  0x4a   : > { %683 = vmatpush1.bf16.msra.mxu0 %v1316_v0  ;;  %756 = vmatpush1.bf16.msra.mxu1 %v1317_v1 }
  0x4b   : > { %684 = vmatprep.subr.bf16.mxu0 %v1318_v2  ;;  %757 = vmatprep.subr.bf16.mxu1 %v1320_v3 }
  0x4e   : > { %685 = vmatpush1.bf16.msra.mxu0 %v1322_v7  ;;  %758 = vmatpush1.bf16.msra.mxu1 %v1323_v8 }
  0x4f   : > { %686 = vmatprep.subr.bf16.mxu0 %v1324_v10  ;;  %759 = vmatprep.subr.bf16.mxu1 %v1326_v11 }
  0x52   : > { %687 = vmatpush1.bf16.msra.mxu0 %v1328_v13  ;;  %760 = vmatpush1.bf16.msra.mxu1 %v1329_v14 }
  0x55   : > { %703 = vmatmul.mubr.bf16.vlgmr.msra.gmra.mrb[0].mxu0 %v1330_v16  ;;  %776 = vmatmul.mubr.bf16.vlgmr.msra.gmra.mrb[0].mxu1 %v1330_v16 }
  0x56   : > { %1185 = vmatprep.mubr.msk.bf16.mxu0 %vm657_vm0, %v1333_v18  ;;  %1189 = vmatprep.mubr.msk.bf16.mxu1 %vm657_vm0, %v1333_v18 }
  0x5d   : > { %713 = vmatmul.mubr.bf16.gmra.mrb[4].mxu0 %v1335_v20  ;;  %786 = vmatmul.mubr.bf16.gmra.mrb[4].mxu1 %v1335_v20 }
  0x5e   : > { %1186 = vmatprep.mubr.msk.bf16.mxu0 %vm657_vm0, %v1336_v21  ;;  %1190 = vmatprep.mubr.msk.bf16.mxu1 %vm657_vm0, %v1336_v21 }
  0x65   : > { %723 = vmatmul.mubr.bf16.gmra.mrb[8].mxu0 %v1338_v22  ;;  %796 = vmatmul.mubr.bf16.gmra.mrb[8].mxu1 %v1338_v22 }
  0x66   : > { %1187 = vmatprep.mubr.msk.bf16.mxu0 %vm657_vm0, %v1339_v23  ;;  %1191 = vmatprep.mubr.msk.bf16.mxu1 %vm657_vm0, %v1339_v23 }
  0x6d   : > { %733 = vmatmul.mubr.bf16.gmra.mrb[12].mxu0 %v1341_v24  ;;  %806 = vmatmul.mubr.bf16.gmra.mrb[12].mxu1 %v1341_v24 }
  0xad   : > { %v404_v25 = vpop.permute.xlu0 %403  ;;  %v414_v27 = vpop.permute.xlu1 %413 }
  0xb3   : > { %v409_v26 = vpop.permute.xlu0 %408  ;;  %v419_v54 = vpop.permute.xlu1 %418 }
  0xb7   : > { %v429_v19 = vpop.permute.xlu1 %428  ;;  %v424_v20 = vpop.permute.xlu0 %423 }
 0x128   : > { %v704_v28 = vpop.f32.mrb[0].mxu0  ;;  %v777_v29 = vpop.f32.mrb[0].mxu1 }
 0x129   : > { %v705_v30 = vadd.f32 %v704_v28, %v404_v25  ;;  %v778_v31 = vadd.f32 %v777_v29, %v404_v25  ;;  %v706_v32 = vpop.f32.mrb[1].mxu0  ;;  %v779_v33 = vpop.f32.mrb[1].mxu1 }
 0x12a   : > { %v707_v34 = vadd.f32 %v706_v32, %v404_v25  ;;  %v780_v35 = vadd.f32 %v779_v33, %v404_v25  ;;  %v708_v36 = vpop.f32.mrb[2].mxu0  ;;  %v781_v37 = vpop.f32.mrb[2].mxu1 }
 0x12b   : > { %v816_v38 = vmax.f32 %v705_v30, 0.0  ;;  %v818_v39 = vmax.f32 %v778_v31, 0.0  ;;  %v709_v40 = vadd.f32 %v708_v36, %v409_v26  ;;  %v782_v41 = vadd.f32 %v781_v37, %v409_v26  ;;  %v710_v42 = vpop.f32.mrb[3].mxu0  ;;  %v783_v43 = vpop.f32.mrb[3].mxu1 }
 0x12c   : > { %v817_v44 = vmax.f32 %v707_v34, 0.0  ;;  %v819_v45 = vmax.f32 %v780_v35, 0.0  ;;  %v711_v46 = vadd.f32 %v710_v42, %v409_v26  ;;  %v784_v47 = vadd.f32 %v783_v43, %v409_v26 }
 0x12d   : > { %v820_v48 = vmax.f32 %v709_v40, 0.0  ;;  %v822_v49 = vmax.f32 %v782_v41, 0.0 }
 0x12e   : > { %v1214_v50 = vpack.c.bf16 %v817_v44, %v816_v38  ;;  %v1215_v51 = vpack.c.bf16 %v819_v45, %v818_v39  ;;  %v821_v52 = vmax.f32 %v711_v46, 0.0  ;;  %v823_v53 = vmax.f32 %v784_v47, 0.0 }
 0x130   : > { %944 = vst [vmem:[%s1628_s12] sm:$0xff] %v1214_v50  ;;  %945 = vst [vmem:[%s1628_s12 + $0x8] sm:$0xff] %v1215_v51  ;;  %v1216_v55 = vpack.c.bf16 %v821_v52, %v820_v48  ;;  %v1217_v56 = vpack.c.bf16 %v823_v53, %v822_v49  ;;  %v714_v57 = vpop.f32.mrb[4].mxu0  ;;  %v787_v58 = vpop.f32.mrb[4].mxu1 }
 0x131   : > { %v715_v59 = vadd.f32 %v714_v57, %v414_v27  ;;  %v788_v60 = vadd.f32 %v787_v58, %v414_v27  ;;  %v716_v61 = vpop.f32.mrb[5].mxu0  ;;  %v789_v62 = vpop.f32.mrb[5].mxu1 }
 0x132   : > { %946 = vst [vmem:[%s1628_s12 + $0x10] sm:$0xff] %v1216_v55  ;;  %947 = vst [vmem:[%s1628_s12 + $0x18] sm:$0xff] %v1217_v56  ;;  %v717_v63 = vadd.f32 %v716_v61, %v414_v27  ;;  %v790_v0 = vadd.f32 %v789_v62, %v414_v27  ;;  %v718_v1 = vpop.f32.mrb[6].mxu0  ;;  %v791_v2 = vpop.f32.mrb[6].mxu1 }
 0x133   : > { %v824_v3 = vmax.f32 %v715_v59, 0.0  ;;  %v826_v4 = vmax.f32 %v788_v60, 0.0  ;;  %v719_v5 = vadd.f32 %v718_v1, %v419_v54  ;;  %v792_v6 = vadd.f32 %v791_v2, %v419_v54  ;;  %v720_v7 = vpop.f32.mrb[7].mxu0  ;;  %v793_v8 = vpop.f32.mrb[7].mxu1 }
 0x134   : > { %v825_v9 = vmax.f32 %v717_v63, 0.0  ;;  %v827_v10 = vmax.f32 %v790_v0, 0.0  ;;  %v721_v11 = vadd.f32 %v720_v7, %v419_v54  ;;  %v794_v12 = vadd.f32 %v793_v8, %v419_v54  ;;  %v439_v49 = vpop.permute.xlu1 %438  ;;  %v434_v50 = vpop.permute.xlu0 %433 }
 0x135   : > { %v828_v13 = vmax.f32 %v719_v5, 0.0  ;;  %v830_v14 = vmax.f32 %v792_v6, 0.0 }
 0x136   : > { %v1218_v15 = vpack.c.bf16 %v825_v9, %v824_v3  ;;  %v1219_v16 = vpack.c.bf16 %v827_v10, %v826_v4  ;;  %v829_v17 = vmax.f32 %v721_v11, 0.0  ;;  %v831_v18 = vmax.f32 %v794_v12, 0.0 }
 0x138   : > { %948 = vst [vmem:[%s1628_s12 + $0x20] sm:$0xff] %v1218_v15  ;;  %949 = vst [vmem:[%s1628_s12 + $0x28] sm:$0xff] %v1219_v16  ;;  %v1220_v21 = vpack.c.bf16 %v829_v17, %v828_v13  ;;  %v1221_v22 = vpack.c.bf16 %v831_v18, %v830_v14  ;;  %v724_v23 = vpop.f32.mrb[8].mxu0  ;;  %v797_v24 = vpop.f32.mrb[8].mxu1  ;;  %v985_v17 = vld [vmem:[%s1628_s12] sm:$0xff] (%p1438_p6)  ;;  %v987_v18 = vld [vmem:[%s1628_s12 + $0x8] sm:$0xff] (%p1438_p6) }
 0x139   : > { %v725_v25 = vadd.f32 %v724_v23, %v424_v20  ;;  %v798_v26 = vadd.f32 %v797_v24, %v424_v20  ;;  %v726_v27 = vpop.f32.mrb[9].mxu0  ;;  %v799_v28 = vpop.f32.mrb[9].mxu1  ;;  %986 = vst [vmem:[%s972_s5] sm:$0xff] (%p1438_p6), %v985_v17  ;;  %988 = vst [vmem:[%s972_s5 + $0x8] sm:$0xff] (%p1438_p6), %v987_v18 }
 0x13a   : > { %950 = vst [vmem:[%s1628_s12 + $0x30] sm:$0xff] %v1220_v21  ;;  %951 = vst [vmem:[%s1628_s12 + $0x38] sm:$0xff] %v1221_v22  ;;  %v727_v29 = vadd.f32 %v726_v27, %v424_v20  ;;  %v800_v30 = vadd.f32 %v799_v28, %v424_v20  ;;  %v728_v31 = vpop.f32.mrb[10].mxu0  ;;  %v801_v32 = vpop.f32.mrb[10].mxu1  ;;  %v991_v20 = vld [vmem:[%s1628_s12 + $0x18] sm:$0xff] (%p1438_p6) }
 0x13b   : > { %v832_v33 = vmax.f32 %v725_v25, 0.0  ;;  %v834_v34 = vmax.f32 %v798_v26, 0.0  ;;  %v729_v35 = vadd.f32 %v728_v31, %v429_v19  ;;  %v802_v36 = vadd.f32 %v801_v32, %v429_v19  ;;  %v730_v37 = vpop.f32.mrb[11].mxu0  ;;  %v803_v38 = vpop.f32.mrb[11].mxu1  ;;  %992 = vst [vmem:[%s972_s5 + $0x48] sm:$0xff] (%p1438_p6), %v991_v20 }
 0x13c   : > { %v833_v39 = vmax.f32 %v727_v29, 0.0  ;;  %v835_v40 = vmax.f32 %v800_v30, 0.0  ;;  %v731_v41 = vadd.f32 %v730_v37, %v429_v19  ;;  %v804_v42 = vadd.f32 %v803_v38, %v429_v19  ;;  %v989_v19 = vld [vmem:[%s1628_s12 + $0x10] sm:$0xff] (%p1438_p6) }
 0x13d   : > { %v836_v43 = vmax.f32 %v729_v35, 0.0  ;;  %v838_v44 = vmax.f32 %v802_v36, 0.0  ;;  %990 = vst [vmem:[%s972_s5 + $0x40] sm:$0xff] (%p1438_p6), %v989_v19 }
 0x13e   : > { %v1222_v45 = vpack.c.bf16 %v833_v39, %v832_v33  ;;  %v1223_v46 = vpack.c.bf16 %v835_v40, %v834_v34  ;;  %v837_v47 = vmax.f32 %v731_v41, 0.0  ;;  %v839_v48 = vmax.f32 %v804_v42, 0.0 }
 0x13f   : > { %v993_v21 = vld [vmem:[%s1628_s12 + $0x20] sm:$0xff] (%p1438_p6)  ;;  %v995_v22 = vld [vmem:[%s1628_s12 + $0x28] sm:$0xff] (%p1438_p6) }
 0x140   : > { %952 = vst [vmem:[%s1628_s12 + $0x40] sm:$0xff] %v1222_v45  ;;  %953 = vst [vmem:[%s1628_s12 + $0x48] sm:$0xff] %v1223_v46  ;;  %v1224_v51 = vpack.c.bf16 %v837_v47, %v836_v43  ;;  %v1225_v52 = vpack.c.bf16 %v839_v48, %v838_v44  ;;  %v734_v53 = vpop.f32.mrb[12].mxu0  ;;  %v807_v54 = vpop.f32.mrb[12].mxu1 }
 0x141   : > { %v735_v55 = vadd.f32 %v734_v53, %v434_v50  ;;  %v808_v56 = vadd.f32 %v807_v54, %v434_v50  ;;  %v736_v57 = vpop.f32.mrb[13].mxu0  ;;  %v809_v58 = vpop.f32.mrb[13].mxu1  ;;  %994 = vst [vmem:[%s972_s5 + $0x80] sm:$0xff] (%p1438_p6), %v993_v21  ;;  %996 = vst [vmem:[%s972_s5 + $0x88] sm:$0xff] (%p1438_p6), %v995_v22  ;;  %v997_v23 = vld [vmem:[%s1628_s12 + $0x30] sm:$0xff] (%p1438_p6)  ;;  %v999_v24 = vld [vmem:[%s1628_s12 + $0x38] sm:$0xff] (%p1438_p6) }
 0x142   : > { %954 = vst [vmem:[%s1628_s12 + $0x50] sm:$0xff] %v1224_v51  ;;  %955 = vst [vmem:[%s1628_s12 + $0x58] sm:$0xff] %v1225_v52  ;;  %v737_v59 = vadd.f32 %v736_v57, %v434_v50  ;;  %v810_v60 = vadd.f32 %v809_v58, %v434_v50  ;;  %v738_v61 = vpop.f32.mrb[14].mxu0  ;;  %v811_v62 = vpop.f32.mrb[14].mxu1 }
 0x143   : > { %v840_v63 = vmax.f32 %v735_v55, 0.0  ;;  %v842_v0 = vmax.f32 %v808_v56, 0.0  ;;  %v739_v1 = vadd.f32 %v738_v61, %v439_v49  ;;  %v812_v2 = vadd.f32 %v811_v62, %v439_v49  ;;  %v740_v3 = vpop.f32.mrb[15].mxu0  ;;  %v813_v4 = vpop.f32.mrb[15].mxu1  ;;  %998 = vst [vmem:[%s972_s5 + $0xc0] sm:$0xff] (%p1438_p6), %v997_v23  ;;  %1000 = vst [vmem:[%s972_s5 + $0xc8] sm:$0xff] (%p1438_p6), %v999_v24 }
 0x144   : > { %v841_v5 = vmax.f32 %v737_v59, 0.0  ;;  %v843_v6 = vmax.f32 %v810_v60, 0.0  ;;  %v741_v7 = vadd.f32 %v740_v3, %v439_v49  ;;  %v814_v8 = vadd.f32 %v813_v4, %v439_v49  ;;  %966 = sbr.rel (!%p1438_p6) target bundleno = 339 (0x153), region = 59 }
 0x145   : > { %v844_v9 = vmax.f32 %v739_v1, 0.0  ;;  %v846_v10 = vmax.f32 %v812_v2, 0.0 }
 0x146   : > { %v1226_v11 = vpack.c.bf16 %v841_v5, %v840_v63  ;;  %v1227_v12 = vpack.c.bf16 %v843_v6, %v842_v0  ;;  %v845_v13 = vmax.f32 %v741_v7, 0.0  ;;  %v847_v14 = vmax.f32 %v814_v8, 0.0 }
 0x147   : > { %v1001_v25 = vld [vmem:[%s1628_s12 + $0x40] sm:$0xff] (%p1438_p6)  ;;  %v1003_v26 = vld [vmem:[%s1628_s12 + $0x48] sm:$0xff] (%p1438_p6) }
 0x148   : > { %956 = vst [vmem:[%s1628_s12 + $0x60] sm:$0xff] %v1226_v11  ;;  %957 = vst [vmem:[%s1628_s12 + $0x68] sm:$0xff] %v1227_v12  ;;  %v1228_v15 = vpack.c.bf16 %v845_v13, %v844_v9  ;;  %v1229_v16 = vpack.c.bf16 %v847_v14, %v846_v10 }
 0x149   : > { %1002 = vst [vmem:[%s972_s5 + $0x100] sm:$0xff] (%p1438_p6), %v1001_v25  ;;  %v1005_v27 = vld [vmem:[%s1628_s12 + $0x50] sm:$0xff] (%p1438_p6)  ;;  %v1007_v28 = vld [vmem:[%s1628_s12 + $0x58] sm:$0xff] (%p1438_p6)  ;;  %1004 = vst [vmem:[%s972_s5 + $0x108] sm:$0xff] (%p1438_p6), %v1003_v26 }
 0x14a   : > { %958 = vst [vmem:[%s1628_s12 + $0x70] sm:$0xff] %v1228_v15  ;;  %959 = vst [vmem:[%s1628_s12 + $0x78] sm:$0xff] %v1229_v16 }
 0x14b   : > { %1006 = vst [vmem:[%s972_s5 + $0x140] sm:$0xff] %v1005_v27  ;;  %1008 = vst [vmem:[%s972_s5 + $0x148] sm:$0xff] %v1007_v28 }
 0x14f   : > { %v1009_v29 = vld [vmem:[%s1628_s12 + $0x60] sm:$0xff]  ;;  %v1011_v30 = vld [vmem:[%s1628_s12 + $0x68] sm:$0xff] }
 0x150   : > { %1010 = vst [vmem:[%s972_s5 + $0x180] sm:$0xff] %v1009_v29  ;;  %1012 = vst [vmem:[%s972_s5 + $0x188] sm:$0xff] %v1011_v30 }
 0x151   : > { %v1013_v31 = vld [vmem:[%s1628_s12 + $0x70] sm:$0xff]  ;;  %v1015_v32 = vld [vmem:[%s1628_s12 + $0x78] sm:$0xff] }
 0x152   : > { %1014 = vst [vmem:[%s972_s5 + $0x1c0] sm:$0xff] %v1013_v31  ;;  %1016 = vst [vmem:[%s972_s5 + $0x1c8] sm:$0xff] %v1015_v32 }
 0x153 PF: > { %s13_s16 = sadd.s32 1, %s1380_s16   ;;  %s1688_s12 = smov %s1368_s13 }
 0x154   : > { %p10_p11 = scmp.ge.s32.totalorder %s13_s16, 6   ;;  %s1689_s13 = smov %s1443_s22 }
 0x155   : > { %s1690_s14 = smov %s1376_s15  ;;  %s1691_s15 = smov %s1693_s17 }
 0x156   :  { %12 = sbr.rel (!%p10_p11) target bundleno = 3 (0x3), region = 119 }

// kernel: encoder_forward.9
= control target key start
LH: loop header
LB: loop body
LE: loop exit
PB: predicated region body
PF: predicated region fallthrough
CT: control target
= control target key end

     0   :  { %s2679_s12 = smov 0   ;;  %s2681_s13 = smov 0   ;;  %s3223_s0 = inlined_call_operand.vmem [shape: bf16[256,576], index: 0, kind: input, shape index: {}]   ;;  %s3224_s1 = inlined_call_operand.vmem [shape: bf16[576,512], index: 1, kind: input, shape index: {}]   ;;  %s3225_s2 = inlined_call_operand.vmem [shape: f32[256,1], index: 2, kind: input, shape index: {}]   ;;  %s3226_s3 = inlined_call_operand.vmem [shape: bf16[256,512], index: 3, kind: output, shape index: {}]  }
   0x1   :  { %s2683_s14 = smov 0  }
   0x2 LB: > { %s32_s15 = sadd.s32 1, %s2652_s13  ;;  %p2051_p0 = scmp.ge.s32.totalorder %s2656_s14, 1  ;;  %s2656_s14 = sphi %s2683_s14, %s13_s14   ;;  %s2652_s13 = sphi %s2681_s13, %s3228_s13   ;;  %s2648_s12 = sphi %s2679_s12, %s3227_s12  }
   0x3   : > { %p34_p1 = scmp.ge.s32.totalorder %s32_s15, 4  ;;  %p197_p2 = scmp.lt.s32.totalorder %s2656_s14, 5 }
   0x5   : > { %s3230_s15 = smov (%p34_p1, %s32_s15), 0  ;;  %p198_p3 = pnand %p2051_p0, %p197_p2 }
   0x6   : > { %v2390_v0 = vld [vmem:[%s3224_s1 + $0x4] ss:$16 sps:$4 sm:$0xff] (!%p198_p3)   ;;  %v2392_v1 = vld [vmem:[%s3224_s1 + $0xc] ss:$16 sps:$4 sm:$0xff] (!%p198_p3)   ;;  %v2394_v2 = vld [vmem:[%s3224_s1] ss:$16 sps:$4 sm:$0xff] (!%p198_p3)  }
   0x7   : > { %201 = sbr.rel (%p198_p3) target bundleno = 413 (0x19d), region = 32  ;;  %1338 = vmatprep.subr.bf16.mxu0 (!%p198_p3), %v2390_v0  ;;  %v2395_v3 = vld [vmem:[%s3224_s1 + $0x8] ss:$16 sps:$4 sm:$0xff] (!%p198_p3)   ;;  %1557 = vmatprep.subr.bf16.mxu1 (!%p198_p3), %v2392_v1  ;;  %v2396_v4 = vld [vmem:[%s3224_s1 + $0x24] ss:$16 sps:$4 sm:$0xff] (!%p198_p3)   ;;  %s2052_s30 = sshll.u32 (!%p198_p3), %s2648_s12, 3 }
   0x8   : > { %1339 = vmatpush1.bf16.msra.mxu0 (!%p198_p3), %v2394_v2  ;;  %1558 = vmatpush1.bf16.msra.mxu1 (!%p198_p3), %v2395_v3  ;;  %v2398_v5 = vld [vmem:[%s3224_s1 + $0x2c] ss:$16 sps:$4 sm:$0xff] (!%p198_p3)   ;;  %v2400_v6 = vld [vmem:[%s3224_s1 + $0x20] ss:$16 sps:$4 sm:$0xff] (!%p198_p3)   ;;  %v2401_v7 = vld [vmem:[%s3224_s1 + $0x28] ss:$16 sps:$4 sm:$0xff] (!%p198_p3)  }
   0x9   : > { %1340 = vmatprep.subr.bf16.mxu0 (!%p198_p3), %v2396_v4  ;;  %1559 = vmatprep.subr.bf16.mxu1 (!%p198_p3), %v2398_v5  ;;  %v2402_v8 = vld [vmem:[%s3224_s1 + $0x44] ss:$16 sps:$4 sm:$0xff] (!%p198_p3)   ;;  %v2404_v9 = vld [vmem:[%s3224_s1 + $0x4c] ss:$16 sps:$4 sm:$0xff] (!%p198_p3)   ;;  %v2406_v10 = vld [vmem:[%s3224_s1 + $0x40] ss:$16 sps:$4 sm:$0xff] (!%p198_p3)  }
   0xa   : > { %v2407_v11 = vld [vmem:[%s3224_s1 + $0x48] ss:$16 sps:$4 sm:$0xff] (!%p198_p3)   ;;  %v2408_v12 = vld [vmem:[%s3224_s1 + $0x64] ss:$16 sps:$4 sm:$0xff] (!%p198_p3)   ;;  %v2410_v13 = vld [vmem:[%s3224_s1 + $0x6c] ss:$16 sps:$4 sm:$0xff] (!%p198_p3)  }
   0xb   : > { %v2412_v14 = vld [vmem:[%s3224_s1 + $0x60] ss:$16 sps:$4 sm:$0xff] (!%p198_p3)   ;;  %v2413_v15 = vld [vmem:[%s3224_s1 + $0x68] ss:$16 sps:$4 sm:$0xff] (!%p198_p3)   ;;  %v2414_v16 = vld [vmem:[%s3224_s1 + $0x84] ss:$16 sps:$4 sm:$0xff] (!%p198_p3)  }
   0xc   : > { %1341 = vmatpush1.bf16.msra.mxu0 (!%p198_p3), %v2400_v6  ;;  %1560 = vmatpush1.bf16.msra.mxu1 (!%p198_p3), %v2401_v7  ;;  %v2416_v17 = vld [vmem:[%s3224_s1 + $0x8c] ss:$16 sps:$4 sm:$0xff] (!%p198_p3)   ;;  %v2418_v18 = vld [vmem:[%s3224_s1 + $0x80] ss:$16 sps:$4 sm:$0xff] (!%p198_p3)   ;;  %v2419_v19 = vld [vmem:[%s3224_s1 + $0x88] ss:$16 sps:$4 sm:$0xff] (!%p198_p3)  }
   0xd   : > { %1342 = vmatprep.subr.bf16.mxu0 (!%p198_p3), %v2402_v8  ;;  %1561 = vmatprep.subr.bf16.mxu1 (!%p198_p3), %v2404_v9  ;;  %v2420_v20 = vld [vmem:[%s3224_s1 + $0xa4] ss:$16 sps:$4 sm:$0xff] (!%p198_p3)   ;;  %v2422_v21 = vld [vmem:[%s3224_s1 + $0xac] ss:$16 sps:$4 sm:$0xff] (!%p198_p3)   ;;  %v2424_v22 = vld [vmem:[%s3224_s1 + $0xa0] ss:$16 sps:$4 sm:$0xff] (!%p198_p3)  }
   0xe   : > { %v2425_v23 = vld [vmem:[%s3224_s1 + $0xa8] ss:$16 sps:$4 sm:$0xff]   ;;  %v2426_v24 = vld [vmem:[%s3224_s1 + $0xc4] ss:$16 sps:$4 sm:$0xff]   ;;  %v2428_v25 = vld [vmem:[%s3224_s1 + $0xcc] ss:$16 sps:$4 sm:$0xff]  }
   0xf   : > { %v2430_v26 = vld [vmem:[%s3224_s1 + $0xc0] ss:$16 sps:$4 sm:$0xff]   ;;  %v2431_v27 = vld [vmem:[%s3224_s1 + $0xc8] ss:$16 sps:$4 sm:$0xff]   ;;  %v2432_v28 = vld [vmem:[%s3224_s1 + $0xe4] ss:$16 sps:$4 sm:$0xff]  }
  0x10   : > { %1343 = vmatpush1.bf16.msra.mxu0 %v2406_v10  ;;  %1562 = vmatpush1.bf16.msra.mxu1 %v2407_v11  ;;  %v2434_v29 = vld [vmem:[%s3224_s1 + $0xec] ss:$16 sps:$4 sm:$0xff]   ;;  %v2436_v30 = vld [vmem:[%s3224_s1 + $0xe0] ss:$16 sps:$4 sm:$0xff]   ;;  %v2437_v31 = vld [vmem:[%s3224_s1 + $0xe8] ss:$16 sps:$4 sm:$0xff]  }
  0x11   : > { %1344 = vmatprep.subr.bf16.mxu0 %v2408_v12  ;;  %1563 = vmatprep.subr.bf16.mxu1 %v2410_v13  ;;  %v2438_v32 = vld [vmem:[%s3224_s1 + $0x104] ss:$16 sps:$4 sm:$0xff]   ;;  %p248_p4 = scmp.lt.s32.totalorder %s2052_s30, 31  ;;  %v2440_v33 = vld [vmem:[%s3224_s1 + $0x10c] ss:$16 sps:$4 sm:$0xff]   ;;  %v2658_v34 = vmov 0  }
  0x12   : > { %2388 = vset.pattern.permute.xlu0 %v2658_v34  ;;  %2389 = vset.pattern.permute.xlu1 %v2658_v34  ;;  %v2442_v35 = vld [vmem:[%s3224_s1 + $0x100] ss:$16 sps:$4 sm:$0xff]   ;;  %v2443_v36 = vld [vmem:[%s3224_s1 + $0x108] ss:$16 sps:$4 sm:$0xff]   ;;  %v2444_v37 = vld [vmem:[%s3224_s1 + $0x124] ss:$16 sps:$4 sm:$0xff]  }
  0x13   : > { %s3232_s30 = smov (!%p248_p4, %s2052_s30), 31  ;;  %v2446_v38 = vld [vmem:[%s3224_s1 + $0x12c] ss:$16 sps:$4 sm:$0xff]   ;;  %v2448_v39 = vld [vmem:[%s3224_s1 + $0x120] ss:$16 sps:$4 sm:$0xff]   ;;  %vm1325_vm0 = vcmask 523264  }
  0x14   : > { %1345 = vmatpush1.bf16.msra.mxu0 %v2412_v14  ;;  %1564 = vmatpush1.bf16.msra.mxu1 %v2413_v15  ;;  %v2449_v40 = vld [vmem:[%s3224_s1 + $0x128] ss:$16 sps:$4 sm:$0xff]   ;;  %v2450_v41 = vld [vmem:[%s3224_s1 + $0x144] ss:$16 sps:$4 sm:$0xff]   ;;  %s2362_s29 = smul.u32 20, %s3232_s30  ;;  %s2055_s10 = sshll.u32 %s3232_s30, 3 }
  0x15   : > { %1346 = vmatprep.subr.bf16.mxu0 %v2414_v16  ;;  %1565 = vmatprep.subr.bf16.mxu1 %v2416_v17  ;;  %v2452_v42 = vld [vmem:[%s3224_s1 + $0x14c] ss:$16 sps:$4 sm:$0xff]   ;;  %v2454_v43 = vld [vmem:[%s3224_s1 + $0x140] ss:$16 sps:$4 sm:$0xff]   ;;  %v2455_v44 = vld [vmem:[%s3224_s1 + $0x148] ss:$16 sps:$4 sm:$0xff]   ;;  %s3059_s23 = scalar_lea.vmem %s3225_s2, %s2055_s10 }
  0x16   : > { %v2456_v45 = vld [vmem:[%s3224_s1 + $0x164] ss:$16 sps:$4 sm:$0xff]   ;;  %s2843_s17 = scalar_lea.vmem %s3223_s0, %s2362_s29  ;;  %v2458_v46 = vld [vmem:[%s3224_s1 + $0x16c] ss:$16 sps:$4 sm:$0xff]   ;;  %v2460_v47 = vld [vmem:[%s3224_s1 + $0x160] ss:$16 sps:$4 sm:$0xff]  }
  0x17   : > { %v2461_v48 = vld [vmem:[%s3224_s1 + $0x168] ss:$16 sps:$4 sm:$0xff]   ;;  %v2462_v50 = vld [vmem:[%s3224_s1 + $0x184] ss:$16 sps:$4 sm:$0xff]   ;;  %v2464_v51 = vld [vmem:[%s3224_s1 + $0x18c] ss:$16 sps:$4 sm:$0xff]  }
  0x18   : > { %1347 = vmatpush1.bf16.msra.mxu0 %v2418_v18  ;;  %1566 = vmatpush1.bf16.msra.mxu1 %v2419_v19  ;;  %v2488_v49 = vld [vmem:[%s2843_s17 + $0x4] ss:$20 sps:$4 sm:$0xff]   ;;  %v2466_v52 = vld [vmem:[%s3224_s1 + $0x180] ss:$16 sps:$4 sm:$0xff]   ;;  %v2470_v55 = vld [vmem:[%s3224_s1 + $0x1ac] ss:$16 sps:$4 sm:$0xff]  }
  0x19   : > { %1348 = vmatprep.subr.bf16.mxu0 %v2420_v20  ;;  %1567 = vmatprep.subr.bf16.mxu1 %v2422_v21  ;;  %v2467_v53 = vld [vmem:[%s3224_s1 + $0x188] ss:$16 sps:$4 sm:$0xff]   ;;  %v2468_v54 = vld [vmem:[%s3224_s1 + $0x1a4] ss:$16 sps:$4 sm:$0xff]   ;;  %v2472_v56 = vld [vmem:[%s3224_s1 + $0x1a0] ss:$16 sps:$4 sm:$0xff]  }
  0x1a   : > { %1370 = vmatprep.mubr.bf16.mxu0 %v2488_v49  ;;  %1589 = vmatprep.mubr.bf16.mxu1 %v2488_v49  ;;  %v2473_v57 = vld [vmem:[%s3224_s1 + $0x1a8] ss:$16 sps:$4 sm:$0xff]   ;;  %v2474_v58 = vld [vmem:[%s3224_s1 + $0x1c4] ss:$16 sps:$4 sm:$0xff]   ;;  %v2476_v59 = vld [vmem:[%s3224_s1 + $0x1cc] ss:$16 sps:$4 sm:$0xff]  }
  0x1b   : > { %v2478_v60 = vld [vmem:[%s3224_s1 + $0x1c0] ss:$16 sps:$4 sm:$0xff]   ;;  %v2479_v61 = vld [vmem:[%s3224_s1 + $0x1c8] ss:$16 sps:$4 sm:$0xff]   ;;  %v2480_v62 = vld [vmem:[%s3224_s1 + $0x1e4] ss:$16 sps:$4 sm:$0xff]  }
  0x1c   : > { %1349 = vmatpush1.bf16.msra.mxu0 %v2424_v22  ;;  %1568 = vmatpush1.bf16.msra.mxu1 %v2425_v23  ;;  %v2482_v63 = vld [vmem:[%s3224_s1 + $0x1ec] ss:$16 sps:$4 sm:$0xff]   ;;  %v2484_v0 = vld [vmem:[%s3224_s1 + $0x1e0] ss:$16 sps:$4 sm:$0xff]   ;;  %v2485_v1 = vld [vmem:[%s3224_s1 + $0x1e8] ss:$16 sps:$4 sm:$0xff]  }
  0x1d   : > { %1350 = vmatprep.subr.bf16.mxu0 %v2426_v24  ;;  %1569 = vmatprep.subr.bf16.mxu1 %v2428_v25  ;;  %v2491_v2 = vld [vmem:[%s3224_s1 + $0x204] ss:$16 sps:$4 sm:$0xff]   ;;  %v2494_v3 = vld [vmem:[%s3224_s1 + $0x20c] ss:$16 sps:$4 sm:$0xff]   ;;  %v2489_v5 = vld [vmem:[%s3224_s1 + $0x200] ss:$16 sps:$4 sm:$0xff]  }
  0x1e   : > { %v2486_v4 = vld [vmem:[%s2843_s17] ss:$20 sps:$4 sm:$0xff]   ;;  %v2492_v6 = vld [vmem:[%s3224_s1 + $0x208] ss:$16 sps:$4 sm:$0xff]   ;;  %v2500_v8 = vld [vmem:[%s3224_s1 + $0x22c] ss:$16 sps:$4 sm:$0xff]  }
  0x1f   : > { %v2497_v7 = vld [vmem:[%s3224_s1 + $0x224] ss:$16 sps:$4 sm:$0xff]   ;;  %v2495_v9 = vld [vmem:[%s3224_s1 + $0x220] ss:$16 sps:$4 sm:$0xff]   ;;  %v2498_v10 = vld [vmem:[%s3224_s1 + $0x228] ss:$16 sps:$4 sm:$0xff]  }
  0x20   : > { %1351 = vmatpush1.bf16.msra.mxu0 %v2430_v26  ;;  %1570 = vmatpush1.bf16.msra.mxu1 %v2431_v27  ;;  %v2503_v11 = vld [vmem:[%s3224_s1 + $0x244] ss:$16 sps:$4 sm:$0xff]   ;;  %v2506_v12 = vld [vmem:[%s3224_s1 + $0x24c] ss:$16 sps:$4 sm:$0xff]   ;;  %v2501_v13 = vld [vmem:[%s3224_s1 + $0x240] ss:$16 sps:$4 sm:$0xff]  }
  0x21   : > { %1352 = vmatprep.subr.bf16.mxu0 %v2432_v28  ;;  %1571 = vmatprep.subr.bf16.mxu1 %v2434_v29  ;;  %v2504_v14 = vld [vmem:[%s3224_s1 + $0x248] ss:$16 sps:$4 sm:$0xff]   ;;  %v2549_v15 = vld [vmem:[%s2843_s17 + $0x2c] ss:$20 sps:$4 sm:$0xff]   ;;  %v2509_v17 = vld [vmem:[%s3224_s1 + $0x264] ss:$16 sps:$4 sm:$0xff]  }
  0x22   : > { %v2551_v16 = vld [vmem:[%s2843_s17 + $0x28] ss:$20 sps:$4 sm:$0xff]   ;;  %v2507_v19 = vld [vmem:[%s3224_s1 + $0x260] ss:$16 sps:$4 sm:$0xff]   ;;  %v2515_v21 = vld [vmem:[%s3224_s1 + $0x284] ss:$16 sps:$4 sm:$0xff]  }
  0x23   : > { %v2512_v18 = vld [vmem:[%s3224_s1 + $0x26c] ss:$16 sps:$4 sm:$0xff]   ;;  %v2510_v20 = vld [vmem:[%s3224_s1 + $0x268] ss:$16 sps:$4 sm:$0xff]   ;;  %v2513_v23 = vld [vmem:[%s3224_s1 + $0x280] ss:$16 sps:$4 sm:$0xff]  }
  0x24   : > { %1353 = vmatpush1.bf16.msra.mxu0 %v2436_v30  ;;  %1572 = vmatpush1.bf16.msra.mxu1 %v2437_v31  ;;  %v2518_v22 = vld [vmem:[%s3224_s1 + $0x28c] ss:$16 sps:$4 sm:$0xff]   ;;  %v2564_v24 = vld [vmem:[%s2843_s17 + $0x54] ss:$20 sps:$4 sm:$0xff]   ;;  %v2566_v26 = vld [vmem:[%s2843_s17 + $0x50] ss:$20 sps:$4 sm:$0xff]  }
  0x25   : > { %1354 = vmatprep.subr.bf16.mxu0 %v2438_v32  ;;  %1573 = vmatprep.subr.bf16.mxu1 %v2440_v33  ;;  %v2516_v25 = vld [vmem:[%s3224_s1 + $0x288] ss:$16 sps:$4 sm:$0xff]   ;;  %v2521_v27 = vld [vmem:[%s3224_s1 + $0x2a4] ss:$16 sps:$4 sm:$0xff]   ;;  %v2524_v28 = vld [vmem:[%s3224_s1 + $0x2ac] ss:$16 sps:$4 sm:$0xff]  }
  0x26   : > { %v2519_v29 = vld [vmem:[%s3224_s1 + $0x2a0] ss:$16 sps:$4 sm:$0xff]   ;;  %v2522_v30 = vld [vmem:[%s3224_s1 + $0x2a8] ss:$16 sps:$4 sm:$0xff]   ;;  %v2527_v31 = vld [vmem:[%s3224_s1 + $0x2c4] ss:$16 sps:$4 sm:$0xff]  }
  0x27   : > { %v2579_v32 = vld [vmem:[%s2843_s17 + $0x7c] ss:$20 sps:$4 sm:$0xff]   ;;  %s2249_s22 = sshll.u32 %s3232_s30, 4 }
  0x28   : > { %1355 = vmatpush1.bf16.msra.mxu0 %v2442_v35  ;;  %1574 = vmatpush1.bf16.msra.mxu1 %v2443_v36  ;;  %v2530_v33 = vld [vmem:[%s3224_s1 + $0x2cc] ss:$16 sps:$4 sm:$0xff]   ;;  %v2525_v35 = vld [vmem:[%s3224_s1 + $0x2c0] ss:$16 sps:$4 sm:$0xff]   ;;  %v2528_v36 = vld [vmem:[%s3224_s1 + $0x2c8] ss:$16 sps:$4 sm:$0xff]   ;;  %s3196_s25 = scalar_lea.vmem %s3226_s3, %s2249_s22 }
  0x29   : > { %1356 = vmatprep.subr.bf16.mxu0 %v2444_v37  ;;  %1575 = vmatprep.subr.bf16.mxu1 %v2446_v38  ;;  %v2581_v37 = vld [vmem:[%s2843_s17 + $0x78] ss:$20 sps:$4 sm:$0xff]   ;;  %v2533_v38 = vld [vmem:[%s3224_s1 + $0x2e4] ss:$16 sps:$4 sm:$0xff]   ;;  %v2543_v49 = vld [vmem:[%s3224_s1 + $0x320] ss:$16 sps:$4 sm:$0xff]  }
  0x2c   : > { %1357 = vmatpush1.bf16.msra.mxu0 %v2448_v39  ;;  %1576 = vmatpush1.bf16.msra.mxu1 %v2449_v40  ;;  %v2536_v39 = vld [vmem:[%s3224_s1 + $0x2ec] ss:$16 sps:$4 sm:$0xff]   ;;  %v2531_v40 = vld [vmem:[%s3224_s1 + $0x2e0] ss:$16 sps:$4 sm:$0xff]  }
  0x2d   : > { %1358 = vmatprep.subr.bf16.mxu0 %v2450_v41  ;;  %1577 = vmatprep.subr.bf16.mxu1 %v2452_v42  ;;  %v2534_v41 = vld [vmem:[%s3224_s1 + $0x2e8] ss:$16 sps:$4 sm:$0xff]   ;;  %v2596_v42 = vld [vmem:[%s2843_s17 + $0xc] ss:$20 sps:$4 sm:$0xff]  }
  0x30   : > { %1359 = vmatpush1.bf16.msra.mxu0 %v2454_v43  ;;  %1578 = vmatpush1.bf16.msra.mxu1 %v2455_v44  ;;  %v2539_v43 = vld [vmem:[%s3224_s1 + $0x304] ss:$16 sps:$4 sm:$0xff]   ;;  %v2542_v44 = vld [vmem:[%s3224_s1 + $0x30c] ss:$16 sps:$4 sm:$0xff]  }
  0x31   : > { %1360 = vmatprep.subr.bf16.mxu0 %v2456_v45  ;;  %1579 = vmatprep.subr.bf16.mxu1 %v2458_v46  ;;  %v2537_v45 = vld [vmem:[%s3224_s1 + $0x300] ss:$16 sps:$4 sm:$0xff]   ;;  %v2540_v46 = vld [vmem:[%s3224_s1 + $0x308] ss:$16 sps:$4 sm:$0xff]  }
  0x34   : > { %1361 = vmatpush1.bf16.msra.mxu0 %v2460_v47  ;;  %1580 = vmatpush1.bf16.msra.mxu1 %v2461_v48  ;;  %v2545_v47 = vld [vmem:[%s3224_s1 + $0x324] ss:$16 sps:$4 sm:$0xff]   ;;  %v2548_v48 = vld [vmem:[%s3224_s1 + $0x32c] ss:$16 sps:$4 sm:$0xff]  }
  0x35   : > { %1362 = vmatprep.subr.bf16.mxu0 %v2462_v50  ;;  %1581 = vmatprep.subr.bf16.mxu1 %v2464_v51  ;;  %v2546_v50 = vld [vmem:[%s3224_s1 + $0x328] ss:$16 sps:$4 sm:$0xff]   ;;  %v2554_v51 = vld [vmem:[%s3224_s1 + $0x344] ss:$16 sps:$4 sm:$0xff]  }
  0x38   : > { %1363 = vmatpush1.bf16.msra.mxu0 %v2466_v52  ;;  %1582 = vmatpush1.bf16.msra.mxu1 %v2467_v53  ;;  %v2557_v52 = vld [vmem:[%s3224_s1 + $0x34c] ss:$16 sps:$4 sm:$0xff]   ;;  %v2552_v53 = vld [vmem:[%s3224_s1 + $0x340] ss:$16 sps:$4 sm:$0xff]  }
  0x39   : > { %1364 = vmatprep.subr.bf16.mxu0 %v2468_v54  ;;  %1583 = vmatprep.subr.bf16.mxu1 %v2470_v55  ;;  %v2555_v54 = vld [vmem:[%s3224_s1 + $0x348] ss:$16 sps:$4 sm:$0xff]   ;;  %v2560_v55 = vld [vmem:[%s3224_s1 + $0x364] ss:$16 sps:$4 sm:$0xff]  }
  0x3c   : > { %1365 = vmatpush1.bf16.msra.mxu0 %v2472_v56  ;;  %1584 = vmatpush1.bf16.msra.mxu1 %v2473_v57  ;;  %v2563_v56 = vld [vmem:[%s3224_s1 + $0x36c] ss:$16 sps:$4 sm:$0xff]   ;;  %v2558_v57 = vld [vmem:[%s3224_s1 + $0x360] ss:$16 sps:$4 sm:$0xff]  }
  0x3d   : > { %1366 = vmatprep.subr.bf16.mxu0 %v2474_v58  ;;  %1585 = vmatprep.subr.bf16.mxu1 %v2476_v59  ;;  %v2561_v58 = vld [vmem:[%s3224_s1 + $0x368] ss:$16 sps:$4 sm:$0xff]   ;;  %v2569_v59 = vld [vmem:[%s3224_s1 + $0x384] ss:$16 sps:$4 sm:$0xff]  }
  0x40   : > { %1367 = vmatpush1.bf16.msra.mxu0 %v2478_v60  ;;  %1586 = vmatpush1.bf16.msra.mxu1 %v2479_v61  ;;  %v2572_v60 = vld [vmem:[%s3224_s1 + $0x38c] ss:$16 sps:$4 sm:$0xff]   ;;  %v457_v61 = vld [vmem:[%s3059_s23] sm:$0xff] }
  0x41   : > { %1368 = vmatprep.subr.bf16.mxu0 %v2480_v62  ;;  %1587 = vmatprep.subr.bf16.mxu1 %v2482_v63  ;;  %v459_v62 = vld [vmem:[%s3059_s23 + $0x10] sm:$0xff] }
  0x42   : > { %467 = vperm.xlu0 %2388, %v457_v61   ;;  %v2567_v63 = vld [vmem:[%s3224_s1 + $0x380] ss:$16 sps:$4 sm:$0xff]   ;;  %477 = vperm.xlu1 %2389, %v459_v62  }
  0x44   : > { %1369 = vmatpush1.bf16.msra.mxu0 %v2484_v0  ;;  %1588 = vmatpush1.bf16.msra.mxu1 %v2485_v1  ;;  %v2570_v0 = vld [vmem:[%s3224_s1 + $0x388] ss:$16 sps:$4 sm:$0xff]  }
  0x45   : > { %1411 = vmatprep.subr.bf16.mxu0 %v2491_v2  ;;  %1630 = vmatprep.subr.bf16.mxu1 %v2494_v3  ;;  %v458_v1 = vld [vmem:[%s3059_s23 + $0x8] sm:$0xff]  ;;  %v2575_v2 = vld [vmem:[%s3224_s1 + $0x3a4] ss:$16 sps:$4 sm:$0xff]  }
  0x46   : > { %v2578_v3 = vld [vmem:[%s3224_s1 + $0x3ac] ss:$16 sps:$4 sm:$0xff]   ;;  %472 = vperm.xlu0 %2388, %v458_v1  }
  0x47   : > { %1371 = vmatmul.mubr.bf16.vlgmr.msra.gmra.mrb[0].mxu0 %v2486_v4  ;;  %1590 = vmatmul.mubr.bf16.vlgmr.msra.gmra.mrb[0].mxu1 %v2486_v4  ;;  %v460_v4 = vld [vmem:[%s3059_s23 + $0x18] sm:$0xff] }
  0x48   : > { %1412 = vmatpush1.bf16.msra.mxu0 %v2489_v5  ;;  %1631 = vmatpush1.bf16.msra.mxu1 %v2492_v6  ;;  %v2573_v5 = vld [vmem:[%s3224_s1 + $0x3a0] ss:$16 sps:$4 sm:$0xff]   ;;  %v2576_v6 = vld [vmem:[%s3224_s1 + $0x3a8] ss:$16 sps:$4 sm:$0xff]  }
  0x49   : > { %1413 = vmatprep.subr.bf16.mxu0 %v2497_v7  ;;  %1632 = vmatprep.subr.bf16.mxu1 %v2500_v8  ;;  %v461_v7 = vld [vmem:[%s3059_s23 + $0x20] sm:$0xff] }
  0x4a   : > { %1380 = vmatprep.mubr.bf16.mxu0 %v2549_v15  ;;  %1599 = vmatprep.mubr.bf16.mxu1 %v2549_v15  ;;  %v2584_v8 = vld [vmem:[%s3224_s1 + $0x3c4] ss:$16 sps:$4 sm:$0xff]   ;;  %v2593_v15 = vld [vmem:[%s3224_s1 + $0x3ec] ss:$16 sps:$4 sm:$0xff]  }
  0x4b   : > { %482 = vperm.xlu1 %2389, %v460_v4   ;;  %487 = vperm.xlu0 %2388, %v461_v7  }
  0x4c   : > { %1414 = vmatpush1.bf16.msra.mxu0 %v2495_v9  ;;  %1633 = vmatpush1.bf16.msra.mxu1 %v2498_v10  ;;  %v2587_v9 = vld [vmem:[%s3224_s1 + $0x3cc] ss:$16 sps:$4 sm:$0xff]  }
  0x4d   : > { %1415 = vmatprep.subr.bf16.mxu0 %v2503_v11  ;;  %1634 = vmatprep.subr.bf16.mxu1 %v2506_v12  ;;  %v462_v10 = vld [vmem:[%s3059_s23 + $0x28] sm:$0xff]  ;;  %v2582_v11 = vld [vmem:[%s3224_s1 + $0x3c0] ss:$16 sps:$4 sm:$0xff]  }
  0x4e   : > { %v2585_v12 = vld [vmem:[%s3224_s1 + $0x3c8] ss:$16 sps:$4 sm:$0xff]  }
  0x4f   : > { %1381 = vmatmul.mubr.bf16.gmra.mrb[4].mxu0 %v2551_v16  ;;  %1600 = vmatmul.mubr.bf16.gmra.mrb[4].mxu1 %v2551_v16  ;;  %v464_v16 = vld [vmem:[%s3059_s23 + $0x38] sm:$0xff] }
  0x50   : > { %1416 = vmatpush1.bf16.msra.mxu0 %v2501_v13  ;;  %1635 = vmatpush1.bf16.msra.mxu1 %v2504_v14  ;;  %v463_v13 = vld [vmem:[%s3059_s23 + $0x30] sm:$0xff] }
  0x51   : > { %1417 = vmatprep.subr.bf16.mxu0 %v2509_v17  ;;  %1636 = vmatprep.subr.bf16.mxu1 %v2512_v18  ;;  %v2590_v14 = vld [vmem:[%s3224_s1 + $0x3e4] ss:$16 sps:$4 sm:$0xff]   ;;  %v2588_v17 = vld [vmem:[%s3224_s1 + $0x3e0] ss:$16 sps:$4 sm:$0xff]   ;;  %v2591_v18 = vld [vmem:[%s3224_s1 + $0x3e8] ss:$16 sps:$4 sm:$0xff]  }
  0x52   : > { %1390 = vmatprep.mubr.bf16.mxu0 %v2564_v24  ;;  %1609 = vmatprep.mubr.bf16.mxu1 %v2564_v24  ;;  %v2603_v24 = vld [vmem:[%s2843_s17 + $0x34] ss:$20 sps:$4 sm:$0xff]  }
  0x53   : > { %492 = vperm.xlu1 %2389, %v462_v10   ;;  %497 = vperm.xlu0 %2388, %v463_v13  }
  0x54   : > { %1418 = vmatpush1.bf16.msra.mxu0 %v2507_v19  ;;  %1637 = vmatpush1.bf16.msra.mxu1 %v2510_v20  ;;  %v2599_v19 = vld [vmem:[%s3224_s1 + $0x404] ss:$16 sps:$4 sm:$0xff]   ;;  %v2602_v20 = vld [vmem:[%s3224_s1 + $0x40c] ss:$16 sps:$4 sm:$0xff]  }
  0x55   : > { %1419 = vmatprep.subr.bf16.mxu0 %v2515_v21  ;;  %1638 = vmatprep.subr.bf16.mxu1 %v2518_v22  ;;  %v2594_v21 = vld [vmem:[%s2843_s17 + $0x8] ss:$20 sps:$4 sm:$0xff]   ;;  %v2597_v22 = vld [vmem:[%s3224_s1 + $0x400] ss:$16 sps:$4 sm:$0xff]  }
  0x57   : > { %1391 = vmatmul.mubr.bf16.gmra.mrb[8].mxu0 %v2566_v26  ;;  %1610 = vmatmul.mubr.bf16.gmra.mrb[8].mxu1 %v2566_v26  ;;  %v2611_v26 = vld [vmem:[%s3224_s1 + $0x42c] ss:$16 sps:$4 sm:$0xff]  }
  0x58   : > { %1420 = vmatpush1.bf16.msra.mxu0 %v2513_v23  ;;  %1639 = vmatpush1.bf16.msra.mxu1 %v2516_v25  ;;  %v2600_v23 = vld [vmem:[%s3224_s1 + $0x408] ss:$16 sps:$4 sm:$0xff]   ;;  %v2608_v25 = vld [vmem:[%s3224_s1 + $0x424] ss:$16 sps:$4 sm:$0xff]  }
  0x59   : > { %1421 = vmatprep.subr.bf16.mxu0 %v2521_v27  ;;  %1640 = vmatprep.subr.bf16.mxu1 %v2524_v28  ;;  %v2606_v27 = vld [vmem:[%s3224_s1 + $0x420] ss:$16 sps:$4 sm:$0xff]   ;;  %v2609_v28 = vld [vmem:[%s3224_s1 + $0x428] ss:$16 sps:$4 sm:$0xff]  }
  0x5a   : > { %1400 = vmatprep.mubr.bf16.mxu0 %v2579_v32  ;;  %1619 = vmatprep.mubr.bf16.mxu1 %v2579_v32  ;;  %v2612_v32 = vld [vmem:[%s2843_s17 + $0x5c] ss:$20 sps:$4 sm:$0xff]  }
  0x5b   : > { %502 = vperm.xlu1 %2389, %v464_v16  }
  0x5c   : > { %1422 = vmatpush1.bf16.msra.mxu0 %v2519_v29  ;;  %1641 = vmatpush1.bf16.msra.mxu1 %v2522_v30  ;;  %v2617_v29 = vld [vmem:[%s3224_s1 + $0x444] ss:$16 sps:$4 sm:$0xff]   ;;  %v2620_v30 = vld [vmem:[%s3224_s1 + $0x44c] ss:$16 sps:$4 sm:$0xff]  }
  0x5d   : > { %1423 = vmatprep.subr.bf16.mxu0 %v2527_v31  ;;  %1642 = vmatprep.subr.bf16.mxu1 %v2530_v33  ;;  %v2605_v31 = vld [vmem:[%s2843_s17 + $0x30] ss:$20 sps:$4 sm:$0xff]  }
  0x5e   : > { %v2615_v33 = vld [vmem:[%s3224_s1 + $0x440] ss:$16 sps:$4 sm:$0xff]  }
  0x5f   : > { %1401 = vmatmul.mubr.bf16.gmra.mrb[12].mxu0 %v2581_v37  ;;  %1620 = vmatmul.mubr.bf16.gmra.mrb[12].mxu1 %v2581_v37  ;;  %v2629_v37 = vld [vmem:[%s3224_s1 + $0x46c] ss:$16 sps:$4 sm:$0xff]  }
  0x60   : > { %1424 = vmatpush1.bf16.msra.mxu0 %v2525_v35  ;;  %1643 = vmatpush1.bf16.msra.mxu1 %v2528_v36  ;;  %v2618_v35 = vld [vmem:[%s3224_s1 + $0x448] ss:$16 sps:$4 sm:$0xff]   ;;  %v2626_v36 = vld [vmem:[%s3224_s1 + $0x464] ss:$16 sps:$4 sm:$0xff]  }
  0x61   : > { %1425 = vmatprep.subr.bf16.mxu0 %v2533_v38  ;;  %1644 = vmatprep.subr.bf16.mxu1 %v2536_v39  ;;  %v2624_v38 = vld [vmem:[%s3224_s1 + $0x460] ss:$16 sps:$4 sm:$0xff]   ;;  %v2627_v39 = vld [vmem:[%s3224_s1 + $0x468] ss:$16 sps:$4 sm:$0xff]  }
  0x62   : > { %1443 = vmatprep.mubr.bf16.mxu0 %v2596_v42  ;;  %1662 = vmatprep.mubr.bf16.mxu1 %v2596_v42  ;;  %v2623_v42 = vld [vmem:[%s2843_s17 + $0x80] ss:$20 sps:$4 sm:$0xff]  }
  0x64   : > { %1426 = vmatpush1.bf16.msra.mxu0 %v2531_v40  ;;  %1645 = vmatpush1.bf16.msra.mxu1 %v2534_v41  ;;  %v2614_v40 = vld [vmem:[%s2843_s17 + $0x58] ss:$20 sps:$4 sm:$0xff]  }
  0x65   : > { %1427 = vmatprep.subr.bf16.mxu0 %v2539_v43  ;;  %1646 = vmatprep.subr.bf16.mxu1 %v2542_v44  ;;  %v2621_v41 = vld [vmem:[%s2843_s17 + $0x84] ss:$20 sps:$4 sm:$0xff]  }
  0x66   : > { %v2630_v43 = vld [vmem:[%s2843_s17 + $0x10] ss:$20 sps:$4 sm:$0xff]   ;;  %v2631_v44 = vld [vmem:[%s2843_s17 + $0x38] ss:$20 sps:$4 sm:$0xff]  }
  0x68   : > { %1428 = vmatpush1.bf16.msra.mxu0 %v2537_v45  ;;  %1647 = vmatpush1.bf16.msra.mxu1 %v2540_v46  ;;  %v2632_v45 = vld [vmem:[%s2843_s17 + $0x60] ss:$20 sps:$4 sm:$0xff]   ;;  %v2633_v46 = vld [vmem:[%s2843_s17 + $0x88] ss:$20 sps:$4 sm:$0xff]  }
  0x69   : > { %1429 = vmatprep.subr.bf16.mxu0 %v2545_v47  ;;  %1648 = vmatprep.subr.bf16.mxu1 %v2548_v48 }
  0x6c   : > { %1430 = vmatpush1.bf16.msra.mxu0 %v2543_v49  ;;  %1649 = vmatpush1.bf16.msra.mxu1 %v2546_v50 }
  0x6d   : > { %1431 = vmatprep.subr.bf16.mxu0 %v2554_v51  ;;  %1650 = vmatprep.subr.bf16.mxu1 %v2557_v52 }
  0x70   : > { %1432 = vmatpush1.bf16.msra.mxu0 %v2552_v53  ;;  %1651 = vmatpush1.bf16.msra.mxu1 %v2555_v54 }
  0x71   : > { %1433 = vmatprep.subr.bf16.mxu0 %v2560_v55  ;;  %1652 = vmatprep.subr.bf16.mxu1 %v2563_v56 }
  0x74   : > { %1434 = vmatpush1.bf16.msra.mxu0 %v2558_v57  ;;  %1653 = vmatpush1.bf16.msra.mxu1 %v2561_v58 }
  0x75   : > { %1435 = vmatprep.subr.bf16.mxu0 %v2569_v59  ;;  %1654 = vmatprep.subr.bf16.mxu1 %v2572_v60 }
  0x78   : > { %1436 = vmatpush1.bf16.msra.mxu0 %v2567_v63  ;;  %1655 = vmatpush1.bf16.msra.mxu1 %v2570_v0 }
  0x79   : > { %1437 = vmatprep.subr.bf16.mxu0 %v2575_v2  ;;  %1656 = vmatprep.subr.bf16.mxu1 %v2578_v3 }
  0x7c   : > { %1438 = vmatpush1.bf16.msra.mxu0 %v2573_v5  ;;  %1657 = vmatpush1.bf16.msra.mxu1 %v2576_v6 }
  0x7d   : > { %1439 = vmatprep.subr.bf16.mxu0 %v2584_v8  ;;  %1658 = vmatprep.subr.bf16.mxu1 %v2587_v9 }
  0x80   : > { %1440 = vmatpush1.bf16.msra.mxu0 %v2582_v11  ;;  %1659 = vmatpush1.bf16.msra.mxu1 %v2585_v12 }
  0x81   : > { %1441 = vmatprep.subr.bf16.mxu0 %v2590_v14  ;;  %1660 = vmatprep.subr.bf16.mxu1 %v2593_v15 }
  0x84   : > { %1442 = vmatpush1.bf16.msra.mxu0 %v2588_v17  ;;  %1661 = vmatpush1.bf16.msra.mxu1 %v2591_v18 }
  0x85   : > { %1484 = vmatprep.subr.bf16.mxu0 %v2599_v19  ;;  %1703 = vmatprep.subr.bf16.mxu1 %v2602_v20 }
  0x87   : > { %1444 = vmatmul.mubr.bf16.vlgmr.msra.gmra.mrb[0].mxu0 %v2594_v21  ;;  %1663 = vmatmul.mubr.bf16.vlgmr.msra.gmra.mrb[0].mxu1 %v2594_v21 }
  0x88   : > { %1485 = vmatpush1.bf16.msra.mxu0 %v2597_v22  ;;  %1704 = vmatpush1.bf16.msra.mxu1 %v2600_v23 }
  0x89   : > { %1453 = vmatprep.mubr.bf16.mxu0 %v2603_v24  ;;  %1672 = vmatprep.mubr.bf16.mxu1 %v2603_v24 }
  0x8a   : > { %1486 = vmatprep.subr.bf16.mxu0 %v2608_v25  ;;  %1705 = vmatprep.subr.bf16.mxu1 %v2611_v26 }
  0x8c   : > { %1487 = vmatpush1.bf16.msra.mxu0 %v2606_v27  ;;  %1706 = vmatpush1.bf16.msra.mxu1 %v2609_v28 }
  0x8d   : > { %1488 = vmatprep.subr.bf16.mxu0 %v2617_v29  ;;  %1707 = vmatprep.subr.bf16.mxu1 %v2620_v30 }
  0x8f   : > { %1454 = vmatmul.mubr.bf16.gmra.mrb[4].mxu0 %v2605_v31  ;;  %1673 = vmatmul.mubr.bf16.gmra.mrb[4].mxu1 %v2605_v31 }
  0x90   : > { %1463 = vmatprep.mubr.bf16.mxu0 %v2612_v32  ;;  %1682 = vmatprep.mubr.bf16.mxu1 %v2612_v32 }
  0x91   : > { %1489 = vmatpush1.bf16.msra.mxu0 %v2615_v33  ;;  %1708 = vmatpush1.bf16.msra.mxu1 %v2618_v35 }
  0x92   : > { %1490 = vmatprep.subr.bf16.mxu0 %v2626_v36  ;;  %1709 = vmatprep.subr.bf16.mxu1 %v2629_v37 }
  0x95   : > { %1491 = vmatpush1.bf16.msra.mxu0 %v2624_v38  ;;  %1710 = vmatpush1.bf16.msra.mxu1 %v2627_v39 }
  0x97   : > { %1464 = vmatmul.mubr.bf16.gmra.mrb[8].mxu0 %v2614_v40  ;;  %1683 = vmatmul.mubr.bf16.gmra.mrb[8].mxu1 %v2614_v40 }
  0x98   : > { %1473 = vmatprep.mubr.bf16.mxu0 %v2621_v41  ;;  %1692 = vmatprep.mubr.bf16.mxu1 %v2621_v41 }
  0x9f   : > { %1474 = vmatmul.mubr.bf16.gmra.mrb[12].mxu0 %v2623_v42  ;;  %1693 = vmatmul.mubr.bf16.gmra.mrb[12].mxu1 %v2623_v42 }
  0xa0   : > { %1516 = vmatprep.mubr.bf16.mxu0 %v2658_v34  ;;  %1735 = vmatprep.mubr.bf16.mxu1 %v2658_v34 }
  0xa7   : > { %2223 = vmatmul.mubr.msk.bf16.vlgmr.msra.gmra.mrb[0].mxu0 %vm1325_vm0, %v2630_v43  ;;  %2227 = vmatmul.mubr.msk.bf16.vlgmr.msra.gmra.mrb[0].mxu1 %vm1325_vm0, %v2630_v43 }
  0xa8   : > { %1526 = vmatprep.mubr.bf16.mxu0 %v2658_v34  ;;  %1745 = vmatprep.mubr.bf16.mxu1 %v2658_v34 }
  0xaf   : > { %2224 = vmatmul.mubr.msk.bf16.gmra.mrb[4].mxu0 %vm1325_vm0, %v2631_v44  ;;  %2228 = vmatmul.mubr.msk.bf16.gmra.mrb[4].mxu1 %vm1325_vm0, %v2631_v44 }
  0xb0   : > { %1536 = vmatprep.mubr.bf16.mxu0 %v2658_v34  ;;  %1755 = vmatprep.mubr.bf16.mxu1 %v2658_v34 }
  0xb7   : > { %2225 = vmatmul.mubr.msk.bf16.gmra.mrb[8].mxu0 %vm1325_vm0, %v2632_v45  ;;  %2229 = vmatmul.mubr.msk.bf16.gmra.mrb[8].mxu1 %vm1325_vm0, %v2632_v45 }
  0xb8   : > { %1546 = vmatprep.mubr.bf16.mxu0 %v2658_v34  ;;  %1765 = vmatprep.mubr.bf16.mxu1 %v2658_v34 }
  0xbf   : > { %2226 = vmatmul.mubr.msk.bf16.gmra.mrb[12].mxu0 %vm1325_vm0, %v2633_v46  ;;  %2230 = vmatmul.mubr.msk.bf16.gmra.mrb[12].mxu1 %vm1325_vm0, %v2633_v46 }
  0xc1   : > { %v468_v47 = vpop.permute.xlu0 %467  ;;  %v478_v49 = vpop.permute.xlu1 %477 }
  0xc5   : > { %v473_v48 = vpop.permute.xlu0 %472 }
  0xca   : > { %v483_v11 = vpop.permute.xlu1 %482  ;;  %v488_v42 = vpop.permute.xlu0 %487 }
  0xd2   : > { %v493_v41 = vpop.permute.xlu1 %492 }
 0x17a   : > { %v1518_v50 = vpop.f32.mrb[0].mxu0  ;;  %v1737_v51 = vpop.f32.mrb[0].mxu1 }
 0x17b   : > { %v2266_v52 = vadd.f32 %v1518_v50, %v468_v47  ;;  %v2282_v53 = vadd.f32 %v1737_v51, %v468_v47  ;;  %v1520_v54 = vpop.f32.mrb[1].mxu0  ;;  %v1739_v55 = vpop.f32.mrb[1].mxu1 }
 0x17c   : > { %v2267_v56 = vadd.f32 %v1520_v54, %v468_v47  ;;  %v2283_v57 = vadd.f32 %v1739_v55, %v468_v47  ;;  %v1522_v58 = vpop.f32.mrb[2].mxu0  ;;  %v1741_v59 = vpop.f32.mrb[2].mxu1 }
 0x17d   : > { %v1776_v34 = vmax.f32 %v2266_v52, 0.0  ;;  %v1778_v60 = vmax.f32 %v2282_v53, 0.0  ;;  %v2268_v61 = vadd.f32 %v1522_v58, %v473_v48  ;;  %v2284_v62 = vadd.f32 %v1741_v59, %v473_v48  ;;  %v1524_v63 = vpop.f32.mrb[3].mxu0  ;;  %v1743_v0 = vpop.f32.mrb[3].mxu1 }
 0x17e   : > { %v1777_v1 = vmax.f32 %v2267_v56, 0.0  ;;  %v1779_v2 = vmax.f32 %v2283_v57, 0.0  ;;  %v2269_v3 = vadd.f32 %v1524_v63, %v473_v48  ;;  %v2285_v4 = vadd.f32 %v1743_v0, %v473_v48 }
 0x17f   : > { %v1780_v5 = vmax.f32 %v2268_v61, 0.0  ;;  %v1782_v6 = vmax.f32 %v2284_v62, 0.0 }
 0x180   : > { %v2250_v7 = vpack.c.bf16 %v1777_v1, %v1776_v34  ;;  %v2251_v8 = vpack.c.bf16 %v1779_v2, %v1778_v60  ;;  %v1781_v9 = vmax.f32 %v2269_v3, 0.0  ;;  %v1783_v10 = vmax.f32 %v2285_v4, 0.0 }
 0x182   : > { %1904 = vst [vmem:[%s3196_s25] sm:$0xff] %v2250_v7  ;;  %1905 = vst [vmem:[%s3196_s25 + $0x8] sm:$0xff] %v2251_v8  ;;  %v2252_v12 = vpack.c.bf16 %v1781_v9, %v1780_v5  ;;  %v2253_v13 = vpack.c.bf16 %v1783_v10, %v1782_v6  ;;  %v1528_v14 = vpop.f32.mrb[4].mxu0  ;;  %v1747_v15 = vpop.f32.mrb[4].mxu1 }
 0x183   : > { %v2270_v16 = vadd.f32 %v1528_v14, %v478_v49  ;;  %v2286_v17 = vadd.f32 %v1747_v15, %v478_v49  ;;  %v1530_v18 = vpop.f32.mrb[5].mxu0  ;;  %v1749_v19 = vpop.f32.mrb[5].mxu1 }
 0x184   : > { %1906 = vst [vmem:[%s3196_s25 + $0x10] sm:$0xff] %v2252_v12  ;;  %1907 = vst [vmem:[%s3196_s25 + $0x18] sm:$0xff] %v2253_v13  ;;  %v2271_v20 = vadd.f32 %v1530_v18, %v478_v49  ;;  %v2287_v21 = vadd.f32 %v1749_v19, %v478_v49  ;;  %v1532_v22 = vpop.f32.mrb[6].mxu0  ;;  %v1751_v23 = vpop.f32.mrb[6].mxu1 }
 0x185   : > { %v1784_v24 = vmax.f32 %v2270_v16, 0.0  ;;  %v1786_v25 = vmax.f32 %v2286_v17, 0.0  ;;  %v2272_v26 = vadd.f32 %v1532_v22, %v483_v11  ;;  %v2288_v27 = vadd.f32 %v1751_v23, %v483_v11  ;;  %v1534_v28 = vpop.f32.mrb[7].mxu0  ;;  %v1753_v29 = vpop.f32.mrb[7].mxu1 }
 0x186   : > { %v1785_v30 = vmax.f32 %v2271_v20, 0.0  ;;  %v1787_v31 = vmax.f32 %v2287_v21, 0.0  ;;  %v2273_v32 = vadd.f32 %v1534_v28, %v483_v11  ;;  %v2289_v33 = vadd.f32 %v1753_v29, %v483_v11  ;;  %v503_v6 = vpop.permute.xlu1 %502  ;;  %v498_v7 = vpop.permute.xlu0 %497 }
 0x187   : > { %v1788_v35 = vmax.f32 %v2272_v26, 0.0  ;;  %v1790_v36 = vmax.f32 %v2288_v27, 0.0 }
 0x188   : > { %v2254_v37 = vpack.c.bf16 %v1785_v30, %v1784_v24  ;;  %v2255_v38 = vpack.c.bf16 %v1787_v31, %v1786_v25  ;;  %v1789_v39 = vmax.f32 %v2273_v32, 0.0  ;;  %v1791_v40 = vmax.f32 %v2289_v33, 0.0 }
 0x18a   : > { %1908 = vst [vmem:[%s3196_s25 + $0x20] sm:$0xff] %v2254_v37  ;;  %1909 = vst [vmem:[%s3196_s25 + $0x28] sm:$0xff] %v2255_v38  ;;  %v2256_v43 = vpack.c.bf16 %v1789_v39, %v1788_v35  ;;  %v2257_v44 = vpack.c.bf16 %v1791_v40, %v1790_v36  ;;  %v1538_v45 = vpop.f32.mrb[8].mxu0  ;;  %v1757_v46 = vpop.f32.mrb[8].mxu1 }
 0x18b   : > { %v2274_v47 = vadd.f32 %v1538_v45, %v488_v42  ;;  %v2290_v48 = vadd.f32 %v1757_v46, %v488_v42  ;;  %v1540_v49 = vpop.f32.mrb[9].mxu0  ;;  %v1759_v50 = vpop.f32.mrb[9].mxu1 }
 0x18c   : > { %1910 = vst [vmem:[%s3196_s25 + $0x30] sm:$0xff] %v2256_v43  ;;  %1911 = vst [vmem:[%s3196_s25 + $0x38] sm:$0xff] %v2257_v44  ;;  %v2275_v51 = vadd.f32 %v1540_v49, %v488_v42  ;;  %v2291_v52 = vadd.f32 %v1759_v50, %v488_v42  ;;  %v1542_v53 = vpop.f32.mrb[10].mxu0  ;;  %v1761_v54 = vpop.f32.mrb[10].mxu1 }
 0x18d   : > { %v1792_v55 = vmax.f32 %v2274_v47, 0.0  ;;  %v1794_v56 = vmax.f32 %v2290_v48, 0.0  ;;  %v2276_v57 = vadd.f32 %v1542_v53, %v493_v41  ;;  %v2292_v58 = vadd.f32 %v1761_v54, %v493_v41  ;;  %v1544_v59 = vpop.f32.mrb[11].mxu0  ;;  %v1763_v34 = vpop.f32.mrb[11].mxu1 }
 0x18e   : > { %v1793_v60 = vmax.f32 %v2275_v51, 0.0  ;;  %v1795_v61 = vmax.f32 %v2291_v52, 0.0  ;;  %v2277_v62 = vadd.f32 %v1544_v59, %v493_v41  ;;  %v2293_v63 = vadd.f32 %v1763_v34, %v493_v41 }
 0x18f   : > { %v1796_v0 = vmax.f32 %v2276_v57, 0.0  ;;  %v1798_v1 = vmax.f32 %v2292_v58, 0.0 }
 0x190   : > { %v2258_v2 = vpack.c.bf16 %v1793_v60, %v1792_v55  ;;  %v2259_v3 = vpack.c.bf16 %v1795_v61, %v1794_v56  ;;  %v1797_v4 = vmax.f32 %v2277_v62, 0.0  ;;  %v1799_v5 = vmax.f32 %v2293_v63, 0.0 }
 0x192   : > { %1912 = vst [vmem:[%s3196_s25 + $0x40] sm:$0xff] %v2258_v2  ;;  %1913 = vst [vmem:[%s3196_s25 + $0x48] sm:$0xff] %v2259_v3  ;;  %v2260_v8 = vpack.c.bf16 %v1797_v4, %v1796_v0  ;;  %v2261_v9 = vpack.c.bf16 %v1799_v5, %v1798_v1  ;;  %v1548_v10 = vpop.f32.mrb[12].mxu0  ;;  %v1767_v11 = vpop.f32.mrb[12].mxu1 }
 0x193   : > { %v2278_v12 = vadd.f32 %v1548_v10, %v498_v7  ;;  %v2294_v13 = vadd.f32 %v1767_v11, %v498_v7  ;;  %v1550_v14 = vpop.f32.mrb[13].mxu0  ;;  %v1769_v15 = vpop.f32.mrb[13].mxu1 }
 0x194   : > { %1914 = vst [vmem:[%s3196_s25 + $0x50] sm:$0xff] %v2260_v8  ;;  %1915 = vst [vmem:[%s3196_s25 + $0x58] sm:$0xff] %v2261_v9  ;;  %v2279_v16 = vadd.f32 %v1550_v14, %v498_v7  ;;  %v2295_v17 = vadd.f32 %v1769_v15, %v498_v7  ;;  %v1552_v18 = vpop.f32.mrb[14].mxu0  ;;  %v1771_v19 = vpop.f32.mrb[14].mxu1 }
 0x195   : > { %v1800_v20 = vmax.f32 %v2278_v12, 0.0  ;;  %v1802_v21 = vmax.f32 %v2294_v13, 0.0  ;;  %v2280_v22 = vadd.f32 %v1552_v18, %v503_v6  ;;  %v2296_v23 = vadd.f32 %v1771_v19, %v503_v6  ;;  %v1554_v24 = vpop.f32.mrb[15].mxu0  ;;  %v1773_v25 = vpop.f32.mrb[15].mxu1 }
 0x196   : > { %v1801_v26 = vmax.f32 %v2279_v16, 0.0  ;;  %v1803_v27 = vmax.f32 %v2295_v17, 0.0  ;;  %v2281_v28 = vadd.f32 %v1554_v24, %v503_v6  ;;  %v2297_v29 = vadd.f32 %v1773_v25, %v503_v6 }
 0x197   : > { %v1804_v30 = vmax.f32 %v2280_v22, 0.0  ;;  %v1806_v31 = vmax.f32 %v2296_v23, 0.0 }
 0x198   : > { %v2262_v32 = vpack.c.bf16 %v1801_v26, %v1800_v20  ;;  %v2263_v33 = vpack.c.bf16 %v1803_v27, %v1802_v21  ;;  %v1805_v35 = vmax.f32 %v2281_v28, 0.0  ;;  %v1807_v36 = vmax.f32 %v2297_v29, 0.0 }
 0x19a   : > { %1916 = vst [vmem:[%s3196_s25 + $0x60] sm:$0xff] %v2262_v32  ;;  %1917 = vst [vmem:[%s3196_s25 + $0x68] sm:$0xff] %v2263_v33  ;;  %v2264_v37 = vpack.c.bf16 %v1805_v35, %v1804_v30  ;;  %v2265_v38 = vpack.c.bf16 %v1807_v36, %v1806_v31 }
 0x19c   : > { %1918 = vst [vmem:[%s3196_s25 + $0x70] sm:$0xff] %v2264_v37  ;;  %1919 = vst [vmem:[%s3196_s25 + $0x78] sm:$0xff] %v2265_v38 }
 0x19d PF: > { %s13_s14 = sadd.s32 1, %s2656_s14   ;;  %s3227_s12 = smov %s2652_s13 }
 0x19e   : > { %p10_p5 = scmp.ge.s32.totalorder %s13_s14, 6   ;;  %s3228_s13 = smov %s3230_s15 }
 0x1a0   :  { %12 = sbr.rel (!%p10_p5) target bundleno = 2 (0x2), region = 68 }

// kernel: encoder_forward.10
= control target key start
LH: loop header
LB: loop body
LE: loop exit
PB: predicated region body
PF: predicated region fallthrough
CT: control target
= control target key end

     0   :  { %s7381_s12 = smov 0   ;;  %s7383_s13 = smov 0   ;;  %s8580_s0 = inlined_call_operand.vmem [shape: bf16[1024,2304], index: 0, kind: input, shape index: {}]   ;;  %s8581_s1 = inlined_call_operand.vmem [shape: bf16[2304,128], index: 1, kind: input, shape index: {}]   ;;  %s8582_s2 = inlined_call_operand.vmem [shape: f32[1024,1], index: 2, kind: input, shape index: {}]   ;;  %s8583_s3 = inlined_call_operand.vmem [shape: bf16[1024,128], index: 3, kind: output, shape index: {}]  }
   0x1   :  { %s7385_s14 = smov 0  }
   0x2 LB: > { %s32_s15 = sadd.s32 1, %s7354_s13  ;;  %p5108_p0 = scmp.ge.s32.totalorder %s7358_s14, 1  ;;  %s7358_s14 = sphi %s7385_s14, %s13_s14   ;;  %s7354_s13 = sphi %s7383_s13, %s8585_s13   ;;  %s7350_s12 = sphi %s7381_s12, %s8584_s12  }
   0x3   : > { %p34_p1 = scmp.ge.s32.totalorder %s32_s15, 4  ;;  %p194_p2 = scmp.lt.s32.totalorder %s7358_s14, 5 }
   0x5   : > { %s8587_s15 = smov (%p34_p1, %s32_s15), 0  ;;  %p195_p3 = pnand %p5108_p0, %p194_p2 }
   0x6   : > { %v6760_v0 = vld [vmem:[%s8581_s1 + $0x40] sm:$0xff] (!%p195_p3)   ;;  %s5109_s18 = sshll.u32 (!%p195_p3), %s7350_s12, 5  ;;  %v6762_v2 = vld [vmem:[%s8581_s1 + $0x48] sm:$0xff] (!%p195_p3)   ;;  %v6764_v4 = vld [vmem:[%s8581_s1 + $0x50] sm:$0xff] (!%p195_p3)   ;;  %v7360_v5 = vmov (!%p195_p3), 0  }
   0x7   : > { %198 = sbr.rel (%p195_p3) target bundleno = 833 (0x341), region = 32  ;;  %v6761_v1 = vld [vmem:[%s8581_s1] sm:$0xff] (!%p195_p3)   ;;  %p241_p4 = scmp.lt.s32.totalorder (!%p195_p3), %s5109_s18, 127  ;;  %5708 = vmatprep.subr.bf16.mxu0 (!%p195_p3), %v6760_v0  ;;  %6716 = vmatprep.subr.bf16.mxu1 (!%p195_p3), %v6760_v0  ;;  %v6763_v3 = vld [vmem:[%s8581_s1 + $0x8] sm:$0xff] (!%p195_p3)   ;;  %v6765_v6 = vld [vmem:[%s8581_s1 + $0x10] sm:$0xff] (!%p195_p3)  }
   0x8   : > { %5709 = vmatpush3.bf16.msra.mxu0 (!%p195_p3), %v6761_v1  ;;  %6724 = vmatpush3.bf16.msra.mxu1 (!%p195_p3), %v6761_v1  ;;  %v6766_v7 = vld [vmem:[%s8581_s1 + $0x58] sm:$0xff] (!%p195_p3)   ;;  %v6768_v9 = vld [vmem:[%s8581_s1 + $0x60] sm:$0xff] (!%p195_p3)   ;;  %v6770_v11 = vld [vmem:[%s8581_s1 + $0x68] sm:$0xff] (!%p195_p3)  }
   0x9   : > { %5710 = vmatprep.subr.bf16.mxu0 (!%p195_p3), %v6762_v2  ;;  %6717 = vmatprep.subr.bf16.mxu1 (!%p195_p3), %v6762_v2  ;;  %v6767_v8 = vld [vmem:[%s8581_s1 + $0x18] sm:$0xff] (!%p195_p3)   ;;  %v6769_v10 = vld [vmem:[%s8581_s1 + $0x20] sm:$0xff] (!%p195_p3)   ;;  %v6771_v14 = vld [vmem:[%s8581_s1 + $0x28] sm:$0xff] (!%p195_p3)  }
   0xa   : > { %6758 = vset.pattern.permute.xlu0 (!%p195_p3), %v7360_v5  ;;  %6759 = vset.pattern.permute.xlu1 (!%p195_p3), %v7360_v5  ;;  %v6772_v15 = vld [vmem:[%s8581_s1 + $0x70] sm:$0xff] (!%p195_p3)   ;;  %v6774_v17 = vld [vmem:[%s8581_s1 + $0x78] sm:$0xff] (!%p195_p3)   ;;  %v6782_v19 = vld [vmem:[%s8581_s1 + $0xc0] sm:$0xff] (!%p195_p3)  }
   0xb   : > { %v6773_v16 = vld [vmem:[%s8581_s1 + $0x30] sm:$0xff] (!%p195_p3)   ;;  %v6775_v18 = vld [vmem:[%s8581_s1 + $0x38] sm:$0xff] (!%p195_p3)   ;;  %v6784_v21 = vld [vmem:[%s8581_s1 + $0x140] sm:$0xff] (!%p195_p3)  }
   0xc   : > { %5711 = vmatpush3.bf16.msra.mxu0 (!%p195_p3), %v6763_v3  ;;  %6725 = vmatpush3.bf16.msra.mxu1 (!%p195_p3), %v6763_v3  ;;  %v6783_v23 = vld [vmem:[%s8581_s1 + $0x80] sm:$0xff] (!%p195_p3)   ;;  %v6792_v27 = vld [vmem:[%s8581_s1 + $0xc8] sm:$0xff] (!%p195_p3)   ;;  %v6802_v31 = vld [vmem:[%s8581_s1 + $0xd0] sm:$0xff] (!%p195_p3)  }
   0xd   : > { %5712 = vmatprep.subr.bf16.mxu0 (!%p195_p3), %v6764_v4  ;;  %6718 = vmatprep.subr.bf16.mxu1 (!%p195_p3), %v6764_v4  ;;  %v6785_v24 = vld [vmem:[%s8581_s1 + $0x100] sm:$0xff] (!%p195_p3)   ;;  %v6793_v28 = vld [vmem:[%s8581_s1 + $0x88] sm:$0xff] (!%p195_p3)   ;;  %v6804_v34 = vld [vmem:[%s8581_s1 + $0x150] sm:$0xff] (!%p195_p3)  }
   0xe   : > { %s8589_s18 = smov (!%p241_p4, %s5109_s18), 127  ;;  %v6794_v29 = vld [vmem:[%s8581_s1 + $0x148] sm:$0xff]   ;;  %v6803_v37 = vld [vmem:[%s8581_s1 + $0x90] sm:$0xff]   ;;  %v6812_v39 = vld [vmem:[%s8581_s1 + $0xd8] sm:$0xff]  }
   0xf   : > { %s6732_s4 = smul.u32 72, %s8589_s18  ;;  %v6795_v30 = vld [vmem:[%s8581_s1 + $0x108] sm:$0xff]   ;;  %v6805_v38 = vld [vmem:[%s8581_s1 + $0x110] sm:$0xff]   ;;  %v6814_v40 = vld [vmem:[%s8581_s1 + $0x158] sm:$0xff]   ;;  %s5112_s7 = sshll.u32 %s8589_s18, 3 }
  0x10   : > { %5713 = vmatpush3.bf16.msra.mxu0 %v6765_v6  ;;  %6726 = vmatpush3.bf16.msra.mxu1 %v6765_v6  ;;  %v6813_v43 = vld [vmem:[%s8581_s1 + $0x98] sm:$0xff]   ;;  %v6822_v47 = vld [vmem:[%s8581_s1 + $0xe0] sm:$0xff]   ;;  %v6832_v53 = vld [vmem:[%s8581_s1 + $0xe8] sm:$0xff]   ;;  %s7552_s16 = scalar_lea.vmem %s8582_s2, %s5112_s7 }
  0x11   : > { %5714 = vmatprep.subr.bf16.mxu0 %v6766_v7  ;;  %6719 = vmatprep.subr.bf16.mxu1 %v6766_v7  ;;  %s7432_s11 = scalar_lea.vmem %s8580_s0, %s6732_s4  ;;  %v6815_v44 = vld [vmem:[%s8581_s1 + $0x118] sm:$0xff]   ;;  %v6823_v48 = vld [vmem:[%s8581_s1 + $0xa0] sm:$0xff]   ;;  %v6833_v56 = vld [vmem:[%s8581_s1 + $0xa8] sm:$0xff]  }
  0x12   : > { %v6778_v12 = vld [vmem:[%s7432_s11 + $0x4] ss:$72 sps:$4 sm:$0xff]   ;;  %v6776_v20 = vld [vmem:[%s7432_s11] ss:$72 sps:$4 sm:$0xff]   ;;  %v6786_v25 = vld [vmem:[%s7432_s11 + $0x94] ss:$72 sps:$4 sm:$0xff]  }
  0x13   : > { %v6781_v13 = vld [vmem:[%s7432_s11 + $0x484] ss:$72 sps:$4 sm:$0xff]   ;;  %3380 = vmatprep.mubr.bf16.mxu0 %v6778_v12  ;;  %v6779_v22 = vld [vmem:[%s7432_s11 + $0x480] ss:$72 sps:$4 sm:$0xff]   ;;  %v6788_v26 = vld [vmem:[%s7432_s11 + $0x514] ss:$72 sps:$4 sm:$0xff]  }
  0x14   : > { %5715 = vmatpush3.bf16.msra.mxu0 %v6767_v8  ;;  %6727 = vmatpush3.bf16.msra.mxu1 %v6767_v8  ;;  %v6790_v32 = vld [vmem:[%s7432_s11 + $0x90] ss:$72 sps:$4 sm:$0xff]   ;;  %v6796_v35 = vld [vmem:[%s7432_s11 + $0x124] ss:$72 sps:$4 sm:$0xff]   ;;  %v6800_v41 = vld [vmem:[%s7432_s11 + $0x120] ss:$72 sps:$4 sm:$0xff]  }
  0x15   : > { %5716 = vmatprep.subr.bf16.mxu0 %v6768_v9  ;;  %6720 = vmatprep.subr.bf16.mxu1 %v6768_v9  ;;  %v6791_v33 = vld [vmem:[%s7432_s11 + $0x510] ss:$72 sps:$4 sm:$0xff]   ;;  %v6798_v36 = vld [vmem:[%s7432_s11 + $0x5a4] ss:$72 sps:$4 sm:$0xff]   ;;  %v6801_v42 = vld [vmem:[%s7432_s11 + $0x5a0] ss:$72 sps:$4 sm:$0xff]  }
  0x16   : > { %3444 = vmatprep.mubr.bf16.mxu1 %v6781_v13  ;;  %v6806_v45 = vld [vmem:[%s7432_s11 + $0x1b4] ss:$72 sps:$4 sm:$0xff]   ;;  %v6824_v49 = vld [vmem:[%s8581_s1 + $0x160] sm:$0xff]   ;;  %v6810_v51 = vld [vmem:[%s7432_s11 + $0x1b0] ss:$72 sps:$4 sm:$0xff]  }
  0x17   : > { %v6808_v46 = vld [vmem:[%s7432_s11 + $0x634] ss:$72 sps:$4 sm:$0xff]   ;;  %v6825_v50 = vld [vmem:[%s8581_s1 + $0x120] sm:$0xff]   ;;  %v6811_v52 = vld [vmem:[%s7432_s11 + $0x630] ss:$72 sps:$4 sm:$0xff]  }
  0x18   : > { %5717 = vmatpush3.bf16.msra.mxu0 %v6769_v10  ;;  %6728 = vmatpush3.bf16.msra.mxu1 %v6769_v10  ;;  %v6816_v54 = vld [vmem:[%s7432_s11 + $0x244] ss:$72 sps:$4 sm:$0xff]   ;;  %v6842_v59 = vld [vmem:[%s8581_s1 + $0xf0] sm:$0xff]   ;;  %v6820_v60 = vld [vmem:[%s7432_s11 + $0x240] ss:$72 sps:$4 sm:$0xff]  }
  0x19   : > { %5718 = vmatprep.subr.bf16.mxu0 %v6770_v11  ;;  %6721 = vmatprep.subr.bf16.mxu1 %v6770_v11  ;;  %v6818_v55 = vld [vmem:[%s7432_s11 + $0x6c4] ss:$72 sps:$4 sm:$0xff]   ;;  %v6821_v61 = vld [vmem:[%s7432_s11 + $0x6c0] ss:$72 sps:$4 sm:$0xff]   ;;  %v6843_v62 = vld [vmem:[%s8581_s1 + $0xb0] sm:$0xff]  }
  0x1a   : > { %v6834_v57 = vld [vmem:[%s8581_s1 + $0x168] sm:$0xff]   ;;  %v6826_v63 = vld [vmem:[%s7432_s11 + $0x2d4] ss:$72 sps:$4 sm:$0xff]   ;;  %v852_v2 = vld [vmem:[%s7552_s16] sm:$0xff] }
  0x1b   : > { %v6835_v58 = vld [vmem:[%s8581_s1 + $0x128] sm:$0xff]   ;;  %v6844_v0 = vld [vmem:[%s8581_s1 + $0x170] sm:$0xff]   ;;  %886 = vperm.xlu0 %6758, %v852_v2   ;;  %v6852_v4 = vld [vmem:[%s8581_s1 + $0xf8] sm:$0xff]  }
  0x1c   : > { %5719 = vmatpush3.bf16.msra.mxu0 %v6771_v14  ;;  %6729 = vmatpush3.bf16.msra.mxu1 %v6771_v14  ;;  %v6845_v1 = vld [vmem:[%s8581_s1 + $0x130] sm:$0xff]   ;;  %v6853_v6 = vld [vmem:[%s8581_s1 + $0xb8] sm:$0xff]   ;;  %v853_v10 = vld [vmem:[%s7552_s16 + $0x8] sm:$0xff] }
  0x1d   : > { %5720 = vmatprep.subr.bf16.mxu0 %v6772_v15  ;;  %6722 = vmatprep.subr.bf16.mxu1 %v6772_v15  ;;  %v6828_v3 = vld [vmem:[%s7432_s11 + $0x754] ss:$72 sps:$4 sm:$0xff]   ;;  %v6830_v7 = vld [vmem:[%s7432_s11 + $0x2d0] ss:$72 sps:$4 sm:$0xff]   ;;  %v6836_v11 = vld [vmem:[%s7432_s11 + $0x364] ss:$72 sps:$4 sm:$0xff]  }
  0x1e   : > { %v854_v5 = vld [vmem:[%s7552_s16 + $0x10] sm:$0xff]  ;;  %v6854_v9 = vld [vmem:[%s8581_s1 + $0x178] sm:$0xff]   ;;  %v6838_v14 = vld [vmem:[%s7432_s11 + $0x7e4] ss:$72 sps:$4 sm:$0xff]  }
  0x1f   : > { %v6831_v8 = vld [vmem:[%s7432_s11 + $0x750] ss:$72 sps:$4 sm:$0xff]   ;;  %896 = vperm.xlu1 %6759, %v854_v5   ;;  %891 = vperm.xlu0 %6758, %v853_v10   ;;  %v856_v15 = vld [vmem:[%s7552_s16 + $0x20] sm:$0xff] }
  0x20   : > { %5721 = vmatpush3.bf16.msra.mxu0 %v6773_v16  ;;  %6730 = vmatpush3.bf16.msra.mxu1 %v6773_v16  ;;  %v6855_v12 = vld [vmem:[%s8581_s1 + $0x138] sm:$0xff]   ;;  %v6862_v16 = vld [vmem:[%s8581_s1 + $0x1c0] sm:$0xff]  }
  0x21   : > { %5722 = vmatprep.subr.bf16.mxu0 %v6774_v17  ;;  %6723 = vmatprep.subr.bf16.mxu1 %v6774_v17  ;;  %v855_v13 = vld [vmem:[%s7552_s16 + $0x18] sm:$0xff]  ;;  %v857_v17 = vld [vmem:[%s7552_s16 + $0x28] sm:$0xff]  ;;  %v876_v10 = vld [vmem:[%s7552_s16 + $0xc0] sm:$0xff] }
  0x22   : > { %v6911_v2 = vld [vmem:[%s8581_s1 + $0x198] sm:$0xff]  }
  0x23   : > { %901 = vperm.xlu1 %6759, %v855_v13   ;;  %906 = vperm.xlu0 %6758, %v856_v15   ;;  %v875_v5 = vld [vmem:[%s7552_s16 + $0xb8] sm:$0xff]  ;;  %v878_v13 = vld [vmem:[%s7552_s16 + $0xd0] sm:$0xff] }
  0x24   : > { %5723 = vmatpush3.bf16.msra.mxu0 %v6775_v18  ;;  %6731 = vmatpush3.bf16.msra.mxu1 %v6775_v18  ;;  %v6840_v18 = vld [vmem:[%s7432_s11 + $0x360] ss:$72 sps:$4 sm:$0xff]   ;;  %v879_v15 = vld [vmem:[%s7552_s16 + $0xd8] sm:$0xff] }
  0x25   : > { %5820 = vmatprep.subr.bf16.mxu1 %v6782_v19  ;;  %5932 = vmatprep.subr.bf16.mxu0 %v6784_v21  ;;  %v6864_v19 = vld [vmem:[%s8581_s1 + $0x240] sm:$0xff]  }
  0x26   : > { %v6841_v21 = vld [vmem:[%s7432_s11 + $0x7e0] ss:$72 sps:$4 sm:$0xff]  }
  0x27   : > { %3381 = vmatmul.mubr.bf16.vlgmr.msra.gmra.mrb[0].mxu0 %v6776_v20  ;;  %3445 = vmatmul.mubr.bf16.vlgmr.msra.gmra.mrb[0].mxu1 %v6779_v22  ;;  %v858_v20 = vld [vmem:[%s7552_s16 + $0x30] sm:$0xff] }
  0x28   : > { %5821 = vmatpush3.bf16.msra.mxu1 %v6783_v23  ;;  %5933 = vmatpush3.bf16.msra.mxu0 %v6785_v24  ;;  %v6846_v22 = vld [vmem:[%s7432_s11 + $0x3f4] ss:$72 sps:$4 sm:$0xff]  }
  0x29   : > { %3388 = vmatprep.mubr.bf16.mxu0 %v6786_v25  ;;  %3452 = vmatprep.mubr.bf16.mxu1 %v6788_v26  ;;  %v859_v23 = vld [vmem:[%s7552_s16 + $0x38] sm:$0xff]  ;;  %v860_v25 = vld [vmem:[%s7552_s16 + $0x40] sm:$0xff]  ;;  %v861_v26 = vld [vmem:[%s7552_s16 + $0x48] sm:$0xff] }
  0x2a   : > { %5822 = vmatprep.subr.bf16.mxu1 %v6792_v27  ;;  %5934 = vmatprep.subr.bf16.mxu0 %v6794_v29  ;;  %v6848_v24 = vld [vmem:[%s7432_s11 + $0x874] ss:$72 sps:$4 sm:$0xff]   ;;  %v6850_v27 = vld [vmem:[%s7432_s11 + $0x3f0] ss:$72 sps:$4 sm:$0xff]  }
  0x2b   : > { %911 = vperm.xlu1 %6759, %v857_v17   ;;  %916 = vperm.xlu0 %6758, %v858_v20   ;;  %v862_v29 = vld [vmem:[%s7552_s16 + $0x50] sm:$0xff]  ;;  %v6928_v17 = vld [vmem:[%s8581_s1 + $0x260] sm:$0xff]  }
  0x2c   : > { %5823 = vmatpush3.bf16.msra.mxu1 %v6793_v28  ;;  %5935 = vmatpush3.bf16.msra.mxu0 %v6795_v30  ;;  %v6851_v28 = vld [vmem:[%s7432_s11 + $0x870] ss:$72 sps:$4 sm:$0xff]   ;;  %v6858_v30 = vld [vmem:[%s7432_s11 + $0xc] ss:$72 sps:$4 sm:$0xff]  }
  0x2d   : > { %5824 = vmatprep.subr.bf16.mxu1 %v6802_v31  ;;  %5936 = vmatprep.subr.bf16.mxu0 %v6804_v34  ;;  %v863_v31 = vld [vmem:[%s7552_s16 + $0x58] sm:$0xff]  ;;  %v865_v34 = vld [vmem:[%s7552_s16 + $0x68] sm:$0xff] }
  0x2e   : > { %v6893_v20 = vld [vmem:[%s7432_s11 + $0x250] ss:$72 sps:$4 sm:$0xff]  }
  0x2f   : > { %3389 = vmatmul.mubr.bf16.gmra.mrb[4].mxu0 %v6790_v32  ;;  %3453 = vmatmul.mubr.bf16.gmra.mrb[4].mxu1 %v6791_v33  ;;  %v6861_v32 = vld [vmem:[%s7432_s11 + $0x14] ss:$72 sps:$4 sm:$0xff]   ;;  %v864_v33 = vld [vmem:[%s7552_s16 + $0x60] sm:$0xff] }
  0x30   : > { %3396 = vmatprep.mubr.bf16.mxu0 %v6796_v35  ;;  %3460 = vmatprep.mubr.bf16.mxu1 %v6798_v36  ;;  %v6856_v35 = vld [vmem:[%s7432_s11 + $0x8] ss:$72 sps:$4 sm:$0xff]  }
  0x31   : > { %5825 = vmatpush3.bf16.msra.mxu1 %v6803_v37  ;;  %5937 = vmatpush3.bf16.msra.mxu0 %v6805_v38  ;;  %v6859_v36 = vld [vmem:[%s7432_s11 + $0x10] ss:$72 sps:$4 sm:$0xff]   ;;  %v6863_v37 = vld [vmem:[%s8581_s1 + $0x180] sm:$0xff]  }
  0x32   : > { %5826 = vmatprep.subr.bf16.mxu1 %v6812_v39  ;;  %5938 = vmatprep.subr.bf16.mxu0 %v6814_v40  ;;  %v6865_v38 = vld [vmem:[%s8581_s1 + $0x200] sm:$0xff]   ;;  %v866_v39 = vld [vmem:[%s7552_s16 + $0x70] sm:$0xff]  ;;  %v867_v40 = vld [vmem:[%s7552_s16 + $0x78] sm:$0xff] }
  0x33   : > { %921 = vperm.xlu1 %6759, %v859_v23   ;;  %926 = vperm.xlu0 %6758, %v860_v25   ;;  %v6898_v23 = vld [vmem:[%s7432_s11 + $0x2dc] ss:$72 sps:$4 sm:$0xff]   ;;  %v882_v25 = vld [vmem:[%s7552_s16 + $0xf0] sm:$0xff] }
  0x35   : > { %5827 = vmatpush3.bf16.msra.mxu1 %v6813_v43  ;;  %5939 = vmatpush3.bf16.msra.mxu0 %v6815_v44  ;;  %v6878_v43 = vld [vmem:[%s8581_s1 + $0x1c8] sm:$0xff]  }
  0x36   : > { %5828 = vmatprep.subr.bf16.mxu1 %v6822_v47  ;;  %5940 = vmatprep.subr.bf16.mxu0 %v6824_v49  ;;  %v6880_v44 = vld [vmem:[%s8581_s1 + $0x248] sm:$0xff]   ;;  %v868_v47 = vld [vmem:[%s7552_s16 + $0x80] sm:$0xff]  ;;  %v6894_v49 = vld [vmem:[%s8581_s1 + $0x1d0] sm:$0xff]  }
  0x37   : > { %3397 = vmatmul.mubr.bf16.gmra.mrb[8].mxu0 %v6800_v41  ;;  %3461 = vmatmul.mubr.bf16.gmra.mrb[8].mxu1 %v6801_v42  ;;  %v6866_v41 = vld [vmem:[%s7432_s11 + $0x9c] ss:$72 sps:$4 sm:$0xff]  }
  0x38   : > { %3404 = vmatprep.mubr.bf16.mxu0 %v6806_v45  ;;  %3468 = vmatprep.mubr.bf16.mxu1 %v6808_v46  ;;  %v6868_v42 = vld [vmem:[%s7432_s11 + $0xa4] ss:$72 sps:$4 sm:$0xff]  }
  0x39   : > { %5829 = vmatpush3.bf16.msra.mxu1 %v6823_v48  ;;  %5941 = vmatpush3.bf16.msra.mxu0 %v6825_v50  ;;  %v6879_v45 = vld [vmem:[%s8581_s1 + $0x188] sm:$0xff]   ;;  %v6896_v50 = vld [vmem:[%s8581_s1 + $0x250] sm:$0xff]  }
  0x3a   : > { %5830 = vmatprep.subr.bf16.mxu1 %v6832_v53  ;;  %5942 = vmatprep.subr.bf16.mxu0 %v6834_v57  ;;  %v6881_v46 = vld [vmem:[%s8581_s1 + $0x208] sm:$0xff]   ;;  %v6895_v57 = vld [vmem:[%s8581_s1 + $0x190] sm:$0xff]  }
  0x3b   : > { %931 = vperm.xlu1 %6759, %v861_v26   ;;  %936 = vperm.xlu0 %6758, %v862_v29   ;;  %v869_v48 = vld [vmem:[%s7552_s16 + $0x88] sm:$0xff]  ;;  %v6902_v29 = vld [vmem:[%s7432_s11 + $0x2d8] ss:$72 sps:$4 sm:$0xff]  }
  0x3c   : > { %v6872_v53 = vld [vmem:[%s7432_s11 + $0x12c] ss:$72 sps:$4 sm:$0xff]  }
  0x3d   : > { %5831 = vmatpush3.bf16.msra.mxu1 %v6833_v56  ;;  %5943 = vmatpush3.bf16.msra.mxu0 %v6835_v58  ;;  %v871_v56 = vld [vmem:[%s7552_s16 + $0x98] sm:$0xff]  ;;  %v6897_v58 = vld [vmem:[%s8581_s1 + $0x210] sm:$0xff]   ;;  %v6942_v26 = vld [vmem:[%s8581_s1 + $0x1e8] sm:$0xff]  }
  0x3e   : > { %5832 = vmatprep.subr.bf16.mxu1 %v6842_v59  ;;  %5944 = vmatprep.subr.bf16.mxu0 %v6844_v0  ;;  %v872_v59 = vld [vmem:[%s7552_s16 + $0xa0] sm:$0xff] }
  0x3f   : > { %3405 = vmatmul.mubr.bf16.gmra.mrb[12].mxu0 %v6810_v51  ;;  %3469 = vmatmul.mubr.bf16.gmra.mrb[12].mxu1 %v6811_v52  ;;  %v6870_v51 = vld [vmem:[%s7432_s11 + $0x98] ss:$72 sps:$4 sm:$0xff]   ;;  %v6882_v0 = vld [vmem:[%s7432_s11 + $0x1bc] ss:$72 sps:$4 sm:$0xff]  }
  0x40   : > { %3412 = vmatprep.mubr.bf16.mxu0 %v6816_v54  ;;  %3476 = vmatprep.mubr.bf16.mxu1 %v6818_v55  ;;  %v6871_v52 = vld [vmem:[%s7432_s11 + $0xa0] ss:$72 sps:$4 sm:$0xff]   ;;  %v6874_v54 = vld [vmem:[%s7432_s11 + $0x134] ss:$72 sps:$4 sm:$0xff]  }
  0x41   : > { %5833 = vmatpush3.bf16.msra.mxu1 %v6843_v62  ;;  %5945 = vmatpush3.bf16.msra.mxu0 %v6845_v1  ;;  %v870_v55 = vld [vmem:[%s7552_s16 + $0x90] sm:$0xff]  ;;  %v873_v62 = vld [vmem:[%s7552_s16 + $0xa8] sm:$0xff] }
  0x42   : > { %5834 = vmatprep.subr.bf16.mxu1 %v6852_v4  ;;  %5946 = vmatprep.subr.bf16.mxu0 %v6854_v9  ;;  %v6884_v1 = vld [vmem:[%s7432_s11 + $0x1c4] ss:$72 sps:$4 sm:$0xff]   ;;  %v874_v4 = vld [vmem:[%s7552_s16 + $0xb0] sm:$0xff] }
  0x43   : > { %941 = vperm.xlu1 %6759, %v863_v31   ;;  %946 = vperm.xlu0 %6758, %v864_v33   ;;  %v6888_v9 = vld [vmem:[%s7432_s11 + $0x24c] ss:$72 sps:$4 sm:$0xff]  }
  0x44   : > { %v6945_v31 = vld [vmem:[%s8581_s1 + $0x228] sm:$0xff]  }
  0x45   : > { %5835 = vmatpush3.bf16.msra.mxu1 %v6853_v6  ;;  %5947 = vmatpush3.bf16.msra.mxu0 %v6855_v12  ;;  %v6913_v6 = vld [vmem:[%s8581_s1 + $0x218] sm:$0xff]   ;;  %v6904_v33 = vld [vmem:[%s7432_s11 + $0x36c] ss:$72 sps:$4 sm:$0xff]  }
  0x46   : > { %6044 = vmatprep.subr.bf16.mxu1 %v6862_v16  ;;  %6156 = vmatprep.subr.bf16.mxu0 %v6864_v19  ;;  %v6890_v12 = vld [vmem:[%s7432_s11 + $0x254] ss:$72 sps:$4 sm:$0xff]   ;;  %v6927_v16 = vld [vmem:[%s8581_s1 + $0x1a0] sm:$0xff]   ;;  %v6892_v19 = vld [vmem:[%s7432_s11 + $0x248] ss:$72 sps:$4 sm:$0xff]  }
  0x47   : > { %3413 = vmatmul.mubr.bf16.gmra.mrb[16].mxu0 %v6820_v60  ;;  %3477 = vmatmul.mubr.bf16.gmra.mrb[16].mxu1 %v6821_v61  ;;  %v6876_v60 = vld [vmem:[%s7432_s11 + $0x128] ss:$72 sps:$4 sm:$0xff]  }
  0x48   : > { %3420 = vmatprep.mubr.bf16.mxu0 %v6826_v63  ;;  %3484 = vmatprep.mubr.bf16.mxu1 %v6828_v3  ;;  %v6877_v61 = vld [vmem:[%s7432_s11 + $0x130] ss:$72 sps:$4 sm:$0xff]  }
  0x49   : > { %951 = vperm.xlu1 %6759, %v865_v34   ;;  %956 = vperm.xlu0 %6758, %v866_v39   ;;  %v6910_v63 = vld [vmem:[%s8581_s1 + $0x1d8] sm:$0xff]  }
  0x4a   : > { %v6912_v3 = vld [vmem:[%s8581_s1 + $0x258] sm:$0xff]  }
  0x4b   : > { %v6906_v34 = vld [vmem:[%s7432_s11 + $0x374] ss:$72 sps:$4 sm:$0xff]  }
  0x4c   : > { %v6914_v39 = vld [vmem:[%s7432_s11 + $0x3fc] ss:$72 sps:$4 sm:$0xff]  }
  0x4d   : > { %961 = vperm.xlu1 %6759, %v867_v40   ;;  %966 = vperm.xlu0 %6758, %v868_v47   ;;  %v6960_v40 = vld [vmem:[%s8581_s1 + $0x270] sm:$0xff]  }
  0x4e   : > { %v6922_v47 = vld [vmem:[%s7432_s11 + $0x494] ss:$72 sps:$4 sm:$0xff]  }
  0x4f   : > { %3421 = vmatmul.mubr.bf16.gmra.mrb[20].mxu0 %v6830_v7  ;;  %3485 = vmatmul.mubr.bf16.gmra.mrb[20].mxu1 %v6831_v8  ;;  %v6886_v7 = vld [vmem:[%s7432_s11 + $0x1b8] ss:$72 sps:$4 sm:$0xff]  }
  0x50   : > { %3428 = vmatprep.mubr.bf16.mxu0 %v6836_v11  ;;  %3492 = vmatprep.mubr.bf16.mxu1 %v6838_v14  ;;  %v6887_v8 = vld [vmem:[%s7432_s11 + $0x1c0] ss:$72 sps:$4 sm:$0xff]  }
  0x51   : > { %971 = vperm.xlu1 %6759, %v869_v48   ;;  %976 = vperm.xlu0 %6758, %v870_v55   ;;  %v877_v11 = vld [vmem:[%s7552_s16 + $0xc8] sm:$0xff]  ;;  %v6926_v14 = vld [vmem:[%s8581_s1 + $0x1e0] sm:$0xff]   ;;  %v6975_v48 = vld [vmem:[%s8581_s1 + $0x1b8] sm:$0xff]  }
  0x52   : > { %v6932_v55 = vld [vmem:[%s7432_s11 + $0x524] ss:$72 sps:$4 sm:$0xff]  }
  0x55   : > { %981 = vperm.xlu1 %6759, %v871_v56   ;;  %986 = vperm.xlu0 %6758, %v872_v59   ;;  %v6992_v56 = vld [vmem:[%s8581_s1 + $0x340] sm:$0xff]   ;;  %v6936_v59 = vld [vmem:[%s7432_s11 + $0x5ac] ss:$72 sps:$4 sm:$0xff]  }
  0x57   : > { %3429 = vmatmul.mubr.bf16.gmra.mrb[24].mxu0 %v6840_v18  ;;  %3493 = vmatmul.mubr.bf16.gmra.mrb[24].mxu1 %v6841_v21  ;;  %v6929_v18 = vld [vmem:[%s8581_s1 + $0x220] sm:$0xff]  }
  0x58   : > { %3436 = vmatprep.mubr.bf16.mxu0 %v6846_v22  ;;  %3500 = vmatprep.mubr.bf16.mxu1 %v6848_v24  ;;  %v880_v21 = vld [vmem:[%s7552_s16 + $0xe0] sm:$0xff]  ;;  %v881_v22 = vld [vmem:[%s7552_s16 + $0xe8] sm:$0xff] }
  0x59   : > { %991 = vperm.xlu1 %6759, %v873_v62   ;;  %996 = vperm.xlu0 %6758, %v874_v4   ;;  %v6900_v24 = vld [vmem:[%s7432_s11 + $0x2e4] ss:$72 sps:$4 sm:$0xff]   ;;  %v6941_v62 = vld [vmem:[%s7432_s11 + $0x5b0] ss:$72 sps:$4 sm:$0xff]   ;;  %v6954_v4 = vld [vmem:[%s7432_s11 + $0x6d4] ss:$72 sps:$4 sm:$0xff]  }
  0x5d   : > { %1001 = vperm.xlu1 %6759, %v875_v5   ;;  %1006 = vperm.xlu0 %6758, %v876_v10   ;;  %v6956_v5 = vld [vmem:[%s7432_s11 + $0x6c8] ss:$72 sps:$4 sm:$0xff]  }
  0x5e   : > { %v6967_v10 = vld [vmem:[%s7432_s11 + $0x760] ss:$72 sps:$4 sm:$0xff]  }
  0x5f   : > { %3437 = vmatmul.mubr.bf16.gmra.mrb[28].mxu0 %v6850_v27  ;;  %3501 = vmatmul.mubr.bf16.gmra.mrb[28].mxu1 %v6851_v28  ;;  %v883_v27 = vld [vmem:[%s7552_s16 + $0xf8] sm:$0xff]  ;;  %v6943_v28 = vld [vmem:[%s8581_s1 + $0x1a8] sm:$0xff]  }
  0x60   : > { %3541 = vmatprep.mubr.bf16.mxu1 %v6858_v30  ;;  %3702 = vmatprep.mubr.bf16.mxu0 %v6861_v32  ;;  %v6944_v30 = vld [vmem:[%s8581_s1 + $0x268] sm:$0xff]  }
  0x61   : > { %1011 = vperm.xlu1 %6759, %v877_v11   ;;  %1016 = vperm.xlu0 %6758, %v878_v13   ;;  %v6903_v32 = vld [vmem:[%s7432_s11 + $0x2e0] ss:$72 sps:$4 sm:$0xff]   ;;  %v6968_v11 = vld [vmem:[%s7432_s11 + $0x7ec] ss:$72 sps:$4 sm:$0xff]  }
  0x62   : > { %v6972_v13 = vld [vmem:[%s7432_s11 + $0x7e8] ss:$72 sps:$4 sm:$0xff]  }
  0x65   : > { %1021 = vperm.xlu1 %6759, %v879_v15   ;;  %1026 = vperm.xlu0 %6758, %v880_v21   ;;  %v6978_v15 = vld [vmem:[%s7432_s11 + $0x87c] ss:$72 sps:$4 sm:$0xff]   ;;  %v6984_v21 = vld [vmem:[%s7432_s11 + $0x18] ss:$72 sps:$4 sm:$0xff]  }
  0x67   : > { %3542 = vmatmul.mubr.bf16.vlgmr.msra.gmra.mrb[32].mxu1 %v6856_v35  ;;  %3703 = vmatmul.mubr.bf16.vlgmr.msra.gmra.mrb[32].mxu0 %v6859_v36  ;;  %v6958_v35 = vld [vmem:[%s8581_s1 + $0x1f0] sm:$0xff]  }
  0x68   : > { %6045 = vmatpush3.bf16.msra.mxu1 %v6863_v37  ;;  %6157 = vmatpush3.bf16.msra.mxu0 %v6865_v38  ;;  %v6908_v36 = vld [vmem:[%s7432_s11 + $0x368] ss:$72 sps:$4 sm:$0xff]  }
  0x69   : > { %3549 = vmatprep.mubr.bf16.mxu1 %v6866_v41  ;;  %3710 = vmatprep.mubr.bf16.mxu0 %v6868_v42  ;;  %v6909_v37 = vld [vmem:[%s7432_s11 + $0x370] ss:$72 sps:$4 sm:$0xff]   ;;  %v6916_v42 = vld [vmem:[%s7432_s11 + $0x404] ss:$72 sps:$4 sm:$0xff]  }
  0x6a   : > { %6046 = vmatprep.subr.bf16.mxu1 %v6878_v43  ;;  %6158 = vmatprep.subr.bf16.mxu0 %v6880_v44  ;;  %v6959_v38 = vld [vmem:[%s8581_s1 + $0x1b0] sm:$0xff]   ;;  %v6918_v43 = vld [vmem:[%s7432_s11 + $0x3f8] ss:$72 sps:$4 sm:$0xff]  }
  0x6b   : > { %1031 = vperm.xlu1 %6759, %v881_v22   ;;  %1036 = vperm.xlu0 %6758, %v882_v25   ;;  %v6961_v41 = vld [vmem:[%s8581_s1 + $0x230] sm:$0xff]   ;;  %v6919_v44 = vld [vmem:[%s7432_s11 + $0x400] ss:$72 sps:$4 sm:$0xff]  }
  0x6c   : > { %6047 = vmatpush3.bf16.msra.mxu1 %v6879_v45  ;;  %6159 = vmatpush3.bf16.msra.mxu0 %v6881_v46  ;;  %v6974_v45 = vld [vmem:[%s8581_s1 + $0x1f8] sm:$0xff]   ;;  %v6920_v46 = vld [vmem:[%s7432_s11 + $0x48c] ss:$72 sps:$4 sm:$0xff]   ;;  %v6987_v22 = vld [vmem:[%s7432_s11 + $0x20] ss:$72 sps:$4 sm:$0xff]  }
  0x6d   : > { %6048 = vmatprep.subr.bf16.mxu1 %v6894_v49  ;;  %6160 = vmatprep.subr.bf16.mxu0 %v6896_v50  ;;  %v6976_v49 = vld [vmem:[%s8581_s1 + $0x278] sm:$0xff]   ;;  %v6994_v25 = vld [vmem:[%s7432_s11 + $0xac] ss:$72 sps:$4 sm:$0xff]  }
  0x6e   : > { %v6977_v50 = vld [vmem:[%s8581_s1 + $0x238] sm:$0xff]  }
  0x6f   : > { %3550 = vmatmul.mubr.bf16.gmra.mrb[36].mxu1 %v6870_v51  ;;  %3711 = vmatmul.mubr.bf16.gmra.mrb[36].mxu0 %v6871_v52  ;;  %v6924_v51 = vld [vmem:[%s7432_s11 + $0x488] ss:$72 sps:$4 sm:$0xff]  }
  0x70   : > { %3557 = vmatprep.mubr.bf16.mxu1 %v6872_v53  ;;  %3718 = vmatprep.mubr.bf16.mxu0 %v6874_v54  ;;  %v6925_v52 = vld [vmem:[%s7432_s11 + $0x490] ss:$72 sps:$4 sm:$0xff]   ;;  %v6930_v53 = vld [vmem:[%s7432_s11 + $0x51c] ss:$72 sps:$4 sm:$0xff]  }
  0x71   : > { %6049 = vmatpush3.bf16.msra.mxu1 %v6895_v57  ;;  %6161 = vmatpush3.bf16.msra.mxu0 %v6897_v58  ;;  %v6990_v54 = vld [vmem:[%s8581_s1 + $0x2c0] sm:$0xff]  }
  0x72   : > { %6050 = vmatprep.subr.bf16.mxu1 %v6910_v63  ;;  %6162 = vmatprep.subr.bf16.mxu0 %v6912_v3  ;;  %v6934_v57 = vld [vmem:[%s7432_s11 + $0x518] ss:$72 sps:$4 sm:$0xff]   ;;  %v6946_v63 = vld [vmem:[%s7432_s11 + $0x63c] ss:$72 sps:$4 sm:$0xff]   ;;  %v6952_v3 = vld [vmem:[%s7432_s11 + $0x6cc] ss:$72 sps:$4 sm:$0xff]  }
  0x73   : > { %1041 = vperm.xlu1 %6759, %v883_v27   ;;  %v6935_v58 = vld [vmem:[%s7432_s11 + $0x520] ss:$72 sps:$4 sm:$0xff]  }
  0x74   : > { %v7006_v27 = vld [vmem:[%s8581_s1 + $0x2c8] sm:$0xff]  }
  0x75   : > { %6051 = vmatpush3.bf16.msra.mxu1 %v6911_v2  ;;  %6163 = vmatpush3.bf16.msra.mxu0 %v6913_v6  ;;  %v6951_v2 = vld [vmem:[%s7432_s11 + $0x640] ss:$72 sps:$4 sm:$0xff]   ;;  %v6957_v6 = vld [vmem:[%s7432_s11 + $0x6d0] ss:$72 sps:$4 sm:$0xff]  }
  0x76   : > { %6052 = vmatprep.subr.bf16.mxu1 %v6926_v14  ;;  %6164 = vmatprep.subr.bf16.mxu0 %v6928_v17  ;;  %v6973_v14 = vld [vmem:[%s7432_s11 + $0x7f0] ss:$72 sps:$4 sm:$0xff]  }
  0x77   : > { %3558 = vmatmul.mubr.bf16.gmra.mrb[40].mxu1 %v6876_v60  ;;  %3719 = vmatmul.mubr.bf16.gmra.mrb[40].mxu0 %v6877_v61  ;;  %v6938_v60 = vld [vmem:[%s7432_s11 + $0x5b4] ss:$72 sps:$4 sm:$0xff]   ;;  %v6940_v61 = vld [vmem:[%s7432_s11 + $0x5a8] ss:$72 sps:$4 sm:$0xff]   ;;  %v6982_v17 = vld [vmem:[%s7432_s11 + $0x878] ss:$72 sps:$4 sm:$0xff]  }
  0x78   : > { %3565 = vmatprep.mubr.bf16.mxu1 %v6882_v0  ;;  %3726 = vmatprep.mubr.bf16.mxu0 %v6884_v1  ;;  %v6948_v0 = vld [vmem:[%s7432_s11 + $0x644] ss:$72 sps:$4 sm:$0xff]   ;;  %v6950_v1 = vld [vmem:[%s7432_s11 + $0x638] ss:$72 sps:$4 sm:$0xff]  }
  0x79   : > { %6053 = vmatpush3.bf16.msra.mxu1 %v6927_v16  ;;  %6165 = vmatpush3.bf16.msra.mxu0 %v6929_v18  ;;  %v6980_v16 = vld [vmem:[%s7432_s11 + $0x884] ss:$72 sps:$4 sm:$0xff]   ;;  %v6983_v18 = vld [vmem:[%s7432_s11 + $0x880] ss:$72 sps:$4 sm:$0xff]  }
  0x7a   : > { %6054 = vmatprep.subr.bf16.mxu1 %v6942_v26  ;;  %6166 = vmatprep.subr.bf16.mxu0 %v6944_v30  ;;  %v6996_v26 = vld [vmem:[%s7432_s11 + $0xb4] ss:$72 sps:$4 sm:$0xff]   ;;  %v7009_v30 = vld [vmem:[%s8581_s1 + $0x308] sm:$0xff]  }
  0x7d   : > { %6055 = vmatpush3.bf16.msra.mxu1 %v6943_v28  ;;  %6167 = vmatpush3.bf16.msra.mxu0 %v6945_v31  ;;  %v7008_v28 = vld [vmem:[%s8581_s1 + $0x348] sm:$0xff]  }
  0x7e   : > { %6056 = vmatprep.subr.bf16.mxu1 %v6958_v35  ;;  %6168 = vmatprep.subr.bf16.mxu0 %v6960_v40  ;;  %v6998_v31 = vld [vmem:[%s7432_s11 + $0xa8] ss:$72 sps:$4 sm:$0xff]   ;;  %v7000_v35 = vld [vmem:[%s7432_s11 + $0x13c] ss:$72 sps:$4 sm:$0xff]  }
  0x7f   : > { %3566 = vmatmul.mubr.bf16.gmra.mrb[44].mxu1 %v6886_v7  ;;  %3727 = vmatmul.mubr.bf16.gmra.mrb[44].mxu0 %v6887_v8  ;;  %v6962_v7 = vld [vmem:[%s7432_s11 + $0x75c] ss:$72 sps:$4 sm:$0xff]  }
  0x80   : > { %3573 = vmatprep.mubr.bf16.mxu1 %v6888_v9  ;;  %3734 = vmatprep.mubr.bf16.mxu0 %v6890_v12  ;;  %v6964_v8 = vld [vmem:[%s7432_s11 + $0x764] ss:$72 sps:$4 sm:$0xff]   ;;  %v6966_v9 = vld [vmem:[%s7432_s11 + $0x758] ss:$72 sps:$4 sm:$0xff]   ;;  %v6970_v12 = vld [vmem:[%s7432_s11 + $0x7f4] ss:$72 sps:$4 sm:$0xff]  }
  0x81   : > { %6057 = vmatpush3.bf16.msra.mxu1 %v6959_v38  ;;  %6169 = vmatpush3.bf16.msra.mxu0 %v6961_v41  ;;  %v7025_v38 = vld [vmem:[%s8581_s1 + $0x310] sm:$0xff]   ;;  %v7040_v40 = vld [vmem:[%s8581_s1 + $0x358] sm:$0xff]  }
  0x82   : > { %6058 = vmatprep.subr.bf16.mxu1 %v6974_v45  ;;  %6170 = vmatprep.subr.bf16.mxu0 %v6976_v49  ;;  %v7039_v41 = vld [vmem:[%s8581_s1 + $0x298] sm:$0xff]   ;;  %v7054_v45 = vld [vmem:[%s8581_s1 + $0x2e0] sm:$0xff]  }
  0x83   : > { %v7055_v49 = vld [vmem:[%s8581_s1 + $0x2a0] sm:$0xff]  }
  0x85   : > { %6059 = vmatpush3.bf16.msra.mxu1 %v6975_v48  ;;  %6171 = vmatpush3.bf16.msra.mxu0 %v6977_v50  ;;  %v7012_v48 = vld [vmem:[%s7432_s11 + $0x1d4] ss:$72 sps:$4 sm:$0xff]   ;;  %v7057_v50 = vld [vmem:[%s8581_s1 + $0x320] sm:$0xff]  }
  0x86   : > { %6268 = vmatprep.subr.bf16.mxu1 %v6990_v54  ;;  %6380 = vmatprep.subr.bf16.mxu0 %v6992_v56  ;;  %v7073_v54 = vld [vmem:[%s8581_s1 + $0x328] sm:$0xff]  }
  0x87   : > { %3574 = vmatmul.mubr.bf16.gmra.mrb[48].mxu1 %v6892_v19  ;;  %3735 = vmatmul.mubr.bf16.gmra.mrb[48].mxu0 %v6893_v20  ;;  %v6986_v19 = vld [vmem:[%s7432_s11 + $0x1c] ss:$72 sps:$4 sm:$0xff]  }
  0x88   : > { %3581 = vmatprep.mubr.bf16.mxu1 %v6898_v23  ;;  %3742 = vmatprep.mubr.bf16.mxu0 %v6900_v24  ;;  %v6989_v20 = vld [vmem:[%s7432_s11 + $0x24] ss:$72 sps:$4 sm:$0xff]  }
  0x89   : > { %v6991_v23 = vld [vmem:[%s8581_s1 + $0x280] sm:$0xff]  }
  0x8a   : > { %v6993_v24 = vld [vmem:[%s8581_s1 + $0x300] sm:$0xff]  }
  0x8f   : > { %3582 = vmatmul.mubr.bf16.gmra.mrb[52].mxu1 %v6902_v29  ;;  %3743 = vmatmul.mubr.bf16.gmra.mrb[52].mxu0 %v6903_v32  ;;  %v7007_v29 = vld [vmem:[%s8581_s1 + $0x288] sm:$0xff]   ;;  %v7022_v32 = vld [vmem:[%s8581_s1 + $0x2d0] sm:$0xff]  }
  0x90   : > { %3589 = vmatprep.mubr.bf16.mxu1 %v6904_v33  ;;  %3750 = vmatprep.mubr.bf16.mxu0 %v6906_v34  ;;  %v7024_v33 = vld [vmem:[%s8581_s1 + $0x350] sm:$0xff]  }
  0x91   : > { %v6999_v34 = vld [vmem:[%s7432_s11 + $0xb0] ss:$72 sps:$4 sm:$0xff]  }
  0x97   : > { %3590 = vmatmul.mubr.bf16.gmra.mrb[56].mxu1 %v6908_v36  ;;  %3751 = vmatmul.mubr.bf16.gmra.mrb[56].mxu0 %v6909_v37  ;;  %v7002_v36 = vld [vmem:[%s7432_s11 + $0x144] ss:$72 sps:$4 sm:$0xff]   ;;  %v7023_v37 = vld [vmem:[%s8581_s1 + $0x290] sm:$0xff]  }
  0x98   : > { %3597 = vmatprep.mubr.bf16.mxu1 %v6914_v39  ;;  %3758 = vmatprep.mubr.bf16.mxu0 %v6916_v42  ;;  %v7038_v39 = vld [vmem:[%s8581_s1 + $0x2d8] sm:$0xff]  }
  0x99   : > { %v7041_v42 = vld [vmem:[%s8581_s1 + $0x318] sm:$0xff]  }
  0x9f   : > { %3598 = vmatmul.mubr.bf16.gmra.mrb[60].mxu1 %v6918_v43  ;;  %3759 = vmatmul.mubr.bf16.gmra.mrb[60].mxu0 %v6919_v44  ;;  %v7004_v43 = vld [vmem:[%s7432_s11 + $0x138] ss:$72 sps:$4 sm:$0xff]  }
  0xa0   : > { %3605 = vmatprep.mubr.bf16.mxu1 %v6920_v46  ;;  %3766 = vmatprep.mubr.bf16.mxu0 %v6922_v47  ;;  %v7005_v44 = vld [vmem:[%s7432_s11 + $0x140] ss:$72 sps:$4 sm:$0xff]   ;;  %v7010_v47 = vld [vmem:[%s7432_s11 + $0x1cc] ss:$72 sps:$4 sm:$0xff]  }
  0xa1   : > { %v7056_v46 = vld [vmem:[%s8581_s1 + $0x360] sm:$0xff]  }
  0xa7   : > { %3606 = vmatmul.mubr.bf16.gmra.mrb[64].mxu1 %v6924_v51  ;;  %3767 = vmatmul.mubr.bf16.gmra.mrb[64].mxu0 %v6925_v52  ;;  %v7070_v51 = vld [vmem:[%s8581_s1 + $0x2e8] sm:$0xff]  }
  0xa8   : > { %3613 = vmatprep.mubr.bf16.mxu1 %v6930_v53  ;;  %3774 = vmatprep.mubr.bf16.mxu0 %v6932_v55  ;;  %v7072_v52 = vld [vmem:[%s8581_s1 + $0x368] sm:$0xff]  }
  0xa9   : > { %v7071_v53 = vld [vmem:[%s8581_s1 + $0x2a8] sm:$0xff]  }
  0xaa   : > { %v7014_v55 = vld [vmem:[%s7432_s11 + $0x1c8] ss:$72 sps:$4 sm:$0xff]  }
  0xaf   : > { %3614 = vmatmul.mubr.bf16.gmra.mrb[68].mxu1 %v6934_v57  ;;  %3775 = vmatmul.mubr.bf16.gmra.mrb[68].mxu0 %v6935_v58  ;;  %v7015_v58 = vld [vmem:[%s7432_s11 + $0x1d0] ss:$72 sps:$4 sm:$0xff]  }
  0xb0   : > { %3621 = vmatprep.mubr.bf16.mxu1 %v6936_v59  ;;  %3782 = vmatprep.mubr.bf16.mxu0 %v6938_v60  ;;  %v7086_v59 = vld [vmem:[%s8581_s1 + $0x2f0] sm:$0xff]  }
  0xb7   : > { %3622 = vmatmul.mubr.bf16.gmra.mrb[72].mxu1 %v6940_v61  ;;  %3783 = vmatmul.mubr.bf16.gmra.mrb[72].mxu0 %v6941_v62  ;;  %v7016_v62 = vld [vmem:[%s7432_s11 + $0x25c] ss:$72 sps:$4 sm:$0xff]  }
  0xb8   : > { %3629 = vmatprep.mubr.bf16.mxu1 %v6946_v63  ;;  %3790 = vmatprep.mubr.bf16.mxu0 %v6948_v0 }
  0xbf   : > { %3630 = vmatmul.mubr.bf16.gmra.mrb[76].mxu1 %v6950_v1  ;;  %3791 = vmatmul.mubr.bf16.gmra.mrb[76].mxu0 %v6951_v2 }
  0xc0   : > { %3637 = vmatprep.mubr.bf16.mxu1 %v6952_v3  ;;  %3798 = vmatprep.mubr.bf16.mxu0 %v6954_v4  ;;  %v7018_v3 = vld [vmem:[%s7432_s11 + $0x264] ss:$72 sps:$4 sm:$0xff]   ;;  %v7087_v4 = vld [vmem:[%s8581_s1 + $0x2b0] sm:$0xff]  }
  0xc7   : > { %3638 = vmatmul.mubr.bf16.gmra.mrb[80].mxu1 %v6956_v5  ;;  %3799 = vmatmul.mubr.bf16.gmra.mrb[80].mxu0 %v6957_v6  ;;  %v7088_v5 = vld [vmem:[%s8581_s1 + $0x370] sm:$0xff]  }
  0xc8   : > { %3645 = vmatprep.mubr.bf16.mxu1 %v6962_v7  ;;  %3806 = vmatprep.mubr.bf16.mxu0 %v6964_v8  ;;  %v7089_v8 = vld [vmem:[%s8581_s1 + $0x330] sm:$0xff]  }
  0xcf   : > { %3646 = vmatmul.mubr.bf16.gmra.mrb[84].mxu1 %v6966_v9  ;;  %3807 = vmatmul.mubr.bf16.gmra.mrb[84].mxu0 %v6967_v10  ;;  %v7102_v9 = vld [vmem:[%s8581_s1 + $0x2f8] sm:$0xff]  }
  0xd0   : > { %3653 = vmatprep.mubr.bf16.mxu1 %v6968_v11  ;;  %3814 = vmatprep.mubr.bf16.mxu0 %v6970_v12  ;;  %v7104_v10 = vld [vmem:[%s8581_s1 + $0x378] sm:$0xff]  }
  0xd7   : > { %3654 = vmatmul.mubr.bf16.gmra.mrb[88].mxu1 %v6972_v13  ;;  %3815 = vmatmul.mubr.bf16.gmra.mrb[88].mxu0 %v6973_v14  ;;  %v7103_v13 = vld [vmem:[%s8581_s1 + $0x2b8] sm:$0xff]  }
  0xd8   : > { %3661 = vmatprep.mubr.bf16.mxu1 %v6978_v15  ;;  %3822 = vmatprep.mubr.bf16.mxu0 %v6980_v16  ;;  %v7105_v14 = vld [vmem:[%s8581_s1 + $0x338] sm:$0xff]   ;;  %v7021_v16 = vld [vmem:[%s7432_s11 + $0x260] ss:$72 sps:$4 sm:$0xff]  }
  0xd9   : > { %v7020_v15 = vld [vmem:[%s7432_s11 + $0x258] ss:$72 sps:$4 sm:$0xff]  }
  0xdf   : > { %3662 = vmatmul.mubr.bf16.gmra.mrb[92].mxu1 %v6982_v17  ;;  %3823 = vmatmul.mubr.bf16.gmra.mrb[92].mxu0 %v6983_v18 }
  0xe0   : > { %3863 = vmatprep.mubr.bf16.mxu1 %v6986_v19  ;;  %4024 = vmatprep.mubr.bf16.mxu0 %v6989_v20 }
  0xe7   : > { %3864 = vmatmul.mubr.bf16.vlgmr.msra.gmra.mrb[96].mxu1 %v6984_v21  ;;  %4025 = vmatmul.mubr.bf16.vlgmr.msra.gmra.mrb[96].mxu0 %v6987_v22 }
  0xe8   : > { %6269 = vmatpush3.bf16.msra.mxu1 %v6991_v23  ;;  %6381 = vmatpush3.bf16.msra.mxu0 %v6993_v24 }
  0xe9   : > { %3871 = vmatprep.mubr.bf16.mxu1 %v6994_v25  ;;  %4032 = vmatprep.mubr.bf16.mxu0 %v6996_v26  ;;  %v7026_v25 = vld [vmem:[%s7432_s11 + $0x2ec] ss:$72 sps:$4 sm:$0xff]  }
  0xea   : > { %6270 = vmatprep.subr.bf16.mxu1 %v7006_v27  ;;  %6382 = vmatprep.subr.bf16.mxu0 %v7008_v28  ;;  %v7028_v26 = vld [vmem:[%s7432_s11 + $0x2f4] ss:$72 sps:$4 sm:$0xff]  }
  0xec   : > { %6271 = vmatpush3.bf16.msra.mxu1 %v7007_v29  ;;  %6383 = vmatpush3.bf16.msra.mxu0 %v7009_v30  ;;  %v7118_v29 = vld [vmem:[%s8581_s1 + $0x3c0] sm:$0xff]  }
  0xed   : > { %6272 = vmatprep.subr.bf16.mxu1 %v7022_v32  ;;  %6384 = vmatprep.subr.bf16.mxu0 %v7024_v33  ;;  %v7120_v30 = vld [vmem:[%s8581_s1 + $0x440] sm:$0xff]  }
  0xef   : > { %3872 = vmatmul.mubr.bf16.gmra.mrb[100].mxu1 %v6998_v31  ;;  %4033 = vmatmul.mubr.bf16.gmra.mrb[100].mxu0 %v6999_v34 }
  0xf0   : > { %3879 = vmatprep.mubr.bf16.mxu1 %v7000_v35  ;;  %4040 = vmatprep.mubr.bf16.mxu0 %v7002_v36  ;;  %v7030_v35 = vld [vmem:[%s7432_s11 + $0x2e8] ss:$72 sps:$4 sm:$0xff]  }
  0xf1   : > { %6273 = vmatpush3.bf16.msra.mxu1 %v7023_v37  ;;  %6385 = vmatpush3.bf16.msra.mxu0 %v7025_v38  ;;  %v7031_v38 = vld [vmem:[%s7432_s11 + $0x2f0] ss:$72 sps:$4 sm:$0xff]  }
  0xf2   : > { %6274 = vmatprep.subr.bf16.mxu1 %v7038_v39  ;;  %6386 = vmatprep.subr.bf16.mxu0 %v7040_v40 }
  0xf5   : > { %6275 = vmatpush3.bf16.msra.mxu1 %v7039_v41  ;;  %6387 = vmatpush3.bf16.msra.mxu0 %v7041_v42 }
  0xf6   : > { %6276 = vmatprep.subr.bf16.mxu1 %v7054_v45  ;;  %6388 = vmatprep.subr.bf16.mxu0 %v7056_v46 }
  0xf7   : > { %3880 = vmatmul.mubr.bf16.gmra.mrb[104].mxu1 %v7004_v43  ;;  %4041 = vmatmul.mubr.bf16.gmra.mrb[104].mxu0 %v7005_v44  ;;  %v7032_v43 = vld [vmem:[%s7432_s11 + $0x37c] ss:$72 sps:$4 sm:$0xff]  }
  0xf8   : > { %3887 = vmatprep.mubr.bf16.mxu1 %v7010_v47  ;;  %4048 = vmatprep.mubr.bf16.mxu0 %v7012_v48  ;;  %v7034_v44 = vld [vmem:[%s7432_s11 + $0x384] ss:$72 sps:$4 sm:$0xff]  }
  0xf9   : > { %6277 = vmatpush3.bf16.msra.mxu1 %v7055_v49  ;;  %6389 = vmatpush3.bf16.msra.mxu0 %v7057_v50  ;;  %v7036_v49 = vld [vmem:[%s7432_s11 + $0x378] ss:$72 sps:$4 sm:$0xff]  }
  0xfa   : > { %v5724_v56 = vpop.f32.mrb[0].mxu0  ;;  %v5772_v57 = vpop.f32.mrb[0].mxu1  ;;  %6278 = vmatprep.subr.bf16.mxu1 %v7070_v51  ;;  %6390 = vmatprep.subr.bf16.mxu0 %v7072_v52  ;;  %v7037_v50 = vld [vmem:[%s7432_s11 + $0x380] ss:$72 sps:$4 sm:$0xff]  }
  0xfb   : > { %v5725_v60 = vpop.f32.mrb[1].mxu0  ;;  %v5773_v61 = vpop.f32.mrb[1].mxu1 }
  0xfc   : > { %v7873_v63 = vadd.f32 %v5725_v60, %v5724_v56  ;;  %v5727_v0 = vpop.f32.mrb[2].mxu0  ;;  %v5775_v1 = vpop.f32.mrb[2].mxu1  ;;  %v7875_v2 = vadd.f32 %v5773_v61, %v5772_v57  ;;  %v7044_v60 = vld [vmem:[%s7432_s11 + $0x414] ss:$72 sps:$4 sm:$0xff]  }
  0xfd   : > { %v5728_v6 = vpop.f32.mrb[3].mxu0  ;;  %v5776_v7 = vpop.f32.mrb[3].mxu1  ;;  %6279 = vmatpush3.bf16.msra.mxu1 %v7071_v53  ;;  %6391 = vmatpush3.bf16.msra.mxu0 %v7073_v54 }
  0xfe   : > { %v7893_v11 = vadd.f32 %v5728_v6, %v5727_v0  ;;  %v7895_v12 = vadd.f32 %v5776_v7, %v5775_v1  ;;  %6280 = vmatprep.subr.bf16.mxu1 %v7086_v59  ;;  %6392 = vmatprep.subr.bf16.mxu0 %v7088_v5  ;;  %v7042_v59 = vld [vmem:[%s7432_s11 + $0x40c] ss:$72 sps:$4 sm:$0xff]   ;;  %v7046_v5 = vld [vmem:[%s7432_s11 + $0x408] ss:$72 sps:$4 sm:$0xff]  }
  0xff   : > { %3888 = vmatmul.mubr.bf16.gmra.mrb[108].mxu1 %v7014_v55  ;;  %4049 = vmatmul.mubr.bf16.gmra.mrb[108].mxu0 %v7015_v58 }
 0x100   : > { %3895 = vmatprep.mubr.bf16.mxu1 %v7016_v62  ;;  %4056 = vmatprep.mubr.bf16.mxu0 %v7018_v3 }
 0x101   : > { %6281 = vmatpush3.bf16.msra.mxu1 %v7087_v4  ;;  %6393 = vmatpush3.bf16.msra.mxu0 %v7089_v8  ;;  %v7047_v8 = vld [vmem:[%s7432_s11 + $0x410] ss:$72 sps:$4 sm:$0xff]  }
 0x102   : > { %v5730_v17 = vpop.f32.mrb[4].mxu0  ;;  %v5778_v18 = vpop.f32.mrb[4].mxu1  ;;  %6282 = vmatprep.subr.bf16.mxu1 %v7102_v9  ;;  %6394 = vmatprep.subr.bf16.mxu0 %v7104_v10 }
 0x103   : > { %v5731_v19 = vpop.f32.mrb[5].mxu0  ;;  %v5779_v20 = vpop.f32.mrb[5].mxu1 }
 0x104   : > { %v7905_v21 = vadd.f32 %v5731_v19, %v5730_v17  ;;  %v5733_v22 = vpop.f32.mrb[6].mxu0  ;;  %v5781_v23 = vpop.f32.mrb[6].mxu1  ;;  %v7907_v24 = vadd.f32 %v5779_v20, %v5778_v18 }
 0x105   : > { %v5734_v27 = vpop.f32.mrb[7].mxu0  ;;  %v5782_v28 = vpop.f32.mrb[7].mxu1  ;;  %6283 = vmatpush3.bf16.msra.mxu1 %v7103_v13  ;;  %6395 = vmatpush3.bf16.msra.mxu0 %v7105_v14 }
 0x106   : > { %v7917_v31 = vadd.f32 %v5734_v27, %v5733_v22  ;;  %v7919_v32 = vadd.f32 %v5782_v28, %v5781_v23  ;;  %6492 = vmatprep.subr.bf16.mxu1 %v7118_v29  ;;  %6604 = vmatprep.subr.bf16.mxu0 %v7120_v30  ;;  %v7052_v22 = vld [vmem:[%s7432_s11 + $0x498] ss:$72 sps:$4 sm:$0xff]  }
 0x107   : > { %3896 = vmatmul.mubr.bf16.gmra.mrb[112].mxu1 %v7020_v15  ;;  %4057 = vmatmul.mubr.bf16.gmra.mrb[112].mxu0 %v7021_v16  ;;  %v7048_v15 = vld [vmem:[%s7432_s11 + $0x49c] ss:$72 sps:$4 sm:$0xff]   ;;  %v7053_v23 = vld [vmem:[%s7432_s11 + $0x4a0] ss:$72 sps:$4 sm:$0xff]  }
 0x108   : > { %3903 = vmatprep.mubr.bf16.mxu1 %v7026_v25  ;;  %4064 = vmatprep.mubr.bf16.mxu0 %v7028_v26  ;;  %v7050_v16 = vld [vmem:[%s7432_s11 + $0x4a4] ss:$72 sps:$4 sm:$0xff]  }
 0x10a   : > { %v5736_v33 = vpop.f32.mrb[8].mxu0  ;;  %v5784_v34 = vpop.f32.mrb[8].mxu1 }
 0x10b   : > { %v5737_v36 = vpop.f32.mrb[9].mxu0  ;;  %v5785_v37 = vpop.f32.mrb[9].mxu1 }
 0x10c   : > { %v7923_v39 = vadd.f32 %v5737_v36, %v5736_v33  ;;  %v5739_v40 = vpop.f32.mrb[10].mxu0  ;;  %v5787_v41 = vpop.f32.mrb[10].mxu1  ;;  %v7925_v42 = vadd.f32 %v5785_v37, %v5784_v34  ;;  %v7060_v36 = vld [vmem:[%s7432_s11 + $0x534] ss:$72 sps:$4 sm:$0xff]  }
 0x10d   : > { %v5740_v45 = vpop.f32.mrb[11].mxu0  ;;  %v5788_v46 = vpop.f32.mrb[11].mxu1 }
 0x10e   : > { %v7929_v47 = vadd.f32 %v5740_v45, %v5739_v40  ;;  %v7931_v48 = vadd.f32 %v5788_v46, %v5787_v41  ;;  %v7062_v45 = vld [vmem:[%s7432_s11 + $0x528] ss:$72 sps:$4 sm:$0xff]  }
 0x10f   : > { %3904 = vmatmul.mubr.bf16.gmra.mrb[116].mxu1 %v7030_v35  ;;  %4065 = vmatmul.mubr.bf16.gmra.mrb[116].mxu0 %v7031_v38  ;;  %v7058_v35 = vld [vmem:[%s7432_s11 + $0x52c] ss:$72 sps:$4 sm:$0xff]  }
 0x110   : > { %3911 = vmatprep.mubr.bf16.mxu1 %v7032_v43  ;;  %4072 = vmatprep.mubr.bf16.mxu0 %v7034_v44 }
 0x112   : > { %v5742_v51 = vpop.f32.mrb[12].mxu0  ;;  %v5790_v52 = vpop.f32.mrb[12].mxu1 }
 0x113   : > { %v5743_v53 = vpop.f32.mrb[13].mxu0  ;;  %v5791_v54 = vpop.f32.mrb[13].mxu1 }
 0x114   : > { %v7935_v55 = vadd.f32 %v5743_v53, %v5742_v51  ;;  %v5745_v56 = vpop.f32.mrb[14].mxu0  ;;  %v5793_v57 = vpop.f32.mrb[14].mxu1  ;;  %v7937_v58 = vadd.f32 %v5791_v54, %v5790_v52 }
 0x115   : > { %v5746_v61 = vpop.f32.mrb[15].mxu0  ;;  %v5794_v62 = vpop.f32.mrb[15].mxu1 }
 0x116   : > { %v7941_v0 = vadd.f32 %v5746_v61, %v5745_v56  ;;  %v7943_v1 = vadd.f32 %v5794_v62, %v5793_v57  ;;  %v7064_v56 = vld [vmem:[%s7432_s11 + $0x5bc] ss:$72 sps:$4 sm:$0xff]  }
 0x117   : > { %3912 = vmatmul.mubr.bf16.gmra.mrb[120].mxu1 %v7036_v49  ;;  %4073 = vmatmul.mubr.bf16.gmra.mrb[120].mxu0 %v7037_v50  ;;  %v7063_v50 = vld [vmem:[%s7432_s11 + $0x530] ss:$72 sps:$4 sm:$0xff]   ;;  %v7066_v57 = vld [vmem:[%s7432_s11 + $0x5c4] ss:$72 sps:$4 sm:$0xff]  }
 0x118   : > { %3919 = vmatprep.mubr.bf16.mxu1 %v7042_v59  ;;  %4080 = vmatprep.mubr.bf16.mxu0 %v7044_v60 }
 0x11a   : > { %v5748_v3 = vpop.f32.mrb[16].mxu0  ;;  %v5796_v4 = vpop.f32.mrb[16].mxu1 }
 0x11b   : > { %v5749_v6 = vpop.f32.mrb[17].mxu0  ;;  %v5797_v7 = vpop.f32.mrb[17].mxu1 }
 0x11c   : > { %v7947_v9 = vadd.f32 %v5749_v6, %v5748_v3  ;;  %v5751_v10 = vpop.f32.mrb[18].mxu0  ;;  %v5799_v13 = vpop.f32.mrb[18].mxu1  ;;  %v7949_v14 = vadd.f32 %v5797_v7, %v5796_v4  ;;  %v7068_v4 = vld [vmem:[%s7432_s11 + $0x5b8] ss:$72 sps:$4 sm:$0xff]  }
 0x11d   : > { %v5752_v17 = vpop.f32.mrb[19].mxu0  ;;  %v5800_v18 = vpop.f32.mrb[19].mxu1 }
 0x11e   : > { %v7953_v19 = vadd.f32 %v5752_v17, %v5751_v10  ;;  %v7955_v20 = vadd.f32 %v5800_v18, %v5799_v13  ;;  %v887_v3 = vpop.permute.xlu0 %886  ;;  %v7074_v18 = vld [vmem:[%s7432_s11 + $0x64c] ss:$72 sps:$4 sm:$0xff]  }
 0x11f   : > { %3920 = vmatmul.mubr.bf16.gmra.mrb[124].mxu1 %v7046_v5  ;;  %4081 = vmatmul.mubr.bf16.gmra.mrb[124].mxu0 %v7047_v8  ;;  %v7069_v5 = vld [vmem:[%s7432_s11 + $0x5c0] ss:$72 sps:$4 sm:$0xff]  }
 0x120   : > { %3927 = vmatprep.mubr.bf16.mxu1 %v7048_v15  ;;  %4088 = vmatprep.mubr.bf16.mxu0 %v7050_v16 }
 0x122   : > { %v5754_v25 = vpop.f32.mrb[20].mxu0  ;;  %v5802_v26 = vpop.f32.mrb[20].mxu1 }
 0x123   : > { %v5755_v27 = vpop.f32.mrb[21].mxu0  ;;  %v5803_v28 = vpop.f32.mrb[21].mxu1 }
 0x124   : > { %v7959_v29 = vadd.f32 %v5755_v27, %v5754_v25  ;;  %v5757_v30 = vpop.f32.mrb[22].mxu0  ;;  %v5805_v33 = vpop.f32.mrb[22].mxu1  ;;  %v7961_v34 = vadd.f32 %v5803_v28, %v5802_v26 }
 0x125   : > { %v5758_v37 = vpop.f32.mrb[23].mxu0  ;;  %v5806_v38 = vpop.f32.mrb[23].mxu1 }
 0x126   : > { %v7965_v40 = vadd.f32 %v5758_v37, %v5757_v30  ;;  %v7967_v41 = vadd.f32 %v5806_v38, %v5805_v33  ;;  %v897_v28 = vpop.permute.xlu1 %896  ;;  %v892_v30 = vpop.permute.xlu0 %891 }
 0x127   : > { %3928 = vmatmul.mubr.bf16.gmra.mrb[128].mxu1 %v7052_v22  ;;  %4089 = vmatmul.mubr.bf16.gmra.mrb[128].mxu0 %v7053_v23  ;;  %v7076_v22 = vld [vmem:[%s7432_s11 + $0x654] ss:$72 sps:$4 sm:$0xff]  }
 0x128   : > { %3935 = vmatprep.mubr.bf16.mxu1 %v7058_v35  ;;  %4096 = vmatprep.mubr.bf16.mxu0 %v7060_v36  ;;  %v7078_v36 = vld [vmem:[%s7432_s11 + $0x648] ss:$72 sps:$4 sm:$0xff]  }
 0x12a   : > { %v5760_v43 = vpop.f32.mrb[24].mxu0  ;;  %v5808_v44 = vpop.f32.mrb[24].mxu1 }
 0x12b   : > { %v5761_v46 = vpop.f32.mrb[25].mxu0  ;;  %v5809_v49 = vpop.f32.mrb[25].mxu1 }
 0x12c   : > { %v7971_v51 = vadd.f32 %v5761_v46, %v5760_v43  ;;  %v5763_v52 = vpop.f32.mrb[26].mxu0  ;;  %v5811_v53 = vpop.f32.mrb[26].mxu1  ;;  %v7973_v54 = vadd.f32 %v5809_v49, %v5808_v44  ;;  %v7079_v43 = vld [vmem:[%s7432_s11 + $0x650] ss:$72 sps:$4 sm:$0xff]   ;;  %v3383_v44 = vadd.f32 %v7873_v63, %v887_v3 }
 0x12d   : > { %v5764_v59 = vpop.f32.mrb[27].mxu0  ;;  %v5812_v60 = vpop.f32.mrb[27].mxu1 }
 0x12e   : > { %v7977_v61 = vadd.f32 %v5764_v59, %v5763_v52  ;;  %v7979_v62 = vadd.f32 %v5812_v60, %v5811_v53  ;;  %v7080_v52 = vld [vmem:[%s7432_s11 + $0x6dc] ss:$72 sps:$4 sm:$0xff]   ;;  %v3386_v60 = vadd.f32 %v7893_v11, %v892_v30  ;;  %v902_v3 = vpop.permute.xlu1 %901 }
 0x12f   : > { %3936 = vmatmul.mubr.bf16.gmra.mrb[132].mxu1 %v7062_v45  ;;  %4097 = vmatmul.mubr.bf16.gmra.mrb[132].mxu0 %v7063_v50  ;;  %v7082_v53 = vld [vmem:[%s7432_s11 + $0x6e4] ss:$72 sps:$4 sm:$0xff]  }
 0x130   : > { %3943 = vmatprep.mubr.bf16.mxu1 %v7064_v56  ;;  %4104 = vmatprep.mubr.bf16.mxu0 %v7066_v57 }
 0x132   : > { %v5766_v6 = vpop.f32.mrb[28].mxu0  ;;  %v5814_v7 = vpop.f32.mrb[28].mxu1 }
 0x133   : > { %v5767_v8 = vpop.f32.mrb[29].mxu0  ;;  %v5815_v10 = vpop.f32.mrb[29].mxu1 }
 0x134   : > { %v7983_v13 = vadd.f32 %v5767_v8, %v5766_v6  ;;  %v5769_v15 = vpop.f32.mrb[30].mxu0  ;;  %v5817_v16 = vpop.f32.mrb[30].mxu1  ;;  %v7985_v17 = vadd.f32 %v5815_v10, %v5814_v7  ;;  %v7084_v7 = vld [vmem:[%s7432_s11 + $0x6d8] ss:$72 sps:$4 sm:$0xff]  }
 0x135   : > { %v5770_v23 = vpop.f32.mrb[31].mxu0  ;;  %v5818_v25 = vpop.f32.mrb[31].mxu1  ;;  %v7085_v8 = vld [vmem:[%s7432_s11 + $0x6e0] ss:$72 sps:$4 sm:$0xff]  }
 0x136   : > { %v7989_v26 = vadd.f32 %v5770_v23, %v5769_v15  ;;  %v7991_v27 = vadd.f32 %v5818_v25, %v5817_v16 }
 0x137   : > { %3944 = vmatmul.mubr.bf16.gmra.mrb[136].mxu1 %v7068_v4  ;;  %4105 = vmatmul.mubr.bf16.gmra.mrb[136].mxu0 %v7069_v5 }
 0x138   : > { %3951 = vmatprep.mubr.bf16.mxu1 %v7074_v18  ;;  %4112 = vmatprep.mubr.bf16.mxu0 %v7076_v22  ;;  %v3391_v22 = vadd.f32 %v7905_v21, %v897_v28  ;;  %v907_v28 = vpop.permute.xlu0 %906 }
 0x13a   : > { %v5836_v33 = vpop.f32.mrb[32].mxu1  ;;  %v5948_v35 = vpop.f32.mrb[32].mxu0 }
 0x13b   : > { %v5837_v37 = vpop.f32.mrb[33].mxu1  ;;  %v5949_v38 = vpop.f32.mrb[33].mxu0 }
 0x13c   : > { %v5838_v45 = vadd.f32 %v5837_v37, %v5836_v33  ;;  %v5950_v46 = vadd.f32 %v5949_v38, %v5948_v35  ;;  %v5839_v49 = vpop.f32.mrb[34].mxu1  ;;  %v5951_v50 = vpop.f32.mrb[34].mxu0  ;;  %v7090_v35 = vld [vmem:[%s7432_s11 + $0x76c] ss:$72 sps:$4 sm:$0xff]  }
 0x13d   : > { %v5840_v56 = vpop.f32.mrb[35].mxu1  ;;  %v5952_v57 = vpop.f32.mrb[35].mxu0 }
 0x13e   : > { %v3544_v59 = vadd.f32 %v5838_v45, %v3383_v44  ;;  %v5841_v4 = vadd.f32 %v5840_v56, %v5839_v49  ;;  %v5953_v5 = vadd.f32 %v5952_v57, %v5951_v50  ;;  %v3394_v44 = vadd.f32 %v7917_v31, %v902_v3  ;;  %v912_v50 = vpop.permute.xlu1 %911  ;;  %v7094_v57 = vld [vmem:[%s7432_s11 + $0x768] ss:$72 sps:$4 sm:$0xff]  }
 0x13f   : > { %3952 = vmatmul.mubr.bf16.gmra.mrb[140].mxu1 %v7078_v36  ;;  %4113 = vmatmul.mubr.bf16.gmra.mrb[140].mxu0 %v7079_v43  ;;  %v7092_v36 = vld [vmem:[%s7432_s11 + $0x774] ss:$72 sps:$4 sm:$0xff]  }
 0x140   : > { %v7999_v6 = vadd.f32 %v5950_v46, %v3544_v59  ;;  %v3547_v63 = vadd.f32 %v5841_v4, %v3386_v60  ;;  %3959 = vmatprep.mubr.bf16.mxu1 %v7080_v52  ;;  %4120 = vmatprep.mubr.bf16.mxu0 %v7082_v53  ;;  %v7095_v60 = vld [vmem:[%s7432_s11 + $0x770] ss:$72 sps:$4 sm:$0xff]   ;;  %v3399_v4 = vadd.f32 %v7923_v39, %v907_v28 }
 0x142   : > { %v8003_v10 = vadd.f32 %v5953_v5, %v3547_v63  ;;  %v5842_v15 = vpop.f32.mrb[36].mxu1  ;;  %v5954_v16 = vpop.f32.mrb[36].mxu0 }
 0x143   : > { %v5843_v18 = vpop.f32.mrb[37].mxu1  ;;  %v5955_v11 = vpop.f32.mrb[37].mxu0 }
 0x144   : > { %v5844_v23 = vadd.f32 %v5843_v18, %v5842_v15  ;;  %v5956_v25 = vadd.f32 %v5955_v11, %v5954_v16  ;;  %v5845_v30 = vpop.f32.mrb[38].mxu1  ;;  %v5957_v33 = vpop.f32.mrb[38].mxu0  ;;  %v7098_v15 = vld [vmem:[%s7432_s11 + $0x804] ss:$72 sps:$4 sm:$0xff]  }
 0x145   : > { %v5846_v37 = vpop.f32.mrb[39].mxu1  ;;  %v5958_v38 = vpop.f32.mrb[39].mxu0 }
 0x146   : > { %v3552_v43 = vadd.f32 %v5844_v23, %v3391_v22  ;;  %v5847_v45 = vadd.f32 %v5846_v37, %v5845_v30  ;;  %v5959_v46 = vadd.f32 %v5958_v38, %v5957_v33  ;;  %v3402_v22 = vadd.f32 %v7929_v47, %v912_v50  ;;  %v917_v33 = vpop.permute.xlu0 %916 }
 0x147   : > { %3960 = vmatmul.mubr.bf16.gmra.mrb[144].mxu1 %v7084_v7  ;;  %4121 = vmatmul.mubr.bf16.gmra.mrb[144].mxu0 %v7085_v8  ;;  %v7096_v8 = vld [vmem:[%s7432_s11 + $0x7fc] ss:$72 sps:$4 sm:$0xff]  }
 0x148   : > { %v8009_v49 = vadd.f32 %v5956_v25, %v3552_v43  ;;  %v3555_v21 = vadd.f32 %v5847_v45, %v3394_v44  ;;  %3967 = vmatprep.mubr.bf16.mxu1 %v7090_v35  ;;  %4128 = vmatprep.mubr.bf16.mxu0 %v7092_v36  ;;  %v922_v35 = vpop.permute.xlu1 %921  ;;  %v7100_v44 = vld [vmem:[%s7432_s11 + $0x7f8] ss:$72 sps:$4 sm:$0xff]  }
 0x149   : > { %v7101_v45 = vld [vmem:[%s7432_s11 + $0x800] ss:$72 sps:$4 sm:$0xff]  }
 0x14a   : > { %v8011_v52 = vadd.f32 %v5959_v46, %v3555_v21  ;;  %v5848_v53 = vpop.f32.mrb[40].mxu1  ;;  %v5960_v56 = vpop.f32.mrb[40].mxu0  ;;  %v3407_v46 = vadd.f32 %v7935_v55, %v917_v33 }
 0x14b   : > { %v5849_v31 = vpop.f32.mrb[41].mxu1  ;;  %v5961_v59 = vpop.f32.mrb[41].mxu0 }
 0x14c   : > { %v5850_v5 = vadd.f32 %v5849_v31, %v5848_v53  ;;  %v5962_v63 = vadd.f32 %v5961_v59, %v5960_v56  ;;  %v5851_v3 = vpop.f32.mrb[42].mxu1  ;;  %v5963_v7 = vpop.f32.mrb[42].mxu0  ;;  %v7106_v56 = vld [vmem:[%s7432_s11 + $0x88c] ss:$72 sps:$4 sm:$0xff]  }
 0x14d   : > { %v5852_v16 = vpop.f32.mrb[43].mxu1  ;;  %v5964_v18 = vpop.f32.mrb[43].mxu0 }
 0x14e   : > { %v3560_v11 = vadd.f32 %v5850_v5, %v3399_v4  ;;  %v5853_v23 = vadd.f32 %v5852_v16, %v5851_v3  ;;  %v5965_v25 = vadd.f32 %v5964_v18, %v5963_v7  ;;  %v3410_v4 = vadd.f32 %v7941_v0, %v922_v35  ;;  %v927_v7 = vpop.permute.xlu0 %926 }
 0x14f   : > { %3968 = vmatmul.mubr.bf16.gmra.mrb[148].mxu1 %v7094_v57  ;;  %4129 = vmatmul.mubr.bf16.gmra.mrb[148].mxu0 %v7095_v60  ;;  %v7108_v57 = vld [vmem:[%s7432_s11 + $0x894] ss:$72 sps:$4 sm:$0xff]  }
 0x150   : > { %v8019_v30 = vadd.f32 %v5962_v63, %v3560_v11  ;;  %v3563_v39 = vadd.f32 %v5853_v23, %v3402_v22  ;;  %3975 = vmatprep.mubr.bf16.mxu1 %v7096_v8  ;;  %4136 = vmatprep.mubr.bf16.mxu0 %v7098_v15  ;;  %v932_v8 = vpop.permute.xlu1 %931  ;;  %v7110_v22 = vld [vmem:[%s7432_s11 + $0x888] ss:$72 sps:$4 sm:$0xff]  }
 0x151   : > { %v7111_v23 = vld [vmem:[%s7432_s11 + $0x890] ss:$72 sps:$4 sm:$0xff]  }
 0x152   : > { %v8021_v36 = vadd.f32 %v5965_v25, %v3563_v39  ;;  %v5854_v37 = vpop.f32.mrb[44].mxu1  ;;  %v5966_v38 = vpop.f32.mrb[44].mxu0  ;;  %v3415_v25 = vadd.f32 %v7947_v9, %v927_v7 }
 0x153   : > { %v5855_v47 = vpop.f32.mrb[45].mxu1  ;;  %v5967_v43 = vpop.f32.mrb[45].mxu0 }
 0x154   : > { %v5856_v21 = vadd.f32 %v5855_v47, %v5854_v37  ;;  %v5968_v28 = vadd.f32 %v5967_v43, %v5966_v38  ;;  %v5857_v50 = vpop.f32.mrb[46].mxu1  ;;  %v5969_v53 = vpop.f32.mrb[46].mxu0  ;;  %v7114_v38 = vld [vmem:[%s7432_s11 + $0x2c] ss:$72 sps:$4 sm:$0xff]  }
 0x155   : > { %v5858_v31 = vpop.f32.mrb[47].mxu1  ;;  %v5970_v59 = vpop.f32.mrb[47].mxu0  ;;  %v7117_v47 = vld [vmem:[%s7432_s11 + $0x34] ss:$72 sps:$4 sm:$0xff]  }
 0x156   : > { %v3568_v60 = vadd.f32 %v5856_v21, %v3407_v46  ;;  %v5859_v5 = vadd.f32 %v5858_v31, %v5857_v50  ;;  %v5971_v63 = vadd.f32 %v5970_v59, %v5969_v53  ;;  %v3418_v46 = vadd.f32 %v7953_v19, %v932_v8  ;;  %v937_v53 = vpop.permute.xlu0 %936 }
 0x157   : > { %3976 = vmatmul.mubr.bf16.gmra.mrb[152].mxu1 %v7100_v44  ;;  %4137 = vmatmul.mubr.bf16.gmra.mrb[152].mxu0 %v7101_v45 }
 0x158   : > { %v8029_v3 = vadd.f32 %v5968_v28, %v3568_v60  ;;  %v3571_v55 = vadd.f32 %v5859_v5, %v3410_v4  ;;  %3983 = vmatprep.mubr.bf16.mxu1 %v7106_v56  ;;  %4144 = vmatprep.mubr.bf16.mxu0 %v7108_v57  ;;  %v942_v56 = vpop.permute.xlu1 %941  ;;  %v7112_v4 = vld [vmem:[%s7432_s11 + $0x28] ss:$72 sps:$4 sm:$0xff]  }
 0x159   : > { %v7115_v5 = vld [vmem:[%s7432_s11 + $0x30] ss:$72 sps:$4 sm:$0xff]  }
 0x15a   : > { %v8031_v15 = vadd.f32 %v5971_v63, %v3571_v55  ;;  %v5860_v16 = vpop.f32.mrb[48].mxu1  ;;  %v5972_v18 = vpop.f32.mrb[48].mxu0  ;;  %v3423_v63 = vadd.f32 %v7959_v29, %v937_v53 }
 0x15b   : > { %v5861_v0 = vpop.f32.mrb[49].mxu1  ;;  %v5973_v11 = vpop.f32.mrb[49].mxu0 }
 0x15c   : > { %v5862_v39 = vadd.f32 %v5861_v0, %v5860_v16  ;;  %v5974_v33 = vadd.f32 %v5973_v11, %v5972_v18  ;;  %v5863_v35 = vpop.f32.mrb[50].mxu1  ;;  %v5975_v37 = vpop.f32.mrb[50].mxu0  ;;  %v7119_v18 = vld [vmem:[%s8581_s1 + $0x380] sm:$0xff]  }
 0x15d   : > { %v5864_v43 = vpop.f32.mrb[51].mxu1  ;;  %v5976_v44 = vpop.f32.mrb[51].mxu0  ;;  %v7121_v0 = vld [vmem:[%s8581_s1 + $0x400] sm:$0xff]  }
 0x15e   : > { %v3576_v45 = vadd.f32 %v5862_v39, %v3415_v25  ;;  %v5865_v21 = vadd.f32 %v5864_v43, %v5863_v35  ;;  %v5977_v28 = vadd.f32 %v5976_v44, %v5975_v37  ;;  %v7124_v25 = vld [vmem:[%s7432_s11 + $0xc4] ss:$72 sps:$4 sm:$0xff]  }
 0x15f   : > { %3984 = vmatmul.mubr.bf16.gmra.mrb[156].mxu1 %v7110_v22  ;;  %4145 = vmatmul.mubr.bf16.gmra.mrb[156].mxu0 %v7111_v23  ;;  %v7122_v23 = vld [vmem:[%s7432_s11 + $0xbc] ss:$72 sps:$4 sm:$0xff]   ;;  %v7134_v37 = vld [vmem:[%s8581_s1 + $0x3c8] sm:$0xff]  }
 0x160   : > { %v8039_v50 = vadd.f32 %v5974_v33, %v3576_v45  ;;  %v3579_v9 = vadd.f32 %v5865_v21, %v3418_v46  ;;  %4185 = vmatprep.mubr.bf16.mxu1 %v7114_v38  ;;  %4346 = vmatprep.mubr.bf16.mxu0 %v7117_v47  ;;  %v3426_v33 = vadd.f32 %v7965_v40, %v942_v56  ;;  %v7136_v38 = vld [vmem:[%s8581_s1 + $0x448] sm:$0xff]   ;;  %v947_v45 = vpop.permute.xlu0 %946  ;;  %v952_v46 = vpop.permute.xlu1 %951  ;;  %v7150_v21 = vld [vmem:[%s8581_s1 + $0x3d0] sm:$0xff]  }
 0x161   : > { %v7135_v40 = vld [vmem:[%s8581_s1 + $0x388] sm:$0xff]  }
 0x162   : > { %v8041_v57 = vadd.f32 %v5977_v28, %v3579_v9  ;;  %v5866_v31 = vpop.f32.mrb[52].mxu1  ;;  %v5978_v59 = vpop.f32.mrb[52].mxu0  ;;  %v7137_v44 = vld [vmem:[%s8581_s1 + $0x408] sm:$0xff]   ;;  %v7152_v28 = vld [vmem:[%s8581_s1 + $0x450] sm:$0xff]  }
 0x163   : > { %v5867_v19 = vpop.f32.mrb[53].mxu1  ;;  %v5979_v60 = vpop.f32.mrb[53].mxu0 }
 0x164   : > { %v5868_v55 = vadd.f32 %v5867_v19, %v5866_v31  ;;  %v5980_v7 = vadd.f32 %v5979_v60, %v5978_v59  ;;  %v5869_v8 = vpop.f32.mrb[54].mxu1  ;;  %v5981_v16 = vpop.f32.mrb[54].mxu0  ;;  %v7126_v19 = vld [vmem:[%s7432_s11 + $0xb8] ss:$72 sps:$4 sm:$0xff]  }
 0x165   : > { %v5870_v11 = vpop.f32.mrb[55].mxu1  ;;  %v5982_v22 = vpop.f32.mrb[55].mxu0  ;;  %v7127_v60 = vld [vmem:[%s7432_s11 + $0xc0] ss:$72 sps:$4 sm:$0xff]  }
 0x166   : > { %v3584_v39 = vadd.f32 %v5868_v55, %v3423_v63  ;;  %v5871_v29 = vadd.f32 %v5870_v11, %v5869_v8  ;;  %v5983_v35 = vadd.f32 %v5982_v22, %v5981_v16  ;;  %v7128_v8 = vld [vmem:[%s7432_s11 + $0x14c] ss:$72 sps:$4 sm:$0xff]  }
 0x167   : > { %4186 = vmatmul.mubr.bf16.vlgmr.msra.gmra.mrb[160].mxu1 %v7112_v4  ;;  %4347 = vmatmul.mubr.bf16.vlgmr.msra.gmra.mrb[160].mxu0 %v7115_v5  ;;  %v3431_v4 = vadd.f32 %v7971_v51, %v947_v45  ;;  %v7130_v16 = vld [vmem:[%s7432_s11 + $0x154] ss:$72 sps:$4 sm:$0xff]  }
 0x168   : > { %v8061_v47 = vadd.f32 %v5980_v7, %v3584_v39  ;;  %v3587_v43 = vadd.f32 %v5871_v29, %v3426_v33  ;;  %6493 = vmatpush3.bf16.msra.mxu1 %v7119_v18  ;;  %6605 = vmatpush3.bf16.msra.mxu0 %v7121_v0  ;;  %v7151_v11 = vld [vmem:[%s8581_s1 + $0x390] sm:$0xff]   ;;  %v7166_v33 = vld [vmem:[%s8581_s1 + $0x3d8] sm:$0xff]  }
 0x169   : > { %4193 = vmatprep.mubr.bf16.mxu1 %v7122_v23  ;;  %4354 = vmatprep.mubr.bf16.mxu0 %v7124_v25  ;;  %v7153_v51 = vld [vmem:[%s8581_s1 + $0x410] sm:$0xff]   ;;  %v3434_v23 = vadd.f32 %v7977_v61, %v952_v46  ;;  %v7168_v29 = vld [vmem:[%s8581_s1 + $0x458] sm:$0xff]   ;;  %v962_v61 = vpop.permute.xlu1 %961 }
 0x16a   : > { %v8075_v9 = vadd.f32 %v5983_v35, %v3587_v43  ;;  %v5872_v53 = vpop.f32.mrb[56].mxu1  ;;  %v5984_v56 = vpop.f32.mrb[56].mxu0  ;;  %6494 = vmatprep.subr.bf16.mxu1 %v7134_v37  ;;  %6606 = vmatprep.subr.bf16.mxu0 %v7136_v38  ;;  %v7167_v43 = vld [vmem:[%s8581_s1 + $0x398] sm:$0xff]  }
 0x16b   : > { %v5873_v31 = vpop.f32.mrb[57].mxu1  ;;  %v5985_v59 = vpop.f32.mrb[57].mxu0 }
 0x16c   : > { %v5874_v5 = vadd.f32 %v5873_v31, %v5872_v53  ;;  %v5986_v63 = vadd.f32 %v5985_v59, %v5984_v56  ;;  %v5875_v55 = vpop.f32.mrb[58].mxu1  ;;  %v5987_v7 = vpop.f32.mrb[58].mxu0  ;;  %6495 = vmatpush3.bf16.msra.mxu1 %v7135_v40  ;;  %6607 = vmatpush3.bf16.msra.mxu0 %v7137_v44  ;;  %v7169_v40 = vld [vmem:[%s8581_s1 + $0x418] sm:$0xff]   ;;  %v7132_v31 = vld [vmem:[%s7432_s11 + $0x148] ss:$72 sps:$4 sm:$0xff]  }
 0x16d   : > { %v5876_v18 = vpop.f32.mrb[59].mxu1  ;;  %v5988_v0 = vpop.f32.mrb[59].mxu0  ;;  %6496 = vmatprep.subr.bf16.mxu1 %v7150_v21  ;;  %6608 = vmatprep.subr.bf16.mxu0 %v7152_v28  ;;  %v7182_v21 = vld [vmem:[%s8581_s1 + $0x3e0] sm:$0xff]   ;;  %v7133_v59 = vld [vmem:[%s7432_s11 + $0x150] ss:$72 sps:$4 sm:$0xff]  }
 0x16e   : > { %v3592_v22 = vadd.f32 %v5874_v5, %v3431_v4  ;;  %v5877_v25 = vadd.f32 %v5876_v18, %v5875_v55  ;;  %v5989_v39 = vadd.f32 %v5988_v0, %v5987_v7  ;;  %v957_v38 = vpop.permute.xlu0 %956  ;;  %v7184_v28 = vld [vmem:[%s8581_s1 + $0x460] sm:$0xff]  }
 0x16f   : > { %4194 = vmatmul.mubr.bf16.gmra.mrb[164].mxu1 %v7126_v19  ;;  %4355 = vmatmul.mubr.bf16.gmra.mrb[164].mxu0 %v7127_v60  ;;  %v3439_v19 = vadd.f32 %v7983_v13, %v957_v38  ;;  %v7138_v55 = vld [vmem:[%s7432_s11 + $0x1dc] ss:$72 sps:$4 sm:$0xff]   ;;  %v7201_v38 = vld [vmem:[%s8581_s1 + $0x428] sm:$0xff]  }
 0x170   : > { %v8095_v35 = vadd.f32 %v5986_v63, %v3592_v22  ;;  %v3595_v37 = vadd.f32 %v5877_v25, %v3434_v23  ;;  %4201 = vmatprep.mubr.bf16.mxu1 %v7128_v8  ;;  %4362 = vmatprep.mubr.bf16.mxu0 %v7130_v16  ;;  %v7140_v7 = vld [vmem:[%s7432_s11 + $0x1e4] ss:$72 sps:$4 sm:$0xff]   ;;  %v3442_v8 = vadd.f32 %v7989_v26, %v962_v61 }
 0x171   : > { %6497 = vmatpush3.bf16.msra.mxu1 %v7151_v11  ;;  %6609 = vmatpush3.bf16.msra.mxu0 %v7153_v51  ;;  %v7183_v0 = vld [vmem:[%s8581_s1 + $0x3a0] sm:$0xff]   ;;  %v7198_v26 = vld [vmem:[%s8581_s1 + $0x3e8] sm:$0xff]  }
 0x172   : > { %v8103_v44 = vadd.f32 %v5989_v39, %v3595_v37  ;;  %v5878_v45 = vpop.f32.mrb[60].mxu1  ;;  %v5990_v46 = vpop.f32.mrb[60].mxu0  ;;  %6498 = vmatprep.subr.bf16.mxu1 %v7166_v33  ;;  %6610 = vmatprep.subr.bf16.mxu0 %v7168_v29  ;;  %v7185_v13 = vld [vmem:[%s8581_s1 + $0x420] sm:$0xff]   ;;  %v7200_v23 = vld [vmem:[%s8581_s1 + $0x468] sm:$0xff]  }
 0x173   : > { %v5879_v53 = vpop.f32.mrb[61].mxu1  ;;  %v5991_v56 = vpop.f32.mrb[61].mxu0  ;;  %v7199_v37 = vld [vmem:[%s8581_s1 + $0x3a8] sm:$0xff]  }
 0x174   : > { %v5880_v60 = vadd.f32 %v5879_v53, %v5878_v45  ;;  %v5992_v4 = vadd.f32 %v5991_v56, %v5990_v46  ;;  %v5881_v5 = vpop.f32.mrb[62].mxu1  ;;  %v5993_v63 = vpop.f32.mrb[62].mxu0  ;;  %v7214_v45 = vld [vmem:[%s8581_s1 + $0x3f0] sm:$0xff]   ;;  %v7142_v53 = vld [vmem:[%s7432_s11 + $0x1d8] ss:$72 sps:$4 sm:$0xff]  }
 0x175   : > { %v5882_v16 = vpop.f32.mrb[63].mxu1  ;;  %v5994_v18 = vpop.f32.mrb[63].mxu0  ;;  %6499 = vmatpush3.bf16.msra.mxu1 %v7167_v43  ;;  %6611 = vmatpush3.bf16.msra.mxu0 %v7169_v40  ;;  %v7216_v46 = vld [vmem:[%s8581_s1 + $0x470] sm:$0xff]   ;;  %v7143_v56 = vld [vmem:[%s7432_s11 + $0x1e0] ss:$72 sps:$4 sm:$0xff]  }
 0x176   : > { %v3600_v11 = vadd.f32 %v5880_v60, %v3439_v19  ;;  %v5883_v51 = vadd.f32 %v5882_v16, %v5881_v5  ;;  %v5995_v22 = vadd.f32 %v5994_v18, %v5993_v63  ;;  %6500 = vmatprep.subr.bf16.mxu1 %v7182_v21  ;;  %6612 = vmatprep.subr.bf16.mxu0 %v7184_v28  ;;  %v967_v33 = vpop.permute.xlu0 %966  ;;  %v972_v29 = vpop.permute.xlu1 %971  ;;  %v7144_v5 = vld [vmem:[%s7432_s11 + $0x26c] ss:$72 sps:$4 sm:$0xff]  }
 0x177   : > { %4202 = vmatmul.mubr.bf16.gmra.mrb[168].mxu1 %v7132_v31  ;;  %4363 = vmatmul.mubr.bf16.gmra.mrb[168].mxu0 %v7133_v59  ;;  %v3447_v31 = vadd.f32 %v7875_v2, %v967_v33  ;;  %v7146_v63 = vld [vmem:[%s7432_s11 + $0x274] ss:$72 sps:$4 sm:$0xff]  }
 0x178   : > { %v8129_v25 = vadd.f32 %v5992_v4, %v3600_v11  ;;  %v3603_v39 = vadd.f32 %v5883_v51, %v3442_v8  ;;  %4209 = vmatprep.mubr.bf16.mxu1 %v7138_v55  ;;  %4370 = vmatprep.mubr.bf16.mxu0 %v7140_v7  ;;  %v3450_v55 = vadd.f32 %v7895_v12, %v972_v29  ;;  %v7215_v16 = vld [vmem:[%s8581_s1 + $0x3b0] sm:$0xff]   ;;  %v7230_v12 = vld [vmem:[%s8581_s1 + $0x3f8] sm:$0xff]  }
 0x179   : > { %6501 = vmatpush3.bf16.msra.mxu1 %v7183_v0  ;;  %6613 = vmatpush3.bf16.msra.mxu0 %v7185_v13  ;;  %v7217_v2 = vld [vmem:[%s8581_s1 + $0x430] sm:$0xff]   ;;  %v7232_v11 = vld [vmem:[%s8581_s1 + $0x478] sm:$0xff]  }
 0x17a   : > { %v8137_v61 = vadd.f32 %v5995_v22, %v3603_v39  ;;  %v5884_v43 = vpop.f32.mrb[64].mxu1  ;;  %v5996_v40 = vpop.f32.mrb[64].mxu0  ;;  %6502 = vmatprep.subr.bf16.mxu1 %v7198_v26  ;;  %6614 = vmatprep.subr.bf16.mxu0 %v7200_v23  ;;  %v7231_v39 = vld [vmem:[%s8581_s1 + $0x3b8] sm:$0xff]  }
 0x17b   : > { %v5885_v21 = vpop.f32.mrb[65].mxu1  ;;  %v5997_v28 = vpop.f32.mrb[65].mxu0  ;;  %v7233_v33 = vld [vmem:[%s8581_s1 + $0x438] sm:$0xff]  }
 0x17c   : > { %v5886_v59 = vadd.f32 %v5885_v21, %v5884_v43  ;;  %v5998_v19 = vadd.f32 %v5997_v28, %v5996_v40  ;;  %v5887_v60 = vpop.f32.mrb[66].mxu1  ;;  %v5999_v4 = vpop.f32.mrb[66].mxu0 }
 0x17d   : > { %v5888_v7 = vpop.f32.mrb[67].mxu1  ;;  %v6000_v8 = vpop.f32.mrb[67].mxu0  ;;  %6503 = vmatpush3.bf16.msra.mxu1 %v7199_v37  ;;  %6615 = vmatpush3.bf16.msra.mxu0 %v7201_v38 }
 0x17e   : > { %v3608_v18 = vadd.f32 %v5886_v59, %v3447_v31  ;;  %v5889_v0 = vadd.f32 %v5888_v7, %v5887_v60  ;;  %v6001_v13 = vadd.f32 %v6000_v8, %v5999_v4  ;;  %6504 = vmatprep.subr.bf16.mxu1 %v7214_v45  ;;  %6616 = vmatprep.subr.bf16.mxu0 %v7216_v46  ;;  %v977_v26 = vpop.permute.xlu0 %976  ;;  %v982_v23 = vpop.permute.xlu1 %981  ;;  %v7148_v45 = vld [vmem:[%s7432_s11 + $0x268] ss:$72 sps:$4 sm:$0xff]   ;;  %v7154_v59 = vld [vmem:[%s7432_s11 + $0x2fc] ss:$72 sps:$4 sm:$0xff]  }
 0x17f   : > { %4210 = vmatmul.mubr.bf16.gmra.mrb[172].mxu1 %v7142_v53  ;;  %4371 = vmatmul.mubr.bf16.gmra.mrb[172].mxu0 %v7143_v56  ;;  %v7149_v46 = vld [vmem:[%s7432_s11 + $0x270] ss:$72 sps:$4 sm:$0xff]   ;;  %v3455_v21 = vadd.f32 %v7907_v24, %v977_v26 }
 0x180   : > { %v8163_v51 = vadd.f32 %v5998_v19, %v3608_v18  ;;  %v3611_v22 = vadd.f32 %v5889_v0, %v3450_v55  ;;  %4217 = vmatprep.mubr.bf16.mxu1 %v7144_v5  ;;  %4378 = vmatprep.mubr.bf16.mxu0 %v7146_v63  ;;  %v7156_v19 = vld [vmem:[%s7432_s11 + $0x304] ss:$72 sps:$4 sm:$0xff]   ;;  %v3458_v5 = vadd.f32 %v7919_v32, %v982_v23 }
 0x181   : > { %6505 = vmatpush3.bf16.msra.mxu1 %v7215_v16  ;;  %6617 = vmatpush3.bf16.msra.mxu0 %v7217_v2 }
 0x182   : > { %v8171_v29 = vadd.f32 %v6001_v13, %v3611_v22  ;;  %v5890_v37 = vpop.f32.mrb[68].mxu1  ;;  %v6002_v38 = vpop.f32.mrb[68].mxu0  ;;  %6506 = vmatprep.subr.bf16.mxu1 %v7230_v12  ;;  %6618 = vmatprep.subr.bf16.mxu0 %v7232_v11  ;;  %v7158_v11 = vld [vmem:[%s7432_s11 + $0x2f8] ss:$72 sps:$4 sm:$0xff]  }
 0x183   : > { %v5891_v43 = vpop.f32.mrb[69].mxu1  ;;  %v6003_v40 = vpop.f32.mrb[69].mxu0  ;;  %v7159_v22 = vld [vmem:[%s7432_s11 + $0x300] ss:$72 sps:$4 sm:$0xff]  }
 0x184   : > { %v5892_v28 = vadd.f32 %v5891_v43, %v5890_v37  ;;  %v6004_v53 = vadd.f32 %v6003_v40, %v6002_v38  ;;  %v5893_v56 = vpop.f32.mrb[70].mxu1  ;;  %v6005_v31 = vpop.f32.mrb[70].mxu0  ;;  %v7160_v38 = vld [vmem:[%s7432_s11 + $0x38c] ss:$72 sps:$4 sm:$0xff]  }
 0x185   : > { %v5894_v60 = vpop.f32.mrb[71].mxu1  ;;  %v6006_v4 = vpop.f32.mrb[71].mxu0  ;;  %6507 = vmatpush3.bf16.msra.mxu1 %v7231_v39  ;;  %6619 = vmatpush3.bf16.msra.mxu0 %v7233_v33  ;;  %v7162_v43 = vld [vmem:[%s7432_s11 + $0x394] ss:$72 sps:$4 sm:$0xff]  }
 0x186   : > { %v3616_v63 = vadd.f32 %v5892_v28, %v3455_v21  ;;  %v5895_v55 = vadd.f32 %v5894_v60, %v5893_v56  ;;  %v6007_v7 = vadd.f32 %v6006_v4, %v6005_v31  ;;  %v987_v16 = vpop.permute.xlu0 %986  ;;  %v992_v2 = vpop.permute.xlu1 %991 }
 0x187   : > { %4218 = vmatmul.mubr.bf16.gmra.mrb[176].mxu1 %v7148_v45  ;;  %4379 = vmatmul.mubr.bf16.gmra.mrb[176].mxu0 %v7149_v46  ;;  %v3463_v26 = vadd.f32 %v7925_v42, %v987_v16  ;;  %v3466_v46 = vadd.f32 %v7931_v48, %v992_v2 }
 0x188   : > { %v8179_v24 = vadd.f32 %v6004_v53, %v3616_v63  ;;  %v3619_v8 = vadd.f32 %v5895_v55, %v3458_v5  ;;  %4225 = vmatprep.mubr.bf16.mxu1 %v7154_v59  ;;  %4386 = vmatprep.mubr.bf16.mxu0 %v7156_v19  ;;  %v7164_v63 = vld [vmem:[%s7432_s11 + $0x388] ss:$72 sps:$4 sm:$0xff]  }
 0x189   : > { %v7165_v55 = vld [vmem:[%s7432_s11 + $0x390] ss:$72 sps:$4 sm:$0xff]  }
 0x18a   : > { %v8181_v18 = vadd.f32 %v6007_v7, %v3619_v8  ;;  %v5896_v0 = vpop.f32.mrb[72].mxu1  ;;  %v6008_v32 = vpop.f32.mrb[72].mxu0 }
 0x18b   : > { %v5897_v13 = vpop.f32.mrb[73].mxu1  ;;  %v6009_v12 = vpop.f32.mrb[73].mxu0 }
 0x18c   : > { %v5898_v23 = vadd.f32 %v5897_v13, %v5896_v0  ;;  %v6010_v39 = vadd.f32 %v6009_v12, %v6008_v32  ;;  %v5899_v33 = vpop.f32.mrb[74].mxu1  ;;  %v6011_v37 = vpop.f32.mrb[74].mxu0  ;;  %v7170_v32 = vld [vmem:[%s7432_s11 + $0x41c] ss:$72 sps:$4 sm:$0xff]  }
 0x18d   : > { %v5900_v40 = vpop.f32.mrb[75].mxu1  ;;  %v6012_v45 = vpop.f32.mrb[75].mxu0  ;;  %v7172_v13 = vld [vmem:[%s7432_s11 + $0x424] ss:$72 sps:$4 sm:$0xff]  }
 0x18e   : > { %v3624_v21 = vadd.f32 %v5898_v23, %v3463_v26  ;;  %v5901_v28 = vadd.f32 %v5900_v40, %v5899_v33  ;;  %v6013_v53 = vadd.f32 %v6012_v45, %v6011_v37  ;;  %v997_v31 = vpop.permute.xlu0 %996  ;;  %v1002_v59 = vpop.permute.xlu1 %1001 }
 0x18f   : > { %4226 = vmatmul.mubr.bf16.gmra.mrb[180].mxu1 %v7158_v11  ;;  %4387 = vmatmul.mubr.bf16.gmra.mrb[180].mxu0 %v7159_v22  ;;  %v3471_v7 = vadd.f32 %v7937_v58, %v997_v31  ;;  %v3474_v22 = vadd.f32 %v7943_v1, %v1002_v59 }
 0x190   : > { %v8189_v56 = vadd.f32 %v6010_v39, %v3624_v21  ;;  %v3627_v42 = vadd.f32 %v5901_v28, %v3466_v46  ;;  %4233 = vmatprep.mubr.bf16.mxu1 %v7160_v38  ;;  %4394 = vmatprep.mubr.bf16.mxu0 %v7162_v43  ;;  %v7174_v21 = vld [vmem:[%s7432_s11 + $0x418] ss:$72 sps:$4 sm:$0xff]  }
 0x191   : > { %v7175_v28 = vld [vmem:[%s7432_s11 + $0x420] ss:$72 sps:$4 sm:$0xff]  }
 0x192   : > { %v8191_v19 = vadd.f32 %v6013_v53, %v3627_v42  ;;  %v5902_v60 = vpop.f32.mrb[76].mxu1  ;;  %v6014_v48 = vpop.f32.mrb[76].mxu0 }
 0x193   : > { %v5903_v4 = vpop.f32.mrb[77].mxu1  ;;  %v6015_v5 = vpop.f32.mrb[77].mxu0 }
 0x194   : > { %v5904_v8 = vadd.f32 %v5903_v4, %v5902_v60  ;;  %v6016_v16 = vadd.f32 %v6015_v5, %v6014_v48  ;;  %v5905_v2 = vpop.f32.mrb[78].mxu1  ;;  %v6017_v0 = vpop.f32.mrb[78].mxu0  ;;  %v7176_v48 = vld [vmem:[%s7432_s11 + $0x4ac] ss:$72 sps:$4 sm:$0xff]  }
 0x195   : > { %v5906_v12 = vpop.f32.mrb[79].mxu1  ;;  %v6018_v11 = vpop.f32.mrb[79].mxu0  ;;  %v7178_v4 = vld [vmem:[%s7432_s11 + $0x4b4] ss:$72 sps:$4 sm:$0xff]  }
 0x196   : > { %v3632_v26 = vadd.f32 %v5904_v8, %v3471_v7  ;;  %v5907_v23 = vadd.f32 %v5906_v12, %v5905_v2  ;;  %v6019_v39 = vadd.f32 %v6018_v11, %v6017_v0  ;;  %v1007_v37 = vpop.permute.xlu0 %1006  ;;  %v1012_v38 = vpop.permute.xlu1 %1011 }
 0x197   : > { %4234 = vmatmul.mubr.bf16.gmra.mrb[184].mxu1 %v7164_v63  ;;  %4395 = vmatmul.mubr.bf16.gmra.mrb[184].mxu0 %v7165_v55  ;;  %v3479_v53 = vadd.f32 %v7949_v14, %v1007_v37  ;;  %v3482_v55 = vadd.f32 %v7955_v20, %v1012_v38 }
 0x198   : > { %v8199_v33 = vadd.f32 %v6016_v16, %v3632_v26  ;;  %v3635_v58 = vadd.f32 %v5907_v23, %v3474_v22  ;;  %4241 = vmatprep.mubr.bf16.mxu1 %v7170_v32  ;;  %4402 = vmatprep.mubr.bf16.mxu0 %v7172_v13  ;;  %v7180_v26 = vld [vmem:[%s7432_s11 + $0x4a8] ss:$72 sps:$4 sm:$0xff]  }
 0x199   : > { %v7181_v23 = vld [vmem:[%s7432_s11 + $0x4b0] ss:$72 sps:$4 sm:$0xff]  }
 0x19a   : > { %v8201_v43 = vadd.f32 %v6019_v39, %v3635_v58  ;;  %v5908_v40 = vpop.f32.mrb[80].mxu1  ;;  %v6020_v1 = vpop.f32.mrb[80].mxu0 }
 0x19b   : > { %v5909_v45 = vpop.f32.mrb[81].mxu1  ;;  %v6021_v46 = vpop.f32.mrb[81].mxu0 }
 0x19c   : > { %v5910_v42 = vadd.f32 %v5909_v45, %v5908_v40  ;;  %v6022_v31 = vadd.f32 %v6021_v46, %v6020_v1  ;;  %v5911_v59 = vpop.f32.mrb[82].mxu1  ;;  %v6023_v60 = vpop.f32.mrb[82].mxu0  ;;  %v7186_v1 = vld [vmem:[%s7432_s11 + $0x53c] ss:$72 sps:$4 sm:$0xff]  }
 0x19d   : > { %v5912_v5 = vpop.f32.mrb[83].mxu1  ;;  %v6024_v63 = vpop.f32.mrb[83].mxu0  ;;  %v7188_v45 = vld [vmem:[%s7432_s11 + $0x544] ss:$72 sps:$4 sm:$0xff]  }
 0x19e   : > { %v3640_v7 = vadd.f32 %v5910_v42, %v3479_v53  ;;  %v5913_v8 = vadd.f32 %v5912_v5, %v5911_v59  ;;  %v6025_v16 = vadd.f32 %v6024_v63, %v6023_v60  ;;  %v1017_v0 = vpop.permute.xlu0 %1016  ;;  %v1022_v32 = vpop.permute.xlu1 %1021 }
 0x19f   : > { %4242 = vmatmul.mubr.bf16.gmra.mrb[188].mxu1 %v7174_v21  ;;  %4403 = vmatmul.mubr.bf16.gmra.mrb[188].mxu0 %v7175_v28  ;;  %v3487_v39 = vadd.f32 %v7961_v34, %v1017_v0  ;;  %v3490_v28 = vadd.f32 %v7967_v41, %v1022_v32 }
 0x1a0   : > { %v8209_v2 = vadd.f32 %v6022_v31, %v3640_v7  ;;  %v3643_v14 = vadd.f32 %v5913_v8, %v3482_v55  ;;  %4249 = vmatprep.mubr.bf16.mxu1 %v7176_v48  ;;  %4410 = vmatprep.mubr.bf16.mxu0 %v7178_v4  ;;  %v7190_v7 = vld [vmem:[%s7432_s11 + $0x538] ss:$72 sps:$4 sm:$0xff]  }
 0x1a1   : > { %v7191_v8 = vld [vmem:[%s7432_s11 + $0x540] ss:$72 sps:$4 sm:$0xff]  }
 0x1a2   : > { %v8211_v13 = vadd.f32 %v6025_v16, %v3643_v14  ;;  %v5914_v12 = vpop.f32.mrb[84].mxu1  ;;  %v6026_v20 = vpop.f32.mrb[84].mxu0 }
 0x1a3   : > { %v5915_v11 = vpop.f32.mrb[85].mxu1  ;;  %v6027_v22 = vpop.f32.mrb[85].mxu0 }
 0x1a4   : > { %v5916_v58 = vadd.f32 %v5915_v11, %v5914_v12  ;;  %v6028_v37 = vadd.f32 %v6027_v22, %v6026_v20  ;;  %v5917_v38 = vpop.f32.mrb[86].mxu1  ;;  %v6029_v40 = vpop.f32.mrb[86].mxu0  ;;  %v7192_v20 = vld [vmem:[%s7432_s11 + $0x5cc] ss:$72 sps:$4 sm:$0xff]  }
 0x1a5   : > { %v5918_v46 = vpop.f32.mrb[87].mxu1  ;;  %v6030_v21 = vpop.f32.mrb[87].mxu0  ;;  %v7194_v11 = vld [vmem:[%s7432_s11 + $0x5d4] ss:$72 sps:$4 sm:$0xff]  }
 0x1a6   : > { %v3648_v53 = vadd.f32 %v5916_v58, %v3487_v39  ;;  %v5919_v42 = vadd.f32 %v5918_v46, %v5917_v38  ;;  %v6031_v31 = vadd.f32 %v6030_v21, %v6029_v40  ;;  %v1027_v60 = vpop.permute.xlu0 %1026  ;;  %v1032_v48 = vpop.permute.xlu1 %1031 }
 0x1a7   : > { %4250 = vmatmul.mubr.bf16.gmra.mrb[192].mxu1 %v7180_v26  ;;  %4411 = vmatmul.mubr.bf16.gmra.mrb[192].mxu0 %v7181_v23  ;;  %v3495_v16 = vadd.f32 %v7973_v54, %v1027_v60  ;;  %v3498_v23 = vadd.f32 %v7979_v62, %v1032_v48 }
 0x1a8   : > { %v8219_v59 = vadd.f32 %v6028_v37, %v3648_v53  ;;  %v3651_v34 = vadd.f32 %v5919_v42, %v3490_v28  ;;  %4257 = vmatprep.mubr.bf16.mxu1 %v7186_v1  ;;  %4418 = vmatprep.mubr.bf16.mxu0 %v7188_v45  ;;  %v7196_v53 = vld [vmem:[%s7432_s11 + $0x5c8] ss:$72 sps:$4 sm:$0xff]  }
 0x1a9   : > { %v7197_v42 = vld [vmem:[%s7432_s11 + $0x5d0] ss:$72 sps:$4 sm:$0xff]  }
 0x1aa   : > { %v8221_v4 = vadd.f32 %v6031_v31, %v3651_v34  ;;  %v5920_v5 = vpop.f32.mrb[88].mxu1  ;;  %v6032_v41 = vpop.f32.mrb[88].mxu0 }
 0x1ab   : > { %v5921_v63 = vpop.f32.mrb[89].mxu1  ;;  %v6033_v55 = vpop.f32.mrb[89].mxu0 }
 0x1ac   : > { %v5922_v14 = vadd.f32 %v5921_v63, %v5920_v5  ;;  %v6034_v0 = vadd.f32 %v6033_v55, %v6032_v41  ;;  %v5923_v32 = vpop.f32.mrb[90].mxu1  ;;  %v6035_v12 = vpop.f32.mrb[90].mxu0  ;;  %v7202_v41 = vld [vmem:[%s7432_s11 + $0x65c] ss:$72 sps:$4 sm:$0xff]  }
 0x1ad   : > { %v5924_v22 = vpop.f32.mrb[91].mxu1  ;;  %v6036_v26 = vpop.f32.mrb[91].mxu0  ;;  %v7204_v63 = vld [vmem:[%s7432_s11 + $0x664] ss:$72 sps:$4 sm:$0xff]  }
 0x1ae   : > { %v3656_v39 = vadd.f32 %v5922_v14, %v3495_v16  ;;  %v5925_v58 = vadd.f32 %v5924_v22, %v5923_v32  ;;  %v6037_v37 = vadd.f32 %v6036_v26, %v6035_v12  ;;  %v1037_v40 = vpop.permute.xlu0 %1036  ;;  %v1042_v1 = vpop.permute.xlu1 %1041 }
 0x1af   : > { %4258 = vmatmul.mubr.bf16.gmra.mrb[196].mxu1 %v7190_v7  ;;  %4419 = vmatmul.mubr.bf16.gmra.mrb[196].mxu0 %v7191_v8  ;;  %v3503_v31 = vadd.f32 %v7985_v17, %v1037_v40  ;;  %v3506_v8 = vadd.f32 %v7991_v27, %v1042_v1  ;;  %v7206_v27 = vld [vmem:[%s7432_s11 + $0x658] ss:$72 sps:$4 sm:$0xff]   ;;  %v7208_v40 = vld [vmem:[%s7432_s11 + $0x6ec] ss:$72 sps:$4 sm:$0xff]  }
 0x1b0   : > { %v8229_v38 = vadd.f32 %v6034_v0, %v3656_v39  ;;  %v3659_v54 = vadd.f32 %v5925_v58, %v3498_v23  ;;  %4265 = vmatprep.mubr.bf16.mxu1 %v7192_v20  ;;  %4426 = vmatprep.mubr.bf16.mxu0 %v7194_v11  ;;  %v7207_v23 = vld [vmem:[%s7432_s11 + $0x660] ss:$72 sps:$4 sm:$0xff]   ;;  %v7210_v1 = vld [vmem:[%s7432_s11 + $0x6f4] ss:$72 sps:$4 sm:$0xff]  }
 0x1b2   : > { %v8231_v45 = vadd.f32 %v6037_v37, %v3659_v54  ;;  %v5926_v46 = vpop.f32.mrb[92].mxu1  ;;  %v6038_v62 = vpop.f32.mrb[92].mxu0 }
 0x1b3   : > { %v5927_v21 = vpop.f32.mrb[93].mxu1  ;;  %v6039_v28 = vpop.f32.mrb[93].mxu0 }
 0x1b4   : > { %v5928_v34 = vadd.f32 %v5927_v21, %v5926_v46  ;;  %v6040_v60 = vadd.f32 %v6039_v28, %v6038_v62  ;;  %v5929_v48 = vpop.f32.mrb[94].mxu1  ;;  %v6041_v5 = vpop.f32.mrb[94].mxu0 }
 0x1b5   : > { %v5930_v55 = vpop.f32.mrb[95].mxu1  ;;  %v6042_v7 = vpop.f32.mrb[95].mxu0 }
 0x1b6   : > { %v3664_v16 = vadd.f32 %v5928_v34, %v3503_v31  ;;  %v5931_v14 = vadd.f32 %v5930_v55, %v5929_v48  ;;  %v6043_v0 = vadd.f32 %v6042_v7, %v6041_v5 }
 0x1b7   : > { %4266 = vmatmul.mubr.bf16.gmra.mrb[200].mxu1 %v7196_v53  ;;  %4427 = vmatmul.mubr.bf16.gmra.mrb[200].mxu0 %v7197_v42 }
 0x1b8   : > { %v8239_v32 = vadd.f32 %v6040_v60, %v3664_v16  ;;  %v3667_v17 = vadd.f32 %v5931_v14, %v3506_v8  ;;  %4273 = vmatprep.mubr.bf16.mxu1 %v7202_v41  ;;  %4434 = vmatprep.mubr.bf16.mxu0 %v7204_v63  ;;  %v7212_v63 = vld [vmem:[%s7432_s11 + $0x6e8] ss:$72 sps:$4 sm:$0xff]   ;;  %v7218_v14 = vld [vmem:[%s7432_s11 + $0x77c] ss:$72 sps:$4 sm:$0xff]  }
 0x1ba   : > { %v8241_v12 = vadd.f32 %v6043_v0, %v3667_v17  ;;  %v6060_v20 = vpop.f32.mrb[96].mxu1  ;;  %v6172_v11 = vpop.f32.mrb[96].mxu0  ;;  %v7220_v0 = vld [vmem:[%s7432_s11 + $0x784] ss:$72 sps:$4 sm:$0xff]  }
 0x1bb   : > { %v6061_v22 = vpop.f32.mrb[97].mxu1  ;;  %v6173_v26 = vpop.f32.mrb[97].mxu0 }
 0x1bc   : > { %v6062_v39 = vadd.f32 %v6061_v22, %v6060_v20  ;;  %v6174_v58 = vadd.f32 %v6173_v26, %v6172_v11  ;;  %v6063_v37 = vpop.f32.mrb[98].mxu1  ;;  %v6175_v54 = vpop.f32.mrb[98].mxu0 }
 0x1bd   : > { %v6064_v46 = vpop.f32.mrb[99].mxu1  ;;  %v6176_v62 = vpop.f32.mrb[99].mxu0 }
 0x1be   : > { %v3866_v21 = vadd.f32 %v6062_v39, %v7999_v6  ;;  %v6065_v28 = vadd.f32 %v6064_v46, %v6063_v37  ;;  %v6177_v53 = vadd.f32 %v6176_v62, %v6175_v54  ;;  %v7213_v6 = vld [vmem:[%s7432_s11 + $0x6f0] ss:$72 sps:$4 sm:$0xff]  }
 0x1bf   : > { %4274 = vmatmul.mubr.bf16.gmra.mrb[204].mxu1 %v7206_v27  ;;  %4435 = vmatmul.mubr.bf16.gmra.mrb[204].mxu0 %v7207_v23 }
 0x1c0   : > { %v8248_v42 = vadd.f32 %v6174_v58, %v3866_v21  ;;  %v3869_v31 = vadd.f32 %v6065_v28, %v8003_v10  ;;  %4281 = vmatprep.mubr.bf16.mxu1 %v7208_v40  ;;  %4442 = vmatprep.mubr.bf16.mxu0 %v7210_v1  ;;  %v7222_v40 = vld [vmem:[%s7432_s11 + $0x778] ss:$72 sps:$4 sm:$0xff]   ;;  %v7224_v28 = vld [vmem:[%s7432_s11 + $0x80c] ss:$72 sps:$4 sm:$0xff]  }
 0x1c2   : > { %v8251_v34 = vadd.f32 %v6177_v53, %v3869_v31  ;;  %v6066_v60 = vpop.f32.mrb[100].mxu1  ;;  %v6178_v48 = vpop.f32.mrb[100].mxu0  ;;  %v7226_v53 = vld [vmem:[%s7432_s11 + $0x814] ss:$72 sps:$4 sm:$0xff]  }
 0x1c3   : > { %v6067_v5 = vpop.f32.mrb[101].mxu1  ;;  %v6179_v41 = vpop.f32.mrb[101].mxu0 }
 0x1c4   : > { %v6068_v55 = vadd.f32 %v6067_v5, %v6066_v60  ;;  %v6180_v7 = vadd.f32 %v6179_v41, %v6178_v48  ;;  %v6069_v8 = vpop.f32.mrb[102].mxu1  ;;  %v6181_v16 = vpop.f32.mrb[102].mxu0 }
 0x1c5   : > { %v6070_v17 = vpop.f32.mrb[103].mxu1  ;;  %v6182_v20 = vpop.f32.mrb[103].mxu0 }
 0x1c6   : > { %v3874_v10 = vadd.f32 %v6068_v55, %v8009_v49  ;;  %v6071_v11 = vadd.f32 %v6070_v17, %v6069_v8  ;;  %v6183_v22 = vadd.f32 %v6182_v20, %v6181_v16  ;;  %v7223_v49 = vld [vmem:[%s7432_s11 + $0x780] ss:$72 sps:$4 sm:$0xff]  }
 0x1c7   : > { %4282 = vmatmul.mubr.bf16.gmra.mrb[208].mxu1 %v7212_v63  ;;  %4443 = vmatmul.mubr.bf16.gmra.mrb[208].mxu0 %v7213_v6 }
 0x1c8   : > { %v8258_v26 = vadd.f32 %v6180_v7, %v3874_v10  ;;  %v3877_v27 = vadd.f32 %v6071_v11, %v8011_v52  ;;  %4289 = vmatprep.mubr.bf16.mxu1 %v7218_v14  ;;  %4450 = vmatprep.mubr.bf16.mxu0 %v7220_v0  ;;  %v7228_v14 = vld [vmem:[%s7432_s11 + $0x808] ss:$72 sps:$4 sm:$0xff]   ;;  %v7234_v11 = vld [vmem:[%s7432_s11 + $0x89c] ss:$72 sps:$4 sm:$0xff]  }
 0x1ca   : > { %v8261_v23 = vadd.f32 %v6183_v22, %v3877_v27  ;;  %v6072_v39 = vpop.f32.mrb[104].mxu1  ;;  %v6184_v58 = vpop.f32.mrb[104].mxu0  ;;  %v7236_v22 = vld [vmem:[%s7432_s11 + $0x8a4] ss:$72 sps:$4 sm:$0xff]  }
 0x1cb   : > { %v6073_v37 = vpop.f32.mrb[105].mxu1  ;;  %v6185_v54 = vpop.f32.mrb[105].mxu0 }
 0x1cc   : > { %v6074_v1 = vadd.f32 %v6073_v37, %v6072_v39  ;;  %v6186_v46 = vadd.f32 %v6185_v54, %v6184_v58  ;;  %v6075_v62 = vpop.f32.mrb[106].mxu1  ;;  %v6187_v21 = vpop.f32.mrb[106].mxu0 }
 0x1cd   : > { %v6076_v31 = vpop.f32.mrb[107].mxu1  ;;  %v6188_v60 = vpop.f32.mrb[107].mxu0 }
 0x1ce   : > { %v3882_v52 = vadd.f32 %v6074_v1, %v8019_v30  ;;  %v6077_v48 = vadd.f32 %v6076_v31, %v6075_v62  ;;  %v6189_v5 = vadd.f32 %v6188_v60, %v6187_v21  ;;  %v7229_v30 = vld [vmem:[%s7432_s11 + $0x810] ss:$72 sps:$4 sm:$0xff]  }
 0x1cf   : > { %4290 = vmatmul.mubr.bf16.gmra.mrb[212].mxu1 %v7222_v40  ;;  %4451 = vmatmul.mubr.bf16.gmra.mrb[212].mxu0 %v7223_v49 }
 0x1d0   : > { %v8268_v41 = vadd.f32 %v6186_v46, %v3882_v52  ;;  %v3885_v63 = vadd.f32 %v6077_v48, %v8021_v36  ;;  %4297 = vmatprep.mubr.bf16.mxu1 %v7224_v28  ;;  %4458 = vmatprep.mubr.bf16.mxu0 %v7226_v53  ;;  %v7238_v28 = vld [vmem:[%s7432_s11 + $0x898] ss:$72 sps:$4 sm:$0xff]   ;;  %v7242_v48 = vld [vmem:[%s7432_s11 + $0x3c] ss:$72 sps:$4 sm:$0xff]  }
 0x1d2   : > { %v8271_v6 = vadd.f32 %v6189_v5, %v3885_v63  ;;  %v6078_v55 = vpop.f32.mrb[108].mxu1  ;;  %v6190_v7 = vpop.f32.mrb[108].mxu0  ;;  %v7245_v5 = vld [vmem:[%s7432_s11 + $0x44] ss:$72 sps:$4 sm:$0xff]  }
 0x1d3   : > { %v6079_v8 = vpop.f32.mrb[109].mxu1  ;;  %v6191_v16 = vpop.f32.mrb[109].mxu0 }
 0x1d4   : > { %v6080_v0 = vadd.f32 %v6079_v8, %v6078_v55  ;;  %v6192_v17 = vadd.f32 %v6191_v16, %v6190_v7  ;;  %v6081_v20 = vpop.f32.mrb[110].mxu1  ;;  %v6193_v10 = vpop.f32.mrb[110].mxu0 }
 0x1d5   : > { %v6082_v27 = vpop.f32.mrb[111].mxu1  ;;  %v6194_v39 = vpop.f32.mrb[111].mxu0 }
 0x1d6   : > { %v3890_v36 = vadd.f32 %v6080_v0, %v8029_v3  ;;  %v6083_v58 = vadd.f32 %v6082_v27, %v6081_v20  ;;  %v6195_v37 = vadd.f32 %v6194_v39, %v6193_v10  ;;  %v7239_v3 = vld [vmem:[%s7432_s11 + $0x8a0] ss:$72 sps:$4 sm:$0xff]  }
 0x1d7   : > { %4298 = vmatmul.mubr.bf16.gmra.mrb[216].mxu1 %v7228_v14  ;;  %4459 = vmatmul.mubr.bf16.gmra.mrb[216].mxu0 %v7229_v30 }
 0x1d8   : > { %v8278_v54 = vadd.f32 %v6192_v17, %v3890_v36  ;;  %v3893_v40 = vadd.f32 %v6083_v58, %v8031_v15  ;;  %4305 = vmatprep.mubr.bf16.mxu1 %v7234_v11  ;;  %4466 = vmatprep.mubr.bf16.mxu0 %v7236_v22  ;;  %v7240_v11 = vld [vmem:[%s7432_s11 + $0x38] ss:$72 sps:$4 sm:$0xff]   ;;  %v7246_v58 = vld [vmem:[%s7432_s11 + $0xcc] ss:$72 sps:$4 sm:$0xff]  }
 0x1da   : > { %v8281_v49 = vadd.f32 %v6195_v37, %v3893_v40  ;;  %v6084_v1 = vpop.f32.mrb[112].mxu1  ;;  %v6196_v46 = vpop.f32.mrb[112].mxu0  ;;  %v7248_v37 = vld [vmem:[%s7432_s11 + $0xd4] ss:$72 sps:$4 sm:$0xff]  }
 0x1db   : > { %v6085_v62 = vpop.f32.mrb[113].mxu1  ;;  %v6197_v21 = vpop.f32.mrb[113].mxu0 }
 0x1dc   : > { %v6086_v53 = vadd.f32 %v6085_v62, %v6084_v1  ;;  %v6198_v31 = vadd.f32 %v6197_v21, %v6196_v46  ;;  %v6087_v60 = vpop.f32.mrb[114].mxu1  ;;  %v6199_v52 = vpop.f32.mrb[114].mxu0 }
 0x1dd   : > { %v6088_v63 = vpop.f32.mrb[115].mxu1  ;;  %v6200_v55 = vpop.f32.mrb[115].mxu0 }
 0x1de   : > { %v3898_v15 = vadd.f32 %v6086_v53, %v8039_v50  ;;  %v6089_v7 = vadd.f32 %v6088_v63, %v6087_v60  ;;  %v6201_v8 = vadd.f32 %v6200_v55, %v6199_v52  ;;  %v7243_v50 = vld [vmem:[%s7432_s11 + $0x40] ss:$72 sps:$4 sm:$0xff]  }
 0x1df   : > { %4306 = vmatmul.mubr.bf16.gmra.mrb[220].mxu1 %v7238_v28  ;;  %4467 = vmatmul.mubr.bf16.gmra.mrb[220].mxu0 %v7239_v3 }
 0x1e0   : > { %v8288_v16 = vadd.f32 %v6198_v31, %v3898_v15  ;;  %v3901_v14 = vadd.f32 %v6089_v7, %v8041_v57  ;;  %4507 = vmatprep.mubr.bf16.mxu1 %v7242_v48  ;;  %4668 = vmatprep.mubr.bf16.mxu0 %v7245_v5  ;;  %v7250_v48 = vld [vmem:[%s7432_s11 + $0xc8] ss:$72 sps:$4 sm:$0xff]   ;;  %v7252_v7 = vld [vmem:[%s7432_s11 + $0x15c] ss:$72 sps:$4 sm:$0xff]  }
 0x1e2   : > { %v8291_v30 = vadd.f32 %v6201_v8, %v3901_v14  ;;  %v6090_v0 = vpop.f32.mrb[116].mxu1  ;;  %v6202_v17 = vpop.f32.mrb[116].mxu0  ;;  %v7254_v8 = vld [vmem:[%s7432_s11 + $0x164] ss:$72 sps:$4 sm:$0xff]  }
 0x1e3   : > { %v6091_v20 = vpop.f32.mrb[117].mxu1  ;;  %v6203_v10 = vpop.f32.mrb[117].mxu0 }
 0x1e4   : > { %v6092_v22 = vadd.f32 %v6091_v20, %v6090_v0  ;;  %v6204_v27 = vadd.f32 %v6203_v10, %v6202_v17  ;;  %v6093_v39 = vpop.f32.mrb[118].mxu1  ;;  %v6205_v36 = vpop.f32.mrb[118].mxu0 }
 0x1e5   : > { %v6094_v40 = vpop.f32.mrb[119].mxu1  ;;  %v6206_v1 = vpop.f32.mrb[119].mxu0 }
 0x1e6   : > { %v3906_v57 = vadd.f32 %v6092_v22, %v8061_v47  ;;  %v6095_v46 = vadd.f32 %v6094_v40, %v6093_v39  ;;  %v6207_v62 = vadd.f32 %v6206_v1, %v6205_v36  ;;  %v7251_v47 = vld [vmem:[%s7432_s11 + $0xd0] ss:$72 sps:$4 sm:$0xff]  }
 0x1e7   : > { %4508 = vmatmul.mubr.bf16.vlgmr.msra.gmra.mrb[224].mxu1 %v7240_v11  ;;  %4669 = vmatmul.mubr.bf16.vlgmr.msra.gmra.mrb[224].mxu0 %v7243_v50 }
 0x1e8   : > { %v8298_v21 = vadd.f32 %v6204_v27, %v3906_v57  ;;  %v3909_v28 = vadd.f32 %v6095_v46, %v8075_v9  ;;  %4515 = vmatprep.mubr.bf16.mxu1 %v7246_v58  ;;  %4676 = vmatprep.mubr.bf16.mxu0 %v7248_v37  ;;  %v7256_v58 = vld [vmem:[%s7432_s11 + $0x158] ss:$72 sps:$4 sm:$0xff]   ;;  %v7258_v46 = vld [vmem:[%s7432_s11 + $0x1ec] ss:$72 sps:$4 sm:$0xff]  }
 0x1ea   : > { %v8301_v3 = vadd.f32 %v6207_v62, %v3909_v28  ;;  %v6096_v53 = vpop.f32.mrb[120].mxu1  ;;  %v6208_v31 = vpop.f32.mrb[120].mxu0  ;;  %v7260_v62 = vld [vmem:[%s7432_s11 + $0x1f4] ss:$72 sps:$4 sm:$0xff]  }
 0x1eb   : > { %v6097_v60 = vpop.f32.mrb[121].mxu1  ;;  %v6209_v52 = vpop.f32.mrb[121].mxu0 }
 0x1ec   : > { %v6098_v5 = vadd.f32 %v6097_v60, %v6096_v53  ;;  %v6210_v63 = vadd.f32 %v6209_v52, %v6208_v31  ;;  %v6099_v55 = vpop.f32.mrb[122].mxu1  ;;  %v6211_v15 = vpop.f32.mrb[122].mxu0 }
 0x1ed   : > { %v6100_v14 = vpop.f32.mrb[123].mxu1  ;;  %v6212_v0 = vpop.f32.mrb[123].mxu0 }
 0x1ee   : > { %v3914_v9 = vadd.f32 %v6098_v5, %v8095_v35  ;;  %v6101_v17 = vadd.f32 %v6100_v14, %v6099_v55  ;;  %v6213_v20 = vadd.f32 %v6212_v0, %v6211_v15  ;;  %v7257_v35 = vld [vmem:[%s7432_s11 + $0x160] ss:$72 sps:$4 sm:$0xff]  }
 0x1ef   : > { %4516 = vmatmul.mubr.bf16.gmra.mrb[228].mxu1 %v7250_v48  ;;  %4677 = vmatmul.mubr.bf16.gmra.mrb[228].mxu0 %v7251_v47 }
 0x1f0   : > { %v8308_v10 = vadd.f32 %v6210_v63, %v3914_v9  ;;  %v3917_v11 = vadd.f32 %v6101_v17, %v8103_v44  ;;  %4523 = vmatprep.mubr.bf16.mxu1 %v7252_v7  ;;  %4684 = vmatprep.mubr.bf16.mxu0 %v7254_v8  ;;  %v7262_v7 = vld [vmem:[%s7432_s11 + $0x1e8] ss:$72 sps:$4 sm:$0xff]   ;;  %v7264_v17 = vld [vmem:[%s7432_s11 + $0x27c] ss:$72 sps:$4 sm:$0xff]  }
 0x1f2   : > { %v8311_v50 = vadd.f32 %v6213_v20, %v3917_v11  ;;  %v6102_v22 = vpop.f32.mrb[124].mxu1  ;;  %v6214_v27 = vpop.f32.mrb[124].mxu0  ;;  %v7266_v20 = vld [vmem:[%s7432_s11 + $0x284] ss:$72 sps:$4 sm:$0xff]  }
 0x1f3   : > { %v6103_v39 = vpop.f32.mrb[125].mxu1  ;;  %v6215_v36 = vpop.f32.mrb[125].mxu0 }
 0x1f4   : > { %v6104_v37 = vadd.f32 %v6103_v39, %v6102_v22  ;;  %v6216_v40 = vadd.f32 %v6215_v36, %v6214_v27  ;;  %v6105_v1 = vpop.f32.mrb[126].mxu1  ;;  %v6217_v57 = vpop.f32.mrb[126].mxu0 }
 0x1f5   : > { %v6106_v28 = vpop.f32.mrb[127].mxu1  ;;  %v6218_v53 = vpop.f32.mrb[127].mxu0 }
 0x1f6   : > { %v3922_v44 = vadd.f32 %v6104_v37, %v8129_v25  ;;  %v6107_v31 = vadd.f32 %v6106_v28, %v6105_v1  ;;  %v6219_v60 = vadd.f32 %v6218_v53, %v6217_v57  ;;  %v7263_v25 = vld [vmem:[%s7432_s11 + $0x1f0] ss:$72 sps:$4 sm:$0xff]  }
 0x1f7   : > { %4524 = vmatmul.mubr.bf16.gmra.mrb[232].mxu1 %v7256_v58  ;;  %4685 = vmatmul.mubr.bf16.gmra.mrb[232].mxu0 %v7257_v35 }
 0x1f8   : > { %v8318_v52 = vadd.f32 %v6216_v40, %v3922_v44  ;;  %v3925_v48 = vadd.f32 %v6107_v31, %v8137_v61  ;;  %4531 = vmatprep.mubr.bf16.mxu1 %v7258_v46  ;;  %4692 = vmatprep.mubr.bf16.mxu0 %v7260_v62  ;;  %v7268_v46 = vld [vmem:[%s7432_s11 + $0x278] ss:$72 sps:$4 sm:$0xff]   ;;  %v7270_v31 = vld [vmem:[%s7432_s11 + $0x30c] ss:$72 sps:$4 sm:$0xff]  }
 0x1fa   : > { %v8321_v47 = vadd.f32 %v6219_v60, %v3925_v48  ;;  %v6108_v5 = vpop.f32.mrb[128].mxu1  ;;  %v6220_v63 = vpop.f32.mrb[128].mxu0  ;;  %v7272_v60 = vld [vmem:[%s7432_s11 + $0x314] ss:$72 sps:$4 sm:$0xff]  }
 0x1fb   : > { %v6109_v55 = vpop.f32.mrb[129].mxu1  ;;  %v6221_v15 = vpop.f32.mrb[129].mxu0 }
 0x1fc   : > { %v6110_v8 = vadd.f32 %v6109_v55, %v6108_v5  ;;  %v6222_v14 = vadd.f32 %v6221_v15, %v6220_v63  ;;  %v6111_v0 = vpop.f32.mrb[130].mxu1  ;;  %v6223_v9 = vpop.f32.mrb[130].mxu0 }
 0x1fd   : > { %v6112_v11 = vpop.f32.mrb[131].mxu1  ;;  %v6224_v22 = vpop.f32.mrb[131].mxu0 }
 0x1fe   : > { %v3930_v61 = vadd.f32 %v6110_v8, %v8163_v51  ;;  %v6113_v27 = vadd.f32 %v6112_v11, %v6111_v0  ;;  %v6225_v39 = vadd.f32 %v6224_v22, %v6223_v9  ;;  %v7269_v51 = vld [vmem:[%s7432_s11 + $0x280] ss:$72 sps:$4 sm:$0xff]  }
 0x1ff   : > { %4532 = vmatmul.mubr.bf16.gmra.mrb[236].mxu1 %v7262_v7  ;;  %4693 = vmatmul.mubr.bf16.gmra.mrb[236].mxu0 %v7263_v25 }
 0x200   : > { %v8328_v36 = vadd.f32 %v6222_v14, %v3930_v61  ;;  %v3933_v58 = vadd.f32 %v6113_v27, %v8171_v29  ;;  %4539 = vmatprep.mubr.bf16.mxu1 %v7264_v17  ;;  %4700 = vmatprep.mubr.bf16.mxu0 %v7266_v20  ;;  %v7274_v17 = vld [vmem:[%s7432_s11 + $0x308] ss:$72 sps:$4 sm:$0xff]   ;;  %v7276_v27 = vld [vmem:[%s7432_s11 + $0x39c] ss:$72 sps:$4 sm:$0xff]  }
 0x202   : > { %v8331_v35 = vadd.f32 %v6225_v39, %v3933_v58  ;;  %v6114_v37 = vpop.f32.mrb[132].mxu1  ;;  %v6226_v40 = vpop.f32.mrb[132].mxu0  ;;  %v7278_v39 = vld [vmem:[%s7432_s11 + $0x3a4] ss:$72 sps:$4 sm:$0xff]  }
 0x203   : > { %v6115_v1 = vpop.f32.mrb[133].mxu1  ;;  %v6227_v57 = vpop.f32.mrb[133].mxu0 }
 0x204   : > { %v6116_v62 = vadd.f32 %v6115_v1, %v6114_v37  ;;  %v6228_v28 = vadd.f32 %v6227_v57, %v6226_v40  ;;  %v6117_v53 = vpop.f32.mrb[134].mxu1  ;;  %v6229_v44 = vpop.f32.mrb[134].mxu0 }
 0x205   : > { %v6118_v48 = vpop.f32.mrb[135].mxu1  ;;  %v6230_v5 = vpop.f32.mrb[135].mxu0 }
 0x206   : > { %v3938_v29 = vadd.f32 %v6116_v62, %v8179_v24  ;;  %v6119_v63 = vadd.f32 %v6118_v48, %v6117_v53  ;;  %v6231_v55 = vadd.f32 %v6230_v5, %v6229_v44  ;;  %v7275_v24 = vld [vmem:[%s7432_s11 + $0x310] ss:$72 sps:$4 sm:$0xff]  }
 0x207   : > { %4540 = vmatmul.mubr.bf16.gmra.mrb[240].mxu1 %v7268_v46  ;;  %4701 = vmatmul.mubr.bf16.gmra.mrb[240].mxu0 %v7269_v51 }
 0x208   : > { %v8338_v15 = vadd.f32 %v6228_v28, %v3938_v29  ;;  %v3941_v7 = vadd.f32 %v6119_v63, %v8181_v18  ;;  %4547 = vmatprep.mubr.bf16.mxu1 %v7270_v31  ;;  %4708 = vmatprep.mubr.bf16.mxu0 %v7272_v60  ;;  %v7280_v31 = vld [vmem:[%s7432_s11 + $0x398] ss:$72 sps:$4 sm:$0xff]   ;;  %v7282_v63 = vld [vmem:[%s7432_s11 + $0x42c] ss:$72 sps:$4 sm:$0xff]  }
 0x20a   : > { %v8341_v25 = vadd.f32 %v6231_v55, %v3941_v7  ;;  %v6120_v8 = vpop.f32.mrb[136].mxu1  ;;  %v6232_v14 = vpop.f32.mrb[136].mxu0  ;;  %v7284_v55 = vld [vmem:[%s7432_s11 + $0x434] ss:$72 sps:$4 sm:$0xff]  }
 0x20b   : > { %v6121_v0 = vpop.f32.mrb[137].mxu1  ;;  %v6233_v9 = vpop.f32.mrb[137].mxu0 }
 0x20c   : > { %v6122_v20 = vadd.f32 %v6121_v0, %v6120_v8  ;;  %v6234_v11 = vadd.f32 %v6233_v9, %v6232_v14  ;;  %v6123_v22 = vpop.f32.mrb[138].mxu1  ;;  %v6235_v61 = vpop.f32.mrb[138].mxu0 }
 0x20d   : > { %v6124_v58 = vpop.f32.mrb[139].mxu1  ;;  %v6236_v37 = vpop.f32.mrb[139].mxu0 }
 0x20e   : > { %v3946_v18 = vadd.f32 %v6122_v20, %v8189_v56  ;;  %v6125_v40 = vadd.f32 %v6124_v58, %v6123_v22  ;;  %v6237_v1 = vadd.f32 %v6236_v37, %v6235_v61  ;;  %v7281_v56 = vld [vmem:[%s7432_s11 + $0x3a0] ss:$72 sps:$4 sm:$0xff]  }
 0x20f   : > { %4548 = vmatmul.mubr.bf16.gmra.mrb[244].mxu1 %v7274_v17  ;;  %4709 = vmatmul.mubr.bf16.gmra.mrb[244].mxu0 %v7275_v24 }
 0x210   : > { %v8348_v57 = vadd.f32 %v6234_v11, %v3946_v18  ;;  %v3949_v46 = vadd.f32 %v6125_v40, %v8191_v19  ;;  %4555 = vmatprep.mubr.bf16.mxu1 %v7276_v27  ;;  %4716 = vmatprep.mubr.bf16.mxu0 %v7278_v39  ;;  %v7286_v27 = vld [vmem:[%s7432_s11 + $0x428] ss:$72 sps:$4 sm:$0xff]   ;;  %v7290_v40 = vld [vmem:[%s7432_s11 + $0x4bc] ss:$72 sps:$4 sm:$0xff]  }
 0x212   : > { %v8351_v51 = vadd.f32 %v6237_v1, %v3949_v46  ;;  %v6126_v62 = vpop.f32.mrb[140].mxu1  ;;  %v6238_v28 = vpop.f32.mrb[140].mxu0  ;;  %v7293_v1 = vld [vmem:[%s7432_s11 + $0x4c4] ss:$72 sps:$4 sm:$0xff]  }
 0x213   : > { %v6127_v53 = vpop.f32.mrb[141].mxu1  ;;  %v6239_v44 = vpop.f32.mrb[141].mxu0 }
 0x214   : > { %v6128_v60 = vadd.f32 %v6127_v53, %v6126_v62  ;;  %v6240_v48 = vadd.f32 %v6239_v44, %v6238_v28  ;;  %v6129_v5 = vpop.f32.mrb[142].mxu1  ;;  %v6241_v29 = vpop.f32.mrb[142].mxu0 }
 0x215   : > { %v6130_v7 = vpop.f32.mrb[143].mxu1  ;;  %v6242_v8 = vpop.f32.mrb[143].mxu0 }
 0x216   : > { %v3954_v19 = vadd.f32 %v6128_v60, %v8199_v33  ;;  %v6131_v14 = vadd.f32 %v6130_v7, %v6129_v5  ;;  %v6243_v0 = vadd.f32 %v6242_v8, %v6241_v29  ;;  %v7287_v33 = vld [vmem:[%s7432_s11 + $0x430] ss:$72 sps:$4 sm:$0xff]  }
 0x217   : > { %4556 = vmatmul.mubr.bf16.gmra.mrb[248].mxu1 %v7280_v31  ;;  %4717 = vmatmul.mubr.bf16.gmra.mrb[248].mxu0 %v7281_v56 }
 0x218   : > { %v8358_v9 = vadd.f32 %v6240_v48, %v3954_v19  ;;  %v3957_v17 = vadd.f32 %v6131_v14, %v8201_v43  ;;  %4563 = vmatprep.mubr.bf16.mxu1 %v7282_v63  ;;  %4724 = vmatprep.mubr.bf16.mxu0 %v7284_v55  ;;  %v7288_v63 = vld [vmem:[%s7432_s11 + $0x4b8] ss:$72 sps:$4 sm:$0xff]   ;;  %v7296_v14 = vld [vmem:[%s7432_s11 + $0x54c] ss:$72 sps:$4 sm:$0xff]  }
 0x21a   : > { %v8361_v24 = vadd.f32 %v6243_v0, %v3957_v17  ;;  %v6132_v20 = vpop.f32.mrb[144].mxu1  ;;  %v6244_v11 = vpop.f32.mrb[144].mxu0  ;;  %v7299_v0 = vld [vmem:[%s7432_s11 + $0x554] ss:$72 sps:$4 sm:$0xff]  }
 0x21b   : > { %v6133_v22 = vpop.f32.mrb[145].mxu1  ;;  %v6245_v61 = vpop.f32.mrb[145].mxu0 }
 0x21c   : > { %v6134_v39 = vadd.f32 %v6133_v22, %v6132_v20  ;;  %v6246_v58 = vadd.f32 %v6245_v61, %v6244_v11  ;;  %v6135_v37 = vpop.f32.mrb[146].mxu1  ;;  %v6247_v18 = vpop.f32.mrb[146].mxu0 }
 0x21d   : > { %v6136_v46 = vpop.f32.mrb[147].mxu1  ;;  %v6248_v62 = vpop.f32.mrb[147].mxu0 }
 0x21e   : > { %v3962_v43 = vadd.f32 %v6134_v39, %v8209_v2  ;;  %v6137_v28 = vadd.f32 %v6136_v46, %v6135_v37  ;;  %v6249_v53 = vadd.f32 %v6248_v62, %v6247_v18  ;;  %v7291_v2 = vld [vmem:[%s7432_s11 + $0x4c0] ss:$72 sps:$4 sm:$0xff]  }
 0x21f   : > { %4564 = vmatmul.mubr.bf16.gmra.mrb[252].mxu1 %v7286_v27  ;;  %4725 = vmatmul.mubr.bf16.gmra.mrb[252].mxu0 %v7287_v33 }
 0x220   : > { %v8368_v44 = vadd.f32 %v6246_v58, %v3962_v43  ;;  %v3965_v31 = vadd.f32 %v6137_v28, %v8211_v13  ;;  %4571 = vmatprep.mubr.bf16.mxu1 %v7290_v40  ;;  %4732 = vmatprep.mubr.bf16.mxu0 %v7293_v1  ;;  %v7294_v40 = vld [vmem:[%s7432_s11 + $0x548] ss:$72 sps:$4 sm:$0xff]   ;;  %v7302_v28 = vld [vmem:[%s7432_s11 + $0x5dc] ss:$72 sps:$4 sm:$0xff]  }
 0x222   : > { %v8371_v56 = vadd.f32 %v6249_v53, %v3965_v31  ;;  %v6138_v60 = vpop.f32.mrb[148].mxu1  ;;  %v6250_v48 = vpop.f32.mrb[148].mxu0  ;;  %v7305_v53 = vld [vmem:[%s7432_s11 + $0x5e4] ss:$72 sps:$4 sm:$0xff]  }
 0x223   : > { %v6139_v5 = vpop.f32.mrb[149].mxu1  ;;  %v6251_v29 = vpop.f32.mrb[149].mxu0 }
 0x224   : > { %v6140_v55 = vadd.f32 %v6139_v5, %v6138_v60  ;;  %v6252_v7 = vadd.f32 %v6251_v29, %v6250_v48  ;;  %v6141_v8 = vpop.f32.mrb[150].mxu1  ;;  %v6253_v19 = vpop.f32.mrb[150].mxu0 }
 0x225   : > { %v6142_v17 = vpop.f32.mrb[151].mxu1  ;;  %v6254_v20 = vpop.f32.mrb[151].mxu0 }
 0x226   : > { %v3970_v13 = vadd.f32 %v6140_v55, %v8219_v59  ;;  %v6143_v11 = vadd.f32 %v6142_v17, %v6141_v8  ;;  %v6255_v22 = vadd.f32 %v6254_v20, %v6253_v19  ;;  %v7297_v59 = vld [vmem:[%s7432_s11 + $0x550] ss:$72 sps:$4 sm:$0xff]  }
 0x227   : > { %4572 = vmatmul.mubr.bf16.gmra.mrb[0].mxu1 %v7288_v63  ;;  %4733 = vmatmul.mubr.bf16.gmra.mrb[0].mxu0 %v7291_v2 }
 0x228   : > { %v8378_v61 = vadd.f32 %v6252_v7, %v3970_v13  ;;  %v3973_v27 = vadd.f32 %v6143_v11, %v8221_v4  ;;  %4579 = vmatprep.mubr.bf16.mxu1 %v7296_v14  ;;  %4740 = vmatprep.mubr.bf16.mxu0 %v7299_v0  ;;  %v7300_v14 = vld [vmem:[%s7432_s11 + $0x5d8] ss:$72 sps:$4 sm:$0xff]   ;;  %v7308_v11 = vld [vmem:[%s7432_s11 + $0x66c] ss:$72 sps:$4 sm:$0xff]  }
 0x22a   : > { %v8381_v33 = vadd.f32 %v6255_v22, %v3973_v27  ;;  %v6144_v39 = vpop.f32.mrb[152].mxu1  ;;  %v6256_v58 = vpop.f32.mrb[152].mxu0  ;;  %v7311_v22 = vld [vmem:[%s7432_s11 + $0x674] ss:$72 sps:$4 sm:$0xff]  }
 0x22b   : > { %v6145_v37 = vpop.f32.mrb[153].mxu1  ;;  %v6257_v18 = vpop.f32.mrb[153].mxu0 }
 0x22c   : > { %v6146_v1 = vadd.f32 %v6145_v37, %v6144_v39  ;;  %v6258_v46 = vadd.f32 %v6257_v18, %v6256_v58  ;;  %v6147_v62 = vpop.f32.mrb[154].mxu1  ;;  %v6259_v43 = vpop.f32.mrb[154].mxu0 }
 0x22d   : > { %v6148_v31 = vpop.f32.mrb[155].mxu1  ;;  %v6260_v60 = vpop.f32.mrb[155].mxu0 }
 0x22e   : > { %v3978_v4 = vadd.f32 %v6146_v1, %v8229_v38  ;;  %v6149_v48 = vadd.f32 %v6148_v31, %v6147_v62  ;;  %v6261_v5 = vadd.f32 %v6260_v60, %v6259_v43  ;;  %v7303_v38 = vld [vmem:[%s7432_s11 + $0x5e0] ss:$72 sps:$4 sm:$0xff]  }
 0x22f   : > { %4580 = vmatmul.mubr.bf16.gmra.mrb[4].mxu1 %v7294_v40  ;;  %4741 = vmatmul.mubr.bf16.gmra.mrb[4].mxu0 %v7297_v59 }
 0x230   : > { %v8388_v29 = vadd.f32 %v6258_v46, %v3978_v4  ;;  %v3981_v63 = vadd.f32 %v6149_v48, %v8231_v45  ;;  %4587 = vmatprep.mubr.bf16.mxu1 %v7302_v28  ;;  %4748 = vmatprep.mubr.bf16.mxu0 %v7305_v53  ;;  %v7306_v28 = vld [vmem:[%s7432_s11 + $0x668] ss:$72 sps:$4 sm:$0xff]   ;;  %v7314_v48 = vld [vmem:[%s7432_s11 + $0x6fc] ss:$72 sps:$4 sm:$0xff]  }
 0x232   : > { %v8391_v2 = vadd.f32 %v6261_v5, %v3981_v63  ;;  %v6150_v55 = vpop.f32.mrb[156].mxu1  ;;  %v6262_v7 = vpop.f32.mrb[156].mxu0  ;;  %v7317_v5 = vld [vmem:[%s7432_s11 + $0x704] ss:$72 sps:$4 sm:$0xff]  }
 0x233   : > { %v6151_v8 = vpop.f32.mrb[157].mxu1  ;;  %v6263_v19 = vpop.f32.mrb[157].mxu0 }
 0x234   : > { %v6152_v0 = vadd.f32 %v6151_v8, %v6150_v55  ;;  %v6264_v17 = vadd.f32 %v6263_v19, %v6262_v7  ;;  %v6153_v20 = vpop.f32.mrb[158].mxu1  ;;  %v6265_v13 = vpop.f32.mrb[158].mxu0 }
 0x235   : > { %v6154_v27 = vpop.f32.mrb[159].mxu1  ;;  %v6266_v39 = vpop.f32.mrb[159].mxu0 }
 0x236   : > { %v3986_v45 = vadd.f32 %v6152_v0, %v8239_v32  ;;  %v6155_v58 = vadd.f32 %v6154_v27, %v6153_v20  ;;  %v6267_v37 = vadd.f32 %v6266_v39, %v6265_v13  ;;  %v7309_v32 = vld [vmem:[%s7432_s11 + $0x670] ss:$72 sps:$4 sm:$0xff]  }
 0x237   : > { %4588 = vmatmul.mubr.bf16.gmra.mrb[8].mxu1 %v7300_v14  ;;  %4749 = vmatmul.mubr.bf16.gmra.mrb[8].mxu0 %v7303_v38 }
 0x238   : > { %v8398_v18 = vadd.f32 %v6264_v17, %v3986_v45  ;;  %v3989_v40 = vadd.f32 %v6155_v58, %v8241_v12  ;;  %4595 = vmatprep.mubr.bf16.mxu1 %v7308_v11  ;;  %4756 = vmatprep.mubr.bf16.mxu0 %v7311_v22  ;;  %v7312_v11 = vld [vmem:[%s7432_s11 + $0x6f8] ss:$72 sps:$4 sm:$0xff]   ;;  %v7320_v58 = vld [vmem:[%s7432_s11 + $0x78c] ss:$72 sps:$4 sm:$0xff]  }
 0x23a   : > { %v8401_v59 = vadd.f32 %v6267_v37, %v3989_v40  ;;  %v6284_v1 = vpop.f32.mrb[160].mxu1  ;;  %v6396_v46 = vpop.f32.mrb[160].mxu0  ;;  %v7323_v37 = vld [vmem:[%s7432_s11 + $0x794] ss:$72 sps:$4 sm:$0xff]  }
 0x23b   : > { %v6285_v62 = vpop.f32.mrb[161].mxu1  ;;  %v6397_v43 = vpop.f32.mrb[161].mxu0 }
 0x23c   : > { %v6286_v53 = vadd.f32 %v6285_v62, %v6284_v1  ;;  %v6398_v31 = vadd.f32 %v6397_v43, %v6396_v46  ;;  %v6287_v60 = vpop.f32.mrb[162].mxu1  ;;  %v6399_v4 = vpop.f32.mrb[162].mxu0 }
 0x23d   : > { %v6288_v63 = vpop.f32.mrb[163].mxu1  ;;  %v6400_v55 = vpop.f32.mrb[163].mxu0 }
 0x23e   : > { %v4188_v12 = vadd.f32 %v6286_v53, %v8248_v42  ;;  %v6289_v7 = vadd.f32 %v6288_v63, %v6287_v60  ;;  %v6401_v8 = vadd.f32 %v6400_v55, %v6399_v4  ;;  %v7315_v42 = vld [vmem:[%s7432_s11 + $0x700] ss:$72 sps:$4 sm:$0xff]  }
 0x23f   : > { %4596 = vmatmul.mubr.bf16.gmra.mrb[12].mxu1 %v7306_v28  ;;  %4757 = vmatmul.mubr.bf16.gmra.mrb[12].mxu0 %v7309_v32 }
 0x240   : > { %v8408_v19 = vadd.f32 %v6398_v31, %v4188_v12  ;;  %v4191_v14 = vadd.f32 %v6289_v7, %v8251_v34  ;;  %4603 = vmatprep.mubr.bf16.mxu1 %v7314_v48  ;;  %4764 = vmatprep.mubr.bf16.mxu0 %v7317_v5  ;;  %v7318_v48 = vld [vmem:[%s7432_s11 + $0x788] ss:$72 sps:$4 sm:$0xff]   ;;  %v7326_v7 = vld [vmem:[%s7432_s11 + $0x81c] ss:$72 sps:$4 sm:$0xff]  }
 0x242   : > { %v8411_v38 = vadd.f32 %v6401_v8, %v4191_v14  ;;  %v6290_v0 = vpop.f32.mrb[164].mxu1  ;;  %v6402_v17 = vpop.f32.mrb[164].mxu0  ;;  %v7329_v8 = vld [vmem:[%s7432_s11 + $0x824] ss:$72 sps:$4 sm:$0xff]  }
 0x243   : > { %v6291_v20 = vpop.f32.mrb[165].mxu1  ;;  %v6403_v13 = vpop.f32.mrb[165].mxu0 }
 0x244   : > { %v6292_v22 = vadd.f32 %v6291_v20, %v6290_v0  ;;  %v6404_v27 = vadd.f32 %v6403_v13, %v6402_v17  ;;  %v6293_v39 = vpop.f32.mrb[166].mxu1  ;;  %v6405_v45 = vpop.f32.mrb[166].mxu0 }
 0x245   : > { %v6294_v40 = vpop.f32.mrb[167].mxu1  ;;  %v6406_v1 = vpop.f32.mrb[167].mxu0 }
 0x246   : > { %v4196_v34 = vadd.f32 %v6292_v22, %v8258_v26  ;;  %v6295_v46 = vadd.f32 %v6294_v40, %v6293_v39  ;;  %v6407_v62 = vadd.f32 %v6406_v1, %v6405_v45  ;;  %v7321_v26 = vld [vmem:[%s7432_s11 + $0x790] ss:$72 sps:$4 sm:$0xff]  }
 0x247   : > { %4604 = vmatmul.mubr.bf16.gmra.mrb[16].mxu1 %v7312_v11  ;;  %4765 = vmatmul.mubr.bf16.gmra.mrb[16].mxu0 %v7315_v42 }
 0x248   : > { %v8418_v43 = vadd.f32 %v6404_v27, %v4196_v34  ;;  %v4199_v28 = vadd.f32 %v6295_v46, %v8261_v23  ;;  %4611 = vmatprep.mubr.bf16.mxu1 %v7320_v58  ;;  %4772 = vmatprep.mubr.bf16.mxu0 %v7323_v37  ;;  %v7324_v58 = vld [vmem:[%s7432_s11 + $0x818] ss:$72 sps:$4 sm:$0xff]   ;;  %v7332_v46 = vld [vmem:[%s7432_s11 + $0x8ac] ss:$72 sps:$4 sm:$0xff]  }
 0x24a   : > { %v8421_v32 = vadd.f32 %v6407_v62, %v4199_v28  ;;  %v6296_v53 = vpop.f32.mrb[168].mxu1  ;;  %v6408_v31 = vpop.f32.mrb[168].mxu0  ;;  %v7335_v62 = vld [vmem:[%s7432_s11 + $0x8b4] ss:$72 sps:$4 sm:$0xff]  }
 0x24b   : > { %v6297_v60 = vpop.f32.mrb[169].mxu1  ;;  %v6409_v4 = vpop.f32.mrb[169].mxu0 }
 0x24c   : > { %v6298_v5 = vadd.f32 %v6297_v60, %v6296_v53  ;;  %v6410_v63 = vadd.f32 %v6409_v4, %v6408_v31  ;;  %v6299_v55 = vpop.f32.mrb[170].mxu1  ;;  %v6411_v12 = vpop.f32.mrb[170].mxu0 }
 0x24d   : > { %v6300_v14 = vpop.f32.mrb[171].mxu1  ;;  %v6412_v0 = vpop.f32.mrb[171].mxu0 }
 0x24e   : > { %v4204_v23 = vadd.f32 %v6298_v5, %v8268_v41  ;;  %v6301_v17 = vadd.f32 %v6300_v14, %v6299_v55  ;;  %v6413_v20 = vadd.f32 %v6412_v0, %v6411_v12  ;;  %v7327_v41 = vld [vmem:[%s7432_s11 + $0x820] ss:$72 sps:$4 sm:$0xff]  }
 0x24f   : > { %4612 = vmatmul.mubr.bf16.gmra.mrb[20].mxu1 %v7318_v48  ;;  %4773 = vmatmul.mubr.bf16.gmra.mrb[20].mxu0 %v7321_v26 }
 0x250   : > { %v8428_v13 = vadd.f32 %v6410_v63, %v4204_v23  ;;  %v4207_v11 = vadd.f32 %v6301_v17, %v8271_v6  ;;  %4619 = vmatprep.mubr.bf16.mxu1 %v7326_v7  ;;  %4780 = vmatprep.mubr.bf16.mxu0 %v7329_v8  ;;  %v7330_v7 = vld [vmem:[%s7432_s11 + $0x8a8] ss:$72 sps:$4 sm:$0xff]  }
 0x251   : > { %v7333_v8 = vld [vmem:[%s7432_s11 + $0x8b0] ss:$72 sps:$4 sm:$0xff]   ;;  %s5114_s11 = sshll.u32 %s8589_s18, 2 }
 0x252   : > { %v8431_v42 = vadd.f32 %v6413_v20, %v4207_v11  ;;  %v6302_v22 = vpop.f32.mrb[172].mxu1  ;;  %v6414_v27 = vpop.f32.mrb[172].mxu0  ;;  %s8523_s30 = scalar_lea.vmem %s8583_s3, %s5114_s11 }
 0x253   : > { %v6303_v39 = vpop.f32.mrb[173].mxu1  ;;  %v6415_v45 = vpop.f32.mrb[173].mxu0 }
 0x254   : > { %v6304_v37 = vadd.f32 %v6303_v39, %v6302_v22  ;;  %v6416_v40 = vadd.f32 %v6415_v45, %v6414_v27  ;;  %v6305_v1 = vpop.f32.mrb[174].mxu1  ;;  %v6417_v34 = vpop.f32.mrb[174].mxu0 }
 0x255   : > { %v6306_v28 = vpop.f32.mrb[175].mxu1  ;;  %v6418_v53 = vpop.f32.mrb[175].mxu0 }
 0x256   : > { %v4212_v6 = vadd.f32 %v6304_v37, %v8278_v54  ;;  %v6307_v31 = vadd.f32 %v6306_v28, %v6305_v1  ;;  %v6419_v60 = vadd.f32 %v6418_v53, %v6417_v34 }
 0x257   : > { %4620 = vmatmul.mubr.bf16.gmra.mrb[24].mxu1 %v7324_v58  ;;  %4781 = vmatmul.mubr.bf16.gmra.mrb[24].mxu0 %v7327_v41 }
 0x258   : > { %v8438_v4 = vadd.f32 %v6416_v40, %v4212_v6  ;;  %v4215_v48 = vadd.f32 %v6307_v31, %v8281_v49  ;;  %4627 = vmatprep.mubr.bf16.mxu1 %v7332_v46  ;;  %4788 = vmatprep.mubr.bf16.mxu0 %v7335_v62 }
 0x25a   : > { %v8441_v26 = vadd.f32 %v6419_v60, %v4215_v48  ;;  %v6308_v5 = vpop.f32.mrb[176].mxu1  ;;  %v6420_v63 = vpop.f32.mrb[176].mxu0 }
 0x25b   : > { %v6309_v55 = vpop.f32.mrb[177].mxu1  ;;  %v6421_v12 = vpop.f32.mrb[177].mxu0 }
 0x25c   : > { %v6310_v14 = vadd.f32 %v6309_v55, %v6308_v5  ;;  %v6422_v54 = vadd.f32 %v6421_v12, %v6420_v63  ;;  %v6311_v0 = vpop.f32.mrb[178].mxu1  ;;  %v6423_v23 = vpop.f32.mrb[178].mxu0 }
 0x25d   : > { %v6312_v17 = vpop.f32.mrb[179].mxu1  ;;  %v6424_v20 = vpop.f32.mrb[179].mxu0 }
 0x25e   : > { %v4220_v11 = vadd.f32 %v6310_v14, %v8288_v16  ;;  %v6313_v22 = vadd.f32 %v6312_v17, %v6311_v0  ;;  %v6425_v49 = vadd.f32 %v6424_v20, %v6423_v23 }
 0x25f   : > { %4628 = vmatmul.mubr.bf16.gmra.mrb[28].mxu1 %v7330_v7  ;;  %4789 = vmatmul.mubr.bf16.gmra.mrb[28].mxu0 %v7333_v8 }
 0x260   : > { %v8446_v27 = vadd.f32 %v6422_v54, %v4220_v11  ;;  %v4223_v39 = vadd.f32 %v6313_v22, %v8291_v30 }
 0x262   : > { %v8449_v45 = vadd.f32 %v6425_v49, %v4223_v39  ;;  %v6314_v58 = vpop.f32.mrb[180].mxu1  ;;  %v6426_v41 = vpop.f32.mrb[180].mxu0 }
 0x263   : > { %v6315_v37 = vpop.f32.mrb[181].mxu1  ;;  %v6427_v40 = vpop.f32.mrb[181].mxu0 }
 0x264   : > { %v6316_v1 = vadd.f32 %v6315_v37, %v6314_v58  ;;  %v6428_v34 = vadd.f32 %v6427_v40, %v6426_v41  ;;  %v6317_v46 = vpop.f32.mrb[182].mxu1  ;;  %v6429_v62 = vpop.f32.mrb[182].mxu0 }
 0x265   : > { %v6318_v28 = vpop.f32.mrb[183].mxu1  ;;  %v6430_v16 = vpop.f32.mrb[183].mxu0 }
 0x266   : > { %v4228_v53 = vadd.f32 %v6316_v1, %v8298_v21  ;;  %v6319_v6 = vadd.f32 %v6318_v28, %v6317_v46  ;;  %v6431_v31 = vadd.f32 %v6430_v16, %v6429_v62 }
 0x268   : > { %v8452_v60 = vadd.f32 %v6428_v34, %v4228_v53  ;;  %v4231_v30 = vadd.f32 %v6319_v6, %v8301_v3 }
 0x26a   : > { %v8455_v48 = vadd.f32 %v6431_v31, %v4231_v30  ;;  %v6320_v5 = vpop.f32.mrb[184].mxu1  ;;  %v6432_v63 = vpop.f32.mrb[184].mxu0 }
 0x26b   : > { %v6321_v55 = vpop.f32.mrb[185].mxu1  ;;  %v6433_v12 = vpop.f32.mrb[185].mxu0 }
 0x26c   : > { %v6322_v7 = vadd.f32 %v6321_v55, %v6320_v5  ;;  %v6434_v8 = vadd.f32 %v6433_v12, %v6432_v63  ;;  %v6323_v14 = vpop.f32.mrb[186].mxu1  ;;  %v6435_v54 = vpop.f32.mrb[186].mxu0 }
 0x26d   : > { %v6324_v0 = vpop.f32.mrb[187].mxu1  ;;  %v6436_v23 = vpop.f32.mrb[187].mxu0 }
 0x26e   : > { %v4236_v21 = vadd.f32 %v6322_v7, %v8308_v10  ;;  %v6325_v17 = vadd.f32 %v6324_v0, %v6323_v14  ;;  %v6437_v20 = vadd.f32 %v6436_v23, %v6435_v54 }
 0x270   : > { %v8458_v11 = vadd.f32 %v6434_v8, %v4236_v21  ;;  %v4239_v3 = vadd.f32 %v6325_v17, %v8311_v50 }
 0x272   : > { %v8461_v22 = vadd.f32 %v6437_v20, %v4239_v3  ;;  %v6326_v49 = vpop.f32.mrb[188].mxu1  ;;  %v6438_v39 = vpop.f32.mrb[188].mxu0 }
 0x273   : > { %v6327_v58 = vpop.f32.mrb[189].mxu1  ;;  %v6439_v41 = vpop.f32.mrb[189].mxu0 }
 0x274   : > { %v6328_v37 = vadd.f32 %v6327_v58, %v6326_v49  ;;  %v6440_v40 = vadd.f32 %v6439_v41, %v6438_v39  ;;  %v6329_v1 = vpop.f32.mrb[190].mxu1  ;;  %v6441_v34 = vpop.f32.mrb[190].mxu0 }
 0x275   : > { %v6330_v46 = vpop.f32.mrb[191].mxu1  ;;  %v6442_v62 = vpop.f32.mrb[191].mxu0 }
 0x276   : > { %v4244_v10 = vadd.f32 %v6328_v37, %v8318_v52  ;;  %v6331_v28 = vadd.f32 %v6330_v46, %v6329_v1  ;;  %v6443_v16 = vadd.f32 %v6442_v62, %v6441_v34 }
 0x278   : > { %v8464_v53 = vadd.f32 %v6440_v40, %v4244_v10  ;;  %v4247_v50 = vadd.f32 %v6331_v28, %v8321_v47 }
 0x27a   : > { %v8467_v6 = vadd.f32 %v6443_v16, %v4247_v50  ;;  %v6332_v31 = vpop.f32.mrb[192].mxu1  ;;  %v6444_v30 = vpop.f32.mrb[192].mxu0 }
 0x27b   : > { %v6333_v5 = vpop.f32.mrb[193].mxu1  ;;  %v6445_v63 = vpop.f32.mrb[193].mxu0 }
 0x27c   : > { %v6334_v55 = vadd.f32 %v6333_v5, %v6332_v31  ;;  %v6446_v12 = vadd.f32 %v6445_v63, %v6444_v30  ;;  %v6335_v7 = vpop.f32.mrb[194].mxu1  ;;  %v6447_v8 = vpop.f32.mrb[194].mxu0 }
 0x27d   : > { %v6336_v14 = vpop.f32.mrb[195].mxu1  ;;  %v6448_v54 = vpop.f32.mrb[195].mxu0 }
 0x27e   : > { %v4252_v52 = vadd.f32 %v6334_v55, %v8328_v36  ;;  %v6337_v0 = vadd.f32 %v6336_v14, %v6335_v7  ;;  %v6449_v23 = vadd.f32 %v6448_v54, %v6447_v8 }
 0x280   : > { %v8470_v21 = vadd.f32 %v6446_v12, %v4252_v52  ;;  %v4255_v47 = vadd.f32 %v6337_v0, %v8331_v35 }
 0x282   : > { %v8473_v17 = vadd.f32 %v6449_v23, %v4255_v47  ;;  %v6338_v20 = vpop.f32.mrb[196].mxu1  ;;  %v6450_v3 = vpop.f32.mrb[196].mxu0 }
 0x283   : > { %v6339_v49 = vpop.f32.mrb[197].mxu1  ;;  %v6451_v39 = vpop.f32.mrb[197].mxu0 }
 0x284   : > { %v6340_v58 = vadd.f32 %v6339_v49, %v6338_v20  ;;  %v6452_v41 = vadd.f32 %v6451_v39, %v6450_v3  ;;  %v6341_v37 = vpop.f32.mrb[198].mxu1  ;;  %v6453_v40 = vpop.f32.mrb[198].mxu0 }
 0x285   : > { %v6342_v1 = vpop.f32.mrb[199].mxu1  ;;  %v6454_v34 = vpop.f32.mrb[199].mxu0 }
 0x286   : > { %v4260_v36 = vadd.f32 %v6340_v58, %v8338_v15  ;;  %v6343_v46 = vadd.f32 %v6342_v1, %v6341_v37  ;;  %v6455_v62 = vadd.f32 %v6454_v34, %v6453_v40 }
 0x288   : > { %v8476_v10 = vadd.f32 %v6452_v41, %v4260_v36  ;;  %v4263_v35 = vadd.f32 %v6343_v46, %v8341_v25 }
 0x28a   : > { %v8479_v28 = vadd.f32 %v6455_v62, %v4263_v35  ;;  %v6344_v16 = vpop.f32.mrb[200].mxu1  ;;  %v6456_v50 = vpop.f32.mrb[200].mxu0 }
 0x28b   : > { %v6345_v31 = vpop.f32.mrb[201].mxu1  ;;  %v6457_v30 = vpop.f32.mrb[201].mxu0 }
 0x28c   : > { %v6346_v5 = vadd.f32 %v6345_v31, %v6344_v16  ;;  %v6458_v63 = vadd.f32 %v6457_v30, %v6456_v50  ;;  %v6347_v55 = vpop.f32.mrb[202].mxu1  ;;  %v6459_v12 = vpop.f32.mrb[202].mxu0 }
 0x28d   : > { %v6348_v7 = vpop.f32.mrb[203].mxu1  ;;  %v6460_v8 = vpop.f32.mrb[203].mxu0 }
 0x28e   : > { %v4268_v15 = vadd.f32 %v6346_v5, %v8348_v57  ;;  %v6349_v14 = vadd.f32 %v6348_v7, %v6347_v55  ;;  %v6461_v54 = vadd.f32 %v6460_v8, %v6459_v12 }
 0x290   : > { %v8482_v52 = vadd.f32 %v6458_v63, %v4268_v15  ;;  %v4271_v25 = vadd.f32 %v6349_v14, %v8351_v51 }
 0x292   : > { %v8485_v0 = vadd.f32 %v6461_v54, %v4271_v25  ;;  %v6350_v23 = vpop.f32.mrb[204].mxu1  ;;  %v6462_v47 = vpop.f32.mrb[204].mxu0 }
 0x293   : > { %v6351_v20 = vpop.f32.mrb[205].mxu1  ;;  %v6463_v3 = vpop.f32.mrb[205].mxu0 }
 0x294   : > { %v6352_v49 = vadd.f32 %v6351_v20, %v6350_v23  ;;  %v6464_v39 = vadd.f32 %v6463_v3, %v6462_v47  ;;  %v6353_v58 = vpop.f32.mrb[206].mxu1  ;;  %v6465_v41 = vpop.f32.mrb[206].mxu0 }
 0x295   : > { %v6354_v37 = vpop.f32.mrb[207].mxu1  ;;  %v6466_v40 = vpop.f32.mrb[207].mxu0 }
 0x296   : > { %v4276_v57 = vadd.f32 %v6352_v49, %v8358_v9  ;;  %v6355_v1 = vadd.f32 %v6354_v37, %v6353_v58  ;;  %v6467_v34 = vadd.f32 %v6466_v40, %v6465_v41 }
 0x298   : > { %v8488_v36 = vadd.f32 %v6464_v39, %v4276_v57  ;;  %v4279_v51 = vadd.f32 %v6355_v1, %v8361_v24 }
 0x29a   : > { %v8491_v46 = vadd.f32 %v6467_v34, %v4279_v51  ;;  %v6356_v62 = vpop.f32.mrb[208].mxu1  ;;  %v6468_v35 = vpop.f32.mrb[208].mxu0 }
 0x29b   : > { %v6357_v16 = vpop.f32.mrb[209].mxu1  ;;  %v6469_v50 = vpop.f32.mrb[209].mxu0 }
 0x29c   : > { %v6358_v31 = vadd.f32 %v6357_v16, %v6356_v62  ;;  %v6470_v30 = vadd.f32 %v6469_v50, %v6468_v35  ;;  %v6359_v5 = vpop.f32.mrb[210].mxu1  ;;  %v6471_v63 = vpop.f32.mrb[210].mxu0 }
 0x29d   : > { %v6360_v55 = vpop.f32.mrb[211].mxu1  ;;  %v6472_v12 = vpop.f32.mrb[211].mxu0 }
 0x29e   : > { %v4284_v9 = vadd.f32 %v6358_v31, %v8368_v44  ;;  %v6361_v7 = vadd.f32 %v6360_v55, %v6359_v5  ;;  %v6473_v8 = vadd.f32 %v6472_v12, %v6471_v63 }
 0x2a0   : > { %v8494_v15 = vadd.f32 %v6470_v30, %v4284_v9  ;;  %v4287_v24 = vadd.f32 %v6361_v7, %v8371_v56 }
 0x2a2   : > { %v8497_v14 = vadd.f32 %v6473_v8, %v4287_v24  ;;  %v6362_v54 = vpop.f32.mrb[212].mxu1  ;;  %v6474_v25 = vpop.f32.mrb[212].mxu0 }
 0x2a3   : > { %v6363_v23 = vpop.f32.mrb[213].mxu1  ;;  %v6475_v47 = vpop.f32.mrb[213].mxu0 }
 0x2a4   : > { %v6364_v20 = vadd.f32 %v6363_v23, %v6362_v54  ;;  %v6476_v3 = vadd.f32 %v6475_v47, %v6474_v25  ;;  %v6365_v49 = vpop.f32.mrb[214].mxu1  ;;  %v6477_v39 = vpop.f32.mrb[214].mxu0 }
 0x2a5   : > { %v6366_v58 = vpop.f32.mrb[215].mxu1  ;;  %v6478_v41 = vpop.f32.mrb[215].mxu0 }
 0x2a6   : > { %v4292_v44 = vadd.f32 %v6364_v20, %v8378_v61  ;;  %v6367_v37 = vadd.f32 %v6366_v58, %v6365_v49  ;;  %v6479_v40 = vadd.f32 %v6478_v41, %v6477_v39 }
 0x2a8   : > { %v8500_v57 = vadd.f32 %v6476_v3, %v4292_v44  ;;  %v4295_v56 = vadd.f32 %v6367_v37, %v8381_v33 }
 0x2aa   : > { %v8503_v1 = vadd.f32 %v6479_v40, %v4295_v56  ;;  %v6368_v34 = vpop.f32.mrb[216].mxu1  ;;  %v6480_v51 = vpop.f32.mrb[216].mxu0 }
 0x2ab   : > { %v6369_v62 = vpop.f32.mrb[217].mxu1  ;;  %v6481_v35 = vpop.f32.mrb[217].mxu0 }
 0x2ac   : > { %v6370_v16 = vadd.f32 %v6369_v62, %v6368_v34  ;;  %v6482_v50 = vadd.f32 %v6481_v35, %v6480_v51  ;;  %v6371_v31 = vpop.f32.mrb[218].mxu1  ;;  %v6483_v30 = vpop.f32.mrb[218].mxu0 }
 0x2ad   : > { %v6372_v5 = vpop.f32.mrb[219].mxu1  ;;  %v6484_v63 = vpop.f32.mrb[219].mxu0 }
 0x2ae   : > { %v4300_v61 = vadd.f32 %v6370_v16, %v8388_v29  ;;  %v6373_v55 = vadd.f32 %v6372_v5, %v6371_v31  ;;  %v6485_v12 = vadd.f32 %v6484_v63, %v6483_v30 }
 0x2b0   : > { %v8506_v9 = vadd.f32 %v6482_v50, %v4300_v61  ;;  %v4303_v33 = vadd.f32 %v6373_v55, %v8391_v2 }
 0x2b2   : > { %v8509_v7 = vadd.f32 %v6485_v12, %v4303_v33  ;;  %v6374_v8 = vpop.f32.mrb[220].mxu1  ;;  %v6486_v24 = vpop.f32.mrb[220].mxu0 }
 0x2b3   : > { %v6375_v54 = vpop.f32.mrb[221].mxu1  ;;  %v6487_v25 = vpop.f32.mrb[221].mxu0 }
 0x2b4   : > { %v6376_v23 = vadd.f32 %v6375_v54, %v6374_v8  ;;  %v6488_v47 = vadd.f32 %v6487_v25, %v6486_v24  ;;  %v6377_v20 = vpop.f32.mrb[222].mxu1  ;;  %v6489_v3 = vpop.f32.mrb[222].mxu0 }
 0x2b5   : > { %v6378_v49 = vpop.f32.mrb[223].mxu1  ;;  %v6490_v39 = vpop.f32.mrb[223].mxu0 }
 0x2b6   : > { %v4308_v29 = vadd.f32 %v6376_v23, %v8398_v18  ;;  %v6379_v58 = vadd.f32 %v6378_v49, %v6377_v20  ;;  %v6491_v41 = vadd.f32 %v6490_v39, %v6489_v3 }
 0x2b8   : > { %v8512_v44 = vadd.f32 %v6488_v47, %v4308_v29  ;;  %v4311_v2 = vadd.f32 %v6379_v58, %v8401_v59 }
 0x2ba   : > { %v8515_v37 = vadd.f32 %v6491_v41, %v4311_v2  ;;  %v6508_v40 = vpop.f32.mrb[224].mxu1  ;;  %v6620_v56 = vpop.f32.mrb[224].mxu0 }
 0x2bb   : > { %v6509_v34 = vpop.f32.mrb[225].mxu1  ;;  %v6621_v51 = vpop.f32.mrb[225].mxu0 }
 0x2bc   : > { %v6510_v62 = vadd.f32 %v6509_v34, %v6508_v40  ;;  %v6622_v35 = vadd.f32 %v6621_v51, %v6620_v56  ;;  %v6511_v16 = vpop.f32.mrb[226].mxu1  ;;  %v6623_v50 = vpop.f32.mrb[226].mxu0 }
 0x2bd   : > { %v6512_v31 = vpop.f32.mrb[227].mxu1  ;;  %v6624_v30 = vpop.f32.mrb[227].mxu0 }
 0x2be   : > { %v4510_v18 = vadd.f32 %v6510_v62, %v8408_v19  ;;  %v6513_v5 = vadd.f32 %v6512_v31, %v6511_v16  ;;  %v6625_v63 = vadd.f32 %v6624_v30, %v6623_v50 }
 0x2c0   : > { %v4671_v61 = vadd.f32 %v6622_v35, %v4510_v18  ;;  %v4513_v59 = vadd.f32 %v6513_v5, %v8411_v38 }
 0x2c2   : > { %v4674_v55 = vadd.f32 %v6625_v63, %v4513_v59  ;;  %v6514_v12 = vpop.f32.mrb[228].mxu1  ;;  %v6626_v33 = vpop.f32.mrb[228].mxu0  ;;  %v4797_v54 = vmax.f32 %v4671_v61, 0.0 }
 0x2c3   : > { %v6515_v8 = vpop.f32.mrb[229].mxu1  ;;  %v6627_v24 = vpop.f32.mrb[229].mxu0 }
 0x2c4   : > { %v4798_v25 = vmax.f32 %v4674_v55, 0.0  ;;  %v6516_v23 = vadd.f32 %v6515_v8, %v6514_v12  ;;  %v6628_v47 = vadd.f32 %v6627_v24, %v6626_v33  ;;  %v6517_v20 = vpop.f32.mrb[230].mxu1  ;;  %v6629_v3 = vpop.f32.mrb[230].mxu0 }
 0x2c5   : > { %v6518_v19 = vpop.f32.mrb[231].mxu1  ;;  %v6630_v38 = vpop.f32.mrb[231].mxu0 }
 0x2c6   : > { %v5616_v49 = vpack.c.bf16 %v4798_v25, %v4797_v54  ;;  %v4518_v39 = vadd.f32 %v6516_v23, %v8418_v43  ;;  %v6519_v29 = vadd.f32 %v6518_v19, %v6517_v20  ;;  %v6631_v58 = vadd.f32 %v6630_v38, %v6629_v3 }
 0x2c8   : > { %5617 = vst [vmem:[%s8523_s30] sm:$0xff] %v5616_v49   ;;  %v4679_v41 = vadd.f32 %v6628_v47, %v4518_v39  ;;  %v4521_v2 = vadd.f32 %v6519_v29, %v8421_v32 }
 0x2ca   : > { %v4682_v40 = vadd.f32 %v6631_v58, %v4521_v2  ;;  %v6520_v56 = vpop.f32.mrb[232].mxu1  ;;  %v6632_v34 = vpop.f32.mrb[232].mxu0  ;;  %v4799_v35 = vmax.f32 %v4679_v41, 0.0 }
 0x2cb   : > { %v6521_v51 = vpop.f32.mrb[233].mxu1  ;;  %v6633_v62 = vpop.f32.mrb[233].mxu0 }
 0x2cc   : > { %v4800_v16 = vmax.f32 %v4682_v40, 0.0  ;;  %v6522_v50 = vadd.f32 %v6521_v51, %v6520_v56  ;;  %v6634_v31 = vadd.f32 %v6633_v62, %v6632_v34  ;;  %v6523_v30 = vpop.f32.mrb[234].mxu1  ;;  %v6635_v18 = vpop.f32.mrb[234].mxu0 }
 0x2cd   : > { %v6524_v5 = vpop.f32.mrb[235].mxu1  ;;  %v6636_v43 = vpop.f32.mrb[235].mxu0 }
 0x2ce   : > { %v5621_v63 = vpack.c.bf16 %v4800_v16, %v4799_v35  ;;  %v4526_v61 = vadd.f32 %v6522_v50, %v8428_v13  ;;  %v6525_v59 = vadd.f32 %v6524_v5, %v6523_v30  ;;  %v6637_v55 = vadd.f32 %v6636_v43, %v6635_v18 }
 0x2d0   : > { %5693 = vst [vmem:[%s8523_s30 + $0x8] sm:$0xff] %v5621_v63   ;;  %v4687_v32 = vadd.f32 %v6634_v31, %v4526_v61  ;;  %v4529_v12 = vadd.f32 %v6525_v59, %v8431_v42 }
 0x2d2   : > { %v4690_v33 = vadd.f32 %v6637_v55, %v4529_v12  ;;  %v6526_v8 = vpop.f32.mrb[236].mxu1  ;;  %v6638_v24 = vpop.f32.mrb[236].mxu0  ;;  %v4801_v23 = vmax.f32 %v4687_v32, 0.0 }
 0x2d3   : > { %v6527_v54 = vpop.f32.mrb[237].mxu1  ;;  %v6639_v25 = vpop.f32.mrb[237].mxu0 }
 0x2d4   : > { %v4802_v47 = vmax.f32 %v4690_v33, 0.0  ;;  %v6528_v20 = vadd.f32 %v6527_v54, %v6526_v8  ;;  %v6640_v3 = vadd.f32 %v6639_v25, %v6638_v24  ;;  %v6529_v19 = vpop.f32.mrb[238].mxu1  ;;  %v6641_v38 = vpop.f32.mrb[238].mxu0 }
 0x2d5   : > { %v6530_v49 = vpop.f32.mrb[239].mxu1  ;;  %v6642_v13 = vpop.f32.mrb[239].mxu0 }
 0x2d6   : > { %v5626_v39 = vpack.c.bf16 %v4802_v47, %v4801_v23  ;;  %v4534_v29 = vadd.f32 %v6528_v20, %v8438_v4  ;;  %v6531_v58 = vadd.f32 %v6530_v49, %v6529_v19  ;;  %v6643_v41 = vadd.f32 %v6642_v13, %v6641_v38 }
 0x2d8   : > { %5694 = vst [vmem:[%s8523_s30 + $0x10] sm:$0xff] %v5626_v39   ;;  %v4695_v42 = vadd.f32 %v6640_v3, %v4534_v29  ;;  %v4537_v2 = vadd.f32 %v6531_v58, %v8441_v26 }
 0x2da   : > { %v4698_v40 = vadd.f32 %v6643_v41, %v4537_v2  ;;  %v6532_v56 = vpop.f32.mrb[240].mxu1  ;;  %v6644_v34 = vpop.f32.mrb[240].mxu0  ;;  %v4803_v35 = vmax.f32 %v4695_v42, 0.0 }
 0x2db   : > { %v6533_v51 = vpop.f32.mrb[241].mxu1  ;;  %v6645_v62 = vpop.f32.mrb[241].mxu0 }
 0x2dc   : > { %v4804_v16 = vmax.f32 %v4698_v40, 0.0  ;;  %v6534_v50 = vadd.f32 %v6533_v51, %v6532_v56  ;;  %v6646_v31 = vadd.f32 %v6645_v62, %v6644_v34  ;;  %v6535_v30 = vpop.f32.mrb[242].mxu1  ;;  %v6647_v18 = vpop.f32.mrb[242].mxu0 }
 0x2dd   : > { %v6536_v5 = vpop.f32.mrb[243].mxu1  ;;  %v6648_v4 = vpop.f32.mrb[243].mxu0 }
 0x2de   : > { %v5631_v43 = vpack.c.bf16 %v4804_v16, %v4803_v35  ;;  %v4542_v63 = vadd.f32 %v6534_v50, %v8446_v27  ;;  %v6537_v61 = vadd.f32 %v6536_v5, %v6535_v30  ;;  %v6649_v59 = vadd.f32 %v6648_v4, %v6647_v18 }
 0x2e0   : > { %5695 = vst [vmem:[%s8523_s30 + $0x18] sm:$0xff] %v5631_v43   ;;  %v4703_v26 = vadd.f32 %v6646_v31, %v4542_v63  ;;  %v4545_v55 = vadd.f32 %v6537_v61, %v8449_v45 }
 0x2e2   : > { %v4706_v32 = vadd.f32 %v6649_v59, %v4545_v55  ;;  %v6538_v12 = vpop.f32.mrb[244].mxu1  ;;  %v6650_v33 = vpop.f32.mrb[244].mxu0  ;;  %v4805_v54 = vmax.f32 %v4703_v26, 0.0 }
 0x2e3   : > { %v6539_v8 = vpop.f32.mrb[245].mxu1  ;;  %v6651_v24 = vpop.f32.mrb[245].mxu0 }
 0x2e4   : > { %v4806_v25 = vmax.f32 %v4706_v32, 0.0  ;;  %v6540_v23 = vadd.f32 %v6539_v8, %v6538_v12  ;;  %v6652_v47 = vadd.f32 %v6651_v24, %v6650_v33  ;;  %v6541_v20 = vpop.f32.mrb[246].mxu1  ;;  %v6653_v3 = vpop.f32.mrb[246].mxu0 }
 0x2e5   : > { %v6542_v19 = vpop.f32.mrb[247].mxu1  ;;  %v6654_v27 = vpop.f32.mrb[247].mxu0 }
 0x2e6   : > { %v5636_v38 = vpack.c.bf16 %v4806_v25, %v4805_v54  ;;  %v4550_v49 = vadd.f32 %v6540_v23, %v8452_v60  ;;  %v6543_v13 = vadd.f32 %v6542_v19, %v6541_v20  ;;  %v6655_v39 = vadd.f32 %v6654_v27, %v6653_v3 }
 0x2e8   : > { %5696 = vst [vmem:[%s8523_s30 + $0x20] sm:$0xff] %v5636_v38   ;;  %v4711_v45 = vadd.f32 %v6652_v47, %v4550_v49  ;;  %v4553_v29 = vadd.f32 %v6543_v13, %v8455_v48 }
 0x2ea   : > { %v4714_v58 = vadd.f32 %v6655_v39, %v4553_v29  ;;  %v6544_v41 = vpop.f32.mrb[248].mxu1  ;;  %v6656_v42 = vpop.f32.mrb[248].mxu0  ;;  %v4807_v56 = vmax.f32 %v4711_v45, 0.0 }
 0x2eb   : > { %v6545_v2 = vpop.f32.mrb[249].mxu1  ;;  %v6657_v40 = vpop.f32.mrb[249].mxu0 }
 0x2ec   : > { %v4808_v34 = vmax.f32 %v4714_v58, 0.0  ;;  %v6546_v51 = vadd.f32 %v6545_v2, %v6544_v41  ;;  %v6658_v62 = vadd.f32 %v6657_v40, %v6656_v42  ;;  %v6547_v35 = vpop.f32.mrb[250].mxu1  ;;  %v6659_v16 = vpop.f32.mrb[250].mxu0 }
 0x2ed   : > { %v6548_v50 = vpop.f32.mrb[251].mxu1  ;;  %v6660_v60 = vpop.f32.mrb[251].mxu0 }
 0x2ee   : > { %v5641_v31 = vpack.c.bf16 %v4808_v34, %v4807_v56  ;;  %v4558_v30 = vadd.f32 %v6546_v51, %v8458_v11  ;;  %v6549_v18 = vadd.f32 %v6548_v50, %v6547_v35  ;;  %v6661_v5 = vadd.f32 %v6660_v60, %v6659_v16 }
 0x2f0   : > { %5697 = vst [vmem:[%s8523_s30 + $0x28] sm:$0xff] %v5641_v31   ;;  %v4719_v48 = vadd.f32 %v6658_v62, %v4558_v30  ;;  %v4561_v4 = vadd.f32 %v6549_v18, %v8461_v22 }
 0x2f2   : > { %v4722_v43 = vadd.f32 %v6661_v5, %v4561_v4  ;;  %v6550_v63 = vpop.f32.mrb[252].mxu1  ;;  %v6662_v61 = vpop.f32.mrb[252].mxu0  ;;  %v4809_v55 = vmax.f32 %v4719_v48, 0.0 }
 0x2f3   : > { %v6551_v59 = vpop.f32.mrb[253].mxu1  ;;  %v6663_v26 = vpop.f32.mrb[253].mxu0 }
 0x2f4   : > { %v4810_v32 = vmax.f32 %v4722_v43, 0.0  ;;  %v6552_v12 = vadd.f32 %v6551_v59, %v6550_v63  ;;  %v6664_v33 = vadd.f32 %v6663_v26, %v6662_v61  ;;  %v6553_v8 = vpop.f32.mrb[254].mxu1  ;;  %v6665_v24 = vpop.f32.mrb[254].mxu0 }
 0x2f5   : > { %v6554_v54 = vpop.f32.mrb[255].mxu1  ;;  %v6666_v11 = vpop.f32.mrb[255].mxu0 }
 0x2f6   : > { %v5646_v25 = vpack.c.bf16 %v4810_v32, %v4809_v55  ;;  %v4566_v23 = vadd.f32 %v6552_v12, %v8464_v53  ;;  %v6555_v47 = vadd.f32 %v6554_v54, %v6553_v8  ;;  %v6667_v20 = vadd.f32 %v6666_v11, %v6665_v24 }
 0x2f8   : > { %5698 = vst [vmem:[%s8523_s30 + $0x30] sm:$0xff] %v5646_v25   ;;  %v4727_v22 = vadd.f32 %v6664_v33, %v4566_v23  ;;  %v4569_v3 = vadd.f32 %v6555_v47, %v8467_v6 }
 0x2fa   : > { %v4730_v19 = vadd.f32 %v6667_v20, %v4569_v3  ;;  %v6556_v27 = vpop.f32.mrb[0].mxu1  ;;  %v6668_v38 = vpop.f32.mrb[0].mxu0  ;;  %v4811_v39 = vmax.f32 %v4727_v22, 0.0 }
 0x2fb   : > { %v6557_v49 = vpop.f32.mrb[1].mxu1  ;;  %v6669_v13 = vpop.f32.mrb[1].mxu0 }
 0x2fc   : > { %v4812_v45 = vmax.f32 %v4730_v19, 0.0  ;;  %v6558_v29 = vadd.f32 %v6557_v49, %v6556_v27  ;;  %v6670_v58 = vadd.f32 %v6669_v13, %v6668_v38  ;;  %v6559_v41 = vpop.f32.mrb[2].mxu1  ;;  %v6671_v42 = vpop.f32.mrb[2].mxu0 }
 0x2fd   : > { %v6560_v2 = vpop.f32.mrb[3].mxu1  ;;  %v6672_v53 = vpop.f32.mrb[3].mxu0 }
 0x2fe   : > { %v5651_v40 = vpack.c.bf16 %v4812_v45, %v4811_v39  ;;  %v4574_v56 = vadd.f32 %v6558_v29, %v8470_v21  ;;  %v6561_v34 = vadd.f32 %v6560_v2, %v6559_v41  ;;  %v6673_v51 = vadd.f32 %v6672_v53, %v6671_v42 }
 0x300   : > { %5699 = vst [vmem:[%s8523_s30 + $0x38] sm:$0xff] %v5651_v40   ;;  %v4735_v6 = vadd.f32 %v6670_v58, %v4574_v56  ;;  %v4577_v62 = vadd.f32 %v6561_v34, %v8473_v17 }
 0x302   : > { %v4738_v35 = vadd.f32 %v6673_v51, %v4577_v62  ;;  %v6562_v16 = vpop.f32.mrb[4].mxu1  ;;  %v6674_v50 = vpop.f32.mrb[4].mxu0  ;;  %v4813_v30 = vmax.f32 %v4735_v6, 0.0 }
 0x303   : > { %v6563_v60 = vpop.f32.mrb[5].mxu1  ;;  %v6675_v31 = vpop.f32.mrb[5].mxu0 }
 0x304   : > { %v4814_v18 = vmax.f32 %v4738_v35, 0.0  ;;  %v6564_v5 = vadd.f32 %v6563_v60, %v6562_v16  ;;  %v6676_v48 = vadd.f32 %v6675_v31, %v6674_v50  ;;  %v6565_v4 = vpop.f32.mrb[6].mxu1  ;;  %v6677_v43 = vpop.f32.mrb[6].mxu0 }
 0x305   : > { %v6566_v63 = vpop.f32.mrb[7].mxu1  ;;  %v6678_v21 = vpop.f32.mrb[7].mxu0 }
 0x306   : > { %v5656_v61 = vpack.c.bf16 %v4814_v18, %v4813_v30  ;;  %v4582_v59 = vadd.f32 %v6564_v5, %v8476_v10  ;;  %v6567_v26 = vadd.f32 %v6566_v63, %v6565_v4  ;;  %v6679_v55 = vadd.f32 %v6678_v21, %v6677_v43 }
 0x308   : > { %5700 = vst [vmem:[%s8523_s30 + $0x40] sm:$0xff] %v5656_v61   ;;  %v4743_v17 = vadd.f32 %v6676_v48, %v4582_v59  ;;  %v4585_v32 = vadd.f32 %v6567_v26, %v8479_v28 }
 0x30a   : > { %v4746_v12 = vadd.f32 %v6679_v55, %v4585_v32  ;;  %v6568_v33 = vpop.f32.mrb[8].mxu1  ;;  %v6680_v8 = vpop.f32.mrb[8].mxu0  ;;  %v4815_v11 = vmax.f32 %v4743_v17, 0.0 }
 0x30b   : > { %v6569_v24 = vpop.f32.mrb[9].mxu1  ;;  %v6681_v54 = vpop.f32.mrb[9].mxu0 }
 0x30c   : > { %v4816_v25 = vmax.f32 %v4746_v12, 0.0  ;;  %v6570_v23 = vadd.f32 %v6569_v24, %v6568_v33  ;;  %v6682_v47 = vadd.f32 %v6681_v54, %v6680_v8  ;;  %v6571_v20 = vpop.f32.mrb[10].mxu1  ;;  %v6683_v22 = vpop.f32.mrb[10].mxu0 }
 0x30d   : > { %v6572_v3 = vpop.f32.mrb[11].mxu1  ;;  %v6684_v10 = vpop.f32.mrb[11].mxu0 }
 0x30e   : > { %v5661_v19 = vpack.c.bf16 %v4816_v25, %v4815_v11  ;;  %v4590_v27 = vadd.f32 %v6570_v23, %v8482_v52  ;;  %v6573_v38 = vadd.f32 %v6572_v3, %v6571_v20  ;;  %v6685_v49 = vadd.f32 %v6684_v10, %v6683_v22 }
 0x310   : > { %5701 = vst [vmem:[%s8523_s30 + $0x48] sm:$0xff] %v5661_v19   ;;  %v4751_v28 = vadd.f32 %v6682_v47, %v4590_v27  ;;  %v4593_v13 = vadd.f32 %v6573_v38, %v8485_v0 }
 0x312   : > { %v4754_v39 = vadd.f32 %v6685_v49, %v4593_v13  ;;  %v6574_v45 = vpop.f32.mrb[12].mxu1  ;;  %v6686_v29 = vpop.f32.mrb[12].mxu0  ;;  %v4817_v42 = vmax.f32 %v4751_v28, 0.0 }
 0x313   : > { %v6575_v58 = vpop.f32.mrb[13].mxu1  ;;  %v6687_v41 = vpop.f32.mrb[13].mxu0 }
 0x314   : > { %v4818_v2 = vmax.f32 %v4754_v39, 0.0  ;;  %v6576_v53 = vadd.f32 %v6575_v58, %v6574_v45  ;;  %v6688_v40 = vadd.f32 %v6687_v41, %v6686_v29  ;;  %v6577_v56 = vpop.f32.mrb[14].mxu1  ;;  %v6689_v34 = vpop.f32.mrb[14].mxu0 }
 0x315   : > { %v6578_v51 = vpop.f32.mrb[15].mxu1  ;;  %v6690_v52 = vpop.f32.mrb[15].mxu0 }
 0x316   : > { %v5666_v6 = vpack.c.bf16 %v4818_v2, %v4817_v42  ;;  %v4598_v62 = vadd.f32 %v6576_v53, %v8488_v36  ;;  %v6579_v35 = vadd.f32 %v6578_v51, %v6577_v56  ;;  %v6691_v16 = vadd.f32 %v6690_v52, %v6689_v34 }
 0x318   : > { %5702 = vst [vmem:[%s8523_s30 + $0x50] sm:$0xff] %v5666_v6   ;;  %v4759_v0 = vadd.f32 %v6688_v40, %v4598_v62  ;;  %v4601_v50 = vadd.f32 %v6579_v35, %v8491_v46 }
 0x31a   : > { %v4762_v60 = vadd.f32 %v6691_v16, %v4601_v50  ;;  %v6580_v31 = vpop.f32.mrb[16].mxu1  ;;  %v6692_v30 = vpop.f32.mrb[16].mxu0  ;;  %v4819_v48 = vmax.f32 %v4759_v0, 0.0 }
 0x31b   : > { %v6581_v18 = vpop.f32.mrb[17].mxu1  ;;  %v6693_v5 = vpop.f32.mrb[17].mxu0 }
 0x31c   : > { %v4820_v4 = vmax.f32 %v4762_v60, 0.0  ;;  %v6582_v43 = vadd.f32 %v6581_v18, %v6580_v31  ;;  %v6694_v63 = vadd.f32 %v6693_v5, %v6692_v30  ;;  %v6583_v21 = vpop.f32.mrb[18].mxu1  ;;  %v6695_v61 = vpop.f32.mrb[18].mxu0 }
 0x31d   : > { %v6584_v59 = vpop.f32.mrb[19].mxu1  ;;  %v6696_v36 = vpop.f32.mrb[19].mxu0 }
 0x31e   : > { %v5671_v26 = vpack.c.bf16 %v4820_v4, %v4819_v48  ;;  %v4606_v55 = vadd.f32 %v6582_v43, %v8494_v15  ;;  %v6585_v17 = vadd.f32 %v6584_v59, %v6583_v21  ;;  %v6697_v32 = vadd.f32 %v6696_v36, %v6695_v61 }
 0x320   : > { %5703 = vst [vmem:[%s8523_s30 + $0x58] sm:$0xff] %v5671_v26   ;;  %v4767_v46 = vadd.f32 %v6694_v63, %v4606_v55  ;;  %v4609_v12 = vadd.f32 %v6585_v17, %v8497_v14 }
 0x322   : > { %v4770_v33 = vadd.f32 %v6697_v32, %v4609_v12  ;;  %v6586_v8 = vpop.f32.mrb[20].mxu1  ;;  %v6698_v24 = vpop.f32.mrb[20].mxu0  ;;  %v4821_v25 = vmax.f32 %v4767_v46, 0.0 }
 0x323   : > { %v6587_v54 = vpop.f32.mrb[21].mxu1  ;;  %v6699_v11 = vpop.f32.mrb[21].mxu0 }
 0x324   : > { %v4822_v23 = vmax.f32 %v4770_v33, 0.0  ;;  %v6588_v47 = vadd.f32 %v6587_v54, %v6586_v8  ;;  %v6700_v20 = vadd.f32 %v6699_v11, %v6698_v24  ;;  %v6589_v22 = vpop.f32.mrb[22].mxu1  ;;  %v6701_v3 = vpop.f32.mrb[22].mxu0 }
 0x325   : > { %v6590_v10 = vpop.f32.mrb[23].mxu1  ;;  %v6702_v15 = vpop.f32.mrb[23].mxu0 }
 0x326   : > { %v5676_v19 = vpack.c.bf16 %v4822_v23, %v4821_v25  ;;  %v4614_v27 = vadd.f32 %v6588_v47, %v8500_v57  ;;  %v6591_v38 = vadd.f32 %v6590_v10, %v6589_v22  ;;  %v6703_v49 = vadd.f32 %v6702_v15, %v6701_v3 }
 0x328   : > { %5704 = vst [vmem:[%s8523_s30 + $0x60] sm:$0xff] %v5676_v19   ;;  %v4775_v14 = vadd.f32 %v6700_v20, %v4614_v27  ;;  %v4617_v28 = vadd.f32 %v6591_v38, %v8503_v1 }
 0x32a   : > { %v4778_v13 = vadd.f32 %v6703_v49, %v4617_v28  ;;  %v6592_v39 = vpop.f32.mrb[24].mxu1  ;;  %v6704_v45 = vpop.f32.mrb[24].mxu0  ;;  %v4823_v41 = vmax.f32 %v4775_v14, 0.0 }
 0x32b   : > { %v6593_v29 = vpop.f32.mrb[25].mxu1  ;;  %v6705_v58 = vpop.f32.mrb[25].mxu0 }
 0x32c   : > { %v4824_v42 = vmax.f32 %v4778_v13, 0.0  ;;  %v6594_v2 = vadd.f32 %v6593_v29, %v6592_v39  ;;  %v6706_v53 = vadd.f32 %v6705_v58, %v6704_v45  ;;  %v6595_v40 = vpop.f32.mrb[26].mxu1  ;;  %v6707_v56 = vpop.f32.mrb[26].mxu0 }
 0x32d   : > { %v6596_v34 = vpop.f32.mrb[27].mxu1  ;;  %v6708_v57 = vpop.f32.mrb[27].mxu0 }
 0x32e   : > { %v5681_v51 = vpack.c.bf16 %v4824_v42, %v4823_v41  ;;  %v4622_v52 = vadd.f32 %v6594_v2, %v8506_v9  ;;  %v6597_v6 = vadd.f32 %v6596_v34, %v6595_v40  ;;  %v6709_v62 = vadd.f32 %v6708_v57, %v6707_v56 }
 0x330   : > { %5705 = vst [vmem:[%s8523_s30 + $0x68] sm:$0xff] %v5681_v51   ;;  %v4783_v1 = vadd.f32 %v6706_v53, %v4622_v52  ;;  %v4625_v35 = vadd.f32 %v6597_v6, %v8509_v7 }
 0x332   : > { %v4786_v16 = vadd.f32 %v6709_v62, %v4625_v35  ;;  %v6598_v0 = vpop.f32.mrb[28].mxu1  ;;  %v6710_v50 = vpop.f32.mrb[28].mxu0  ;;  %v4825_v30 = vmax.f32 %v4783_v1, 0.0 }
 0x333   : > { %v6599_v60 = vpop.f32.mrb[29].mxu1  ;;  %v6711_v31 = vpop.f32.mrb[29].mxu0 }
 0x334   : > { %v4826_v18 = vmax.f32 %v4786_v16, 0.0  ;;  %v6600_v5 = vadd.f32 %v6599_v60, %v6598_v0  ;;  %v6712_v48 = vadd.f32 %v6711_v31, %v6710_v50  ;;  %v6601_v4 = vpop.f32.mrb[30].mxu1  ;;  %v6713_v43 = vpop.f32.mrb[30].mxu0 }
 0x335   : > { %v6602_v9 = vpop.f32.mrb[31].mxu1  ;;  %v6714_v63 = vpop.f32.mrb[31].mxu0 }
 0x336   : > { %v5686_v21 = vpack.c.bf16 %v4826_v18, %v4825_v30  ;;  %v4630_v61 = vadd.f32 %v6600_v5, %v8512_v44  ;;  %v6603_v59 = vadd.f32 %v6602_v9, %v6601_v4  ;;  %v6715_v7 = vadd.f32 %v6714_v63, %v6713_v43 }
 0x338   : > { %5706 = vst [vmem:[%s8523_s30 + $0x70] sm:$0xff] %v5686_v21   ;;  %v4791_v36 = vadd.f32 %v6712_v48, %v4630_v61  ;;  %v4633_v26 = vadd.f32 %v6603_v59, %v8515_v37 }
 0x33a   : > { %v4794_v55 = vadd.f32 %v6715_v7, %v4633_v26  ;;  %v4827_v17 = vmax.f32 %v4791_v36, 0.0 }
 0x33c   : > { %v4828_v32 = vmax.f32 %v4794_v55, 0.0 }
 0x33e   : > { %v5691_v46 = vpack.c.bf16 %v4828_v32, %v4827_v17 }
 0x340   : > { %5707 = vst [vmem:[%s8523_s30 + $0x78] sm:$0xff] %v5691_v46  }
 0x341 PF: > { %s13_s14 = sadd.s32 1, %s7358_s14   ;;  %s8584_s12 = smov %s7354_s13 }
 0x342   : > { %p10_p5 = scmp.ge.s32.totalorder %s13_s14, 6   ;;  %s8585_s13 = smov %s8587_s15 }
 0x344   :  { %12 = sbr.rel (!%p10_p5) target bundleno = 2 (0x2), region = 68 }

// kernel: encoder_forward.11
= control target key start
LH: loop header
LB: loop body
LE: loop exit
PB: predicated region body
PF: predicated region fallthrough
CT: control target
= control target key end

     0   :  { %s7988_s9 = smov 0   ;;  %s7990_s10 = smov 0   ;;  %s8689_s0 = inlined_call_operand.vmem [shape: bf16[2,65536], index: 0, kind: input, shape index: {}]   ;;  %s8690_s1 = inlined_call_operand.vmem [shape: bf16[65536,64], index: 1, kind: input, shape index: {}]   ;;  %s8691_s2 = inlined_call_operand.vmem [shape: f32[2,2,64], index: 2, kind: output, shape index: {}]  }
   0x1   :  { %s7992_s11 = smov 0   ;;  %s7994_s12 = smov 0  }
   0x2   :  { %s7996_s13 = smov 0  }
   0x3 LB: > { %s21_s14 = sadd.s32 1, %s7961_s11  ;;  %s24_s15 = sadd.s32 1, %s7965_s12  ;;  %s7969_s13 = sphi %s7996_s13, %s12_s13   ;;  %s7965_s12 = sphi %s7994_s12, %s8695_s12   ;;  %s7961_s11 = sphi %s7992_s11, %s8694_s11   ;;  %s7957_s10 = sphi %s7990_s10, %s8693_s10   ;;  %s7953_s9 = sphi %s7988_s9, %s8692_s9  }
   0x4   : > { %p22_p0 = scmp.ge.s32.totalorder %s21_s14, 4  ;;  %p6143_p1 = scmp.ge.s32.totalorder %s7969_s13, 1 }
   0x5   : > { %p151_p2 = scmp.lt.s32.totalorder %s7969_s13, 9 }
   0x6   : > { %s8697_s14 = smov (%p22_p0, %s21_s14), 0  ;;  %s8699_s15 = smov (!%p22_p0, %s24_s15), %s7965_s12 }
   0x7   : > { %p152_p3 = pnand %p6143_p1, %p151_p2  ;;  %p26_p4 = scmp.ge.s32.totalorder %s8699_s15, 2 }
   0x8   : > { %s6144_s16 = sshll.u32 (!%p152_p3), %s7957_s10, 2  ;;  %p199_p5 = scmp.lt.s32.totalorder (!%p152_p3), %s7957_s10, 1 }
   0x9   : > { %s8701_s15 = smov (%p26_p4, %s8699_s15), 0  ;;  %155 = sbr.rel (%p152_p3) target bundleno = 763 (0x2fb), region = 28 }
   0xa   : > { %s181_s17 = sadd.s32 (!%p152_p3), %s7953_s9, %s6144_s16  ;;  %p6150_p8 = scmp.ne.s32.totalorder (!%p152_p3), %s7953_s9, 0 }
   0xb   : > { %s6145_s18 = sshll.u32 (!%p152_p3), %s181_s17, 6  ;;  %s6147_s19 = sshll.u32 (!%p152_p3), %s181_s17, 10 }
   0xc   : > { %p183_p6 = scmp.lt.s32.totalorder (!%p152_p3), %s6145_s18, 511  ;;  %p192_p7 = scmp.lt.s32.totalorder (!%p152_p3), %s6147_s19, 8191 }
  0x10   : > { %s8703_s10 = smov (!%p199_p5, %s7957_s10), 1  ;;  %s8705_s18 = smov (!%p183_p6, %s6145_s18), 511 }
  0x11   : > { %s8707_s19 = smov (!%p192_p7, %s6147_s19), 8191  ;;  %s8024_s22 = scalar_lea.vmem %s8689_s0, %s8705_s18  ;;  %vm208_vm0 = vcmask (!%p6150_p8), 517120   ;;  %v7971_v0 = vmov (!%p6150_p8), 0.0  }
  0x12   : > { %s6149_s23 = sshll.u32 %s8703_s10, 1  ;;  %s6148_s24 = sshll.u32 %s8707_s19, 2 }
  0x13   : > { %s8029_s27 = scalar_lea.vmem %s8691_s2, %s6149_s23  ;;  %s8034_s30 = scalar_lea.vmem %s8690_s1, %s6148_s24 }
  0x14   : > { %207 = sbr.rel (%p6150_p8) target bundleno = 27 (0x1b), region = 32  ;;  %209 = vst.msk [vmem:[%s8029_s27] sm:$0x3] (!%p6150_p8), %vm208_vm0, %v7971_v0 }
  0x1b PF: > { %v7411_v1 = vld [vmem:[%s8034_s30 + $0x40] sm:$0xff]   ;;  %v7415_v5 = vld [vmem:[%s8034_s30 + $0x48] sm:$0xff]   ;;  %v7419_v9 = vld [vmem:[%s8034_s30 + $0x50] sm:$0xff]   ;;  %v1255_v29 = vlaneseq  ;;  %v7972_v37 = vmov 1966171168   ;;  %vm6060_vm1 = vcmask 517120  }
  0x1c   : > { %v7412_v2 = vld [vmem:[%s8034_s30 + $0xc0] sm:$0xff]   ;;  %6665 = vmatprep.subr.bf16.mxu0 %v7411_v1  ;;  %v7416_v6 = vld [vmem:[%s8034_s30 + $0xc8] sm:$0xff]   ;;  %v7420_v10 = vld [vmem:[%s8034_s30 + $0xd0] sm:$0xff]   ;;  %v1253_v38 = vunpack.c.l.s4 %v7972_v37 }
  0x1d   : > { %v7413_v3 = vld [vmem:[%s8034_s30] sm:$0xff]   ;;  %6687 = vmatprep.subr.bf16.mxu1 %v7412_v2  ;;  %v7417_v7 = vld [vmem:[%s8034_s30 + $0x8] sm:$0xff]   ;;  %v7421_v11 = vld [vmem:[%s8034_s30 + $0x10] sm:$0xff]   ;;  %v1256_v34 = vshrl.u32 %v1255_v29, 7 }
  0x1e   : > { %v7414_v4 = vld [vmem:[%s8034_s30 + $0x80] sm:$0xff]   ;;  %6666 = vmatpush3.bf16.msra.mxu0 %v7413_v3  ;;  %v7418_v8 = vld [vmem:[%s8034_s30 + $0x88] sm:$0xff]   ;;  %v7422_v12 = vld [vmem:[%s8034_s30 + $0x90] sm:$0xff]   ;;  %v1254_v41 = vunpack.c.0.s8 %v1253_v38 }
  0x1f   : > { %6688 = vmatpush3.bf16.msra.mxu1 %v7414_v4  ;;  %6667 = vmatprep.subr.bf16.mxu0 %v7415_v5  ;;  %v7423_v13 = vld [vmem:[%s8034_s30 + $0x58] sm:$0xff]   ;;  %v7427_v17 = vld [vmem:[%s8034_s30 + $0x60] sm:$0xff]   ;;  %v7431_v21 = vld [vmem:[%s8034_s30 + $0x68] sm:$0xff]  }
  0x20   : > { %6689 = vmatprep.subr.bf16.mxu1 %v7416_v6  ;;  %v7424_v14 = vld [vmem:[%s8034_s30 + $0xd8] sm:$0xff]   ;;  %v7428_v18 = vld [vmem:[%s8034_s30 + $0xe0] sm:$0xff]   ;;  %v7432_v22 = vld [vmem:[%s8034_s30 + $0xe8] sm:$0xff]   ;;  %v8073_v42 = vsub.s32 %v1254_v41, %v1256_v34 }
  0x21   : > { %v7425_v15 = vld [vmem:[%s8034_s30 + $0x18] sm:$0xff]   ;;  %v7429_v19 = vld [vmem:[%s8034_s30 + $0x20] sm:$0xff]   ;;  %v7433_v23 = vld [vmem:[%s8034_s30 + $0x28] sm:$0xff]  }
  0x22   : > { %6668 = vmatpush3.bf16.msra.mxu0 %v7417_v7  ;;  %v7426_v16 = vld [vmem:[%s8034_s30 + $0x98] sm:$0xff]   ;;  %v7430_v20 = vld [vmem:[%s8034_s30 + $0xa0] sm:$0xff]   ;;  %v7434_v24 = vld [vmem:[%s8034_s30 + $0xa8] sm:$0xff]  }
  0x23   : > { %6690 = vmatpush3.bf16.msra.mxu1 %v7418_v8  ;;  %6669 = vmatprep.subr.bf16.mxu0 %v7419_v9  ;;  %v7435_v25 = vld [vmem:[%s8034_s30 + $0x70] sm:$0xff]   ;;  %v7439_v30 = vld [vmem:[%s8034_s30 + $0x78] sm:$0xff]   ;;  %v211_v35 = vld [vmem:[%s8024_s22] sm:$0xff] }
  0x24   : > { %6691 = vmatprep.subr.bf16.mxu1 %v7420_v10  ;;  %v7436_v26 = vld [vmem:[%s8034_s30 + $0xf0] sm:$0xff]   ;;  %v7440_v31 = vld [vmem:[%s8034_s30 + $0xf8] sm:$0xff]   ;;  %v7444_v36 = vld [vmem:[%s8034_s30 + $0x140] sm:$0xff]   ;;  %v1251_v40 = vcombine.high %v211_v35, %v211_v35  ;;  %v1258_v43 = vrot.slane %v211_v35, %v8073_v42 }
  0x25   : > { %v7437_v27 = vld [vmem:[%s8034_s30 + $0x30] sm:$0xff]   ;;  %v7441_v32 = vld [vmem:[%s8034_s30 + $0x38] sm:$0xff]   ;;  %v7445_v39 = vld [vmem:[%s8034_s30 + $0x1c0] sm:$0xff]  }
  0x26   : > { %6670 = vmatpush3.bf16.msra.mxu0 %v7421_v11  ;;  %v7438_v28 = vld [vmem:[%s8034_s30 + $0xb0] sm:$0xff]   ;;  %v7442_v33 = vld [vmem:[%s8034_s30 + $0xb8] sm:$0xff]   ;;  %v8077_v44 = vrot.slane %v1251_v40, %v8073_v42  ;;  %v1266_v45 = vcombine.high %v1258_v43, %v1258_v43  ;;  %v1274_v46 = vrot.slane %v1258_v43, %v8073_v42  ;;  %v7446_v48 = vld [vmem:[%s8034_s30 + $0x100] sm:$0xff]  }
  0x27   : > { %6692 = vmatpush3.bf16.msra.mxu1 %v7422_v12  ;;  %6671 = vmatprep.subr.bf16.mxu0 %v7423_v13  ;;  %v7447_v50 = vld [vmem:[%s8034_s30 + $0x180] sm:$0xff]   ;;  %v7448_v53 = vld [vmem:[%s8034_s30 + $0x148] sm:$0xff]   ;;  %v7452_v59 = vld [vmem:[%s8034_s30 + $0x150] sm:$0xff]  }
  0x28   : > { %6693 = vmatprep.subr.bf16.mxu1 %v7424_v14  ;;  %v1267_v47 = vcombine.high %v8077_v44, %v8077_v44  ;;  %v1288_v49 = vrot.slane %v1266_v45, %v8073_v42  ;;  %v1296_v52 = vcombine.high %v1274_v46, %v1274_v46  ;;  %v7449_v55 = vld [vmem:[%s8034_s30 + $0x1c8] sm:$0xff]   ;;  %v7453_v60 = vld [vmem:[%s8034_s30 + $0x1d0] sm:$0xff]   ;;  %v7456_v63 = vld [vmem:[%s8034_s30 + $0x158] sm:$0xff]  }
  0x29   : > { %v7450_v56 = vld [vmem:[%s8034_s30 + $0x108] sm:$0xff]   ;;  %v7454_v61 = vld [vmem:[%s8034_s30 + $0x110] sm:$0xff]   ;;  %v7457_v0 = vld [vmem:[%s8034_s30 + $0x1d8] sm:$0xff]  }
  0x2a   : > { %6672 = vmatpush3.bf16.msra.mxu0 %v7425_v15  ;;  %v1295_v51 = vrot.slane %v1267_v47, %v8073_v42  ;;  %4811 = vmatprep.mubr.bf16.mxu0 %v1288_v49  ;;  %v1298_v54 = vcombine.high %v1288_v49, %v1288_v49  ;;  %v7451_v58 = vld [vmem:[%s8034_s30 + $0x188] sm:$0xff]   ;;  %v7455_v62 = vld [vmem:[%s8034_s30 + $0x190] sm:$0xff]   ;;  %v7458_v1 = vld [vmem:[%s8034_s30 + $0x118] sm:$0xff]  }
  0x2b   : > { %6694 = vmatpush3.bf16.msra.mxu1 %v7426_v16  ;;  %6673 = vmatprep.subr.bf16.mxu0 %v7427_v17  ;;  %v7459_v2 = vld [vmem:[%s8034_s30 + $0x198] sm:$0xff]   ;;  %v7460_v3 = vld [vmem:[%s8034_s30 + $0x160] sm:$0xff]   ;;  %v7464_v7 = vld [vmem:[%s8034_s30 + $0x168] sm:$0xff]  }
  0x2c   : > { %6695 = vmatprep.subr.bf16.mxu1 %v7428_v18  ;;  %v1299_v57 = vcombine.high %v1295_v51, %v1295_v51  ;;  %4851 = vmatprep.mubr.bf16.mxu1 %v1298_v54  ;;  %v7461_v4 = vld [vmem:[%s8034_s30 + $0x1e0] sm:$0xff]   ;;  %v7465_v8 = vld [vmem:[%s8034_s30 + $0x1e8] sm:$0xff]   ;;  %v7468_v11 = vld [vmem:[%s8034_s30 + $0x170] sm:$0xff]  }
  0x2d   : > { %v7462_v5 = vld [vmem:[%s8034_s30 + $0x120] sm:$0xff]   ;;  %v7466_v9 = vld [vmem:[%s8034_s30 + $0x128] sm:$0xff]   ;;  %v7469_v12 = vld [vmem:[%s8034_s30 + $0x1f0] sm:$0xff]  }
  0x2e   : > { %6674 = vmatpush3.bf16.msra.mxu0 %v7429_v19  ;;  %v7463_v6 = vld [vmem:[%s8034_s30 + $0x1a0] sm:$0xff]   ;;  %v7467_v10 = vld [vmem:[%s8034_s30 + $0x1a8] sm:$0xff]   ;;  %v7470_v13 = vld [vmem:[%s8034_s30 + $0x130] sm:$0xff]   ;;  %v1281_v19 = vrot.slane %v8077_v44, %v8073_v42 }
  0x2f   : > { %6696 = vmatpush3.bf16.msra.mxu1 %v7430_v20  ;;  %6675 = vmatprep.subr.bf16.mxu0 %v7431_v21  ;;  %v7471_v14 = vld [vmem:[%s8034_s30 + $0x1b0] sm:$0xff]   ;;  %v7472_v15 = vld [vmem:[%s8034_s30 + $0x178] sm:$0xff]   ;;  %v7476_v20 = vld [vmem:[%s8034_s30 + $0x240] sm:$0xff]  }
  0x30   : > { %6697 = vmatprep.subr.bf16.mxu1 %v7432_v22  ;;  %v7473_v16 = vld [vmem:[%s8034_s30 + $0x1f8] sm:$0xff]   ;;  %v7477_v21 = vld [vmem:[%s8034_s30 + $0x2c0] sm:$0xff]   ;;  %v7484_v29 = vld [vmem:[%s8034_s30 + $0x250] sm:$0xff]  }
  0x31   : > { %v7474_v17 = vld [vmem:[%s8034_s30 + $0x138] sm:$0xff]   ;;  %v7478_v22 = vld [vmem:[%s8034_s30 + $0x200] sm:$0xff]   ;;  %v7496_v41 = vld [vmem:[%s8034_s30 + $0x268] sm:$0xff]  }
  0x32   : > { %6676 = vmatpush3.bf16.msra.mxu0 %v7433_v23  ;;  %v7475_v18 = vld [vmem:[%s8034_s30 + $0x1b8] sm:$0xff]   ;;  %v7479_v23 = vld [vmem:[%s8034_s30 + $0x280] sm:$0xff]   ;;  %v7497_v43 = vld [vmem:[%s8034_s30 + $0x2e8] sm:$0xff]  }
  0x33   : > { %6698 = vmatpush3.bf16.msra.mxu1 %v7434_v24  ;;  %6677 = vmatprep.subr.bf16.mxu0 %v7435_v25  ;;  %v1297_v24 = vcombine.high %v1281_v19, %v1281_v19  ;;  %v7480_v25 = vld [vmem:[%s8034_s30 + $0x248] sm:$0xff]   ;;  %v7489_v34 = vld [vmem:[%s8034_s30 + $0x2d8] sm:$0xff]   ;;  %v7492_v37 = vld [vmem:[%s8034_s30 + $0x260] sm:$0xff]  }
  0x34   : > { %6699 = vmatprep.subr.bf16.mxu1 %v7436_v26  ;;  %v7481_v26 = vld [vmem:[%s8034_s30 + $0x2c8] sm:$0xff]   ;;  %v7490_v35 = vld [vmem:[%s8034_s30 + $0x218] sm:$0xff]   ;;  %v7493_v38 = vld [vmem:[%s8034_s30 + $0x2e0] sm:$0xff]  }
  0x35   : > { %v7495_v40 = vld [vmem:[%s8034_s30 + $0x2a0] sm:$0xff]   ;;  %v7498_v44 = vld [vmem:[%s8034_s30 + $0x228] sm:$0xff]  }
  0x36   : > { %6678 = vmatpush3.bf16.msra.mxu0 %v7437_v27  ;;  %v7482_v27 = vld [vmem:[%s8034_s30 + $0x208] sm:$0xff]  }
  0x37   : > { %6700 = vmatpush3.bf16.msra.mxu1 %v7438_v28  ;;  %6679 = vmatprep.subr.bf16.mxu0 %v7439_v30  ;;  %v7483_v28 = vld [vmem:[%s8034_s30 + $0x288] sm:$0xff]   ;;  %v7485_v30 = vld [vmem:[%s8034_s30 + $0x2d0] sm:$0xff]  }
  0x38   : > { %6701 = vmatprep.subr.bf16.mxu1 %v7440_v31  ;;  %v7486_v31 = vld [vmem:[%s8034_s30 + $0x210] sm:$0xff]   ;;  %v7499_v45 = vld [vmem:[%s8034_s30 + $0x2a8] sm:$0xff]  }
  0x39   : > { %v212_v47 = vld [vmem:[%s8024_s22 + $0x8] sm:$0xff] }
  0x3a   : > { %6680 = vmatpush3.bf16.msra.mxu0 %v7441_v32  ;;  %v7487_v32 = vld [vmem:[%s8034_s30 + $0x290] sm:$0xff]   ;;  %v1307_v49 = vrot.slane %v212_v47, %v8073_v42 }
  0x3b   : > { %6702 = vmatpush3.bf16.msra.mxu1 %v7442_v33  ;;  %6709 = vmatprep.subr.bf16.mxu0 %v7444_v36  ;;  %v7488_v33 = vld [vmem:[%s8034_s30 + $0x258] sm:$0xff]  }
  0x3c   : > { %6731 = vmatprep.subr.bf16.mxu1 %v7445_v39  ;;  %v7491_v36 = vld [vmem:[%s8034_s30 + $0x298] sm:$0xff]   ;;  %v7494_v39 = vld [vmem:[%s8034_s30 + $0x220] sm:$0xff]  }
  0x3d   : > { %4812 = vmatmul.mubr.bf16.vlgmr.msra.gmra.mrb[0].mxu0 %v1274_v46  ;;  %v7500_v46 = vld [vmem:[%s8034_s30 + $0x270] sm:$0xff]  }
  0x3e   : > { %6710 = vmatpush3.bf16.msra.mxu0 %v7446_v48  ;;  %4852 = vmatmul.mubr.bf16.vlgmr.msra.gmra.mrb[0].mxu1 %v1296_v52  ;;  %v7501_v48 = vld [vmem:[%s8034_s30 + $0x2f0] sm:$0xff]  }
  0x3f   : > { %6711 = vmatprep.subr.bf16.mxu0 %v7448_v53  ;;  %6732 = vmatpush3.bf16.msra.mxu1 %v7447_v50  ;;  %v1300_v50 = vcombine.high %v212_v47, %v212_v47  ;;  %v7503_v52 = vld [vmem:[%s8034_s30 + $0x2b0] sm:$0xff]   ;;  %v1315_v53 = vcombine.high %v1307_v49, %v1307_v49 }
  0x40   : > { %4891 = vmatprep.mubr.bf16.mxu0 %v1295_v51  ;;  %6733 = vmatprep.subr.bf16.mxu1 %v7449_v55  ;;  %v7502_v51 = vld [vmem:[%s8034_s30 + $0x230] sm:$0xff]   ;;  %v7504_v55 = vld [vmem:[%s8034_s30 + $0x278] sm:$0xff]  }
  0x41   : > { %4931 = vmatprep.mubr.bf16.mxu1 %v1299_v57  ;;  %v8147_v54 = vrot.slane %v1300_v50, %v8073_v42  ;;  %v1337_v57 = vrot.slane %v1315_v53, %v8073_v42  ;;  %v7551_v47 = vld [vmem:[%s8034_s30 + $0x410] sm:$0xff]   ;;  %v7554_v50 = vld [vmem:[%s8034_s30 + $0x4d8] sm:$0xff]   ;;  %v7557_v53 = vld [vmem:[%s8034_s30 + $0x460] sm:$0xff]  }
  0x42   : > { %6712 = vmatpush3.bf16.msra.mxu0 %v7450_v56  ;;  %v7505_v56 = vld [vmem:[%s8034_s30 + $0x2f8] sm:$0xff]  }
  0x43   : > { %6713 = vmatprep.subr.bf16.mxu0 %v7452_v59  ;;  %6734 = vmatpush3.bf16.msra.mxu1 %v7451_v58  ;;  %v1316_v58 = vcombine.high %v8147_v54, %v8147_v54  ;;  %v7506_v59 = vld [vmem:[%s8034_s30 + $0x238] sm:$0xff]  }
  0x44   : > { %6735 = vmatprep.subr.bf16.mxu1 %v7453_v60  ;;  %v7507_v60 = vld [vmem:[%s8034_s30 + $0x2b8] sm:$0xff]  }
  0x46   : > { %6714 = vmatpush3.bf16.msra.mxu0 %v7454_v61  ;;  %v1347_v61 = vcombine.high %v1337_v57, %v1337_v57 }
  0x47   : > { %6715 = vmatprep.subr.bf16.mxu0 %v7456_v63  ;;  %6736 = vmatpush3.bf16.msra.mxu1 %v7455_v62  ;;  %v1323_v62 = vrot.slane %v1307_v49, %v8073_v42  ;;  %v7508_v63 = vld [vmem:[%s8034_s30 + $0x340] sm:$0xff]   ;;  %v7553_v49 = vld [vmem:[%s8034_s30 + $0x458] sm:$0xff]  }
  0x48   : > { %6737 = vmatprep.subr.bf16.mxu1 %v7457_v0  ;;  %v7509_v0 = vld [vmem:[%s8034_s30 + $0x3c0] sm:$0xff]  }
  0x4a   : > { %6716 = vmatpush3.bf16.msra.mxu0 %v7458_v1  ;;  %v1344_v1 = vrot.slane %v1316_v58, %v8073_v42  ;;  %v7562_v58 = vld [vmem:[%s8034_s30 + $0x4e8] sm:$0xff]  }
  0x4b   : > { %6717 = vmatprep.subr.bf16.mxu0 %v7460_v3  ;;  %6738 = vmatpush3.bf16.msra.mxu1 %v7459_v2  ;;  %v7510_v2 = vld [vmem:[%s8034_s30 + $0x300] sm:$0xff]  }
  0x4c   : > { %6739 = vmatprep.subr.bf16.mxu1 %v7461_v4  ;;  %v7511_v3 = vld [vmem:[%s8034_s30 + $0x380] sm:$0xff]   ;;  %v1345_v4 = vcombine.high %v1323_v62, %v1323_v62 }
  0x4e   : > { %6718 = vmatpush3.bf16.msra.mxu0 %v7462_v5  ;;  %v7512_v5 = vld [vmem:[%s8034_s30 + $0x348] sm:$0xff]  }
  0x4f   : > { %6719 = vmatprep.subr.bf16.mxu0 %v7464_v7  ;;  %6740 = vmatpush3.bf16.msra.mxu1 %v7463_v6  ;;  %v7513_v6 = vld [vmem:[%s8034_s30 + $0x3c8] sm:$0xff]   ;;  %v1348_v7 = vcombine.high %v1344_v1, %v1344_v1 }
  0x50   : > { %6741 = vmatprep.subr.bf16.mxu1 %v7465_v8  ;;  %v7514_v8 = vld [vmem:[%s8034_s30 + $0x308] sm:$0xff]  }
  0x52   : > { %6720 = vmatpush3.bf16.msra.mxu0 %v7466_v9  ;;  %v7515_v9 = vld [vmem:[%s8034_s30 + $0x388] sm:$0xff]  }
  0x53   : > { %6721 = vmatprep.subr.bf16.mxu0 %v7468_v11  ;;  %6742 = vmatpush3.bf16.msra.mxu1 %v7467_v10  ;;  %v7516_v10 = vld [vmem:[%s8034_s30 + $0x350] sm:$0xff]  }
  0x54   : > { %6743 = vmatprep.subr.bf16.mxu1 %v7469_v12  ;;  %v7517_v11 = vld [vmem:[%s8034_s30 + $0x3d0] sm:$0xff]  }
  0x55   : > { %v7518_v12 = vld [vmem:[%s8034_s30 + $0x310] sm:$0xff]  }
  0x56   : > { %6722 = vmatpush3.bf16.msra.mxu0 %v7470_v13  ;;  %v7519_v13 = vld [vmem:[%s8034_s30 + $0x390] sm:$0xff]  }
  0x57   : > { %6723 = vmatprep.subr.bf16.mxu0 %v7472_v15  ;;  %6744 = vmatpush3.bf16.msra.mxu1 %v7471_v14  ;;  %v7520_v14 = vld [vmem:[%s8034_s30 + $0x358] sm:$0xff]  }
  0x58   : > { %6745 = vmatprep.subr.bf16.mxu1 %v7473_v16  ;;  %v7521_v15 = vld [vmem:[%s8034_s30 + $0x3d8] sm:$0xff]  }
  0x59   : > { %v7522_v16 = vld [vmem:[%s8034_s30 + $0x318] sm:$0xff]  }
  0x5a   : > { %6724 = vmatpush3.bf16.msra.mxu0 %v7474_v17  ;;  %v7523_v17 = vld [vmem:[%s8034_s30 + $0x398] sm:$0xff]  }
  0x5b   : > { %6753 = vmatprep.subr.bf16.mxu0 %v7476_v20  ;;  %6746 = vmatpush3.bf16.msra.mxu1 %v7475_v18  ;;  %v7524_v18 = vld [vmem:[%s8034_s30 + $0x360] sm:$0xff]  }
  0x5c   : > { %6775 = vmatprep.subr.bf16.mxu1 %v7477_v21  ;;  %v7526_v20 = vld [vmem:[%s8034_s30 + $0x320] sm:$0xff]  }
  0x5d   : > { %4892 = vmatmul.mubr.bf16.vlgmr.msra.gmra.mrb[4].mxu0 %v1281_v19  ;;  %v7525_v19 = vld [vmem:[%s8034_s30 + $0x3e0] sm:$0xff]  }
  0x5e   : > { %6754 = vmatpush3.bf16.msra.mxu0 %v7478_v22  ;;  %4932 = vmatmul.mubr.bf16.vlgmr.msra.gmra.mrb[4].mxu1 %v1297_v24  ;;  %v7527_v21 = vld [vmem:[%s8034_s30 + $0x3a0] sm:$0xff]   ;;  %v7528_v22 = vld [vmem:[%s8034_s30 + $0x368] sm:$0xff]  }
  0x5f   : > { %6755 = vmatprep.subr.bf16.mxu0 %v7480_v25  ;;  %6776 = vmatpush3.bf16.msra.mxu1 %v7479_v23  ;;  %v7529_v23 = vld [vmem:[%s8034_s30 + $0x3e8] sm:$0xff]  }
  0x60   : > { %6777 = vmatprep.subr.bf16.mxu1 %v7481_v26  ;;  %4971 = vmatprep.mubr.bf16.mxu0 %v1337_v57  ;;  %v7530_v24 = vld [vmem:[%s8034_s30 + $0x328] sm:$0xff]   ;;  %v7532_v26 = vld [vmem:[%s8034_s30 + $0x370] sm:$0xff]  }
  0x61   : > { %5011 = vmatprep.mubr.bf16.mxu1 %v1347_v61  ;;  %v7531_v25 = vld [vmem:[%s8034_s30 + $0x3a8] sm:$0xff]   ;;  %v7565_v61 = vld [vmem:[%s8034_s30 + $0x470] sm:$0xff]  }
  0x62   : > { %6756 = vmatpush3.bf16.msra.mxu0 %v7482_v27  ;;  %v7533_v27 = vld [vmem:[%s8034_s30 + $0x3f0] sm:$0xff]   ;;  %v7561_v57 = vld [vmem:[%s8034_s30 + $0x468] sm:$0xff]  }
  0x63   : > { %6757 = vmatprep.subr.bf16.mxu0 %v7484_v29  ;;  %6778 = vmatpush3.bf16.msra.mxu1 %v7483_v28  ;;  %v7534_v28 = vld [vmem:[%s8034_s30 + $0x330] sm:$0xff]  }
  0x64   : > { %6779 = vmatprep.subr.bf16.mxu1 %v7485_v30  ;;  %v7535_v29 = vld [vmem:[%s8034_s30 + $0x3b0] sm:$0xff]   ;;  %v7536_v30 = vld [vmem:[%s8034_s30 + $0x378] sm:$0xff]  }
  0x66   : > { %6758 = vmatpush3.bf16.msra.mxu0 %v7486_v31  ;;  %v7537_v31 = vld [vmem:[%s8034_s30 + $0x3f8] sm:$0xff]  }
  0x67   : > { %6759 = vmatprep.subr.bf16.mxu0 %v7488_v33  ;;  %6780 = vmatpush3.bf16.msra.mxu1 %v7487_v32  ;;  %v7538_v32 = vld [vmem:[%s8034_s30 + $0x338] sm:$0xff]  }
  0x68   : > { %6781 = vmatprep.subr.bf16.mxu1 %v7489_v34  ;;  %v7539_v33 = vld [vmem:[%s8034_s30 + $0x3b8] sm:$0xff]   ;;  %v1330_v34 = vrot.slane %v8147_v54, %v8073_v42  ;;  %v7558_v54 = vld [vmem:[%s8034_s30 + $0x4e0] sm:$0xff]  }
  0x6a   : > { %6760 = vmatpush3.bf16.msra.mxu0 %v7490_v35  ;;  %v7541_v35 = vld [vmem:[%s8034_s30 + $0x440] sm:$0xff]  }
  0x6b   : > { %6761 = vmatprep.subr.bf16.mxu0 %v7492_v37  ;;  %6782 = vmatpush3.bf16.msra.mxu1 %v7491_v36  ;;  %v7542_v36 = vld [vmem:[%s8034_s30 + $0x4c0] sm:$0xff]  }
  0x6c   : > { %6783 = vmatprep.subr.bf16.mxu1 %v7493_v38  ;;  %v7543_v37 = vld [vmem:[%s8034_s30 + $0x400] sm:$0xff]  }
  0x6d   : > { %v7544_v38 = vld [vmem:[%s8034_s30 + $0x480] sm:$0xff]  }
  0x6e   : > { %6762 = vmatpush3.bf16.msra.mxu0 %v7494_v39  ;;  %v1346_v39 = vcombine.high %v1330_v34, %v1330_v34 }
  0x6f   : > { %6763 = vmatprep.subr.bf16.mxu0 %v7496_v41  ;;  %6784 = vmatpush3.bf16.msra.mxu1 %v7495_v40  ;;  %v7545_v40 = vld [vmem:[%s8034_s30 + $0x448] sm:$0xff]  }
  0x70   : > { %6785 = vmatprep.subr.bf16.mxu1 %v7497_v43  ;;  %v7546_v41 = vld [vmem:[%s8034_s30 + $0x4c8] sm:$0xff]  }
  0x71   : > { %v7547_v43 = vld [vmem:[%s8034_s30 + $0x408] sm:$0xff]  }
  0x72   : > { %6764 = vmatpush3.bf16.msra.mxu0 %v7498_v44  ;;  %v7548_v44 = vld [vmem:[%s8034_s30 + $0x488] sm:$0xff]  }
  0x73   : > { %6765 = vmatprep.subr.bf16.mxu0 %v7500_v46  ;;  %6786 = vmatpush3.bf16.msra.mxu1 %v7499_v45  ;;  %v7549_v45 = vld [vmem:[%s8034_s30 + $0x450] sm:$0xff]  }
  0x74   : > { %6787 = vmatprep.subr.bf16.mxu1 %v7501_v48  ;;  %v7550_v46 = vld [vmem:[%s8034_s30 + $0x4d0] sm:$0xff]  }
  0x75   : > { %v7552_v48 = vld [vmem:[%s8034_s30 + $0x490] sm:$0xff]  }
  0x76   : > { %6766 = vmatpush3.bf16.msra.mxu0 %v7502_v51  ;;  %v7555_v51 = vld [vmem:[%s8034_s30 + $0x418] sm:$0xff]  }
  0x77   : > { %6767 = vmatprep.subr.bf16.mxu0 %v7504_v55  ;;  %6788 = vmatpush3.bf16.msra.mxu1 %v7503_v52  ;;  %v7556_v52 = vld [vmem:[%s8034_s30 + $0x498] sm:$0xff]   ;;  %v7559_v55 = vld [vmem:[%s8034_s30 + $0x420] sm:$0xff]  }
  0x78   : > { %6789 = vmatprep.subr.bf16.mxu1 %v7505_v56  ;;  %v7560_v56 = vld [vmem:[%s8034_s30 + $0x4a0] sm:$0xff]  }
  0x7a   : > { %6768 = vmatpush3.bf16.msra.mxu0 %v7506_v59  ;;  %v7563_v59 = vld [vmem:[%s8034_s30 + $0x428] sm:$0xff]  }
  0x7b   : > { %6797 = vmatprep.subr.bf16.mxu0 %v7508_v63  ;;  %6790 = vmatpush3.bf16.msra.mxu1 %v7507_v60  ;;  %v7564_v60 = vld [vmem:[%s8034_s30 + $0x4a8] sm:$0xff]   ;;  %v7566_v63 = vld [vmem:[%s8034_s30 + $0x4f0] sm:$0xff]  }
  0x7c   : > { %6819 = vmatprep.subr.bf16.mxu1 %v7509_v0 }
  0x7d   : > { %4972 = vmatmul.mubr.bf16.vlgmr.msra.gmra.mrb[8].mxu0 %v1323_v62  ;;  %v213_v62 = vld [vmem:[%s8024_s22 + $0x10] sm:$0xff] }
  0x7e   : > { %6798 = vmatpush3.bf16.msra.mxu0 %v7510_v2  ;;  %5051 = vmatprep.mubr.bf16.mxu0 %v1344_v1  ;;  %v1356_v0 = vrot.slane %v213_v62, %v8073_v42  ;;  %v1349_v1 = vcombine.high %v213_v62, %v213_v62  ;;  %v7567_v2 = vld [vmem:[%s8034_s30 + $0x430] sm:$0xff]  }
  0x7f   : > { %5012 = vmatmul.mubr.bf16.vlgmr.msra.gmra.mrb[8].mxu1 %v1345_v4  ;;  %6799 = vmatprep.subr.bf16.mxu0 %v7512_v5  ;;  %v7616_v62 = vld [vmem:[%s8034_s30 + $0x610] sm:$0xff]  }
  0x80   : > { %6820 = vmatpush3.bf16.msra.mxu1 %v7511_v3  ;;  %5091 = vmatprep.mubr.bf16.mxu1 %v1348_v7  ;;  %v7568_v3 = vld [vmem:[%s8034_s30 + $0x4b0] sm:$0xff]   ;;  %v1364_v4 = vcombine.high %v1356_v0, %v1356_v0  ;;  %v8223_v5 = vrot.slane %v1349_v1, %v8073_v42  ;;  %v7570_v7 = vld [vmem:[%s8034_s30 + $0x4f8] sm:$0xff]  }
  0x81   : > { %6821 = vmatprep.subr.bf16.mxu1 %v7513_v6  ;;  %v7569_v6 = vld [vmem:[%s8034_s30 + $0x478] sm:$0xff]  }
  0x82   : > { %6800 = vmatpush3.bf16.msra.mxu0 %v7514_v8  ;;  %v1386_v8 = vrot.slane %v1364_v4, %v8073_v42  ;;  %v7619_v1 = vld [vmem:[%s8034_s30 + $0x6d8] sm:$0xff]   ;;  %v7622_v4 = vld [vmem:[%s8034_s30 + $0x660] sm:$0xff]  }
  0x83   : > { %6801 = vmatprep.subr.bf16.mxu0 %v7516_v10  ;;  %v7571_v10 = vld [vmem:[%s8034_s30 + $0x438] sm:$0xff]  }
  0x84   : > { %6822 = vmatpush3.bf16.msra.mxu1 %v7515_v9  ;;  %v1365_v9 = vcombine.high %v8223_v5, %v8223_v5 }
  0x85   : > { %6823 = vmatprep.subr.bf16.mxu1 %v7517_v11  ;;  %v7572_v11 = vld [vmem:[%s8034_s30 + $0x4b8] sm:$0xff]  }
  0x86   : > { %6802 = vmatpush3.bf16.msra.mxu0 %v7518_v12  ;;  %v1396_v12 = vcombine.high %v1386_v8, %v1386_v8 }
  0x87   : > { %6803 = vmatprep.subr.bf16.mxu0 %v7520_v14  ;;  %v7573_v14 = vld [vmem:[%s8034_s30 + $0x540] sm:$0xff]  }
  0x88   : > { %6824 = vmatpush3.bf16.msra.mxu1 %v7519_v13  ;;  %v1372_v13 = vrot.slane %v1356_v0, %v8073_v42  ;;  %v7618_v0 = vld [vmem:[%s8034_s30 + $0x658] sm:$0xff]  }
  0x89   : > { %6825 = vmatprep.subr.bf16.mxu1 %v7521_v15  ;;  %v7574_v15 = vld [vmem:[%s8034_s30 + $0x5c0] sm:$0xff]  }
  0x8a   : > { %6804 = vmatpush3.bf16.msra.mxu0 %v7522_v16  ;;  %v1393_v16 = vrot.slane %v1365_v9, %v8073_v42  ;;  %v7627_v9 = vld [vmem:[%s8034_s30 + $0x6e8] sm:$0xff]  }
  0x8b   : > { %6805 = vmatprep.subr.bf16.mxu0 %v7524_v18  ;;  %v7576_v18 = vld [vmem:[%s8034_s30 + $0x580] sm:$0xff]  }
  0x8c   : > { %6826 = vmatpush3.bf16.msra.mxu1 %v7523_v17  ;;  %v7575_v17 = vld [vmem:[%s8034_s30 + $0x500] sm:$0xff]  }
  0x8d   : > { %6827 = vmatprep.subr.bf16.mxu1 %v7525_v19  ;;  %v1394_v19 = vcombine.high %v1372_v13, %v1372_v13 }
  0x8e   : > { %6806 = vmatpush3.bf16.msra.mxu0 %v7526_v20  ;;  %v7577_v20 = vld [vmem:[%s8034_s30 + $0x548] sm:$0xff]  }
  0x8f   : > { %6807 = vmatprep.subr.bf16.mxu0 %v7528_v22  ;;  %v1397_v22 = vcombine.high %v1393_v16, %v1393_v16 }
  0x90   : > { %6828 = vmatpush3.bf16.msra.mxu1 %v7527_v21  ;;  %v7578_v21 = vld [vmem:[%s8034_s30 + $0x5c8] sm:$0xff]  }
  0x91   : > { %6829 = vmatprep.subr.bf16.mxu1 %v7529_v23  ;;  %v7579_v23 = vld [vmem:[%s8034_s30 + $0x508] sm:$0xff]  }
  0x92   : > { %6808 = vmatpush3.bf16.msra.mxu0 %v7530_v24  ;;  %v7580_v24 = vld [vmem:[%s8034_s30 + $0x588] sm:$0xff]  }
  0x93   : > { %6809 = vmatprep.subr.bf16.mxu0 %v7532_v26  ;;  %v7582_v26 = vld [vmem:[%s8034_s30 + $0x5d0] sm:$0xff]  }
  0x94   : > { %6830 = vmatpush3.bf16.msra.mxu1 %v7531_v25  ;;  %v7581_v25 = vld [vmem:[%s8034_s30 + $0x550] sm:$0xff]  }
  0x95   : > { %6831 = vmatprep.subr.bf16.mxu1 %v7533_v27  ;;  %v7583_v27 = vld [vmem:[%s8034_s30 + $0x510] sm:$0xff]  }
  0x96   : > { %6810 = vmatpush3.bf16.msra.mxu0 %v7534_v28  ;;  %v7584_v28 = vld [vmem:[%s8034_s30 + $0x590] sm:$0xff]  }
  0x97   : > { %6811 = vmatprep.subr.bf16.mxu0 %v7536_v30  ;;  %v7586_v30 = vld [vmem:[%s8034_s30 + $0x5d8] sm:$0xff]  }
  0x98   : > { %6832 = vmatpush3.bf16.msra.mxu1 %v7535_v29  ;;  %v7585_v29 = vld [vmem:[%s8034_s30 + $0x558] sm:$0xff]  }
  0x99   : > { %6833 = vmatprep.subr.bf16.mxu1 %v7537_v31  ;;  %v7587_v31 = vld [vmem:[%s8034_s30 + $0x518] sm:$0xff]  }
  0x9a   : > { %6812 = vmatpush3.bf16.msra.mxu0 %v7538_v32  ;;  %v7588_v32 = vld [vmem:[%s8034_s30 + $0x598] sm:$0xff]  }
  0x9b   : > { %6841 = vmatprep.subr.bf16.mxu0 %v7541_v35  ;;  %v7591_v35 = vld [vmem:[%s8034_s30 + $0x520] sm:$0xff]  }
  0x9c   : > { %6834 = vmatpush3.bf16.msra.mxu1 %v7539_v33  ;;  %v7589_v33 = vld [vmem:[%s8034_s30 + $0x560] sm:$0xff]  }
  0x9d   : > { %5052 = vmatmul.mubr.bf16.vlgmr.msra.gmra.mrb[12].mxu0 %v1330_v34  ;;  %6863 = vmatprep.subr.bf16.mxu1 %v7542_v36  ;;  %v7590_v34 = vld [vmem:[%s8034_s30 + $0x5e0] sm:$0xff]  }
  0x9e   : > { %6842 = vmatpush3.bf16.msra.mxu0 %v7543_v37  ;;  %5131 = vmatprep.mubr.bf16.mxu0 %v1386_v8  ;;  %v7592_v36 = vld [vmem:[%s8034_s30 + $0x5a0] sm:$0xff]   ;;  %v7593_v37 = vld [vmem:[%s8034_s30 + $0x568] sm:$0xff]  }
  0x9f   : > { %5092 = vmatmul.mubr.bf16.vlgmr.msra.gmra.mrb[12].mxu1 %v1346_v39  ;;  %6843 = vmatprep.subr.bf16.mxu0 %v7545_v40  ;;  %v7595_v39 = vld [vmem:[%s8034_s30 + $0x528] sm:$0xff]  }
  0xa0   : > { %6864 = vmatpush3.bf16.msra.mxu1 %v7544_v38  ;;  %5171 = vmatprep.mubr.bf16.mxu1 %v1396_v12  ;;  %v7594_v38 = vld [vmem:[%s8034_s30 + $0x5e8] sm:$0xff]   ;;  %v7630_v12 = vld [vmem:[%s8034_s30 + $0x670] sm:$0xff]  }
  0xa1   : > { %6865 = vmatprep.subr.bf16.mxu1 %v7546_v41  ;;  %v7596_v40 = vld [vmem:[%s8034_s30 + $0x5a8] sm:$0xff]   ;;  %v7597_v41 = vld [vmem:[%s8034_s30 + $0x570] sm:$0xff]  }
  0xa2   : > { %6844 = vmatpush3.bf16.msra.mxu0 %v7547_v43  ;;  %v7598_v43 = vld [vmem:[%s8034_s30 + $0x5f0] sm:$0xff]   ;;  %v7626_v8 = vld [vmem:[%s8034_s30 + $0x668] sm:$0xff]  }
  0xa3   : > { %6845 = vmatprep.subr.bf16.mxu0 %v7549_v45  ;;  %v7600_v45 = vld [vmem:[%s8034_s30 + $0x5b0] sm:$0xff]  }
  0xa4   : > { %6866 = vmatpush3.bf16.msra.mxu1 %v7548_v44  ;;  %v7599_v44 = vld [vmem:[%s8034_s30 + $0x530] sm:$0xff]  }
  0xa5   : > { %6867 = vmatprep.subr.bf16.mxu1 %v7550_v46  ;;  %v7601_v46 = vld [vmem:[%s8034_s30 + $0x578] sm:$0xff]  }
  0xa6   : > { %6846 = vmatpush3.bf16.msra.mxu0 %v7551_v47  ;;  %v7602_v47 = vld [vmem:[%s8034_s30 + $0x5f8] sm:$0xff]  }
  0xa7   : > { %6847 = vmatprep.subr.bf16.mxu0 %v7553_v49  ;;  %v7604_v49 = vld [vmem:[%s8034_s30 + $0x5b8] sm:$0xff]  }
  0xa8   : > { %6868 = vmatpush3.bf16.msra.mxu1 %v7552_v48  ;;  %v7603_v48 = vld [vmem:[%s8034_s30 + $0x538] sm:$0xff]  }
  0xa9   : > { %6869 = vmatprep.subr.bf16.mxu1 %v7554_v50  ;;  %v1379_v50 = vrot.slane %v8223_v5, %v8073_v42  ;;  %v7623_v5 = vld [vmem:[%s8034_s30 + $0x6e0] sm:$0xff]  }
  0xaa   : > { %6848 = vmatpush3.bf16.msra.mxu0 %v7555_v51  ;;  %v7606_v51 = vld [vmem:[%s8034_s30 + $0x640] sm:$0xff]  }
  0xab   : > { %6849 = vmatprep.subr.bf16.mxu0 %v7557_v53  ;;  %v7608_v53 = vld [vmem:[%s8034_s30 + $0x600] sm:$0xff]  }
  0xac   : > { %6870 = vmatpush3.bf16.msra.mxu1 %v7556_v52  ;;  %v7607_v52 = vld [vmem:[%s8034_s30 + $0x6c0] sm:$0xff]  }
  0xad   : > { %6871 = vmatprep.subr.bf16.mxu1 %v7558_v54  ;;  %v7609_v54 = vld [vmem:[%s8034_s30 + $0x680] sm:$0xff]  }
  0xae   : > { %6850 = vmatpush3.bf16.msra.mxu0 %v7559_v55  ;;  %v1395_v55 = vcombine.high %v1379_v50, %v1379_v50 }
  0xaf   : > { %6851 = vmatprep.subr.bf16.mxu0 %v7561_v57  ;;  %v7611_v57 = vld [vmem:[%s8034_s30 + $0x6c8] sm:$0xff]  }
  0xb0   : > { %6872 = vmatpush3.bf16.msra.mxu1 %v7560_v56  ;;  %v7610_v56 = vld [vmem:[%s8034_s30 + $0x648] sm:$0xff]  }
  0xb1   : > { %6873 = vmatprep.subr.bf16.mxu1 %v7562_v58  ;;  %v7612_v58 = vld [vmem:[%s8034_s30 + $0x608] sm:$0xff]  }
  0xb2   : > { %6852 = vmatpush3.bf16.msra.mxu0 %v7563_v59  ;;  %v7613_v59 = vld [vmem:[%s8034_s30 + $0x688] sm:$0xff]  }
  0xb3   : > { %6853 = vmatprep.subr.bf16.mxu0 %v7565_v61  ;;  %v7615_v61 = vld [vmem:[%s8034_s30 + $0x6d0] sm:$0xff]  }
  0xb4   : > { %6874 = vmatpush3.bf16.msra.mxu1 %v7564_v60  ;;  %v7614_v60 = vld [vmem:[%s8034_s30 + $0x650] sm:$0xff]  }
  0xb5   : > { %6875 = vmatprep.subr.bf16.mxu1 %v7566_v63  ;;  %v7617_v63 = vld [vmem:[%s8034_s30 + $0x690] sm:$0xff]  }
  0xb6   : > { %6854 = vmatpush3.bf16.msra.mxu0 %v7567_v2  ;;  %v7620_v2 = vld [vmem:[%s8034_s30 + $0x618] sm:$0xff]  }
  0xb7   : > { %6855 = vmatprep.subr.bf16.mxu0 %v7569_v6  ;;  %v7624_v6 = vld [vmem:[%s8034_s30 + $0x620] sm:$0xff]  }
  0xb8   : > { %6876 = vmatpush3.bf16.msra.mxu1 %v7568_v3  ;;  %v7621_v3 = vld [vmem:[%s8034_s30 + $0x698] sm:$0xff]  }
  0xb9   : > { %6877 = vmatprep.subr.bf16.mxu1 %v7570_v7  ;;  %v7625_v7 = vld [vmem:[%s8034_s30 + $0x6a0] sm:$0xff]  }
  0xba   : > { %6856 = vmatpush3.bf16.msra.mxu0 %v7571_v10  ;;  %v7628_v10 = vld [vmem:[%s8034_s30 + $0x628] sm:$0xff]  }
  0xbb   : > { %6885 = vmatprep.subr.bf16.mxu0 %v7573_v14  ;;  %v214_v14 = vld [vmem:[%s8024_s22 + $0x18] sm:$0xff] }
  0xbc   : > { %6878 = vmatpush3.bf16.msra.mxu1 %v7572_v11  ;;  %v7629_v11 = vld [vmem:[%s8034_s30 + $0x6a8] sm:$0xff]  }
  0xbd   : > { %5132 = vmatmul.mubr.bf16.vlgmr.msra.gmra.mrb[16].mxu0 %v1372_v13  ;;  %6907 = vmatprep.subr.bf16.mxu1 %v7574_v15  ;;  %v7631_v13 = vld [vmem:[%s8034_s30 + $0x6f0] sm:$0xff]  }
  0xbe   : > { %6886 = vmatpush3.bf16.msra.mxu0 %v7575_v17  ;;  %5211 = vmatprep.mubr.bf16.mxu0 %v1393_v16  ;;  %v7632_v15 = vld [vmem:[%s8034_s30 + $0x630] sm:$0xff]   ;;  %v1405_v16 = vrot.slane %v214_v14, %v8073_v42  ;;  %v1398_v17 = vcombine.high %v214_v14, %v214_v14  ;;  %v7672_v14 = vld [vmem:[%s8034_s30 + $0x8c0] sm:$0xff]  }
  0xbf   : > { %5172 = vmatmul.mubr.bf16.vlgmr.msra.gmra.mrb[16].mxu1 %v1394_v19  ;;  %6887 = vmatprep.subr.bf16.mxu0 %v7577_v20  ;;  %v7634_v19 = vld [vmem:[%s8034_s30 + $0x678] sm:$0xff]  }
  0xc0   : > { %6908 = vmatpush3.bf16.msra.mxu1 %v7576_v18  ;;  %5251 = vmatprep.mubr.bf16.mxu1 %v1397_v22  ;;  %v7633_v18 = vld [vmem:[%s8034_s30 + $0x6b0] sm:$0xff]   ;;  %v1413_v20 = vcombine.high %v1405_v16, %v1405_v16  ;;  %v7635_v22 = vld [vmem:[%s8034_s30 + $0x6f8] sm:$0xff]  }
  0xc1   : > { %6909 = vmatprep.subr.bf16.mxu1 %v7578_v21  ;;  %v8300_v21 = vrot.slane %v1398_v17, %v8073_v42 }
  0xc2   : > { %6888 = vmatpush3.bf16.msra.mxu0 %v7579_v23  ;;  %v7636_v23 = vld [vmem:[%s8034_s30 + $0x638] sm:$0xff]  }
  0xc3   : > { %6889 = vmatprep.subr.bf16.mxu0 %v7581_v25  ;;  %v1414_v25 = vcombine.high %v8300_v21, %v8300_v21 }
  0xc4   : > { %6910 = vmatpush3.bf16.msra.mxu1 %v7580_v24  ;;  %v1435_v24 = vrot.slane %v1413_v20, %v8073_v42  ;;  %v7677_v20 = vld [vmem:[%s8034_s30 + $0x808] sm:$0xff]  }
  0xc5   : > { %6911 = vmatprep.subr.bf16.mxu1 %v7582_v26  ;;  %v7637_v26 = vld [vmem:[%s8034_s30 + $0x6b8] sm:$0xff]  }
  0xc6   : > { %6890 = vmatpush3.bf16.msra.mxu0 %v7583_v27  ;;  %v1445_v27 = vcombine.high %v1435_v24, %v1435_v24 }
  0xc7   : > { %6891 = vmatprep.subr.bf16.mxu0 %v7585_v29  ;;  %v7638_v29 = vld [vmem:[%s8034_s30 + $0x740] sm:$0xff]  }
  0xc8   : > { %6912 = vmatpush3.bf16.msra.mxu1 %v7584_v28  ;;  %v1421_v28 = vrot.slane %v1405_v16, %v8073_v42  ;;  %v7674_v16 = vld [vmem:[%s8034_s30 + $0x880] sm:$0xff]  }
  0xc9   : > { %6913 = vmatprep.subr.bf16.mxu1 %v7586_v30  ;;  %v7639_v30 = vld [vmem:[%s8034_s30 + $0x7c0] sm:$0xff]  }
  0xca   : > { %6892 = vmatpush3.bf16.msra.mxu0 %v7587_v31  ;;  %v1442_v31 = vrot.slane %v1414_v25, %v8073_v42  ;;  %v7682_v25 = vld [vmem:[%s8034_s30 + $0x890] sm:$0xff]  }
  0xcb   : > { %6893 = vmatprep.subr.bf16.mxu0 %v7589_v33  ;;  %v7641_v33 = vld [vmem:[%s8034_s30 + $0x780] sm:$0xff]  }
  0xcc   : > { %6914 = vmatpush3.bf16.msra.mxu1 %v7588_v32  ;;  %v7640_v32 = vld [vmem:[%s8034_s30 + $0x700] sm:$0xff]  }
  0xcd   : > { %6915 = vmatprep.subr.bf16.mxu1 %v7590_v34  ;;  %v1443_v34 = vcombine.high %v1421_v28, %v1421_v28 }
  0xce   : > { %6894 = vmatpush3.bf16.msra.mxu0 %v7591_v35  ;;  %v7642_v35 = vld [vmem:[%s8034_s30 + $0x748] sm:$0xff]  }
  0xcf   : > { %6895 = vmatprep.subr.bf16.mxu0 %v7593_v37  ;;  %v1446_v37 = vcombine.high %v1442_v31, %v1442_v31 }
  0xd0   : > { %6916 = vmatpush3.bf16.msra.mxu1 %v7592_v36  ;;  %v7643_v36 = vld [vmem:[%s8034_s30 + $0x7c8] sm:$0xff]  }
  0xd1   : > { %6917 = vmatprep.subr.bf16.mxu1 %v7594_v38  ;;  %v7644_v38 = vld [vmem:[%s8034_s30 + $0x708] sm:$0xff]  }
  0xd2   : > { %6896 = vmatpush3.bf16.msra.mxu0 %v7595_v39  ;;  %v7645_v39 = vld [vmem:[%s8034_s30 + $0x788] sm:$0xff]  }
  0xd3   : > { %6897 = vmatprep.subr.bf16.mxu0 %v7597_v41  ;;  %v7647_v41 = vld [vmem:[%s8034_s30 + $0x7d0] sm:$0xff]  }
  0xd4   : > { %6918 = vmatpush3.bf16.msra.mxu1 %v7596_v40  ;;  %v7646_v40 = vld [vmem:[%s8034_s30 + $0x750] sm:$0xff]  }
  0xd5   : > { %6919 = vmatprep.subr.bf16.mxu1 %v7598_v43  ;;  %v7648_v43 = vld [vmem:[%s8034_s30 + $0x710] sm:$0xff]  }
  0xd6   : > { %6898 = vmatpush3.bf16.msra.mxu0 %v7599_v44  ;;  %v7649_v44 = vld [vmem:[%s8034_s30 + $0x790] sm:$0xff]  }
  0xd7   : > { %6899 = vmatprep.subr.bf16.mxu0 %v7601_v46  ;;  %v7651_v46 = vld [vmem:[%s8034_s30 + $0x7d8] sm:$0xff]  }
  0xd8   : > { %6920 = vmatpush3.bf16.msra.mxu1 %v7600_v45  ;;  %v7650_v45 = vld [vmem:[%s8034_s30 + $0x758] sm:$0xff]  }
  0xd9   : > { %6921 = vmatprep.subr.bf16.mxu1 %v7602_v47  ;;  %v7652_v47 = vld [vmem:[%s8034_s30 + $0x718] sm:$0xff]  }
  0xda   : > { %6900 = vmatpush3.bf16.msra.mxu0 %v7603_v48  ;;  %v7653_v48 = vld [vmem:[%s8034_s30 + $0x798] sm:$0xff]  }
  0xdb   : > { %6929 = vmatprep.subr.bf16.mxu0 %v7606_v51  ;;  %v7656_v51 = vld [vmem:[%s8034_s30 + $0x720] sm:$0xff]  }
  0xdc   : > { %6922 = vmatpush3.bf16.msra.mxu1 %v7604_v49  ;;  %v7654_v49 = vld [vmem:[%s8034_s30 + $0x760] sm:$0xff]  }
  0xdd   : > { %5212 = vmatmul.mubr.bf16.vlgmr.msra.gmra.mrb[20].mxu0 %v1379_v50  ;;  %6951 = vmatprep.subr.bf16.mxu1 %v7607_v52  ;;  %v7655_v50 = vld [vmem:[%s8034_s30 + $0x7e0] sm:$0xff]  }
  0xde   : > { %6930 = vmatpush3.bf16.msra.mxu0 %v7608_v53  ;;  %5291 = vmatprep.mubr.bf16.mxu0 %v1435_v24  ;;  %v7657_v52 = vld [vmem:[%s8034_s30 + $0x7a0] sm:$0xff]   ;;  %v7658_v53 = vld [vmem:[%s8034_s30 + $0x768] sm:$0xff]   ;;  %v7681_v24 = vld [vmem:[%s8034_s30 + $0x810] sm:$0xff]  }
  0xdf   : > { %5252 = vmatmul.mubr.bf16.vlgmr.msra.gmra.mrb[20].mxu1 %v1395_v55  ;;  %6931 = vmatprep.subr.bf16.mxu0 %v7610_v56  ;;  %v7660_v55 = vld [vmem:[%s8034_s30 + $0x728] sm:$0xff]  }
  0xe0   : > { %6952 = vmatpush3.bf16.msra.mxu1 %v7609_v54  ;;  %5331 = vmatprep.mubr.bf16.mxu1 %v1445_v27  ;;  %v7659_v54 = vld [vmem:[%s8034_s30 + $0x7e8] sm:$0xff]   ;;  %v7684_v27 = vld [vmem:[%s8034_s30 + $0x8d8] sm:$0xff]  }
  0xe1   : > { %6953 = vmatprep.subr.bf16.mxu1 %v7611_v57  ;;  %v7661_v56 = vld [vmem:[%s8034_s30 + $0x7a8] sm:$0xff]   ;;  %v7662_v57 = vld [vmem:[%s8034_s30 + $0x770] sm:$0xff]  }
  0xe2   : > { %6932 = vmatpush3.bf16.msra.mxu0 %v7612_v58 }
  0xe3   : > { %6933 = vmatprep.subr.bf16.mxu0 %v7614_v60 }
  0xe4   : > { %6954 = vmatpush3.bf16.msra.mxu1 %v7613_v59  ;;  %v7663_v59 = vld [vmem:[%s8034_s30 + $0x7f0] sm:$0xff]  }
  0xe5   : > { %6955 = vmatprep.subr.bf16.mxu1 %v7615_v61  ;;  %v7664_v61 = vld [vmem:[%s8034_s30 + $0x730] sm:$0xff]  }
  0xe6   : > { %6934 = vmatpush3.bf16.msra.mxu0 %v7616_v62 }
  0xe7   : > { %6935 = vmatprep.subr.bf16.mxu0 %v7618_v0 }
  0xe8   : > { %6956 = vmatpush3.bf16.msra.mxu1 %v7617_v63 }
  0xe9   : > { %6957 = vmatprep.subr.bf16.mxu1 %v7619_v1  ;;  %v7665_v1 = vld [vmem:[%s8034_s30 + $0x7b0] sm:$0xff]  }
  0xea   : > { %6936 = vmatpush3.bf16.msra.mxu0 %v7620_v2  ;;  %v7666_v2 = vld [vmem:[%s8034_s30 + $0x778] sm:$0xff]  }
  0xeb   : > { %6937 = vmatprep.subr.bf16.mxu0 %v7622_v4 }
  0xec   : > { %6958 = vmatpush3.bf16.msra.mxu1 %v7621_v3 }
  0xed   : > { %6959 = vmatprep.subr.bf16.mxu1 %v7623_v5 }
  0xee   : > { %6938 = vmatpush3.bf16.msra.mxu0 %v7624_v6 }
  0xef   : > { %6939 = vmatprep.subr.bf16.mxu0 %v7626_v8 }
  0xf0   : > { %6960 = vmatpush3.bf16.msra.mxu1 %v7625_v7  ;;  %v7667_v7 = vld [vmem:[%s8034_s30 + $0x7f8] sm:$0xff]  }
  0xf1   : > { %6961 = vmatprep.subr.bf16.mxu1 %v7627_v9  ;;  %v7668_v9 = vld [vmem:[%s8034_s30 + $0x738] sm:$0xff]  }
  0xf2   : > { %6940 = vmatpush3.bf16.msra.mxu0 %v7628_v10 }
  0xf3   : > { %6941 = vmatprep.subr.bf16.mxu0 %v7630_v12  ;;  %v1428_v12 = vrot.slane %v8300_v21, %v8073_v42  ;;  %v7678_v21 = vld [vmem:[%s8034_s30 + $0x888] sm:$0xff]  }
  0xf4   : > { %6962 = vmatpush3.bf16.msra.mxu1 %v7629_v11  ;;  %v7669_v11 = vld [vmem:[%s8034_s30 + $0x7b8] sm:$0xff]  }
  0xf5   : > { %6963 = vmatprep.subr.bf16.mxu1 %v7631_v13  ;;  %v7671_v13 = vld [vmem:[%s8034_s30 + $0x840] sm:$0xff]   ;;  %v1444_v17 = vcombine.high %v1428_v12, %v1428_v12 }
  0xf6   : > { %6942 = vmatpush3.bf16.msra.mxu0 %v7632_v15  ;;  %v7673_v15 = vld [vmem:[%s8034_s30 + $0x800] sm:$0xff]  }
  0xf7   : > { %6943 = vmatprep.subr.bf16.mxu0 %v7634_v19  ;;  %v7676_v19 = vld [vmem:[%s8034_s30 + $0x8c8] sm:$0xff]  }
  0xf8   : > { %6964 = vmatpush3.bf16.msra.mxu1 %v7633_v18  ;;  %v7675_v18 = vld [vmem:[%s8034_s30 + $0x848] sm:$0xff]  }
  0xf9   : > { %6965 = vmatprep.subr.bf16.mxu1 %v7635_v22  ;;  %v7679_v22 = vld [vmem:[%s8034_s30 + $0x850] sm:$0xff]  }
  0xfa   : > { %6944 = vmatpush3.bf16.msra.mxu0 %v7636_v23  ;;  %v7680_v23 = vld [vmem:[%s8034_s30 + $0x8d0] sm:$0xff]  }
  0xfb   : > { %6973 = vmatprep.subr.bf16.mxu0 %v7638_v29  ;;  %v7686_v29 = vld [vmem:[%s8034_s30 + $0x898] sm:$0xff]  }
  0xfc   : > { %6966 = vmatpush3.bf16.msra.mxu1 %v7637_v26  ;;  %v7683_v26 = vld [vmem:[%s8034_s30 + $0x858] sm:$0xff]  }
  0xfd   : > { %5292 = vmatmul.mubr.bf16.vlgmr.msra.gmra.mrb[24].mxu0 %v1421_v28  ;;  %6995 = vmatprep.subr.bf16.mxu1 %v7639_v30  ;;  %v7685_v28 = vld [vmem:[%s8034_s30 + $0x818] sm:$0xff]   ;;  %v7687_v30 = vld [vmem:[%s8034_s30 + $0x860] sm:$0xff]  }
  0xfe   : > { %6974 = vmatpush3.bf16.msra.mxu0 %v7640_v32  ;;  %5371 = vmatprep.mubr.bf16.mxu0 %v1442_v31  ;;  %v7688_v31 = vld [vmem:[%s8034_s30 + $0x8e0] sm:$0xff]  }
  0xff   : > { %5332 = vmatmul.mubr.bf16.vlgmr.msra.gmra.mrb[24].mxu1 %v1443_v34  ;;  %6975 = vmatprep.subr.bf16.mxu0 %v7642_v35  ;;  %v7689_v32 = vld [vmem:[%s8034_s30 + $0x820] sm:$0xff]   ;;  %v7691_v34 = vld [vmem:[%s8034_s30 + $0x868] sm:$0xff]  }
 0x100   : > { %6996 = vmatpush3.bf16.msra.mxu1 %v7641_v33  ;;  %5411 = vmatprep.mubr.bf16.mxu1 %v1446_v37  ;;  %v7690_v33 = vld [vmem:[%s8034_s30 + $0x8a0] sm:$0xff]   ;;  %v7692_v35 = vld [vmem:[%s8034_s30 + $0x8e8] sm:$0xff]  }
 0x101   : > { %6997 = vmatprep.subr.bf16.mxu1 %v7643_v36  ;;  %v7693_v36 = vld [vmem:[%s8034_s30 + $0x828] sm:$0xff]  }
 0x102   : > { %6976 = vmatpush3.bf16.msra.mxu0 %v7644_v38  ;;  %v7694_v37 = vld [vmem:[%s8034_s30 + $0x8a8] sm:$0xff]   ;;  %v7695_v38 = vld [vmem:[%s8034_s30 + $0x870] sm:$0xff]  }
 0x103   : > { %6977 = vmatprep.subr.bf16.mxu0 %v7646_v40  ;;  %v7696_v40 = vld [vmem:[%s8034_s30 + $0x8f0] sm:$0xff]  }
 0x104   : > { %6998 = vmatpush3.bf16.msra.mxu1 %v7645_v39 }
 0x105   : > { %6999 = vmatprep.subr.bf16.mxu1 %v7647_v41  ;;  %v215_v41 = vld [vmem:[%s8024_s22 + $0x20] sm:$0xff] }
 0x106   : > { %6978 = vmatpush3.bf16.msra.mxu0 %v7648_v43 }
 0x107   : > { %6979 = vmatprep.subr.bf16.mxu0 %v7650_v45  ;;  %v1454_v45 = vrot.slane %v215_v41, %v8073_v42 }
 0x108   : > { %7000 = vmatpush3.bf16.msra.mxu1 %v7649_v44  ;;  %v7697_v44 = vld [vmem:[%s8034_s30 + $0x830] sm:$0xff]  }
 0x109   : > { %7001 = vmatprep.subr.bf16.mxu1 %v7651_v46  ;;  %v1447_v46 = vcombine.high %v215_v41, %v215_v41 }
 0x10a   : > { %6980 = vmatpush3.bf16.msra.mxu0 %v7652_v47 }
 0x10b   : > { %6981 = vmatprep.subr.bf16.mxu0 %v7654_v49 }
 0x10c   : > { %7002 = vmatpush3.bf16.msra.mxu1 %v7653_v48 }
 0x10d   : > { %7003 = vmatprep.subr.bf16.mxu1 %v7655_v50 }
 0x10e   : > { %6982 = vmatpush3.bf16.msra.mxu0 %v7656_v51 }
 0x10f   : > { %6983 = vmatprep.subr.bf16.mxu0 %v7658_v53  ;;  %v7699_v53 = vld [vmem:[%s8034_s30 + $0x878] sm:$0xff]  }
 0x110   : > { %7004 = vmatpush3.bf16.msra.mxu1 %v7657_v52  ;;  %v6681_v58 = vpop.f32.mrb[0].mxu0  ;;  %v7698_v52 = vld [vmem:[%s8034_s30 + $0x8b0] sm:$0xff]  }
 0x111   : > { %v6682_v60 = vpop.f32.mrb[1].mxu0  ;;  %7005 = vmatprep.subr.bf16.mxu1 %v7659_v54  ;;  %v6703_v62 = vpop.f32.mrb[0].mxu1  ;;  %v1462_v54 = vcombine.high %v1454_v45, %v1454_v45 }
 0x112   : > { %v6683_v63 = vadd.f32 %v6682_v60, %v6681_v58  ;;  %v6684_v0 = vpop.f32.mrb[2].mxu0  ;;  %6984 = vmatpush3.bf16.msra.mxu0 %v7660_v55  ;;  %v6704_v3 = vpop.f32.mrb[1].mxu1  ;;  %v8378_v55 = vrot.slane %v1447_v46, %v8073_v42 }
 0x113   : > { %v6685_v4 = vpop.f32.mrb[3].mxu0  ;;  %6985 = vmatprep.subr.bf16.mxu0 %v7662_v57  ;;  %v6705_v5 = vadd.f32 %v6704_v3, %v6703_v62  ;;  %v6706_v6 = vpop.f32.mrb[2].mxu1  ;;  %v1484_v62 = vrot.slane %v1462_v54, %v8073_v42  ;;  %v1470_v3 = vrot.slane %v1454_v45, %v8073_v42  ;;  %v7737_v54 = vld [vmem:[%s8034_s30 + $0xac0] sm:$0xff]  }
 0x114   : > { %7006 = vmatpush3.bf16.msra.mxu1 %v7661_v56  ;;  %v6707_v8 = vpop.f32.mrb[3].mxu1  ;;  %v7703_v4 = vld [vmem:[%s8034_s30 + $0x940] sm:$0xff]  }
 0x115   : > { %7007 = vmatprep.subr.bf16.mxu1 %v7663_v59  ;;  %v8341_v10 = vadd.f32 %v6705_v5, %v6683_v63  ;;  %v7700_v59 = vld [vmem:[%s8034_s30 + $0x8f8] sm:$0xff]   ;;  %v1463_v63 = vcombine.high %v8378_v55, %v8378_v55  ;;  %v7704_v5 = vld [vmem:[%s8034_s30 + $0x9c0] sm:$0xff]  }
 0x116   : > { %6986 = vmatpush3.bf16.msra.mxu0 %v7664_v61  ;;  %v7701_v61 = vld [vmem:[%s8034_s30 + $0x838] sm:$0xff]   ;;  %v7706_v8 = vld [vmem:[%s8034_s30 + $0x980] sm:$0xff]  }
 0x117   : > { %6987 = vmatprep.subr.bf16.mxu0 %v7666_v2  ;;  %v1494_v2 = vcombine.high %v1484_v62, %v1484_v62  ;;  %v1491_v6 = vrot.slane %v1463_v63, %v8073_v42  ;;  %v7745_v63 = vld [vmem:[%s8034_s30 + $0xad0] sm:$0xff]  }
 0x118   : > { %7008 = vmatpush3.bf16.msra.mxu1 %v7665_v1  ;;  %v7702_v1 = vld [vmem:[%s8034_s30 + $0x8b8] sm:$0xff]  }
 0x119   : > { %7009 = vmatprep.subr.bf16.mxu1 %v7667_v7  ;;  %v7705_v7 = vld [vmem:[%s8034_s30 + $0x900] sm:$0xff]  }
 0x11a   : > { %6988 = vmatpush3.bf16.msra.mxu0 %v7668_v9  ;;  %v1492_v9 = vcombine.high %v1470_v3, %v1470_v3 }
 0x11b   : > { %7017 = vmatprep.subr.bf16.mxu0 %v7671_v13  ;;  %v7709_v13 = vld [vmem:[%s8034_s30 + $0x908] sm:$0xff]  }
 0x11c   : > { %7010 = vmatpush3.bf16.msra.mxu1 %v7669_v11  ;;  %v7708_v11 = vld [vmem:[%s8034_s30 + $0x9c8] sm:$0xff]  }
 0x11d   : > { %5372 = vmatmul.mubr.bf16.vlgmr.msra.gmra.mrb[28].mxu0 %v1428_v12  ;;  %7039 = vmatprep.subr.bf16.mxu1 %v7672_v14  ;;  %v1495_v12 = vcombine.high %v1491_v6, %v1491_v6  ;;  %v7710_v14 = vld [vmem:[%s8034_s30 + $0x988] sm:$0xff]  }
 0x11e   : > { %7018 = vmatpush3.bf16.msra.mxu0 %v7673_v15  ;;  %5451 = vmatprep.mubr.bf16.mxu0 %v1484_v62  ;;  %v7711_v15 = vld [vmem:[%s8034_s30 + $0x950] sm:$0xff]  }
 0x11f   : > { %5412 = vmatmul.mubr.bf16.vlgmr.msra.gmra.mrb[28].mxu1 %v1444_v17  ;;  %7019 = vmatprep.subr.bf16.mxu0 %v7675_v18  ;;  %v7713_v17 = vld [vmem:[%s8034_s30 + $0x910] sm:$0xff]  }
 0x120   : > { %7040 = vmatpush3.bf16.msra.mxu1 %v7674_v16  ;;  %5491 = vmatprep.mubr.bf16.mxu1 %v1494_v2  ;;  %v7712_v16 = vld [vmem:[%s8034_s30 + $0x9d0] sm:$0xff]   ;;  %v7748_v2 = vld [vmem:[%s8034_s30 + $0xa58] sm:$0xff]  }
 0x121   : > { %7041 = vmatprep.subr.bf16.mxu1 %v7676_v19  ;;  %v7714_v18 = vld [vmem:[%s8034_s30 + $0x990] sm:$0xff]   ;;  %v7715_v19 = vld [vmem:[%s8034_s30 + $0x958] sm:$0xff]  }
 0x122   : > { %7020 = vmatpush3.bf16.msra.mxu0 %v7677_v20  ;;  %v7716_v20 = vld [vmem:[%s8034_s30 + $0x9d8] sm:$0xff]   ;;  %v7744_v62 = vld [vmem:[%s8034_s30 + $0xa50] sm:$0xff]  }
 0x123   : > { %7021 = vmatprep.subr.bf16.mxu0 %v7679_v22  ;;  %v7718_v22 = vld [vmem:[%s8034_s30 + $0x998] sm:$0xff]  }
 0x124   : > { %7042 = vmatpush3.bf16.msra.mxu1 %v7678_v21  ;;  %v7717_v21 = vld [vmem:[%s8034_s30 + $0x918] sm:$0xff]  }
 0x125   : > { %7043 = vmatprep.subr.bf16.mxu1 %v7680_v23  ;;  %v7719_v23 = vld [vmem:[%s8034_s30 + $0x960] sm:$0xff]  }
 0x126   : > { %7022 = vmatpush3.bf16.msra.mxu0 %v7681_v24  ;;  %v7720_v24 = vld [vmem:[%s8034_s30 + $0x9e0] sm:$0xff]  }
 0x127   : > { %7023 = vmatprep.subr.bf16.mxu0 %v7683_v26  ;;  %v7722_v26 = vld [vmem:[%s8034_s30 + $0x9a0] sm:$0xff]  }
 0x128   : > { %7044 = vmatpush3.bf16.msra.mxu1 %v7682_v25  ;;  %v7721_v25 = vld [vmem:[%s8034_s30 + $0x920] sm:$0xff]  }
 0x129   : > { %7045 = vmatprep.subr.bf16.mxu1 %v7684_v27  ;;  %v7723_v27 = vld [vmem:[%s8034_s30 + $0x968] sm:$0xff]  }
 0x12a   : > { %7024 = vmatpush3.bf16.msra.mxu0 %v7685_v28  ;;  %v7724_v28 = vld [vmem:[%s8034_s30 + $0x9e8] sm:$0xff]  }
 0x12b   : > { %7025 = vmatprep.subr.bf16.mxu0 %v7687_v30  ;;  %v7726_v30 = vld [vmem:[%s8034_s30 + $0x9a8] sm:$0xff]  }
 0x12c   : > { %7046 = vmatpush3.bf16.msra.mxu1 %v7686_v29  ;;  %v7725_v29 = vld [vmem:[%s8034_s30 + $0x928] sm:$0xff]  }
 0x12d   : > { %7047 = vmatprep.subr.bf16.mxu1 %v7688_v31  ;;  %v7727_v31 = vld [vmem:[%s8034_s30 + $0x970] sm:$0xff]  }
 0x12e   : > { %7026 = vmatpush3.bf16.msra.mxu0 %v7689_v32 }
 0x12f   : > { %7027 = vmatprep.subr.bf16.mxu0 %v7691_v34 }
 0x130   : > { %7048 = vmatpush3.bf16.msra.mxu1 %v7690_v33  ;;  %v6725_v39 = vpop.f32.mrb[4].mxu0  ;;  %v7728_v33 = vld [vmem:[%s8034_s30 + $0x9f0] sm:$0xff]  }
 0x131   : > { %v6726_v43 = vpop.f32.mrb[5].mxu0  ;;  %7049 = vmatprep.subr.bf16.mxu1 %v7692_v35  ;;  %v6747_v47 = vpop.f32.mrb[4].mxu1  ;;  %v7729_v35 = vld [vmem:[%s8034_s30 + $0x930] sm:$0xff]  }
 0x132   : > { %v6727_v48 = vadd.f32 %v6726_v43, %v6725_v39  ;;  %v6728_v49 = vpop.f32.mrb[6].mxu0  ;;  %7028 = vmatpush3.bf16.msra.mxu0 %v7693_v36  ;;  %v6748_v50 = vpop.f32.mrb[5].mxu1  ;;  %v7730_v39 = vld [vmem:[%s8034_s30 + $0x9b0] sm:$0xff]  }
 0x133   : > { %v6729_v51 = vpop.f32.mrb[7].mxu0  ;;  %7029 = vmatprep.subr.bf16.mxu0 %v7695_v38  ;;  %v6749_v57 = vadd.f32 %v6748_v50, %v6747_v47  ;;  %v6750_v58 = vpop.f32.mrb[6].mxu1  ;;  %v7732_v47 = vld [vmem:[%s8034_s30 + $0x9f8] sm:$0xff]  }
 0x134   : > { %v4894_v56 = vadd.f32 %v6727_v48, %v8341_v10  ;;  %7050 = vmatpush3.bf16.msra.mxu1 %v7694_v37  ;;  %v6751_v60 = vpop.f32.mrb[7].mxu1  ;;  %v7707_v10 = vld [vmem:[%s8034_s30 + $0x948] sm:$0xff]   ;;  %v7733_v49 = vld [vmem:[%s8034_s30 + $0x938] sm:$0xff]  }
 0x135   : > { %7051 = vmatprep.subr.bf16.mxu1 %v7696_v40  ;;  %v7731_v40 = vld [vmem:[%s8034_s30 + $0x978] sm:$0xff]   ;;  %v7741_v60 = vld [vmem:[%s8034_s30 + $0xac8] sm:$0xff]  }
 0x136   : > { %v8386_v0 = vadd.f32 %v6749_v57, %v4894_v56  ;;  %7030 = vmatpush3.bf16.msra.mxu0 %v7697_v44  ;;  %v7734_v51 = vld [vmem:[%s8034_s30 + $0x9b8] sm:$0xff]   ;;  %v7738_v56 = vld [vmem:[%s8034_s30 + $0xa00] sm:$0xff]  }
 0x137   : > { %7031 = vmatprep.subr.bf16.mxu0 %v7699_v53  ;;  %v7736_v53 = vld [vmem:[%s8034_s30 + $0xa40] sm:$0xff]  }
 0x138   : > { %7052 = vmatpush3.bf16.msra.mxu1 %v7698_v52  ;;  %v1477_v52 = vrot.slane %v8378_v55, %v8073_v42  ;;  %v7739_v57 = vld [vmem:[%s8034_s30 + $0xa80] sm:$0xff]   ;;  %v7742_v55 = vld [vmem:[%s8034_s30 + $0xa08] sm:$0xff]  }
 0x139   : > { %7053 = vmatprep.subr.bf16.mxu1 %v7700_v59  ;;  %v7740_v59 = vld [vmem:[%s8034_s30 + $0xa48] sm:$0xff]  }
 0x13a   : > { %7032 = vmatpush3.bf16.msra.mxu0 %v7701_v61  ;;  %v1493_v58 = vcombine.high %v1477_v52, %v1477_v52  ;;  %v7743_v61 = vld [vmem:[%s8034_s30 + $0xa88] sm:$0xff]  }
 0x13b   : > { %7061 = vmatprep.subr.bf16.mxu0 %v7703_v4  ;;  %v7750_v4 = vld [vmem:[%s8034_s30 + $0xa18] sm:$0xff]  }
 0x13c   : > { %7054 = vmatpush3.bf16.msra.mxu1 %v7702_v1  ;;  %v7747_v1 = vld [vmem:[%s8034_s30 + $0xa90] sm:$0xff]  }
 0x13d   : > { %5452 = vmatmul.mubr.bf16.vlgmr.msra.gmra.mrb[32].mxu0 %v1470_v3  ;;  %7083 = vmatprep.subr.bf16.mxu1 %v7704_v5  ;;  %v7749_v3 = vld [vmem:[%s8034_s30 + $0xad8] sm:$0xff]  }
 0x13e   : > { %7062 = vmatpush3.bf16.msra.mxu0 %v7705_v7  ;;  %5531 = vmatprep.mubr.bf16.mxu0 %v1491_v6  ;;  %v7751_v5 = vld [vmem:[%s8034_s30 + $0xa98] sm:$0xff]   ;;  %v7752_v6 = vld [vmem:[%s8034_s30 + $0xa60] sm:$0xff]  }
 0x13f   : > { %5492 = vmatmul.mubr.bf16.vlgmr.msra.gmra.mrb[32].mxu1 %v1492_v9  ;;  %7063 = vmatprep.subr.bf16.mxu0 %v7707_v10  ;;  %v7753_v7 = vld [vmem:[%s8034_s30 + $0xae0] sm:$0xff]   ;;  %v7756_v10 = vld [vmem:[%s8034_s30 + $0xa68] sm:$0xff]  }
 0x140   : > { %7084 = vmatpush3.bf16.msra.mxu1 %v7706_v8  ;;  %5571 = vmatprep.mubr.bf16.mxu1 %v1495_v12  ;;  %v7754_v8 = vld [vmem:[%s8034_s30 + $0xa20] sm:$0xff]   ;;  %v7758_v12 = vld [vmem:[%s8034_s30 + $0xa28] sm:$0xff]  }
 0x141   : > { %7085 = vmatprep.subr.bf16.mxu1 %v7708_v11  ;;  %v7755_v9 = vld [vmem:[%s8034_s30 + $0xaa0] sm:$0xff]   ;;  %v7757_v11 = vld [vmem:[%s8034_s30 + $0xae8] sm:$0xff]  }
 0x142   : > { %7064 = vmatpush3.bf16.msra.mxu0 %v7709_v13  ;;  %v7759_v13 = vld [vmem:[%s8034_s30 + $0xaa8] sm:$0xff]  }
 0x143   : > { %7065 = vmatprep.subr.bf16.mxu0 %v7711_v15 }
 0x144   : > { %7086 = vmatpush3.bf16.msra.mxu1 %v7710_v14  ;;  %v7760_v14 = vld [vmem:[%s8034_s30 + $0xa70] sm:$0xff]  }
 0x145   : > { %7087 = vmatprep.subr.bf16.mxu1 %v7712_v16  ;;  %v7761_v16 = vld [vmem:[%s8034_s30 + $0xaf0] sm:$0xff]  }
 0x146   : > { %7066 = vmatpush3.bf16.msra.mxu0 %v7713_v17 }
 0x147   : > { %7067 = vmatprep.subr.bf16.mxu0 %v7715_v19  ;;  %v216_v19 = vld [vmem:[%s8024_s22 + $0x28] sm:$0xff] }
 0x148   : > { %7088 = vmatpush3.bf16.msra.mxu1 %v7714_v18  ;;  %v7762_v18 = vld [vmem:[%s8034_s30 + $0xa30] sm:$0xff]  }
 0x149   : > { %7089 = vmatprep.subr.bf16.mxu1 %v7716_v20 }
 0x14a   : > { %7068 = vmatpush3.bf16.msra.mxu0 %v7717_v21 }
 0x14b   : > { %7069 = vmatprep.subr.bf16.mxu0 %v7719_v23  ;;  %v1503_v23 = vrot.slane %v216_v19, %v8073_v42 }
 0x14c   : > { %7090 = vmatpush3.bf16.msra.mxu1 %v7718_v22 }
 0x14d   : > { %7091 = vmatprep.subr.bf16.mxu1 %v7720_v24  ;;  %v1496_v24 = vcombine.high %v216_v19, %v216_v19 }
 0x14e   : > { %7070 = vmatpush3.bf16.msra.mxu0 %v7721_v25 }
 0x14f   : > { %7071 = vmatprep.subr.bf16.mxu0 %v7723_v27  ;;  %v7763_v27 = vld [vmem:[%s8034_s30 + $0xab0] sm:$0xff]  }
 0x150   : > { %7092 = vmatpush3.bf16.msra.mxu1 %v7722_v26  ;;  %v6769_v32 = vpop.f32.mrb[8].mxu0 }
 0x151   : > { %v6770_v34 = vpop.f32.mrb[9].mxu0  ;;  %7093 = vmatprep.subr.bf16.mxu1 %v7724_v28  ;;  %v7764_v28 = vld [vmem:[%s8034_s30 + $0xa78] sm:$0xff]  }
 0x152   : > { %v6791_v36 = vpop.f32.mrb[8].mxu1  ;;  %v6771_v37 = vadd.f32 %v6770_v34, %v6769_v32  ;;  %v6772_v38 = vpop.f32.mrb[10].mxu0  ;;  %7072 = vmatpush3.bf16.msra.mxu0 %v7725_v29  ;;  %v7765_v32 = vld [vmem:[%s8034_s30 + $0xaf8] sm:$0xff]  }
 0x153   : > { %v6792_v41 = vpop.f32.mrb[9].mxu1  ;;  %v6773_v43 = vpop.f32.mrb[11].mxu0  ;;  %7073 = vmatprep.subr.bf16.mxu0 %v7727_v31  ;;  %v7767_v38 = vld [vmem:[%s8034_s30 + $0xab8] sm:$0xff]  }
 0x154   : > { %v4974_v44 = vadd.f32 %v6771_v37, %v8386_v0  ;;  %v6793_v45 = vadd.f32 %v6792_v41, %v6791_v36  ;;  %v6794_v46 = vpop.f32.mrb[10].mxu1  ;;  %7094 = vmatpush3.bf16.msra.mxu1 %v7726_v30  ;;  %v7746_v0 = vld [vmem:[%s8034_s30 + $0xa10] sm:$0xff]   ;;  %v8463_v36 = vrot.slane %v1496_v24, %v8073_v42  ;;  %v7768_v41 = vld [vmem:[%s8034_s30 + $0xb40] sm:$0xff]   ;;  %v7798_v24 = vld [vmem:[%s8034_s30 + $0xb38] sm:$0xff]  }
 0x155   : > { %v6795_v48 = vpop.f32.mrb[11].mxu1  ;;  %7095 = vmatprep.subr.bf16.mxu1 %v7728_v33  ;;  %v1511_v33 = vcombine.high %v1503_v23, %v1503_v23  ;;  %v7770_v46 = vld [vmem:[%s8034_s30 + $0xb00] sm:$0xff]  }
 0x156   : > { %v8423_v50 = vadd.f32 %v6793_v45, %v4974_v44  ;;  %7074 = vmatpush3.bf16.msra.mxu0 %v7729_v35  ;;  %v7766_v35 = vld [vmem:[%s8034_s30 + $0xa38] sm:$0xff]   ;;  %v1512_v43 = vcombine.high %v8463_v36, %v8463_v36  ;;  %v7769_v45 = vld [vmem:[%s8034_s30 + $0xbc0] sm:$0xff]  }
 0x157   : > { %7075 = vmatprep.subr.bf16.mxu0 %v7731_v40  ;;  %v1519_v40 = vrot.slane %v1503_v23, %v8073_v42  ;;  %v7771_v48 = vld [vmem:[%s8034_s30 + $0xb80] sm:$0xff]  }
 0x158   : > { %7096 = vmatpush3.bf16.msra.mxu1 %v7730_v39  ;;  %v1533_v39 = vrot.slane %v1511_v33, %v8073_v42  ;;  %v7805_v33 = vld [vmem:[%s8034_s30 + $0xc48] sm:$0xff]  }
 0x159   : > { %7097 = vmatprep.subr.bf16.mxu1 %v7732_v47  ;;  %v1540_v47 = vrot.slane %v1512_v43, %v8073_v42  ;;  %v7814_v43 = vld [vmem:[%s8034_s30 + $0xcd8] sm:$0xff]  }
 0x15a   : > { %7076 = vmatpush3.bf16.msra.mxu0 %v7733_v49  ;;  %v1543_v44 = vcombine.high %v1533_v39, %v1533_v39  ;;  %v1541_v49 = vcombine.high %v1519_v40, %v1519_v40 }
 0x15b   : > { %7105 = vmatprep.subr.bf16.mxu0 %v7736_v53  ;;  %v7774_v53 = vld [vmem:[%s8034_s30 + $0xb08] sm:$0xff]  }
 0x15c   : > { %7098 = vmatpush3.bf16.msra.mxu1 %v7734_v51  ;;  %v7773_v51 = vld [vmem:[%s8034_s30 + $0xbc8] sm:$0xff]  }
 0x15d   : > { %5532 = vmatmul.mubr.bf16.vlgmr.msra.gmra.mrb[36].mxu0 %v1477_v52  ;;  %7127 = vmatprep.subr.bf16.mxu1 %v7737_v54  ;;  %v1544_v52 = vcombine.high %v1540_v47, %v1540_v47  ;;  %v7775_v54 = vld [vmem:[%s8034_s30 + $0xb88] sm:$0xff]  }
 0x15e   : > { %7106 = vmatpush3.bf16.msra.mxu0 %v7738_v56  ;;  %5611 = vmatprep.mubr.bf16.mxu0 %v1533_v39  ;;  %v7776_v56 = vld [vmem:[%s8034_s30 + $0xb50] sm:$0xff]  }
 0x15f   : > { %5572 = vmatmul.mubr.bf16.vlgmr.msra.gmra.mrb[36].mxu1 %v1493_v58  ;;  %7107 = vmatprep.subr.bf16.mxu0 %v7740_v59  ;;  %v7778_v58 = vld [vmem:[%s8034_s30 + $0xb10] sm:$0xff]  }
 0x160   : > { %7128 = vmatpush3.bf16.msra.mxu1 %v7739_v57  ;;  %5651 = vmatprep.mubr.bf16.mxu1 %v1543_v44  ;;  %v7777_v57 = vld [vmem:[%s8034_s30 + $0xbd0] sm:$0xff]   ;;  %v7815_v44 = vld [vmem:[%s8034_s30 + $0xc18] sm:$0xff]  }
 0x161   : > { %7129 = vmatprep.subr.bf16.mxu1 %v7741_v60  ;;  %v7779_v59 = vld [vmem:[%s8034_s30 + $0xb90] sm:$0xff]   ;;  %v7780_v60 = vld [vmem:[%s8034_s30 + $0xb58] sm:$0xff]  }
 0x162   : > { %7108 = vmatpush3.bf16.msra.mxu0 %v7742_v55  ;;  %v7781_v55 = vld [vmem:[%s8034_s30 + $0xbd8] sm:$0xff]   ;;  %v7811_v39 = vld [vmem:[%s8034_s30 + $0xc10] sm:$0xff]  }
 0x163   : > { %7109 = vmatprep.subr.bf16.mxu0 %v7744_v62  ;;  %v7783_v62 = vld [vmem:[%s8034_s30 + $0xb98] sm:$0xff]  }
 0x164   : > { %7130 = vmatpush3.bf16.msra.mxu1 %v7743_v61  ;;  %v7782_v61 = vld [vmem:[%s8034_s30 + $0xb18] sm:$0xff]  }
 0x165   : > { %7131 = vmatprep.subr.bf16.mxu1 %v7745_v63  ;;  %v7784_v63 = vld [vmem:[%s8034_s30 + $0xb60] sm:$0xff]  }
 0x166   : > { %7110 = vmatpush3.bf16.msra.mxu0 %v7746_v0  ;;  %v7785_v0 = vld [vmem:[%s8034_s30 + $0xbe0] sm:$0xff]  }
 0x167   : > { %7111 = vmatprep.subr.bf16.mxu0 %v7748_v2  ;;  %v7787_v2 = vld [vmem:[%s8034_s30 + $0xba0] sm:$0xff]  }
 0x168   : > { %7132 = vmatpush3.bf16.msra.mxu1 %v7747_v1  ;;  %v7786_v1 = vld [vmem:[%s8034_s30 + $0xb20] sm:$0xff]  }
 0x169   : > { %7133 = vmatprep.subr.bf16.mxu1 %v7749_v3  ;;  %v7788_v3 = vld [vmem:[%s8034_s30 + $0xb68] sm:$0xff]  }
 0x16a   : > { %7112 = vmatpush3.bf16.msra.mxu0 %v7750_v4  ;;  %v7789_v4 = vld [vmem:[%s8034_s30 + $0xbe8] sm:$0xff]  }
 0x16b   : > { %7113 = vmatprep.subr.bf16.mxu0 %v7752_v6  ;;  %v7791_v6 = vld [vmem:[%s8034_s30 + $0xba8] sm:$0xff]  }
 0x16c   : > { %7134 = vmatpush3.bf16.msra.mxu1 %v7751_v5  ;;  %v7790_v5 = vld [vmem:[%s8034_s30 + $0xb28] sm:$0xff]  }
 0x16d   : > { %7135 = vmatprep.subr.bf16.mxu1 %v7753_v7  ;;  %v7792_v7 = vld [vmem:[%s8034_s30 + $0xb70] sm:$0xff]  }
 0x16e   : > { %7114 = vmatpush3.bf16.msra.mxu0 %v7754_v8 }
 0x16f   : > { %7115 = vmatprep.subr.bf16.mxu0 %v7756_v10 }
 0x170   : > { %7136 = vmatpush3.bf16.msra.mxu1 %v7755_v9  ;;  %v6813_v15 = vpop.f32.mrb[12].mxu0  ;;  %v7793_v9 = vld [vmem:[%s8034_s30 + $0xbf0] sm:$0xff]  }
 0x171   : > { %v6814_v17 = vpop.f32.mrb[13].mxu0  ;;  %7137 = vmatprep.subr.bf16.mxu1 %v7757_v11  ;;  %v7794_v11 = vld [vmem:[%s8034_s30 + $0xb30] sm:$0xff]  }
 0x172   : > { %v6835_v20 = vpop.f32.mrb[12].mxu1  ;;  %v6815_v21 = vadd.f32 %v6814_v17, %v6813_v15  ;;  %v6816_v22 = vpop.f32.mrb[14].mxu0  ;;  %7116 = vmatpush3.bf16.msra.mxu0 %v7758_v12  ;;  %v7795_v15 = vld [vmem:[%s8034_s30 + $0xbb0] sm:$0xff]  }
 0x173   : > { %v6836_v25 = vpop.f32.mrb[13].mxu1  ;;  %v6817_v26 = vpop.f32.mrb[15].mxu0  ;;  %7117 = vmatprep.subr.bf16.mxu0 %v7760_v14  ;;  %v7797_v22 = vld [vmem:[%s8034_s30 + $0xbf8] sm:$0xff]  }
 0x174   : > { %v5054_v29 = vadd.f32 %v6815_v21, %v8423_v50  ;;  %v6837_v30 = vadd.f32 %v6836_v25, %v6835_v20  ;;  %v6838_v31 = vpop.f32.mrb[14].mxu1  ;;  %7138 = vmatpush3.bf16.msra.mxu1 %v7759_v13  ;;  %v7772_v50 = vld [vmem:[%s8034_s30 + $0xb48] sm:$0xff]   ;;  %v7799_v26 = vld [vmem:[%s8034_s30 + $0xbb8] sm:$0xff]  }
 0x175   : > { %v6839_v34 = vpop.f32.mrb[15].mxu1  ;;  %7139 = vmatprep.subr.bf16.mxu1 %v7761_v16  ;;  %v7796_v16 = vld [vmem:[%s8034_s30 + $0xb78] sm:$0xff]   ;;  %v7804_v31 = vld [vmem:[%s8034_s30 + $0xc80] sm:$0xff]  }
 0x176   : > { %v8465_v37 = vadd.f32 %v6837_v30, %v5054_v29  ;;  %7118 = vmatpush3.bf16.msra.mxu0 %v7762_v18  ;;  %v7802_v29 = vld [vmem:[%s8034_s30 + $0xcc0] sm:$0xff]   ;;  %v7806_v34 = vld [vmem:[%s8034_s30 + $0xcc8] sm:$0xff]  }
 0x177   : > { %7119 = vmatprep.subr.bf16.mxu0 %v7764_v28  ;;  %v7801_v28 = vld [vmem:[%s8034_s30 + $0xc40] sm:$0xff]  }
 0x178   : > { %7140 = vmatpush3.bf16.msra.mxu1 %v7763_v27  ;;  %v1526_v27 = vrot.slane %v8463_v36, %v8073_v42  ;;  %v7803_v30 = vld [vmem:[%s8034_s30 + $0xc00] sm:$0xff]   ;;  %v7808_v36 = vld [vmem:[%s8034_s30 + $0xc88] sm:$0xff]  }
 0x179   : > { %7141 = vmatprep.subr.bf16.mxu1 %v7765_v32 }
 0x17a   : > { %7120 = vmatpush3.bf16.msra.mxu0 %v7766_v35  ;;  %v1542_v32 = vcombine.high %v1526_v27, %v1526_v27  ;;  %v7807_v35 = vld [vmem:[%s8034_s30 + $0xc08] sm:$0xff]  }
 0x17b   : > { %7149 = vmatprep.subr.bf16.mxu0 %v7768_v41  ;;  %v7813_v41 = vld [vmem:[%s8034_s30 + $0xc58] sm:$0xff]  }
 0x17c   : > { %7142 = vmatpush3.bf16.msra.mxu1 %v7767_v38  ;;  %v7810_v38 = vld [vmem:[%s8034_s30 + $0xcd0] sm:$0xff]  }
 0x17d   : > { %5612 = vmatmul.mubr.bf16.vlgmr.msra.gmra.mrb[40].mxu0 %v1519_v40  ;;  %7171 = vmatprep.subr.bf16.mxu1 %v7769_v45  ;;  %v7812_v40 = vld [vmem:[%s8034_s30 + $0xc90] sm:$0xff]   ;;  %v7816_v45 = vld [vmem:[%s8034_s30 + $0xc98] sm:$0xff]  }
 0x17e   : > { %7150 = vmatpush3.bf16.msra.mxu0 %v7770_v46  ;;  %5691 = vmatprep.mubr.bf16.mxu0 %v1540_v47  ;;  %v7817_v46 = vld [vmem:[%s8034_s30 + $0xc60] sm:$0xff]  }
 0x17f   : > { %5652 = vmatmul.mubr.bf16.vlgmr.msra.gmra.mrb[40].mxu1 %v1541_v49  ;;  %7151 = vmatprep.subr.bf16.mxu0 %v7772_v50  ;;  %v7818_v47 = vld [vmem:[%s8034_s30 + $0xce0] sm:$0xff]   ;;  %v7821_v50 = vld [vmem:[%s8034_s30 + $0xc68] sm:$0xff]  }
 0x180   : > { %7172 = vmatpush3.bf16.msra.mxu1 %v7771_v48  ;;  %5731 = vmatprep.mubr.bf16.mxu1 %v1544_v52  ;;  %v7819_v48 = vld [vmem:[%s8034_s30 + $0xc20] sm:$0xff]   ;;  %v7823_v52 = vld [vmem:[%s8034_s30 + $0xc28] sm:$0xff]  }
 0x181   : > { %7173 = vmatprep.subr.bf16.mxu1 %v7773_v51  ;;  %v7820_v49 = vld [vmem:[%s8034_s30 + $0xca0] sm:$0xff]   ;;  %v7822_v51 = vld [vmem:[%s8034_s30 + $0xce8] sm:$0xff]  }
 0x182   : > { %7152 = vmatpush3.bf16.msra.mxu0 %v7774_v53  ;;  %v7824_v53 = vld [vmem:[%s8034_s30 + $0xca8] sm:$0xff]  }
 0x183   : > { %7153 = vmatprep.subr.bf16.mxu0 %v7776_v56 }
 0x184   : > { %7174 = vmatpush3.bf16.msra.mxu1 %v7775_v54  ;;  %v7825_v54 = vld [vmem:[%s8034_s30 + $0xc70] sm:$0xff]  }
 0x185   : > { %7175 = vmatprep.subr.bf16.mxu1 %v7777_v57  ;;  %v7826_v57 = vld [vmem:[%s8034_s30 + $0xcf0] sm:$0xff]  }
 0x186   : > { %7154 = vmatpush3.bf16.msra.mxu0 %v7778_v58 }
 0x187   : > { %7155 = vmatprep.subr.bf16.mxu0 %v7780_v60 }
 0x188   : > { %7176 = vmatpush3.bf16.msra.mxu1 %v7779_v59  ;;  %v7827_v59 = vld [vmem:[%s8034_s30 + $0xc30] sm:$0xff]  }
 0x189   : > { %7177 = vmatprep.subr.bf16.mxu1 %v7781_v55 }
 0x18a   : > { %7156 = vmatpush3.bf16.msra.mxu0 %v7782_v61 }
 0x18b   : > { %7157 = vmatprep.subr.bf16.mxu0 %v7784_v63  ;;  %v7829_v63 = vld [vmem:[%s8034_s30 + $0xc78] sm:$0xff]  }
 0x18c   : > { %7178 = vmatpush3.bf16.msra.mxu1 %v7783_v62  ;;  %v7828_v62 = vld [vmem:[%s8034_s30 + $0xcb0] sm:$0xff]  }
 0x18d   : > { %7179 = vmatprep.subr.bf16.mxu1 %v7785_v0  ;;  %v217_v0 = vld [vmem:[%s8024_s22 + $0x30] sm:$0xff] }
 0x18e   : > { %7158 = vmatpush3.bf16.msra.mxu0 %v7786_v1 }
 0x18f   : > { %7159 = vmatprep.subr.bf16.mxu0 %v7788_v3  ;;  %v1552_v3 = vrot.slane %v217_v0, %v8073_v42 }
 0x190   : > { %7180 = vmatpush3.bf16.msra.mxu1 %v7787_v2  ;;  %v6857_v8 = vpop.f32.mrb[16].mxu0 }
 0x191   : > { %v6858_v10 = vpop.f32.mrb[17].mxu0  ;;  %7181 = vmatprep.subr.bf16.mxu1 %v7789_v4  ;;  %v1545_v4 = vcombine.high %v217_v0, %v217_v0  ;;  %v7863_v0 = vld [vmem:[%s8034_s30 + $0xd38] sm:$0xff]  }
 0x192   : > { %v6879_v12 = vpop.f32.mrb[16].mxu1  ;;  %v6859_v13 = vadd.f32 %v6858_v10, %v6857_v8  ;;  %v6860_v14 = vpop.f32.mrb[18].mxu0  ;;  %7160 = vmatpush3.bf16.msra.mxu0 %v7790_v5  ;;  %v7830_v8 = vld [vmem:[%s8034_s30 + $0xcf8] sm:$0xff]  }
 0x193   : > { %v6880_v17 = vpop.f32.mrb[17].mxu1  ;;  %v6861_v18 = vpop.f32.mrb[19].mxu0  ;;  %7161 = vmatprep.subr.bf16.mxu0 %v7792_v7  ;;  %v7831_v10 = vld [vmem:[%s8034_s30 + $0xc38] sm:$0xff]  }
 0x194   : > { %v5134_v19 = vadd.f32 %v6859_v13, %v8465_v37  ;;  %v6881_v20 = vadd.f32 %v6880_v17, %v6879_v12  ;;  %v6882_v21 = vpop.f32.mrb[18].mxu1  ;;  %7182 = vmatpush3.bf16.msra.mxu1 %v7791_v6  ;;  %v7809_v37 = vld [vmem:[%s8034_s30 + $0xc50] sm:$0xff]   ;;  %v8545_v12 = vrot.slane %v1545_v4, %v8073_v42  ;;  %v7832_v14 = vld [vmem:[%s8034_s30 + $0xcb8] sm:$0xff]   ;;  %v7833_v17 = vld [vmem:[%s8034_s30 + $0xd40] sm:$0xff]  }
 0x195   : > { %v6883_v23 = vpop.f32.mrb[19].mxu1  ;;  %7183 = vmatprep.subr.bf16.mxu1 %v7793_v9  ;;  %v7835_v21 = vld [vmem:[%s8034_s30 + $0xd00] sm:$0xff]  }
 0x196   : > { %v8505_v25 = vadd.f32 %v6881_v20, %v5134_v19  ;;  %7162 = vmatpush3.bf16.msra.mxu0 %v7794_v11  ;;  %v1560_v11 = vcombine.high %v1552_v3, %v1552_v3  ;;  %v1561_v18 = vcombine.high %v8545_v12, %v8545_v12  ;;  %v7834_v19 = vld [vmem:[%s8034_s30 + $0xdc0] sm:$0xff]  }
 0x197   : > { %7163 = vmatprep.subr.bf16.mxu0 %v7796_v16  ;;  %v1568_v16 = vrot.slane %v1552_v3, %v8073_v42  ;;  %v7836_v23 = vld [vmem:[%s8034_s30 + $0xd80] sm:$0xff]   ;;  %v1575_v3 = vrot.slane %v8545_v12, %v8073_v42  ;;  %v7873_v12 = vld [vmem:[%s8034_s30 + $0xe88] sm:$0xff]  }
 0x198   : > { %7184 = vmatpush3.bf16.msra.mxu1 %v7795_v15  ;;  %v1582_v15 = vrot.slane %v1560_v11, %v8073_v42  ;;  %v7866_v4 = vld [vmem:[%s8034_s30 + $0xe40] sm:$0xff]   ;;  %v7872_v11 = vld [vmem:[%s8034_s30 + $0xe08] sm:$0xff]  }
 0x199   : > { %7185 = vmatprep.subr.bf16.mxu1 %v7797_v22  ;;  %v1589_v22 = vrot.slane %v1561_v18, %v8073_v42  ;;  %v7879_v18 = vld [vmem:[%s8034_s30 + $0xed8] sm:$0xff]  }
 0x19a   : > { %7164 = vmatpush3.bf16.msra.mxu0 %v7798_v24  ;;  %v1592_v20 = vcombine.high %v1582_v15, %v1582_v15  ;;  %v1590_v24 = vcombine.high %v1568_v16, %v1568_v16 }
 0x19b   : > { %7193 = vmatprep.subr.bf16.mxu0 %v7801_v28  ;;  %v7839_v28 = vld [vmem:[%s8034_s30 + $0xd08] sm:$0xff]  }
 0x19c   : > { %7186 = vmatpush3.bf16.msra.mxu1 %v7799_v26  ;;  %v7838_v26 = vld [vmem:[%s8034_s30 + $0xdc8] sm:$0xff]  }
 0x19d   : > { %5692 = vmatmul.mubr.bf16.vlgmr.msra.gmra.mrb[44].mxu0 %v1526_v27  ;;  %7215 = vmatprep.subr.bf16.mxu1 %v7802_v29  ;;  %v1593_v27 = vcombine.high %v1589_v22, %v1589_v22  ;;  %v7840_v29 = vld [vmem:[%s8034_s30 + $0xd88] sm:$0xff]  }
 0x19e   : > { %7194 = vmatpush3.bf16.msra.mxu0 %v7803_v30  ;;  %5771 = vmatprep.mubr.bf16.mxu0 %v1582_v15  ;;  %v7841_v30 = vld [vmem:[%s8034_s30 + $0xd50] sm:$0xff]  }
 0x19f   : > { %5732 = vmatmul.mubr.bf16.vlgmr.msra.gmra.mrb[44].mxu1 %v1542_v32  ;;  %7195 = vmatprep.subr.bf16.mxu0 %v7805_v33  ;;  %v7843_v32 = vld [vmem:[%s8034_s30 + $0xd10] sm:$0xff]  }
 0x1a0   : > { %7216 = vmatpush3.bf16.msra.mxu1 %v7804_v31  ;;  %5811 = vmatprep.mubr.bf16.mxu1 %v1592_v20  ;;  %v7842_v31 = vld [vmem:[%s8034_s30 + $0xdd0] sm:$0xff]   ;;  %v7881_v20 = vld [vmem:[%s8034_s30 + $0xe98] sm:$0xff]  }
 0x1a1   : > { %7217 = vmatprep.subr.bf16.mxu1 %v7806_v34  ;;  %v7844_v33 = vld [vmem:[%s8034_s30 + $0xd90] sm:$0xff]   ;;  %v7845_v34 = vld [vmem:[%s8034_s30 + $0xd58] sm:$0xff]  }
 0x1a2   : > { %7196 = vmatpush3.bf16.msra.mxu0 %v7807_v35  ;;  %v7846_v35 = vld [vmem:[%s8034_s30 + $0xdd8] sm:$0xff]   ;;  %v7876_v15 = vld [vmem:[%s8034_s30 + $0xe10] sm:$0xff]  }
 0x1a3   : > { %7197 = vmatprep.subr.bf16.mxu0 %v7809_v37  ;;  %v7848_v37 = vld [vmem:[%s8034_s30 + $0xd98] sm:$0xff]  }
 0x1a4   : > { %7218 = vmatpush3.bf16.msra.mxu1 %v7808_v36  ;;  %v7847_v36 = vld [vmem:[%s8034_s30 + $0xd18] sm:$0xff]  }
 0x1a5   : > { %7219 = vmatprep.subr.bf16.mxu1 %v7810_v38  ;;  %v7849_v38 = vld [vmem:[%s8034_s30 + $0xd60] sm:$0xff]  }
 0x1a6   : > { %7198 = vmatpush3.bf16.msra.mxu0 %v7811_v39  ;;  %v7850_v39 = vld [vmem:[%s8034_s30 + $0xde0] sm:$0xff]  }
 0x1a7   : > { %7199 = vmatprep.subr.bf16.mxu0 %v7813_v41  ;;  %v7852_v41 = vld [vmem:[%s8034_s30 + $0xda0] sm:$0xff]  }
 0x1a8   : > { %7220 = vmatpush3.bf16.msra.mxu1 %v7812_v40  ;;  %v7851_v40 = vld [vmem:[%s8034_s30 + $0xd20] sm:$0xff]  }
 0x1a9   : > { %7221 = vmatprep.subr.bf16.mxu1 %v7814_v43  ;;  %v7853_v43 = vld [vmem:[%s8034_s30 + $0xd68] sm:$0xff]  }
 0x1aa   : > { %7200 = vmatpush3.bf16.msra.mxu0 %v7815_v44  ;;  %v7854_v44 = vld [vmem:[%s8034_s30 + $0xde8] sm:$0xff]  }
 0x1ab   : > { %7201 = vmatprep.subr.bf16.mxu0 %v7817_v46  ;;  %v7856_v46 = vld [vmem:[%s8034_s30 + $0xda8] sm:$0xff]  }
 0x1ac   : > { %7222 = vmatpush3.bf16.msra.mxu1 %v7816_v45  ;;  %v7855_v45 = vld [vmem:[%s8034_s30 + $0xd28] sm:$0xff]  }
 0x1ad   : > { %7223 = vmatprep.subr.bf16.mxu1 %v7818_v47  ;;  %v7857_v47 = vld [vmem:[%s8034_s30 + $0xd70] sm:$0xff]  }
 0x1ae   : > { %7202 = vmatpush3.bf16.msra.mxu0 %v7819_v48 }
 0x1af   : > { %7203 = vmatprep.subr.bf16.mxu0 %v7821_v50 }
 0x1b0   : > { %7224 = vmatpush3.bf16.msra.mxu1 %v7820_v49  ;;  %v6901_v56 = vpop.f32.mrb[20].mxu0  ;;  %v7858_v49 = vld [vmem:[%s8034_s30 + $0xdf0] sm:$0xff]  }
 0x1b1   : > { %v6902_v58 = vpop.f32.mrb[21].mxu0  ;;  %7225 = vmatprep.subr.bf16.mxu1 %v7822_v51  ;;  %v7859_v51 = vld [vmem:[%s8034_s30 + $0xd30] sm:$0xff]  }
 0x1b2   : > { %v6923_v60 = vpop.f32.mrb[20].mxu1  ;;  %v6903_v55 = vadd.f32 %v6902_v58, %v6901_v56  ;;  %v6904_v61 = vpop.f32.mrb[22].mxu0  ;;  %7204 = vmatpush3.bf16.msra.mxu0 %v7823_v52  ;;  %v7860_v56 = vld [vmem:[%s8034_s30 + $0xdb0] sm:$0xff]  }
 0x1b3   : > { %v6924_v1 = vpop.f32.mrb[21].mxu1  ;;  %v6905_v2 = vpop.f32.mrb[23].mxu0  ;;  %7205 = vmatprep.subr.bf16.mxu0 %v7825_v54 }
 0x1b4   : > { %v5214_v5 = vadd.f32 %v6903_v55, %v8505_v25  ;;  %v6925_v6 = vadd.f32 %v6924_v1, %v6923_v60  ;;  %v6926_v7 = vpop.f32.mrb[22].mxu1  ;;  %7226 = vmatpush3.bf16.msra.mxu1 %v7824_v53  ;;  %v7837_v25 = vld [vmem:[%s8034_s30 + $0xd48] sm:$0xff]   ;;  %v7864_v2 = vld [vmem:[%s8034_s30 + $0xdb8] sm:$0xff]  }
 0x1b5   : > { %v6927_v9 = vpop.f32.mrb[23].mxu1  ;;  %7227 = vmatprep.subr.bf16.mxu1 %v7826_v57  ;;  %v7861_v57 = vld [vmem:[%s8034_s30 + $0xd78] sm:$0xff]   ;;  %v7869_v7 = vld [vmem:[%s8034_s30 + $0xe80] sm:$0xff]  }
 0x1b6   : > { %v8547_v13 = vadd.f32 %v6925_v6, %v5214_v5  ;;  %7206 = vmatpush3.bf16.msra.mxu0 %v7827_v59  ;;  %v7867_v5 = vld [vmem:[%s8034_s30 + $0xec0] sm:$0xff]   ;;  %v7870_v9 = vld [vmem:[%s8034_s30 + $0xe48] sm:$0xff]  }
 0x1b7   : > { %7207 = vmatprep.subr.bf16.mxu0 %v7829_v63  ;;  %v7868_v6 = vld [vmem:[%s8034_s30 + $0xe00] sm:$0xff]  }
 0x1b8   : > { %7228 = vmatpush3.bf16.msra.mxu1 %v7828_v62  ;;  %v7862_v62 = vld [vmem:[%s8034_s30 + $0xdf8] sm:$0xff]  }
 0x1b9   : > { %7229 = vmatprep.subr.bf16.mxu1 %v7830_v8  ;;  %v1591_v8 = vcombine.high %v1575_v3, %v1575_v3 }
 0x1ba   : > { %7208 = vmatpush3.bf16.msra.mxu0 %v7831_v10  ;;  %v7871_v10 = vld [vmem:[%s8034_s30 + $0xec8] sm:$0xff]  }
 0x1bb   : > { %7237 = vmatprep.subr.bf16.mxu0 %v7833_v17  ;;  %v7878_v17 = vld [vmem:[%s8034_s30 + $0xe58] sm:$0xff]  }
 0x1bc   : > { %7230 = vmatpush3.bf16.msra.mxu1 %v7832_v14  ;;  %v7875_v14 = vld [vmem:[%s8034_s30 + $0xed0] sm:$0xff]  }
 0x1bd   : > { %5772 = vmatmul.mubr.bf16.vlgmr.msra.gmra.mrb[48].mxu0 %v1568_v16  ;;  %7259 = vmatprep.subr.bf16.mxu1 %v7834_v19  ;;  %v7877_v16 = vld [vmem:[%s8034_s30 + $0xe90] sm:$0xff]   ;;  %v7880_v19 = vld [vmem:[%s8034_s30 + $0xe18] sm:$0xff]  }
 0x1be   : > { %7238 = vmatpush3.bf16.msra.mxu0 %v7835_v21  ;;  %5851 = vmatprep.mubr.bf16.mxu0 %v1589_v22  ;;  %v7882_v21 = vld [vmem:[%s8034_s30 + $0xe60] sm:$0xff]  }
 0x1bf   : > { %5812 = vmatmul.mubr.bf16.vlgmr.msra.gmra.mrb[48].mxu1 %v1590_v24  ;;  %7239 = vmatprep.subr.bf16.mxu0 %v7837_v25  ;;  %v7883_v22 = vld [vmem:[%s8034_s30 + $0xee0] sm:$0xff]   ;;  %v7886_v25 = vld [vmem:[%s8034_s30 + $0xe68] sm:$0xff]  }
 0x1c0   : > { %7260 = vmatpush3.bf16.msra.mxu1 %v7836_v23  ;;  %5891 = vmatprep.mubr.bf16.mxu1 %v1593_v27  ;;  %v7884_v23 = vld [vmem:[%s8034_s30 + $0xe20] sm:$0xff]   ;;  %v7888_v27 = vld [vmem:[%s8034_s30 + $0xe28] sm:$0xff]  }
 0x1c1   : > { %7261 = vmatprep.subr.bf16.mxu1 %v7838_v26  ;;  %v7885_v24 = vld [vmem:[%s8034_s30 + $0xea0] sm:$0xff]   ;;  %v7887_v26 = vld [vmem:[%s8034_s30 + $0xee8] sm:$0xff]  }
 0x1c2   : > { %7240 = vmatpush3.bf16.msra.mxu0 %v7839_v28  ;;  %v7889_v28 = vld [vmem:[%s8034_s30 + $0xea8] sm:$0xff]  }
 0x1c3   : > { %7241 = vmatprep.subr.bf16.mxu0 %v7841_v30 }
 0x1c4   : > { %7262 = vmatpush3.bf16.msra.mxu1 %v7840_v29  ;;  %v7890_v29 = vld [vmem:[%s8034_s30 + $0xe70] sm:$0xff]  }
 0x1c5   : > { %7263 = vmatprep.subr.bf16.mxu1 %v7842_v31  ;;  %v7891_v31 = vld [vmem:[%s8034_s30 + $0xef0] sm:$0xff]  }
 0x1c6   : > { %7242 = vmatpush3.bf16.msra.mxu0 %v7843_v32 }
 0x1c7   : > { %7243 = vmatprep.subr.bf16.mxu0 %v7845_v34 }
 0x1c8   : > { %7264 = vmatpush3.bf16.msra.mxu1 %v7844_v33  ;;  %v7892_v33 = vld [vmem:[%s8034_s30 + $0xe30] sm:$0xff]  }
 0x1c9   : > { %7265 = vmatprep.subr.bf16.mxu1 %v7846_v35 }
 0x1ca   : > { %7244 = vmatpush3.bf16.msra.mxu0 %v7847_v36 }
 0x1cb   : > { %7245 = vmatprep.subr.bf16.mxu0 %v7849_v38  ;;  %v7894_v38 = vld [vmem:[%s8034_s30 + $0xe78] sm:$0xff]  }
 0x1cc   : > { %7266 = vmatpush3.bf16.msra.mxu1 %v7848_v37  ;;  %v7893_v37 = vld [vmem:[%s8034_s30 + $0xeb0] sm:$0xff]  }
 0x1cd   : > { %7267 = vmatprep.subr.bf16.mxu1 %v7850_v39 }
 0x1ce   : > { %7246 = vmatpush3.bf16.msra.mxu0 %v7851_v40 }
 0x1cf   : > { %7247 = vmatprep.subr.bf16.mxu0 %v7853_v43 }
 0x1d0   : > { %7268 = vmatpush3.bf16.msra.mxu1 %v7852_v41  ;;  %v6945_v48 = vpop.f32.mrb[24].mxu0 }
 0x1d1   : > { %v6946_v50 = vpop.f32.mrb[25].mxu0  ;;  %7269 = vmatprep.subr.bf16.mxu1 %v7854_v44 }
 0x1d2   : > { %v6967_v52 = vpop.f32.mrb[24].mxu1  ;;  %v6947_v53 = vadd.f32 %v6946_v50, %v6945_v48  ;;  %v6948_v54 = vpop.f32.mrb[26].mxu0  ;;  %7248 = vmatpush3.bf16.msra.mxu0 %v7855_v45  ;;  %v218_v45 = vld [vmem:[%s8024_s22 + $0x38] sm:$0xff] }
 0x1d3   : > { %v6968_v58 = vpop.f32.mrb[25].mxu1  ;;  %v6949_v59 = vpop.f32.mrb[27].mxu0  ;;  %7249 = vmatprep.subr.bf16.mxu0 %v7857_v47  ;;  %v7895_v47 = vld [vmem:[%s8034_s30 + $0xef8] sm:$0xff]   ;;  %v1601_v48 = vrot.slane %v218_v45, %v8073_v42  ;;  %v7898_v54 = vld [vmem:[%s8034_s30 + $0xf40] sm:$0xff]  }
 0x1d4   : > { %v5294_v60 = vadd.f32 %v6947_v53, %v8547_v13  ;;  %v6969_v55 = vadd.f32 %v6968_v58, %v6967_v52  ;;  %v6970_v61 = vpop.f32.mrb[26].mxu1  ;;  %7270 = vmatpush3.bf16.msra.mxu1 %v7856_v46  ;;  %v7874_v13 = vld [vmem:[%s8034_s30 + $0xe50] sm:$0xff]   ;;  %v7899_v59 = vld [vmem:[%s8034_s30 + $0xfc0] sm:$0xff]  }
 0x1d5   : > { %v6971_v63 = vpop.f32.mrb[27].mxu1  ;;  %7271 = vmatprep.subr.bf16.mxu1 %v7858_v49  ;;  %v1594_v49 = vcombine.high %v218_v45, %v218_v45  ;;  %v1609_v52 = vcombine.high %v1601_v48, %v1601_v48  ;;  %v1617_v53 = vrot.slane %v1601_v48, %v8073_v42 }
 0x1d6   : > { %v8587_v1 = vadd.f32 %v6969_v55, %v5294_v60  ;;  %7250 = vmatpush3.bf16.msra.mxu0 %v7859_v51  ;;  %v7896_v51 = vld [vmem:[%s8034_s30 + $0xe38] sm:$0xff]   ;;  %v7900_v55 = vld [vmem:[%s8034_s30 + $0xf00] sm:$0xff]   ;;  %v7902_v63 = vld [vmem:[%s8034_s30 + $0xf48] sm:$0xff]  }
 0x1d7   : > { %7251 = vmatprep.subr.bf16.mxu0 %v7861_v57  ;;  %v7897_v57 = vld [vmem:[%s8034_s30 + $0xeb8] sm:$0xff]   ;;  %v1631_v58 = vrot.slane %v1609_v52, %v8073_v42 }
 0x1d8   : > { %7272 = vmatpush3.bf16.msra.mxu1 %v7860_v56  ;;  %v8631_v56 = vrot.slane %v1594_v49, %v8073_v42 }
 0x1d9   : > { %7273 = vmatprep.subr.bf16.mxu1 %v7862_v62  ;;  %v1641_v61 = vcombine.high %v1631_v58, %v1631_v58  ;;  %v1639_v62 = vcombine.high %v1617_v53, %v1617_v53 }
 0x1da   : > { %7252 = vmatpush3.bf16.msra.mxu0 %v7863_v0  ;;  %v1610_v60 = vcombine.high %v8631_v56, %v8631_v56 }
 0x1db   : > { %7281 = vmatprep.subr.bf16.mxu0 %v7866_v4  ;;  %v7904_v4 = vld [vmem:[%s8034_s30 + $0xf08] sm:$0xff]  }
 0x1dc   : > { %7274 = vmatpush3.bf16.msra.mxu1 %v7864_v2  ;;  %v1638_v0 = vrot.slane %v1610_v60, %v8073_v42  ;;  %v7903_v2 = vld [vmem:[%s8034_s30 + $0xfc8] sm:$0xff]  }
 0x1dd   : > { %5852 = vmatmul.mubr.bf16.vlgmr.msra.gmra.mrb[52].mxu0 %v1575_v3  ;;  %7303 = vmatprep.subr.bf16.mxu1 %v7867_v5  ;;  %v7906_v5 = vld [vmem:[%s8034_s30 + $0xf50] sm:$0xff]  }
 0x1de   : > { %7282 = vmatpush3.bf16.msra.mxu0 %v7868_v6  ;;  %5931 = vmatprep.mubr.bf16.mxu0 %v1631_v58  ;;  %v1642_v3 = vcombine.high %v1638_v0, %v1638_v0  ;;  %v7905_v6 = vld [vmem:[%s8034_s30 + $0xf88] sm:$0xff]  }
 0x1df   : > { %5892 = vmatmul.mubr.bf16.vlgmr.msra.gmra.mrb[52].mxu1 %v1591_v8  ;;  %7283 = vmatprep.subr.bf16.mxu0 %v7870_v9  ;;  %v7908_v8 = vld [vmem:[%s8034_s30 + $0xf10] sm:$0xff]   ;;  %v7910_v9 = vld [vmem:[%s8034_s30 + $0xf58] sm:$0xff]  }
 0x1e0   : > { %7304 = vmatpush3.bf16.msra.mxu1 %v7869_v7  ;;  %5971 = vmatprep.mubr.bf16.mxu1 %v1641_v61  ;;  %v7907_v7 = vld [vmem:[%s8034_s30 + $0xfd0] sm:$0xff]  }
 0x1e1   : > { %7305 = vmatprep.subr.bf16.mxu1 %v7871_v10  ;;  %v7909_v10 = vld [vmem:[%s8034_s30 + $0xf90] sm:$0xff]  }
 0x1e2   : > { %7284 = vmatpush3.bf16.msra.mxu0 %v7872_v11  ;;  %v7911_v11 = vld [vmem:[%s8034_s30 + $0xfd8] sm:$0xff]  }
 0x1e3   : > { %7285 = vmatprep.subr.bf16.mxu0 %v7874_v13  ;;  %v7914_v13 = vld [vmem:[%s8034_s30 + $0xf60] sm:$0xff]  }
 0x1e4   : > { %7306 = vmatpush3.bf16.msra.mxu1 %v7873_v12  ;;  %v7912_v12 = vld [vmem:[%s8034_s30 + $0xf18] sm:$0xff]  }
 0x1e5   : > { %7307 = vmatprep.subr.bf16.mxu1 %v7875_v14  ;;  %v7913_v14 = vld [vmem:[%s8034_s30 + $0xf98] sm:$0xff]  }
 0x1e6   : > { %7286 = vmatpush3.bf16.msra.mxu0 %v7876_v15  ;;  %v7915_v15 = vld [vmem:[%s8034_s30 + $0xfe0] sm:$0xff]  }
 0x1e7   : > { %7287 = vmatprep.subr.bf16.mxu0 %v7878_v17  ;;  %v7918_v17 = vld [vmem:[%s8034_s30 + $0xf68] sm:$0xff]  }
 0x1e8   : > { %7308 = vmatpush3.bf16.msra.mxu1 %v7877_v16  ;;  %v7916_v16 = vld [vmem:[%s8034_s30 + $0xf20] sm:$0xff]  }
 0x1e9   : > { %7309 = vmatprep.subr.bf16.mxu1 %v7879_v18  ;;  %v7917_v18 = vld [vmem:[%s8034_s30 + $0xfa0] sm:$0xff]  }
 0x1ea   : > { %7288 = vmatpush3.bf16.msra.mxu0 %v7880_v19  ;;  %v7919_v19 = vld [vmem:[%s8034_s30 + $0xfe8] sm:$0xff]  }
 0x1eb   : > { %7289 = vmatprep.subr.bf16.mxu0 %v7882_v21  ;;  %v7922_v21 = vld [vmem:[%s8034_s30 + $0xf70] sm:$0xff]  }
 0x1ec   : > { %7310 = vmatpush3.bf16.msra.mxu1 %v7881_v20  ;;  %v7920_v20 = vld [vmem:[%s8034_s30 + $0xf28] sm:$0xff]  }
 0x1ed   : > { %7311 = vmatprep.subr.bf16.mxu1 %v7883_v22 }
 0x1ee   : > { %7290 = vmatpush3.bf16.msra.mxu0 %v7884_v23  ;;  %v7921_v23 = vld [vmem:[%s8034_s30 + $0xfa8] sm:$0xff]  }
 0x1ef   : > { %7291 = vmatprep.subr.bf16.mxu0 %v7886_v25  ;;  %v7923_v25 = vld [vmem:[%s8034_s30 + $0xff0] sm:$0xff]  }
 0x1f0   : > { %7312 = vmatpush3.bf16.msra.mxu1 %v7885_v24  ;;  %v6989_v30 = vpop.f32.mrb[28].mxu0 }
 0x1f1   : > { %v6990_v32 = vpop.f32.mrb[29].mxu0  ;;  %7313 = vmatprep.subr.bf16.mxu1 %v7887_v26 }
 0x1f2   : > { %v7011_v34 = vpop.f32.mrb[28].mxu1  ;;  %v6991_v35 = vadd.f32 %v6990_v32, %v6989_v30  ;;  %v6992_v36 = vpop.f32.mrb[30].mxu0  ;;  %7292 = vmatpush3.bf16.msra.mxu0 %v7888_v27  ;;  %v7926_v30 = vld [vmem:[%s8034_s30 + $0xf78] sm:$0xff]  }
 0x1f3   : > { %v7012_v39 = vpop.f32.mrb[29].mxu1  ;;  %v6993_v40 = vpop.f32.mrb[31].mxu0  ;;  %7293 = vmatprep.subr.bf16.mxu0 %v7890_v29  ;;  %v7924_v29 = vld [vmem:[%s8034_s30 + $0xf30] sm:$0xff]  }
 0x1f4   : > { %v5374_v41 = vadd.f32 %v6991_v35, %v8587_v1  ;;  %v7013_v43 = vadd.f32 %v7012_v39, %v7011_v34  ;;  %v7014_v44 = vpop.f32.mrb[30].mxu1  ;;  %7314 = vmatpush3.bf16.msra.mxu1 %v7889_v28  ;;  %v7901_v1 = vld [vmem:[%s8034_s30 + $0xf80] sm:$0xff]   ;;  %v7925_v36 = vld [vmem:[%s8034_s30 + $0xfb0] sm:$0xff]   ;;  %v7928_v40 = vld [vmem:[%s8034_s30 + $0xf38] sm:$0xff]  }
 0x1f5   : > { %v7015_v46 = vpop.f32.mrb[31].mxu1  ;;  %7315 = vmatprep.subr.bf16.mxu1 %v7891_v31 }
 0x1f6   : > { %v8625_v50 = vadd.f32 %v7013_v43, %v5374_v41  ;;  %7294 = vmatpush3.bf16.msra.mxu0 %v7892_v33  ;;  %v1624_v41 = vrot.slane %v8631_v56, %v8073_v42  ;;  %v7929_v43 = vld [vmem:[%s8034_s30 + $0xfb8] sm:$0xff]  }
 0x1f7   : > { %7295 = vmatprep.subr.bf16.mxu0 %v7894_v38  ;;  %v7927_v38 = vld [vmem:[%s8034_s30 + $0xff8] sm:$0xff]  }
 0x1f8   : > { %7316 = vmatpush3.bf16.msra.mxu1 %v7893_v37  ;;  %v1640_v44 = vcombine.high %v1624_v41, %v1624_v41 }
 0x1f9   : > { %7317 = vmatprep.subr.bf16.mxu1 %v7895_v47 }
 0x1fa   : > { %7296 = vmatpush3.bf16.msra.mxu0 %v7896_v51 }
 0x1fb   : > { %7325 = vmatprep.subr.bf16.mxu0 %v7898_v54 }
 0x1fc   : > { %7318 = vmatpush3.bf16.msra.mxu1 %v7897_v57 }
 0x1fd   : > { %5932 = vmatmul.mubr.bf16.vlgmr.msra.gmra.mrb[56].mxu0 %v1617_v53  ;;  %7347 = vmatprep.subr.bf16.mxu1 %v7899_v59 }
 0x1fe   : > { %7326 = vmatpush3.bf16.msra.mxu0 %v7900_v55  ;;  %6011 = vmatprep.mubr.bf16.mxu0 %v1638_v0 }
 0x1ff   : > { %5972 = vmatmul.mubr.bf16.vlgmr.msra.gmra.mrb[56].mxu1 %v1639_v62  ;;  %7327 = vmatprep.subr.bf16.mxu0 %v7902_v63 }
 0x200   : > { %7348 = vmatpush3.bf16.msra.mxu1 %v7901_v1  ;;  %6051 = vmatprep.mubr.bf16.mxu1 %v1642_v3 }
 0x201   : > { %7349 = vmatprep.subr.bf16.mxu1 %v7903_v2 }
 0x202   : > { %7328 = vmatpush3.bf16.msra.mxu0 %v7904_v4 }
 0x203   : > { %7329 = vmatprep.subr.bf16.mxu0 %v7906_v5 }
 0x204   : > { %7350 = vmatpush3.bf16.msra.mxu1 %v7905_v6 }
 0x205   : > { %7351 = vmatprep.subr.bf16.mxu1 %v7907_v7 }
 0x206   : > { %7330 = vmatpush3.bf16.msra.mxu0 %v7908_v8 }
 0x207   : > { %7331 = vmatprep.subr.bf16.mxu0 %v7910_v9 }
 0x208   : > { %7352 = vmatpush3.bf16.msra.mxu1 %v7909_v10 }
 0x209   : > { %7353 = vmatprep.subr.bf16.mxu1 %v7911_v11 }
 0x20a   : > { %7332 = vmatpush3.bf16.msra.mxu0 %v7912_v12 }
 0x20b   : > { %7333 = vmatprep.subr.bf16.mxu0 %v7914_v13 }
 0x20c   : > { %7354 = vmatpush3.bf16.msra.mxu1 %v7913_v14 }
 0x20d   : > { %7355 = vmatprep.subr.bf16.mxu1 %v7915_v15 }
 0x20e   : > { %7334 = vmatpush3.bf16.msra.mxu0 %v7916_v16 }
 0x20f   : > { %7335 = vmatprep.subr.bf16.mxu0 %v7918_v17 }
 0x210   : > { %7356 = vmatpush3.bf16.msra.mxu1 %v7917_v18  ;;  %v7033_v22 = vpop.f32.mrb[32].mxu0 }
 0x211   : > { %v7034_v24 = vpop.f32.mrb[33].mxu0  ;;  %7357 = vmatprep.subr.bf16.mxu1 %v7919_v19 }
 0x212   : > { %v7055_v26 = vpop.f32.mrb[32].mxu1  ;;  %v7035_v27 = vadd.f32 %v7034_v24, %v7033_v22  ;;  %v7036_v28 = vpop.f32.mrb[34].mxu0  ;;  %7336 = vmatpush3.bf16.msra.mxu0 %v7920_v20 }
 0x213   : > { %v7056_v31 = vpop.f32.mrb[33].mxu1  ;;  %v7037_v32 = vpop.f32.mrb[35].mxu0  ;;  %7337 = vmatprep.subr.bf16.mxu0 %v7922_v21 }
 0x214   : > { %v5454_v33 = vadd.f32 %v7035_v27, %v8625_v50  ;;  %v7057_v34 = vadd.f32 %v7056_v31, %v7055_v26  ;;  %v7058_v35 = vpop.f32.mrb[34].mxu1  ;;  %7358 = vmatpush3.bf16.msra.mxu1 %v7921_v23 }
 0x215   : > { %v7059_v37 = vpop.f32.mrb[35].mxu1  ;;  %7359 = vmatprep.subr.bf16.mxu1 %v7923_v25 }
 0x216   : > { %v5494_v39 = vadd.f32 %v7057_v34, %v5454_v33  ;;  %7338 = vmatpush3.bf16.msra.mxu0 %v7924_v29 }
 0x217   : > { %7339 = vmatprep.subr.bf16.mxu0 %v7926_v30 }
 0x218   : > { %7360 = vmatpush3.bf16.msra.mxu1 %v7925_v36 }
 0x219   : > { %7361 = vmatprep.subr.bf16.mxu1 %v7927_v38 }
 0x21a   : > { %7340 = vmatpush3.bf16.msra.mxu0 %v7928_v40 }
 0x21c   : > { %7362 = vmatpush3.bf16.msra.mxu1 %v7929_v43 }
 0x21d   : > { %6012 = vmatmul.mubr.bf16.vlgmr.msra.gmra.mrb[60].mxu0 %v1624_v41 }
 0x21f   : > { %6052 = vmatmul.mubr.bf16.vlgmr.msra.gmra.mrb[60].mxu1 %v1640_v44 }
 0x230   : > { %v7077_v45 = vpop.f32.mrb[36].mxu0 }
 0x231   : > { %v7078_v46 = vpop.f32.mrb[37].mxu0 }
 0x232   : > { %v7099_v47 = vpop.f32.mrb[36].mxu1  ;;  %v7079_v48 = vadd.f32 %v7078_v46, %v7077_v45  ;;  %v7080_v49 = vpop.f32.mrb[38].mxu0 }
 0x233   : > { %v7100_v50 = vpop.f32.mrb[37].mxu1  ;;  %v7081_v51 = vpop.f32.mrb[39].mxu0 }
 0x234   : > { %v5534_v52 = vadd.f32 %v7079_v48, %v5494_v39  ;;  %v7101_v53 = vadd.f32 %v7100_v50, %v7099_v47  ;;  %v7102_v54 = vpop.f32.mrb[38].mxu1 }
 0x235   : > { %v7103_v57 = vpop.f32.mrb[39].mxu1 }
 0x236   : > { %v5574_v42 = vadd.f32 %v7101_v53, %v5534_v52 }
 0x250   : > { %v7121_v56 = vpop.f32.mrb[40].mxu0 }
 0x251   : > { %v7122_v58 = vpop.f32.mrb[41].mxu0 }
 0x252   : > { %v7143_v59 = vpop.f32.mrb[40].mxu1  ;;  %v7123_v60 = vadd.f32 %v7122_v58, %v7121_v56  ;;  %v7124_v55 = vpop.f32.mrb[42].mxu0 }
 0x253   : > { %v7144_v61 = vpop.f32.mrb[41].mxu1  ;;  %v7125_v62 = vpop.f32.mrb[43].mxu0 }
 0x254   : > { %v5614_v63 = vadd.f32 %v7123_v60, %v5574_v42  ;;  %v7145_v0 = vadd.f32 %v7144_v61, %v7143_v59  ;;  %v7146_v1 = vpop.f32.mrb[42].mxu1  ;;  %v210_v62 = vld [vmem:[%s8029_s27] sm:$0x3] }
 0x255   : > { %v7147_v2 = vpop.f32.mrb[43].mxu1 }
 0x256   : > { %v5654_v3 = vadd.f32 %v7145_v0, %v5614_v63 }
 0x270   : > { %v7165_v4 = vpop.f32.mrb[44].mxu0 }
 0x271   : > { %v7166_v5 = vpop.f32.mrb[45].mxu0 }
 0x272   : > { %v7187_v6 = vpop.f32.mrb[44].mxu1  ;;  %v7167_v7 = vadd.f32 %v7166_v5, %v7165_v4  ;;  %v7168_v8 = vpop.f32.mrb[46].mxu0 }
 0x273   : > { %v7188_v9 = vpop.f32.mrb[45].mxu1  ;;  %v7169_v10 = vpop.f32.mrb[47].mxu0 }
 0x274   : > { %v5694_v11 = vadd.f32 %v7167_v7, %v5654_v3  ;;  %v7189_v12 = vadd.f32 %v7188_v9, %v7187_v6  ;;  %v7190_v13 = vpop.f32.mrb[46].mxu1 }
 0x275   : > { %v7191_v14 = vpop.f32.mrb[47].mxu1 }
 0x276   : > { %v5734_v15 = vadd.f32 %v7189_v12, %v5694_v11 }
 0x290   : > { %v7209_v16 = vpop.f32.mrb[48].mxu0 }
 0x291   : > { %v7210_v17 = vpop.f32.mrb[49].mxu0 }
 0x292   : > { %v7231_v18 = vpop.f32.mrb[48].mxu1  ;;  %v7211_v19 = vadd.f32 %v7210_v17, %v7209_v16  ;;  %v7212_v20 = vpop.f32.mrb[50].mxu0 }
 0x293   : > { %v7232_v21 = vpop.f32.mrb[49].mxu1  ;;  %v7213_v22 = vpop.f32.mrb[51].mxu0 }
 0x294   : > { %v5774_v23 = vadd.f32 %v7211_v19, %v5734_v15  ;;  %v7233_v24 = vadd.f32 %v7232_v21, %v7231_v18  ;;  %v7234_v25 = vpop.f32.mrb[50].mxu1 }
 0x295   : > { %v7235_v26 = vpop.f32.mrb[51].mxu1 }
 0x296   : > { %v5814_v27 = vadd.f32 %v7233_v24, %v5774_v23 }
 0x2b0   : > { %v7253_v28 = vpop.f32.mrb[52].mxu0 }
 0x2b1   : > { %v7254_v29 = vpop.f32.mrb[53].mxu0 }
 0x2b2   : > { %v7275_v30 = vpop.f32.mrb[52].mxu1  ;;  %v7255_v31 = vadd.f32 %v7254_v29, %v7253_v28  ;;  %v7256_v32 = vpop.f32.mrb[54].mxu0 }
 0x2b3   : > { %v7276_v33 = vpop.f32.mrb[53].mxu1  ;;  %v7257_v34 = vpop.f32.mrb[55].mxu0 }
 0x2b4   : > { %v5854_v35 = vadd.f32 %v7255_v31, %v5814_v27  ;;  %v7277_v36 = vadd.f32 %v7276_v33, %v7275_v30  ;;  %v7278_v37 = vpop.f32.mrb[54].mxu1 }
 0x2b5   : > { %v7279_v38 = vpop.f32.mrb[55].mxu1 }
 0x2b6   : > { %v5894_v39 = vadd.f32 %v7277_v36, %v5854_v35 }
 0x2d0   : > { %v7297_v40 = vpop.f32.mrb[56].mxu0 }
 0x2d1   : > { %v7298_v41 = vpop.f32.mrb[57].mxu0 }
 0x2d2   : > { %v7319_v43 = vpop.f32.mrb[56].mxu1  ;;  %v7299_v44 = vadd.f32 %v7298_v41, %v7297_v40  ;;  %v7300_v45 = vpop.f32.mrb[58].mxu0 }
 0x2d3   : > { %v7320_v46 = vpop.f32.mrb[57].mxu1  ;;  %v7301_v47 = vpop.f32.mrb[59].mxu0 }
 0x2d4   : > { %v5934_v48 = vadd.f32 %v7299_v44, %v5894_v39  ;;  %v7321_v49 = vadd.f32 %v7320_v46, %v7319_v43  ;;  %v7322_v50 = vpop.f32.mrb[58].mxu1 }
 0x2d5   : > { %v7323_v51 = vpop.f32.mrb[59].mxu1 }
 0x2d6   : > { %v5974_v52 = vadd.f32 %v7321_v49, %v5934_v48 }
 0x2f0   : > { %v7341_v53 = vpop.f32.mrb[60].mxu0 }
 0x2f1   : > { %v7342_v54 = vpop.f32.mrb[61].mxu0 }
 0x2f2   : > { %v7363_v57 = vpop.f32.mrb[60].mxu1  ;;  %v7343_v42 = vadd.f32 %v7342_v54, %v7341_v53  ;;  %v7344_v56 = vpop.f32.mrb[62].mxu0 }
 0x2f3   : > { %v7364_v58 = vpop.f32.mrb[61].mxu1  ;;  %v7345_v59 = vpop.f32.mrb[63].mxu0 }
 0x2f4   : > { %v6014_v60 = vadd.f32 %v7343_v42, %v5974_v52  ;;  %v7365_v55 = vadd.f32 %v7364_v58, %v7363_v57  ;;  %v7366_v61 = vpop.f32.mrb[62].mxu1 }
 0x2f5   : > { %v7367_v63 = vpop.f32.mrb[63].mxu1 }
 0x2f6   : > { %v6054_v0 = vadd.f32 %v7365_v55, %v6014_v60 }
 0x2f8   : > { %v6059_v1 = vadd.f32 %v6054_v0, %v210_v62 }
 0x2fa   : > { %6061 = vst.msk [vmem:[%s8029_s27] sm:$0x3] %vm6060_vm1, %v6059_v1 }
 0x2fb PF: > { %s12_s13 = sadd.s32 1, %s7969_s13   ;;  %s8692_s9 = smov %s7961_s11 }
 0x2fc   : > { %p9_p9 = scmp.ge.s32.totalorder %s12_s13, 10   ;;  %s8693_s10 = smov %s7965_s12 }
 0x2fd   : > { %s8694_s11 = smov %s8697_s14  ;;  %s8695_s12 = smov %s8701_s15 }
 0x2fe   :  { %11 = sbr.rel (!%p9_p9) target bundleno = 3 (0x3), region = 65 }

</bundles_post_ra>
